<compile_context>
chip_gen: v6e
topology: v6e:2x2x1
jax: 0.10.0
libtpu: 0.0.40
codegen_flags: <defaults>
</compile_context>

<pallas_src>
import functools

import jax
import jax.numpy as jnp
import numpy as np
from jax.experimental import pallas as pl
from jax.experimental.pallas import tpu as pltpu

# ---- model dims (fixed by FineGE.__init__) ----------------------------------
D_IN = 1539
D_H1 = 1539
D_H2 = 384
D_H3 = 96
D_OUT = 12     # 4 offset points x 3 coords per input token

# ---- lane-padded (multiple-of-128) dims used inside the kernel ---------------
D_H1P = 1664   # 13 * 128
D_H3P = 128
D_OUTP = 128


def _round_up(x, m):
    return (x + m - 1) // m * m


def _vmem_limit_bytes():
    """Generation-aware VMEM budget: ~3/4 of physical capacity, capped at 96 MiB.

    v7x has only 64 MiB VMEM per TensorCore, so a blanket 128 MiB request is
    invalid there; the kernel itself peaks around ~35 MiB at tm=1024.
    """
    cap = 64 * 1024 * 1024  # conservative fallback (v7x per-TC capacity)
    try:
        info = pltpu.get_tpu_info()
        cap = int(getattr(info, "vmem_capacity_bytes", cap))
    except Exception:
        pass
    return int(min(cap * 3 // 4, 96 * 1024 * 1024))


def finege_kernel(feat_ref, w1_ref, b1_ref, w2_ref, b2_ref,
                  w3_ref, b3_ref, w4_ref, b4_ref, out_ref):
    """One row-tile of the fused 4-layer MLP.

    feat_ref : (tm, 1539) f32  -- cast to bf16 in-kernel (VPU, hidden under MXU)
    wK_ref   : bf16 weights (lane-padded), resident across the grid
    bK_ref   : f32 biases (lane-padded)
    out_ref  : (tm, 128) f32   -- lanes 0..11 = fc4(relu(fc3(relu(fc2(relu(fc1(x)))))))
    """
    x = feat_ref[...].astype(jnp.bfloat16)

    h1 = jnp.dot(x, w1_ref[...], preferred_element_type=jnp.float32) + b1_ref[...]
    h1 = jnp.maximum(h1, 0.0).astype(jnp.bfloat16)

    h2 = jnp.dot(h1, w2_ref[...], preferred_element_type=jnp.float32) + b2_ref[...]
    h2 = jnp.maximum(h2, 0.0).astype(jnp.bfloat16)

    h3 = jnp.dot(h2, w3_ref[...], preferred_element_type=jnp.float32) + b3_ref[...]
    h3 = jnp.maximum(h3, 0.0).astype(jnp.bfloat16)

    out_ref[...] = (jnp.dot(h3, w4_ref[...], preferred_element_type=jnp.float32)
                    + b4_ref[...])


def finege_forward(features, sparse_cloud, params, *, num_pred, tm=1024):
    """features: (B, N, 1539), sparse_cloud: (B, N, 3) -> (-1, num_pred//8, 3)."""
    w1, b1, w2, b2, w3, b3, w4, b4 = params
    B, N, _ = features.shape
    M = B * N

    # Row tile: multiple of 16 (bf16 sublane pack).  For large M keep the grid
    # >= 2 (megacore sharding on 2-TC parts) with a 256-aligned split (MXU row
    # dim); for small/medium M take one tile covering all rows (splitting on a
    # single TensorCore only shrinks the MXU tile and adds a step).
    tm_eff = min(tm, _round_up(M, 16))
    if M >= 1024:
        tm_eff = min(tm_eff, max(256, _round_up(pl.cdiv(M, 2), 256)))
    tm_eff = max(16, _round_up(tm_eff, 16))
    grid = (pl.cdiv(M, tm_eff),)

    # Features go in untouched (f32) -- no wrapper-side cast or pad pass.
    feat2d = features.reshape(M, D_IN)

    # One-time weight prep: bf16 + zero-pad the ragged dims to lane multiples.
    # Zeros are numerically inert through the ReLUs / following matmuls.
    w1b = jnp.pad(w1, ((0, 0), (0, D_H1P - D_H1))).astype(jnp.bfloat16)   # (1539, 1664)
    b1p = jnp.pad(b1, ((0, 0), (0, D_H1P - D_H1)))                        # (1, 1664) f32
    w2b = jnp.pad(w2, ((0, D_H1P - D_H1), (0, 0))).astype(jnp.bfloat16)   # (1664, 384)
    w3b = jnp.pad(w3, ((0, 0), (0, D_H3P - D_H3))).astype(jnp.bfloat16)   # (384, 128)
    b3p = jnp.pad(b3, ((0, 0), (0, D_H3P - D_H3)))                        # (1, 128)
    w4b = jnp.pad(w4, ((0, D_H3P - D_H3),
                       (0, D_OUTP - D_OUT))).astype(jnp.bfloat16)         # (128, 128)
    b4p = jnp.pad(b4, ((0, 0), (0, D_OUTP - D_OUT)))                      # (1, 128)

    # Weights/biases: full blocks with a constant block index -> DMA'd once and
    # resident across the grid; single-buffered so they don't burn 2x VMEM.
    def fixed(shape):
        return pl.BlockSpec(shape, lambda i: (0, 0), pipeline_mode=pl.Buffered(1))

    rows = grid[0] * tm_eff
    mm_flops = D_IN * D_H1P + D_H1P * D_H2 + D_H2 * D_H3P + D_H3P * D_OUTP
    w_bytes = 2 * (D_IN * D_H1P + D_H1P * D_H2 + D_H2 * D_H3P + D_H3P * D_OUTP)
    b_bytes = 4 * (D_H1P + D_H2 + D_H3P + D_OUTP)
    cost = pl.CostEstimate(
        flops=2 * rows * mm_flops,
        transcendentals=0,
        bytes_accessed=M * D_IN * 4 + M * D_OUTP * 4 + w_bytes + b_bytes,
    )

    out_pad = pl.pallas_call(
        finege_kernel,
        out_shape=jax.ShapeDtypeStruct((M, D_OUTP), jnp.float32),
        grid_spec=pltpu.PrefetchScalarGridSpec(
            num_scalar_prefetch=0,
            grid=grid,
            in_specs=[
                pl.BlockSpec((tm_eff, D_IN), lambda i: (i, 0)),   # f32 feature tile
                fixed((D_IN, D_H1P)), fixed((1, D_H1P)),          # fc1
                fixed((D_H1P, D_H2)), fixed((1, D_H2)),           # fc2
                fixed((D_H2, D_H3P)), fixed((1, D_H3P)),          # fc3
                fixed((D_H3P, D_OUTP)), fixed((1, D_OUTP)),       # fc4 (padded)
            ],
            out_specs=pl.BlockSpec((tm_eff, D_OUTP), lambda i: (i, 0)),
        ),
        compiler_params=pltpu.CompilerParams(
            dimension_semantics=("parallel",),
            vmem_limit_bytes=_vmem_limit_bytes(),
        ),
        cost_estimate=cost,
    )(feat2d, w1b, b1p, w2b, b2, w3b, b3p, w4b, b4p)

    # Epilogue in the wrapper (fuses with the lane slice): add the 4x-repeated
    # sparse xyz to the 12 live lanes, then reshape like torch .view.
    sp12 = jnp.tile(sparse_cloud.reshape(M, 3), (1, 4))    # (M, 12)
    out12 = out_pad[:, :D_OUT] + sp12
    return out12.reshape(-1, num_pred // 8, 3)


def init_params(key):
    """Deterministic Linear params, PyTorch-style U(-1/sqrt(fan_in), 1/sqrt(fan_in))."""
    dims = [(D_IN, D_H1), (D_H1, D_H2), (D_H2, D_H3), (D_H3, D_OUT)]
    params = []
    for i, (fin, fout) in enumerate(dims):
        kw, kb = jax.random.split(jax.random.fold_in(key, i))
        bound = 1.0 / np.sqrt(fin)
        w = jax.random.uniform(kw, (fin, fout), jnp.float32, -bound, bound)
        b = jax.random.uniform(kb, (1, fout), jnp.float32, -bound, bound)
        params += [w, b]
    return tuple(params)


def finege_reference(features, sparse_cloud, params, *, num_pred):
    """Pure-JAX f32 reference mirroring the PyTorch forward."""
    w1, b1, w2, b2, w3, b3, w4, b4 = params
    x = jax.nn.relu(features @ w1 + b1[0])
    x = jax.nn.relu(x @ w2 + b2[0])
    x = jax.nn.relu(x @ w3 + b3[0])
    x = x @ w4 + b4[0]                                   # (B, N, 12)
    point_offset = x.reshape(-1, num_pred // 8, 3)
    rep = jnp.repeat(sparse_cloud[:, :, None, :], 4, axis=2)
    rep = rep.reshape(-1, num_pred // 8, 3)
    return rep + point_offset


if __name__ == "__main__":
    # Small shapes consistent with the module: B=2 clouds, N=16 sparse points,
    # num_pred chosen so that num_pred//8 == 4*N (as the forward implies).
    B, N = 2, 16
    num_pred = 8 * 4 * N  # 512

    key = jax.random.PRNGKey(0)
    k_feat, k_cloud, k_par = jax.random.split(key, 3)

    features = jax.random.normal(k_feat, (B, N, D_IN), jnp.float32)
    sparse_cloud = jax.random.normal(k_cloud, (B, N, 3), jnp.float32)
    params = init_params(k_par)

    fwd = jax.jit(functools.partial(finege_forward, num_pred=num_pred))
    fine_cloud = fwd(features, sparse_cloud, params)
    jax.block_until_ready(fine_cloud)

    ref = finege_reference(features, sparse_cloud, params, num_pred=num_pred)
    # bf16 matmul operands with f32 accumulation: loosen tolerance vs f32 ref.
    np.testing.assert_allclose(np.asarray(fine_cloud), np.asarray(ref),
                               rtol=2e-2, atol=2e-2)
    assert fine_cloud.shape == (B, num_pred // 8, 3)

    print("KERNEL_OK")
</pallas_src>

<mosaic_0001>
module attributes {stable_mosaic.version = 11 : i64} {
  func.func @finege_kernel(%arg0: i32, %arg1: memref<32x1539xf32, #tpu.memory_space<vmem>>, %arg2: memref<1539x1664xbf16, #tpu.memory_space<vmem>>, %arg3: memref<1x1664xf32, #tpu.memory_space<vmem>>, %arg4: memref<1664x384xbf16, #tpu.memory_space<vmem>>, %arg5: memref<1x384xf32, #tpu.memory_space<vmem>>, %arg6: memref<384x128xbf16, #tpu.memory_space<vmem>>, %arg7: memref<1x128xf32, #tpu.memory_space<vmem>>, %arg8: memref<128x128xbf16, #tpu.memory_space<vmem>>, %arg9: memref<1x128xf32, #tpu.memory_space<vmem>>, %arg10: memref<32x128xf32, #tpu.memory_space<vmem>>) attributes {dimension_semantics = [#tpu.dimension_semantics<parallel>], iteration_bounds = array<i64: 1>, scalar_prefetch = 0 : i64, scratch_operands = 0 : i64, tpu.core_type = #tpu.core_type<tc>, window_params = [{transform_indices = @transform_0, window_bounds = array<i64: 32, 1539>}, {pipeline_mode = #tpu.pipeline_mode<synchronous>, transform_indices = @transform_1, window_bounds = array<i64: 1539, 1664>}, {pipeline_mode = #tpu.pipeline_mode<synchronous>, transform_indices = @transform_2, window_bounds = array<i64: 1, 1664>}, {pipeline_mode = #tpu.pipeline_mode<synchronous>, transform_indices = @transform_3, window_bounds = array<i64: 1664, 384>}, {pipeline_mode = #tpu.pipeline_mode<synchronous>, transform_indices = @transform_4, window_bounds = array<i64: 1, 384>}, {pipeline_mode = #tpu.pipeline_mode<synchronous>, transform_indices = @transform_5, window_bounds = array<i64: 384, 128>}, {pipeline_mode = #tpu.pipeline_mode<synchronous>, transform_indices = @transform_6, window_bounds = array<i64: 1, 128>}, {pipeline_mode = #tpu.pipeline_mode<synchronous>, transform_indices = @transform_7, window_bounds = array<i64: 128, 128>}, {pipeline_mode = #tpu.pipeline_mode<synchronous>, transform_indices = @transform_8, window_bounds = array<i64: 1, 128>}, {transform_indices = @transform_9, window_bounds = array<i64: 32, 128>}]} {
    %c0 = arith.constant 0 : index
    %c0_0 = arith.constant 0 : index
    %0 = vector.load %arg1[%c0, %c0_0] : memref<32x1539xf32, #tpu.memory_space<vmem>>, vector<32x1539xf32>
    %1 = arith.truncf %0 : vector<32x1539xf32> to vector<32x1539xbf16>
    %c0_1 = arith.constant 0 : index
    %c0_2 = arith.constant 0 : index
    %2 = vector.load %arg2[%c0_1, %c0_2] : memref<1539x1664xbf16, #tpu.memory_space<vmem>>, vector<1539x1664xbf16>
    %cst = arith.constant dense<0.000000e+00> : vector<32x1664xf32>
    %3 = tpu.matmul %1, %2, %cst {dimension_numbers = #tpu.dot_dimension_numbers<[1], [0], [0], [1], [0, 0, 1, 1], [], []>} : vector<32x1539xbf16>, vector<1539x1664xbf16>, vector<32x1664xf32> -> vector<32x1664xf32>
    %c0_3 = arith.constant 0 : index
    %c0_4 = arith.constant 0 : index
    %4 = vector.load %arg3[%c0_3, %c0_4] : memref<1x1664xf32, #tpu.memory_space<vmem>>, vector<1x1664xf32>
    %5 = vector.broadcast %4 : vector<1x1664xf32> to vector<32x1664xf32>
    %6 = arith.addf %3, %5 : vector<32x1664xf32>
    %cst_5 = arith.constant 0.000000e+00 : f32
    %7 = vector.broadcast %cst_5 : f32 to vector<32x1664xf32>
    %8 = arith.maximumf %6, %7 : vector<32x1664xf32>
    %9 = arith.truncf %8 : vector<32x1664xf32> to vector<32x1664xbf16>
    %c0_6 = arith.constant 0 : index
    %c0_7 = arith.constant 0 : index
    %10 = vector.load %arg4[%c0_6, %c0_7] : memref<1664x384xbf16, #tpu.memory_space<vmem>>, vector<1664x384xbf16>
    %cst_8 = arith.constant dense<0.000000e+00> : vector<32x384xf32>
    %11 = tpu.matmul %9, %10, %cst_8 {dimension_numbers = #tpu.dot_dimension_numbers<[1], [0], [0], [1], [0, 0, 1, 1], [], []>} : vector<32x1664xbf16>, vector<1664x384xbf16>, vector<32x384xf32> -> vector<32x384xf32>
    %c0_9 = arith.constant 0 : index
    %c0_10 = arith.constant 0 : index
    %12 = vector.load %arg5[%c0_9, %c0_10] : memref<1x384xf32, #tpu.memory_space<vmem>>, vector<1x384xf32>
    %13 = vector.broadcast %12 : vector<1x384xf32> to vector<32x384xf32>
    %14 = arith.addf %11, %13 : vector<32x384xf32>
    %cst_11 = arith.constant 0.000000e+00 : f32
    %15 = vector.broadcast %cst_11 : f32 to vector<32x384xf32>
    %16 = arith.maximumf %14, %15 : vector<32x384xf32>
    %17 = arith.truncf %16 : vector<32x384xf32> to vector<32x384xbf16>
    %c0_12 = arith.constant 0 : index
    %c0_13 = arith.constant 0 : index
    %18 = vector.load %arg6[%c0_12, %c0_13] : memref<384x128xbf16, #tpu.memory_space<vmem>>, vector<384x128xbf16>
    %cst_14 = arith.constant dense<0.000000e+00> : vector<32x128xf32>
    %19 = tpu.matmul %17, %18, %cst_14 {dimension_numbers = #tpu.dot_dimension_numbers<[1], [0], [0], [1], [0, 0, 1, 1], [], []>} : vector<32x384xbf16>, vector<384x128xbf16>, vector<32x128xf32> -> vector<32x128xf32>
    %c0_15 = arith.constant 0 : index
    %c0_16 = arith.constant 0 : index
    %20 = vector.load %arg7[%c0_15, %c0_16] : memref<1x128xf32, #tpu.memory_space<vmem>>, vector<1x128xf32>
    %21 = vector.broadcast %20 : vector<1x128xf32> to vector<32x128xf32>
    %22 = arith.addf %19, %21 : vector<32x128xf32>
    %cst_17 = arith.constant 0.000000e+00 : f32
    %23 = vector.broadcast %cst_17 : f32 to vector<32x128xf32>
    %24 = arith.maximumf %22, %23 : vector<32x128xf32>
    %25 = arith.truncf %24 : vector<32x128xf32> to vector<32x128xbf16>
    %c0_18 = arith.constant 0 : index
    %c0_19 = arith.constant 0 : index
    %26 = vector.load %arg8[%c0_18, %c0_19] : memref<128x128xbf16, #tpu.memory_space<vmem>>, vector<128x128xbf16>
    %cst_20 = arith.constant dense<0.000000e+00> : vector<32x128xf32>
    %27 = tpu.matmul %25, %26, %cst_20 {dimension_numbers = #tpu.dot_dimension_numbers<[1], [0], [0], [1], [0, 0, 1, 1], [], []>} : vector<32x128xbf16>, vector<128x128xbf16>, vector<32x128xf32> -> vector<32x128xf32>
    %c0_21 = arith.constant 0 : index
    %c0_22 = arith.constant 0 : index
    %28 = vector.load %arg9[%c0_21, %c0_22] : memref<1x128xf32, #tpu.memory_space<vmem>>, vector<1x128xf32>
    %29 = vector.broadcast %28 : vector<1x128xf32> to vector<32x128xf32>
    %30 = arith.addf %27, %29 : vector<32x128xf32>
    %c0_23 = arith.constant 0 : index
    %c0_24 = arith.constant 0 : index
    %31 = vector.load %arg10[%c0_23, %c0_24] : memref<32x128xf32, #tpu.memory_space<vmem>>, vector<32x128xf32>
    tpu.vector_store %arg10[%c0_23, %c0_24], %30 {strides = array<i32>} : memref<32x128xf32, #tpu.memory_space<vmem>>, vector<32x128xf32>,
    return
  }
  func.func @transform_0(%arg0: i32) -> (i32, i32) {
    %c0_i32 = arith.constant 0 : i32
    %c0_i32_0 = arith.constant 0 : i32
    return %arg0, %c0_i32 : i32, i32
  }
  func.func @transform_1(%arg0: i32) -> (i32, i32) {
    %c0_i32 = arith.constant 0 : i32
    %c0_i32_0 = arith.constant 0 : i32
    %c0_i32_1 = arith.constant 0 : i32
    return %c0_i32, %c0_i32_0 : i32, i32
  }
  func.func @transform_2(%arg0: i32) -> (i32, i32) {
    %c0_i32 = arith.constant 0 : i32
    %c0_i32_0 = arith.constant 0 : i32
    %c0_i32_1 = arith.constant 0 : i32
    return %c0_i32, %c0_i32_0 : i32, i32
  }
  func.func @transform_3(%arg0: i32) -> (i32, i32) {
    %c0_i32 = arith.constant 0 : i32
    %c0_i32_0 = arith.constant 0 : i32
    %c0_i32_1 = arith.constant 0 : i32
    return %c0_i32, %c0_i32_0 : i32, i32
  }
  func.func @transform_4(%arg0: i32) -> (i32, i32) {
    %c0_i32 = arith.constant 0 : i32
    %c0_i32_0 = arith.constant 0 : i32
    %c0_i32_1 = arith.constant 0 : i32
    return %c0_i32, %c0_i32_0 : i32, i32
  }
  func.func @transform_5(%arg0: i32) -> (i32, i32) {
    %c0_i32 = arith.constant 0 : i32
    %c0_i32_0 = arith.constant 0 : i32
    %c0_i32_1 = arith.constant 0 : i32
    return %c0_i32, %c0_i32_0 : i32, i32
  }
  func.func @transform_6(%arg0: i32) -> (i32, i32) {
    %c0_i32 = arith.constant 0 : i32
    %c0_i32_0 = arith.constant 0 : i32
    %c0_i32_1 = arith.constant 0 : i32
    return %c0_i32, %c0_i32_0 : i32, i32
  }
  func.func @transform_7(%arg0: i32) -> (i32, i32) {
    %c0_i32 = arith.constant 0 : i32
    %c0_i32_0 = arith.constant 0 : i32
    %c0_i32_1 = arith.constant 0 : i32
    return %c0_i32, %c0_i32_0 : i32, i32
  }
  func.func @transform_8(%arg0: i32) -> (i32, i32) {
    %c0_i32 = arith.constant 0 : i32
    %c0_i32_0 = arith.constant 0 : i32
    %c0_i32_1 = arith.constant 0 : i32
    return %c0_i32, %c0_i32_0 : i32, i32
  }
  func.func @transform_9(%arg0: i32) -> (i32, i32) {
    %c0_i32 = arith.constant 0 : i32
    %c0_i32_0 = arith.constant 0 : i32
    return %arg0, %c0_i32 : i32, i32
  }
}

</mosaic_0001>

<bundles_post_ra>
// kernel: tile.7
= control target key start
LH: loop header
LB: loop body
LE: loop exit
PB: predicated region body
PF: predicated region fallthrough
CT: control target
= control target key end

     0   :  { %vm22_vm0 = vcmask 261120   ;;  %s81_s0 = inlined_call_operand.vmem [shape: f32[32,4,3], index: 0, kind: input, shape index: {}]   ;;  %s82_s1 = inlined_call_operand.vmem [shape: f32[32,12], index: 1, kind: output, shape index: {}]  }
   0x1   :  { %v41_v0 = vld [vmem:[%s81_s0 + $0xc] sm:$0xf]  ;;  %v42_v1 = vld [vmem:[%s81_s0 + $0x8] sm:$0xf]  ;;  %v43_v2 = vld [vmem:[%s81_s0 + $0x4] sm:$0xf] }
   0x2   :  { %9 = vst [vmem:[#allocation0 + $0x8] sm:$0xf] %v41_v0  ;;  %14 = vst [vmem:[#allocation0 + $0x18] sm:$0xf] %v42_v1  ;;  %v19_v3 = vld [vmem:[%s81_s0] sm:$0xf] }
   0x3   :  { %18 = vst [vmem:[#allocation0] sm:$0xf] %v43_v2  ;;  %20 = vst [vmem:[#allocation0 + $0x10] sm:$0xf] %v19_v3 }
   0x9   :  { %v30_v5 = vld [vmem:[#allocation0 + $0x18] sm:$0x7]   ;;  %v35_v6 = vld [vmem:[#allocation0 + $0x8] sm:$0x7]  }
   0xa   :  { %v25_v4 = vld [vmem:[#allocation0] sm:$0x7]   ;;  %v21_v7 = vld [vmem:[#allocation0 + $0x10] sm:$0x7]   ;;  %45 = vst.msk [vmem:[%s82_s1 + $0x6] sm:$0x7] %vm22_vm0, %v30_v5  }
   0xb   :  { %44 = vst.msk [vmem:[%s82_s1 + $0x3] sm:$0x7] %vm22_vm0, %v25_v4   ;;  %46 = vst.msk [vmem:[%s82_s1 + $0x9] sm:$0x7] %vm22_vm0, %v35_v6  }
   0xc   :  { %23 = vst.msk [vmem:[%s82_s1] sm:$0x7] %vm22_vm0, %v21_v7  }

// kernel: finege_forward.1
= control target key start
LH: loop header
LB: loop body
LE: loop exit
PB: predicated region body
PF: predicated region fallthrough
CT: control target
= control target key end

     0   :  { %vm7907_vm0 = vcmask 1040384   ;;  %vm7908_vm1 = vcmask 1041408   ;;  %vm7900_vm2 = vcmask 23552   ;;  %s24468_s1 = inlined_call_operand.vmem [shape: bf16[1539,1664], index: 1, kind: input, shape index: {}]   ;;  %s24469_s0 = inlined_call_operand.vmem [shape: f32[32,1539], index: 0, kind: input, shape index: {}]   ;;  %s24470_s2 = inlined_call_operand.vmem [shape: f32[1,1664], index: 2, kind: input, shape index: {}]   ;;  %s24471_s3 = inlined_call_operand.vmem [shape: bf16[1664,384], index: 3, kind: input, shape index: {}]   ;;  %s24472_s5 = inlined_call_operand.vmem [shape: bf16[384,128], index: 5, kind: input, shape index: {}]   ;;  %s24473_s4 = inlined_call_operand.vmem [shape: f32[1,384], index: 4, kind: input, shape index: {}]   ;;  %s24474_s7 = inlined_call_operand.vmem [shape: bf16[128,128], index: 7, kind: input, shape index: {}]   ;;  %s24475_s6 = inlined_call_operand.vmem [shape: f32[1,128], index: 6, kind: input, shape index: {}]   ;;  %s24476_s8 = inlined_call_operand.vmem [shape: f32[1,128], index: 8, kind: input, shape index: {}]   ;;  %s24477_s9 = inlined_call_operand.vmem [shape: f32[32,128], index: 9, kind: output, shape index: {}]  }
   0x1   :  { %v15943_v0 = vld [vmem:[%s24468_s1 + $0x2dc] ss:$52 sps:$4 sm:$0xff]   ;;  %v15947_v2 = vld [vmem:[%s24468_s1 + $0x2d8] ss:$52 sps:$4 sm:$0xff]   ;;  %v15949_v4 = vld [vmem:[%s24468_s1 + $0x274] ss:$52 sps:$4 sm:$0xff]  }
   0x2   :  { %v15945_v1 = vld [vmem:[%s24468_s1 + $0x95c] ss:$52 sps:$4 sm:$0xff]   ;;  %7950 = vmatprep.subr.bf16.mxu0 %v15943_v0  ;;  %v15948_v3 = vld [vmem:[%s24468_s1 + $0x958] ss:$52 sps:$4 sm:$0xff]   ;;  %v15951_v5 = vld [vmem:[%s24468_s1 + $0x8f4] ss:$52 sps:$4 sm:$0xff]  }
   0x3   :  { %8003 = vmatprep.subr.bf16.mxu1 %v15945_v1  ;;  %7951 = vmatpush1.bf16.msra.mxu0 %v15947_v2  ;;  %v15953_v6 = vld [vmem:[%s24468_s1 + $0x270] ss:$52 sps:$4 sm:$0xff]   ;;  %v15955_v8 = vld [vmem:[%s24468_s1 + $0x20c] ss:$52 sps:$4 sm:$0xff]   ;;  %v15959_v10 = vld [vmem:[%s24468_s1 + $0x208] ss:$52 sps:$4 sm:$0xff]  }
   0x4   :  { %8004 = vmatpush1.bf16.msra.mxu1 %v15948_v3  ;;  %7952 = vmatprep.subr.bf16.mxu0 %v15949_v4  ;;  %v15954_v7 = vld [vmem:[%s24468_s1 + $0x8f0] ss:$52 sps:$4 sm:$0xff]   ;;  %v15957_v9 = vld [vmem:[%s24468_s1 + $0x88c] ss:$52 sps:$4 sm:$0xff]   ;;  %v15960_v11 = vld [vmem:[%s24468_s1 + $0x888] ss:$52 sps:$4 sm:$0xff]  }
   0x5   :  { %8005 = vmatprep.subr.bf16.mxu1 %v15951_v5  ;;  %v15961_v12 = vld [vmem:[%s24468_s1 + $0x1a4] ss:$52 sps:$4 sm:$0xff]   ;;  %v15965_v14 = vld [vmem:[%s24468_s1 + $0x1a0] ss:$52 sps:$4 sm:$0xff]   ;;  %v15967_v16 = vld [vmem:[%s24468_s1 + $0x13c] ss:$52 sps:$4 sm:$0xff]  }
   0x6   :  { %v15963_v13 = vld [vmem:[%s24468_s1 + $0x824] ss:$52 sps:$4 sm:$0xff]   ;;  %v15966_v15 = vld [vmem:[%s24468_s1 + $0x820] ss:$52 sps:$4 sm:$0xff]   ;;  %v15969_v17 = vld [vmem:[%s24468_s1 + $0x7bc] ss:$52 sps:$4 sm:$0xff]  }
   0x7   :  { %7953 = vmatpush1.bf16.msra.mxu0 %v15953_v6  ;;  %v15971_v18 = vld [vmem:[%s24468_s1 + $0x138] ss:$52 sps:$4 sm:$0xff]   ;;  %v15973_v20 = vld [vmem:[%s24468_s1 + $0xd4] ss:$52 sps:$4 sm:$0xff]   ;;  %v15977_v22 = vld [vmem:[%s24468_s1 + $0xd0] ss:$52 sps:$4 sm:$0xff]  }
   0x8   :  { %8006 = vmatpush1.bf16.msra.mxu1 %v15954_v7  ;;  %7954 = vmatprep.subr.bf16.mxu0 %v15955_v8  ;;  %v15972_v19 = vld [vmem:[%s24468_s1 + $0x7b8] ss:$52 sps:$4 sm:$0xff]   ;;  %v15975_v21 = vld [vmem:[%s24468_s1 + $0x754] ss:$52 sps:$4 sm:$0xff]   ;;  %v15978_v23 = vld [vmem:[%s24468_s1 + $0x750] ss:$52 sps:$4 sm:$0xff]  }
   0x9   :  { %8007 = vmatprep.subr.bf16.mxu1 %v15957_v9  ;;  %v15979_v24 = vld [vmem:[%s24468_s1 + $0x6c] ss:$52 sps:$4 sm:$0xff]   ;;  %v15983_v26 = vld [vmem:[%s24468_s1 + $0x68] ss:$52 sps:$4 sm:$0xff]   ;;  %v15985_v28 = vld [vmem:[%s24468_s1 + $0x4] ss:$52 sps:$4 sm:$0xff]  }
   0xa   :  { %v15981_v25 = vld [vmem:[%s24468_s1 + $0x6ec] ss:$52 sps:$4 sm:$0xff]   ;;  %v15984_v27 = vld [vmem:[%s24468_s1 + $0x6e8] ss:$52 sps:$4 sm:$0xff]   ;;  %v15987_v29 = vld [vmem:[%s24468_s1 + $0x684] ss:$52 sps:$4 sm:$0xff]  }
   0xb   :  { %7955 = vmatpush1.bf16.msra.mxu0 %v15959_v10  ;;  %v15989_v30 = vld [vmem:[%s24468_s1] ss:$52 sps:$4 sm:$0xff]   ;;  %v15991_v32 = vld [vmem:[%s24468_s1 + $0x61c] ss:$52 sps:$4 sm:$0xff]   ;;  %v15995_v34 = vld [vmem:[%s24468_s1 + $0x618] ss:$52 sps:$4 sm:$0xff]  }
   0xc   :  { %8008 = vmatpush1.bf16.msra.mxu1 %v15960_v11  ;;  %7956 = vmatprep.subr.bf16.mxu0 %v15961_v12  ;;  %v15990_v31 = vld [vmem:[%s24468_s1 + $0x680] ss:$52 sps:$4 sm:$0xff]   ;;  %v15993_v33 = vld [vmem:[%s24468_s1 + $0xc9c] ss:$52 sps:$4 sm:$0xff]   ;;  %v15996_v35 = vld [vmem:[%s24468_s1 + $0xc98] ss:$52 sps:$4 sm:$0xff]  }
   0xd   :  { %8009 = vmatprep.subr.bf16.mxu1 %v15963_v13  ;;  %v15997_v36 = vld [vmem:[%s24468_s1 + $0x5b4] ss:$52 sps:$4 sm:$0xff]   ;;  %v16001_v38 = vld [vmem:[%s24468_s1 + $0x5b0] ss:$52 sps:$4 sm:$0xff]   ;;  %v16003_v40 = vld [vmem:[%s24468_s1 + $0x54c] ss:$52 sps:$4 sm:$0xff]  }
   0xe   :  { %v15999_v37 = vld [vmem:[%s24468_s1 + $0xc34] ss:$52 sps:$4 sm:$0xff]   ;;  %v16002_v39 = vld [vmem:[%s24468_s1 + $0xc30] ss:$52 sps:$4 sm:$0xff]   ;;  %v16005_v41 = vld [vmem:[%s24468_s1 + $0xbcc] ss:$52 sps:$4 sm:$0xff]  }
   0xf   :  { %7957 = vmatpush1.bf16.msra.mxu0 %v15965_v14  ;;  %v16007_v42 = vld [vmem:[%s24468_s1 + $0x548] ss:$52 sps:$4 sm:$0xff]   ;;  %v16009_v44 = vld [vmem:[%s24468_s1 + $0x4e4] ss:$52 sps:$4 sm:$0xff]   ;;  %v47_v47 = vld [vmem:[%s24469_s0 + $0x70] sm:$0xff] }
  0x10   :  { %8010 = vmatpush1.bf16.msra.mxu1 %v15966_v15  ;;  %7958 = vmatprep.subr.bf16.mxu0 %v15967_v16  ;;  %v16008_v43 = vld [vmem:[%s24468_s1 + $0xbc8] ss:$52 sps:$4 sm:$0xff]   ;;  %v16011_v45 = vld [vmem:[%s24468_s1 + $0xb64] ss:$52 sps:$4 sm:$0xff]   ;;  %v16013_v50 = vld [vmem:[%s24468_s1 + $0x4e0] ss:$52 sps:$4 sm:$0xff]  }
  0x11   :  { %8011 = vmatprep.subr.bf16.mxu1 %v15969_v17  ;;  %v34_v46 = vld [vmem:[%s24469_s0 + $0x8] sm:$0xff]  ;;  %v36_v48 = vld [vmem:[%s24469_s0 + $0x18] sm:$0xff]  ;;  %v49_v49 = vld [vmem:[%s24469_s0 + $0x80] sm:$0xff] }
  0x12   :  { %v16014_v51 = vld [vmem:[%s24468_s1 + $0xb60] ss:$52 sps:$4 sm:$0xff]   ;;  %v16015_v52 = vld [vmem:[%s24468_s1 + $0x47c] ss:$52 sps:$4 sm:$0xff]   ;;  %v18444_v53 = vpack.c.bf16 %v47_v47, %v34_v46  ;;  %v18446_v54 = vpack.c.bf16 %v49_v49, %v36_v48  ;;  %v16019_v56 = vld [vmem:[%s24468_s1 + $0x478] ss:$52 sps:$4 sm:$0xff]  }
  0x13   :  { %7959 = vmatpush1.bf16.msra.mxu0 %v15971_v18  ;;  %v16017_v55 = vld [vmem:[%s24468_s1 + $0xafc] ss:$52 sps:$4 sm:$0xff]   ;;  %v16020_v57 = vld [vmem:[%s24468_s1 + $0xaf8] ss:$52 sps:$4 sm:$0xff]   ;;  %v16021_v58 = vld [vmem:[%s24468_s1 + $0x414] ss:$52 sps:$4 sm:$0xff]  }
  0x14   :  { %8012 = vmatpush1.bf16.msra.mxu1 %v15972_v19  ;;  %7960 = vmatprep.subr.bf16.mxu0 %v15973_v20  ;;  %v16023_v59 = vld [vmem:[%s24468_s1 + $0xa94] ss:$52 sps:$4 sm:$0xff]   ;;  %v16025_v60 = vld [vmem:[%s24468_s1 + $0x410] ss:$52 sps:$4 sm:$0xff]   ;;  %v16027_v62 = vld [vmem:[%s24468_s1 + $0x3ac] ss:$52 sps:$4 sm:$0xff]  }
  0x15   :  { %8013 = vmatprep.subr.bf16.mxu1 %v15975_v21  ;;  %7982 = vmatprep.mubr.bf16.mxu0 %v18444_v53  ;;  %v16026_v61 = vld [vmem:[%s24468_s1 + $0xa90] ss:$52 sps:$4 sm:$0xff]   ;;  %v16029_v63 = vld [vmem:[%s24468_s1 + $0xa2c] ss:$52 sps:$4 sm:$0xff]   ;;  %v16031_v0 = vld [vmem:[%s24468_s1 + $0x3a8] ss:$52 sps:$4 sm:$0xff]  }
  0x16   :  { %8035 = vmatprep.mubr.bf16.mxu1 %v18446_v54  ;;  %v16032_v1 = vld [vmem:[%s24468_s1 + $0xa28] ss:$52 sps:$4 sm:$0xff]   ;;  %v16033_v2 = vld [vmem:[%s24468_s1 + $0x344] ss:$52 sps:$4 sm:$0xff]   ;;  %v16037_v4 = vld [vmem:[%s24468_s1 + $0x340] ss:$52 sps:$4 sm:$0xff]  }
  0x17   :  { %7961 = vmatpush1.bf16.msra.mxu0 %v15977_v22  ;;  %v16035_v3 = vld [vmem:[%s24468_s1 + $0x9c4] ss:$52 sps:$4 sm:$0xff]   ;;  %v16038_v5 = vld [vmem:[%s24468_s1 + $0x9c0] ss:$52 sps:$4 sm:$0xff]   ;;  %v46_v7 = vld [vmem:[%s24469_s0 + $0x68] sm:$0xff] }
  0x18   :  { %8014 = vmatpush1.bf16.msra.mxu1 %v15978_v23  ;;  %7962 = vmatprep.subr.bf16.mxu0 %v15979_v24  ;;  %v33_v6 = vld [vmem:[%s24469_s0] sm:$0xff]  ;;  %v35_v8 = vld [vmem:[%s24469_s0 + $0x10] sm:$0xff]  ;;  %v48_v9 = vld [vmem:[%s24469_s0 + $0x78] sm:$0xff] }
  0x19   :  { %8015 = vmatprep.subr.bf16.mxu1 %v15981_v25  ;;  %v16041_v10 = vld [vmem:[%s24468_s1 + $0xfdc] ss:$52 sps:$4 sm:$0xff]   ;;  %v18513_v12 = vpack.c.bf16 %v46_v7, %v33_v6  ;;  %v18515_v13 = vpack.c.bf16 %v48_v9, %v35_v8  ;;  %v16039_v14 = vld [vmem:[%s24468_s1 + $0xfd8] ss:$52 sps:$4 sm:$0xff]   ;;  %v16047_v16 = vld [vmem:[%s24468_s1 + $0xf74] ss:$52 sps:$4 sm:$0xff]  }
  0x1a   :  { %v16044_v11 = vld [vmem:[%s24468_s1 + $0x165c] ss:$52 sps:$4 sm:$0xff]   ;;  %v16042_v15 = vld [vmem:[%s24468_s1 + $0x1658] ss:$52 sps:$4 sm:$0xff]   ;;  %v16050_v17 = vld [vmem:[%s24468_s1 + $0x15f4] ss:$52 sps:$4 sm:$0xff]  }
  0x1b   :  { %7963 = vmatpush1.bf16.msra.mxu0 %v15983_v26  ;;  %v16045_v18 = vld [vmem:[%s24468_s1 + $0xf70] ss:$52 sps:$4 sm:$0xff]   ;;  %v16053_v20 = vld [vmem:[%s24468_s1 + $0xf0c] ss:$52 sps:$4 sm:$0xff]   ;;  %v16051_v22 = vld [vmem:[%s24468_s1 + $0xf08] ss:$52 sps:$4 sm:$0xff]  }
  0x1c   :  { %8016 = vmatpush1.bf16.msra.mxu1 %v15984_v27  ;;  %7964 = vmatprep.subr.bf16.mxu0 %v15985_v28  ;;  %v16048_v19 = vld [vmem:[%s24468_s1 + $0x15f0] ss:$52 sps:$4 sm:$0xff]   ;;  %v16056_v21 = vld [vmem:[%s24468_s1 + $0x158c] ss:$52 sps:$4 sm:$0xff]   ;;  %v16054_v23 = vld [vmem:[%s24468_s1 + $0x1588] ss:$52 sps:$4 sm:$0xff]  }
  0x1d   :  { %8017 = vmatprep.subr.bf16.mxu1 %v15987_v29  ;;  %v16059_v24 = vld [vmem:[%s24468_s1 + $0xea4] ss:$52 sps:$4 sm:$0xff]   ;;  %v16057_v26 = vld [vmem:[%s24468_s1 + $0xea0] ss:$52 sps:$4 sm:$0xff]   ;;  %v16065_v28 = vld [vmem:[%s24468_s1 + $0xe3c] ss:$52 sps:$4 sm:$0xff]  }
  0x1e   :  { %v16062_v25 = vld [vmem:[%s24468_s1 + $0x1524] ss:$52 sps:$4 sm:$0xff]   ;;  %v16060_v27 = vld [vmem:[%s24468_s1 + $0x1520] ss:$52 sps:$4 sm:$0xff]   ;;  %v16068_v29 = vld [vmem:[%s24468_s1 + $0x14bc] ss:$52 sps:$4 sm:$0xff]  }
  0x1f   :  { %7965 = vmatpush1.bf16.msra.mxu0 %v15989_v30  ;;  %v16063_v30 = vld [vmem:[%s24468_s1 + $0xe38] ss:$52 sps:$4 sm:$0xff]   ;;  %v61_v47 = vld [vmem:[%s24469_s0 + $0xe0] sm:$0xff] }
  0x20   :  { %8018 = vmatpush1.bf16.msra.mxu1 %v15990_v31  ;;  %7966 = vmatprep.subr.bf16.mxu0 %v15991_v32  ;;  %v16066_v31 = vld [vmem:[%s24468_s1 + $0x14b8] ss:$52 sps:$4 sm:$0xff]   ;;  %v16071_v32 = vld [vmem:[%s24468_s1 + $0xdd4] ss:$52 sps:$4 sm:$0xff]   ;;  %v16093_v6 = vld [vmem:[%s24468_s1 + $0x12b0] ss:$52 sps:$4 sm:$0xff]  }
  0x21   :  { %8019 = vmatprep.subr.bf16.mxu1 %v15993_v33  ;;  %v16074_v33 = vld [vmem:[%s24468_s1 + $0x1454] ss:$52 sps:$4 sm:$0xff]   ;;  %v16080_v46 = vld [vmem:[%s24468_s1 + $0x13ec] ss:$52 sps:$4 sm:$0xff]   ;;  %v16096_v7 = vld [vmem:[%s24468_s1 + $0x1930] ss:$52 sps:$4 sm:$0xff]  }
  0x22   :  { %v74_v48 = vld [vmem:[%s24469_s0 + $0x148] sm:$0xff] }
  0x23   :  { %7967 = vmatpush2.bf16.msra.mxu0 %v15995_v34  ;;  %v60_v34 = vld [vmem:[%s24469_s0 + $0xd8] sm:$0xff]  ;;  %v18624_v49 = vpack.c.bf16 %v74_v48, %v61_v47  ;;  %v16101_v8 = vld [vmem:[%s24468_s1 + $0x124c] ss:$52 sps:$4 sm:$0xff]  }
  0x24   :  { %8020 = vmatpush2.bf16.msra.mxu1 %v15996_v35  ;;  %7968 = vmatprep.subr.bf16.mxu0 %v15997_v36  ;;  %v73_v35 = vld [vmem:[%s24469_s0 + $0x140] sm:$0xff]  ;;  %v59_v36 = vld [vmem:[%s24469_s0 + $0xd0] sm:$0xff] }
  0x25   :  { %8021 = vmatprep.subr.bf16.mxu1 %v15999_v37  ;;  %v18588_v37 = vpack.c.bf16 %v73_v35, %v60_v34  ;;  %v16104_v9 = vld [vmem:[%s24468_s1 + $0x18cc] ss:$52 sps:$4 sm:$0xff]  }
  0x26   :  { %v37_v34 = vld [vmem:[%s24469_s0 + $0x20] sm:$0xff]  ;;  %v50_v35 = vld [vmem:[%s24469_s0 + $0x88] sm:$0xff] }
  0x27   :  { %7969 = vmatpush2.bf16.msra.mxu0 %v16001_v38  ;;  %v72_v38 = vld [vmem:[%s24469_s0 + $0x138] sm:$0xff]  ;;  %v18789_v47 = vpack.c.bf16 %v50_v35, %v37_v34  ;;  %v16177_v34 = vld [vmem:[%s24468_s1 + $0x1a00] ss:$52 sps:$4 sm:$0xff]  }
  0x28   :  { %8022 = vmatpush2.bf16.msra.mxu1 %v16002_v39  ;;  %7970 = vmatprep.subr.bf16.mxu0 %v16003_v40  ;;  %v62_v39 = vld [vmem:[%s24469_s0 + $0xe8] sm:$0xff]  ;;  %v75_v40 = vld [vmem:[%s24469_s0 + $0x150] sm:$0xff] }
  0x29   :  { %8023 = vmatprep.subr.bf16.mxu1 %v16005_v41  ;;  %v16069_v41 = vld [vmem:[%s24468_s1 + $0xdd0] ss:$52 sps:$4 sm:$0xff]   ;;  %v16180_v35 = vld [vmem:[%s24468_s1 + $0x2080] ss:$52 sps:$4 sm:$0xff]  }
  0x2b   :  { %7971 = vmatpush2.bf16.msra.mxu0 %v16007_v42  ;;  %v18602_v42 = vpack.c.bf16 %v72_v38, %v59_v36  ;;  %v39_v36 = vld [vmem:[%s24469_s0 + $0x30] sm:$0xff]  ;;  %v52_v38 = vld [vmem:[%s24469_s0 + $0x98] sm:$0xff] }
  0x2c   :  { %8024 = vmatpush2.bf16.msra.mxu1 %v16008_v43  ;;  %7972 = vmatprep.subr.bf16.mxu0 %v16009_v44  ;;  %v18604_v43 = vpack.c.bf16 %v75_v40, %v62_v39  ;;  %v16072_v44 = vld [vmem:[%s24468_s1 + $0x1450] ss:$52 sps:$4 sm:$0xff]   ;;  %v18791_v48 = vpack.c.bf16 %v52_v38, %v39_v36 }
  0x2d   :  { %8025 = vmatprep.subr.bf16.mxu1 %v16011_v45  ;;  %v16077_v45 = vld [vmem:[%s24468_s1 + $0xd6c] ss:$52 sps:$4 sm:$0xff]   ;;  %v16137_v39 = vld [vmem:[%s24468_s1 + $0x1cdc] ss:$52 sps:$4 sm:$0xff]  }
  0x2e   :  { %v16140_v40 = vld [vmem:[%s24468_s1 + $0x235c] ss:$52 sps:$4 sm:$0xff]  }
  0x2f   :  { %7973 = vmatpush2.bf16.msra.mxu0 %v16013_v50  ;;  %v16075_v50 = vld [vmem:[%s24468_s1 + $0xd68] ss:$52 sps:$4 sm:$0xff]  }
  0x30   :  { %8026 = vmatpush2.bf16.msra.mxu1 %v16014_v51  ;;  %7974 = vmatprep.subr.bf16.mxu0 %v16015_v52  ;;  %v16078_v51 = vld [vmem:[%s24468_s1 + $0x13e8] ss:$52 sps:$4 sm:$0xff]   ;;  %v16083_v52 = vld [vmem:[%s24468_s1 + $0xd04] ss:$52 sps:$4 sm:$0xff]  }
  0x31   :  { %8027 = vmatprep.subr.bf16.mxu1 %v16017_v55  ;;  %v16086_v55 = vld [vmem:[%s24468_s1 + $0x1384] ss:$52 sps:$4 sm:$0xff]   ;;  %v16185_v36 = vld [vmem:[%s24468_s1 + $0x201c] ss:$52 sps:$4 sm:$0xff]  }
  0x32   :  { %v16188_v38 = vld [vmem:[%s24468_s1 + $0x269c] ss:$52 sps:$4 sm:$0xff]  }
  0x33   :  { %7975 = vmatpush2.bf16.msra.mxu0 %v16019_v56  ;;  %v38_v56 = vld [vmem:[%s24469_s0 + $0x28] sm:$0xff] }
  0x34   :  { %8028 = vmatpush2.bf16.msra.mxu1 %v16020_v57  ;;  %7976 = vmatprep.subr.bf16.mxu0 %v16021_v58  ;;  %v51_v57 = vld [vmem:[%s24469_s0 + $0x90] sm:$0xff]  ;;  %v40_v58 = vld [vmem:[%s24469_s0 + $0x38] sm:$0xff] }
  0x35   :  { %8029 = vmatprep.subr.bf16.mxu1 %v16023_v59  ;;  %v53_v59 = vld [vmem:[%s24469_s0 + $0xa0] sm:$0xff] }
  0x37   :  { %7977 = vmatpush2.bf16.msra.mxu0 %v16025_v60  ;;  %v16081_v60 = vld [vmem:[%s24468_s1 + $0xd00] ss:$52 sps:$4 sm:$0xff]  }
  0x38   :  { %8030 = vmatpush2.bf16.msra.mxu1 %v16026_v61  ;;  %7978 = vmatprep.subr.bf16.mxu0 %v16027_v62  ;;  %v16084_v61 = vld [vmem:[%s24468_s1 + $0x1380] ss:$52 sps:$4 sm:$0xff]   ;;  %v16089_v62 = vld [vmem:[%s24468_s1 + $0x131c] ss:$52 sps:$4 sm:$0xff]  }
  0x39   :  { %8031 = vmatprep.subr.bf16.mxu1 %v16029_v63  ;;  %v18660_v63 = vpack.c.bf16 %v51_v57, %v38_v56  ;;  %v16141_v56 = vld [vmem:[%s24468_s1 + $0x1c70] ss:$52 sps:$4 sm:$0xff]  }
  0x3a   :  { %v16144_v57 = vld [vmem:[%s24468_s1 + $0x22f0] ss:$52 sps:$4 sm:$0xff]  }
  0x3b   :  { %7979 = vmatpush2.bf16.msra.mxu0 %v16031_v0  ;;  %v18662_v0 = vpack.c.bf16 %v53_v59, %v40_v58  ;;  %v63_v59 = vld [vmem:[%s24469_s0 + $0xf0] sm:$0xff] }
  0x3c   :  { %8032 = vmatpush2.bf16.msra.mxu1 %v16032_v1  ;;  %7980 = vmatprep.subr.bf16.mxu0 %v16033_v2  ;;  %v16092_v1 = vld [vmem:[%s24468_s1 + $0x199c] ss:$52 sps:$4 sm:$0xff]   ;;  %v16087_v2 = vld [vmem:[%s24468_s1 + $0x1318] ss:$52 sps:$4 sm:$0xff]  }
  0x3d   :  { %8033 = vmatprep.subr.bf16.mxu1 %v16035_v3  ;;  %v16090_v3 = vld [vmem:[%s24468_s1 + $0x1998] ss:$52 sps:$4 sm:$0xff]  }
  0x3f   :  { %7981 = vmatpush2.bf16.msra.mxu0 %v16037_v4  ;;  %v16095_v4 = vld [vmem:[%s24468_s1 + $0x12b4] ss:$52 sps:$4 sm:$0xff]  }
  0x40   :  { %8034 = vmatpush2.bf16.msra.mxu1 %v16038_v5  ;;  %8056 = vmatprep.subr.bf16.mxu0 %v16041_v10  ;;  %v16098_v5 = vld [vmem:[%s24468_s1 + $0x1934] ss:$52 sps:$4 sm:$0xff]  }
  0x41   :  { %8109 = vmatprep.subr.bf16.mxu1 %v16044_v11  ;;  %v16099_v10 = vld [vmem:[%s24468_s1 + $0x1248] ss:$52 sps:$4 sm:$0xff]  }
  0x42   :  { %7983 = vmatmul.mubr.bf16.vlgmr.msra.gmra.mxu0 %v18513_v12  ;;  %v16102_v11 = vld [vmem:[%s24468_s1 + $0x18c8] ss:$52 sps:$4 sm:$0xff]  }
  0x43   :  { %8036 = vmatmul.mubr.bf16.vlgmr.msra.gmra.mxu1 %v18515_v13  ;;  %8057 = vmatpush1.bf16.msra.mxu0 %v16039_v14  ;;  %v16107_v14 = vld [vmem:[%s24468_s1 + $0x11e4] ss:$52 sps:$4 sm:$0xff]  }
  0x44   :  { %8110 = vmatpush1.bf16.msra.mxu1 %v16042_v15  ;;  %8058 = vmatprep.subr.bf16.mxu0 %v16047_v16  ;;  %v16110_v15 = vld [vmem:[%s24468_s1 + $0x1864] ss:$52 sps:$4 sm:$0xff]   ;;  %v16105_v16 = vld [vmem:[%s24468_s1 + $0x11e0] ss:$52 sps:$4 sm:$0xff]  }
  0x45   :  { %8111 = vmatprep.subr.bf16.mxu1 %v16050_v17  ;;  %7992 = vmatprep.mubr.bf16.mxu0 %v18588_v37  ;;  %v16108_v17 = vld [vmem:[%s24468_s1 + $0x1860] ss:$52 sps:$4 sm:$0xff]  }
  0x46   :  { %8045 = vmatprep.mubr.bf16.mxu1 %v18604_v43 }
  0x47   :  { %8059 = vmatpush1.bf16.msra.mxu0 %v16045_v18  ;;  %v16113_v18 = vld [vmem:[%s24468_s1 + $0x117c] ss:$52 sps:$4 sm:$0xff]  }
  0x48   :  { %8112 = vmatpush1.bf16.msra.mxu1 %v16048_v19  ;;  %8060 = vmatprep.subr.bf16.mxu0 %v16053_v20  ;;  %v16116_v19 = vld [vmem:[%s24468_s1 + $0x17fc] ss:$52 sps:$4 sm:$0xff]   ;;  %v16111_v20 = vld [vmem:[%s24468_s1 + $0x1178] ss:$52 sps:$4 sm:$0xff]  }
  0x49   :  { %8113 = vmatprep.subr.bf16.mxu1 %v16056_v21  ;;  %v16114_v21 = vld [vmem:[%s24468_s1 + $0x17f8] ss:$52 sps:$4 sm:$0xff]  }
  0x4a   :  { %7993 = vmatmul.mubr.bf16.gmra.mxu0 %v18602_v42 }
  0x4b   :  { %8061 = vmatpush1.bf16.msra.mxu0 %v16051_v22  ;;  %8046 = vmatmul.mubr.bf16.gmra.mxu1 %v18624_v49  ;;  %v16119_v22 = vld [vmem:[%s24468_s1 + $0x1114] ss:$52 sps:$4 sm:$0xff]  }
  0x4c   :  { %8114 = vmatpush1.bf16.msra.mxu1 %v16054_v23  ;;  %8062 = vmatprep.subr.bf16.mxu0 %v16059_v24  ;;  %v16122_v23 = vld [vmem:[%s24468_s1 + $0x1794] ss:$52 sps:$4 sm:$0xff]   ;;  %v16117_v24 = vld [vmem:[%s24468_s1 + $0x1110] ss:$52 sps:$4 sm:$0xff]  }
  0x4d   :  { %8115 = vmatprep.subr.bf16.mxu1 %v16062_v25  ;;  %8088 = vmatprep.mubr.bf16.mxu0 %v18660_v63  ;;  %v16120_v25 = vld [vmem:[%s24468_s1 + $0x1790] ss:$52 sps:$4 sm:$0xff]  }
  0x4e   :  { %8141 = vmatprep.mubr.bf16.mxu1 %v18662_v0 }
  0x4f   :  { %8063 = vmatpush1.bf16.msra.mxu0 %v16057_v26  ;;  %v16125_v26 = vld [vmem:[%s24468_s1 + $0x10ac] ss:$52 sps:$4 sm:$0xff]  }
  0x50   :  { %8116 = vmatpush1.bf16.msra.mxu1 %v16060_v27  ;;  %8064 = vmatprep.subr.bf16.mxu0 %v16065_v28  ;;  %v16128_v27 = vld [vmem:[%s24468_s1 + $0x172c] ss:$52 sps:$4 sm:$0xff]   ;;  %v16123_v28 = vld [vmem:[%s24468_s1 + $0x10a8] ss:$52 sps:$4 sm:$0xff]  }
  0x51   :  { %8117 = vmatprep.subr.bf16.mxu1 %v16068_v29  ;;  %v16126_v29 = vld [vmem:[%s24468_s1 + $0x1728] ss:$52 sps:$4 sm:$0xff]  }
  0x53   :  { %8065 = vmatpush1.bf16.msra.mxu0 %v16063_v30  ;;  %v16131_v30 = vld [vmem:[%s24468_s1 + $0x1044] ss:$52 sps:$4 sm:$0xff]  }
  0x54   :  { %8118 = vmatpush1.bf16.msra.mxu1 %v16066_v31  ;;  %8066 = vmatprep.subr.bf16.mxu0 %v16071_v32  ;;  %v16134_v31 = vld [vmem:[%s24468_s1 + $0x16c4] ss:$52 sps:$4 sm:$0xff]   ;;  %v16129_v32 = vld [vmem:[%s24468_s1 + $0x1040] ss:$52 sps:$4 sm:$0xff]  }
  0x55   :  { %8119 = vmatprep.subr.bf16.mxu1 %v16074_v33  ;;  %v16132_v33 = vld [vmem:[%s24468_s1 + $0x16c0] ss:$52 sps:$4 sm:$0xff]  }
  0x57   :  { %8067 = vmatpush1.bf16.msra.mxu0 %v16069_v41  ;;  %v16135_v41 = vld [vmem:[%s24468_s1 + $0x1cd8] ss:$52 sps:$4 sm:$0xff]  }
  0x58   :  { %8120 = vmatpush1.bf16.msra.mxu1 %v16072_v44  ;;  %8068 = vmatprep.subr.bf16.mxu0 %v16077_v45  ;;  %v16138_v44 = vld [vmem:[%s24468_s1 + $0x2358] ss:$52 sps:$4 sm:$0xff]  }
  0x59   :  { %8121 = vmatprep.subr.bf16.mxu1 %v16080_v46  ;;  %v64_v45 = vld [vmem:[%s24469_s0 + $0xf8] sm:$0xff]  ;;  %v77_v46 = vld [vmem:[%s24469_s0 + $0x160] sm:$0xff] }
  0x5a   :  { %v18811_v58 = vpack.c.bf16 %v77_v46, %v64_v45  ;;  %v16189_v45 = vld [vmem:[%s24468_s1 + $0x1fb0] ss:$52 sps:$4 sm:$0xff]  }
  0x5b   :  { %8069 = vmatpush1.bf16.msra.mxu0 %v16075_v50  ;;  %v66_v50 = vld [vmem:[%s24469_s0 + $0x108] sm:$0xff]  ;;  %v16192_v46 = vld [vmem:[%s24468_s1 + $0x2630] ss:$52 sps:$4 sm:$0xff]  }
  0x5c   :  { %8122 = vmatpush1.bf16.msra.mxu1 %v16078_v51  ;;  %8070 = vmatprep.subr.bf16.mxu0 %v16083_v52  ;;  %v79_v51 = vld [vmem:[%s24469_s0 + $0x170] sm:$0xff] }
  0x5d   :  { %8123 = vmatprep.subr.bf16.mxu1 %v16086_v55  ;;  %v16143_v52 = vld [vmem:[%s24468_s1 + $0x1c74] ss:$52 sps:$4 sm:$0xff]  }
  0x5e   :  { %v16146_v55 = vld [vmem:[%s24468_s1 + $0x22f4] ss:$52 sps:$4 sm:$0xff]  }
  0x5f   :  { %8071 = vmatpush1.bf16.msra.mxu0 %v16081_v60  ;;  %v76_v60 = vld [vmem:[%s24469_s0 + $0x158] sm:$0xff] }
  0x60   :  { %8124 = vmatpush1.bf16.msra.mxu1 %v16084_v61  ;;  %8072 = vmatprep.subr.bf16.mxu0 %v16089_v62  ;;  %v18819_v61 = vpack.c.bf16 %v79_v51, %v66_v50  ;;  %v16149_v62 = vld [vmem:[%s24468_s1 + $0x1c0c] ss:$52 sps:$4 sm:$0xff]  }
  0x61   :  { %8125 = vmatprep.subr.bf16.mxu1 %v16092_v1  ;;  %v65_v1 = vld [vmem:[%s24469_s0 + $0x100] sm:$0xff] }
  0x62   :  { %v16197_v50 = vld [vmem:[%s24468_s1 + $0x1f4c] ss:$52 sps:$4 sm:$0xff]  }
  0x63   :  { %8073 = vmatpush2.bf16.msra.mxu0 %v16087_v2  ;;  %v78_v2 = vld [vmem:[%s24469_s0 + $0x168] sm:$0xff] }
  0x64   :  { %8126 = vmatpush2.bf16.msra.mxu1 %v16090_v3  ;;  %8074 = vmatprep.subr.bf16.mxu0 %v16095_v4  ;;  %v16152_v3 = vld [vmem:[%s24468_s1 + $0x228c] ss:$52 sps:$4 sm:$0xff]   ;;  %v18837_v4 = vpack.c.bf16 %v76_v60, %v63_v59 }
  0x65   :  { %8127 = vmatprep.subr.bf16.mxu1 %v16098_v5  ;;  %v16147_v5 = vld [vmem:[%s24468_s1 + $0x1c08] ss:$52 sps:$4 sm:$0xff]   ;;  %v16200_v51 = vld [vmem:[%s24468_s1 + $0x25cc] ss:$52 sps:$4 sm:$0xff]  }
  0x66   :  { %v16201_v59 = vld [vmem:[%s24468_s1 + $0x1ee0] ss:$52 sps:$4 sm:$0xff]  }
  0x67   :  { %8075 = vmatpush2.bf16.msra.mxu0 %v16093_v6  ;;  %v16150_v6 = vld [vmem:[%s24468_s1 + $0x2288] ss:$52 sps:$4 sm:$0xff]   ;;  %v16204_v60 = vld [vmem:[%s24468_s1 + $0x2560] ss:$52 sps:$4 sm:$0xff]  }
  0x68   :  { %8128 = vmatpush2.bf16.msra.mxu1 %v16096_v7  ;;  %8076 = vmatprep.subr.bf16.mxu0 %v16101_v8  ;;  %v18845_v7 = vpack.c.bf16 %v78_v2, %v65_v1  ;;  %v16155_v8 = vld [vmem:[%s24468_s1 + $0x1ba4] ss:$52 sps:$4 sm:$0xff]   ;;  %v16212_v1 = vld [vmem:[%s24468_s1 + $0x24fc] ss:$52 sps:$4 sm:$0xff]  }
  0x69   :  { %8129 = vmatprep.subr.bf16.mxu1 %v16104_v9  ;;  %v16158_v9 = vld [vmem:[%s24468_s1 + $0x2224] ss:$52 sps:$4 sm:$0xff]  }
  0x6a   :  { %v16207_v2 = vld [vmem:[%s24468_s1 + $0x1e78] ss:$52 sps:$4 sm:$0xff]  }
  0x6b   :  { %8077 = vmatpush2.bf16.msra.mxu0 %v16099_v10  ;;  %v42_v10 = vld [vmem:[%s24469_s0 + $0x48] sm:$0xff] }
  0x6c   :  { %8130 = vmatpush2.bf16.msra.mxu1 %v16102_v11  ;;  %8078 = vmatprep.subr.bf16.mxu0 %v16107_v14  ;;  %v55_v11 = vld [vmem:[%s24469_s0 + $0xb0] sm:$0xff]  ;;  %v44_v14 = vld [vmem:[%s24469_s0 + $0x58] sm:$0xff] }
  0x6d   :  { %8131 = vmatprep.subr.bf16.mxu1 %v16110_v15  ;;  %v57_v15 = vld [vmem:[%s24469_s0 + $0xc0] sm:$0xff] }
  0x6f   :  { %8079 = vmatpush2.bf16.msra.mxu0 %v16105_v16  ;;  %v16153_v16 = vld [vmem:[%s24468_s1 + $0x1ba0] ss:$52 sps:$4 sm:$0xff]  }
  0x70   :  { %8132 = vmatpush2.bf16.msra.mxu1 %v16108_v17  ;;  %8080 = vmatprep.subr.bf16.mxu0 %v16113_v18  ;;  %v16156_v17 = vld [vmem:[%s24468_s1 + $0x2220] ss:$52 sps:$4 sm:$0xff]   ;;  %v18873_v18 = vpack.c.bf16 %v55_v11, %v42_v10 }
  0x71   :  { %8133 = vmatprep.subr.bf16.mxu1 %v16116_v19  ;;  %v18875_v19 = vpack.c.bf16 %v57_v15, %v44_v14  ;;  %v16221_v10 = vld [vmem:[%s24468_s1 + $0x1dac] ss:$52 sps:$4 sm:$0xff]   ;;  %v18233_v15 = vmov 65535  }
  0x72   :  { %v16224_v11 = vld [vmem:[%s24468_s1 + $0x242c] ss:$52 sps:$4 sm:$0xff]  }
  0x73   :  { %8081 = vmatpush2.bf16.msra.mxu0 %v16111_v20  ;;  %v16161_v20 = vld [vmem:[%s24468_s1 + $0x1b3c] ss:$52 sps:$4 sm:$0xff]   ;;  %v1455_v14 = vld [vmem:[%s24468_s1 + $0x2700] sm:$0x33] }
  0x74   :  { %8134 = vmatpush2.bf16.msra.mxu1 %v16114_v21  ;;  %8082 = vmatprep.subr.bf16.mxu0 %v16119_v22  ;;  %v16164_v21 = vld [vmem:[%s24468_s1 + $0x21bc] ss:$52 sps:$4 sm:$0xff]   ;;  %v16159_v22 = vld [vmem:[%s24468_s1 + $0x1b38] ss:$52 sps:$4 sm:$0xff]  }
  0x75   :  { %8135 = vmatprep.subr.bf16.mxu1 %v16122_v23  ;;  %v16162_v23 = vld [vmem:[%s24468_s1 + $0x21b8] ss:$52 sps:$4 sm:$0xff]  }
  0x77   :  { %8083 = vmatpush2.bf16.msra.mxu0 %v16117_v24  ;;  %v16167_v24 = vld [vmem:[%s24468_s1 + $0x1ad4] ss:$52 sps:$4 sm:$0xff]  }
  0x78   :  { %8136 = vmatpush2.bf16.msra.mxu1 %v16120_v25  ;;  %8084 = vmatprep.subr.bf16.mxu0 %v16125_v26  ;;  %v16170_v25 = vld [vmem:[%s24468_s1 + $0x2154] ss:$52 sps:$4 sm:$0xff]   ;;  %v16165_v26 = vld [vmem:[%s24468_s1 + $0x1ad0] ss:$52 sps:$4 sm:$0xff]  }
  0x79   :  { %8137 = vmatprep.subr.bf16.mxu1 %v16128_v27  ;;  %v16168_v27 = vld [vmem:[%s24468_s1 + $0x2150] ss:$52 sps:$4 sm:$0xff]  }
  0x7b   :  { %8085 = vmatpush2.bf16.msra.mxu0 %v16123_v28  ;;  %v16173_v28 = vld [vmem:[%s24468_s1 + $0x1a6c] ss:$52 sps:$4 sm:$0xff]  }
  0x7c   :  { %8138 = vmatpush2.bf16.msra.mxu1 %v16126_v29  ;;  %8086 = vmatprep.subr.bf16.mxu0 %v16131_v30  ;;  %v16176_v29 = vld [vmem:[%s24468_s1 + $0x20ec] ss:$52 sps:$4 sm:$0xff]   ;;  %v16171_v30 = vld [vmem:[%s24468_s1 + $0x1a68] ss:$52 sps:$4 sm:$0xff]  }
  0x7d   :  { %8139 = vmatprep.subr.bf16.mxu1 %v16134_v31  ;;  %v16174_v31 = vld [vmem:[%s24468_s1 + $0x20e8] ss:$52 sps:$4 sm:$0xff]  }
  0x7f   :  { %8087 = vmatpush2.bf16.msra.mxu0 %v16129_v32  ;;  %v16179_v32 = vld [vmem:[%s24468_s1 + $0x1a04] ss:$52 sps:$4 sm:$0xff]  }
  0x80   :  { %8140 = vmatpush2.bf16.msra.mxu1 %v16132_v33  ;;  %8162 = vmatprep.subr.bf16.mxu0 %v16137_v39  ;;  %v16182_v33 = vld [vmem:[%s24468_s1 + $0x2084] ss:$52 sps:$4 sm:$0xff]  }
  0x81   :  { %8215 = vmatprep.subr.bf16.mxu1 %v16140_v40  ;;  %v16183_v39 = vld [vmem:[%s24468_s1 + $0x2018] ss:$52 sps:$4 sm:$0xff]  }
  0x82   :  { %8089 = vmatmul.mubr.bf16.vlgmr.msra.gmra.mxu0 %v18789_v47  ;;  %v16186_v40 = vld [vmem:[%s24468_s1 + $0x2698] ss:$52 sps:$4 sm:$0xff]  }
  0x83   :  { %8142 = vmatmul.mubr.bf16.vlgmr.msra.gmra.mxu1 %v18791_v48  ;;  %8163 = vmatpush1.bf16.msra.mxu0 %v16135_v41  ;;  %v16191_v41 = vld [vmem:[%s24468_s1 + $0x1fb4] ss:$52 sps:$4 sm:$0xff]  }
  0x84   :  { %8216 = vmatpush1.bf16.msra.mxu1 %v16138_v44  ;;  %8164 = vmatprep.subr.bf16.mxu0 %v16143_v52  ;;  %v16194_v44 = vld [vmem:[%s24468_s1 + $0x2634] ss:$52 sps:$4 sm:$0xff]  }
  0x85   :  { %8217 = vmatprep.subr.bf16.mxu1 %v16146_v55  ;;  %8098 = vmatprep.mubr.bf16.mxu0 %v18811_v58  ;;  %v16195_v52 = vld [vmem:[%s24468_s1 + $0x1f48] ss:$52 sps:$4 sm:$0xff]  }
  0x86   :  { %8151 = vmatprep.mubr.bf16.mxu1 %v18819_v61  ;;  %v16198_v55 = vld [vmem:[%s24468_s1 + $0x25c8] ss:$52 sps:$4 sm:$0xff]  }
  0x87   :  { %8165 = vmatpush1.bf16.msra.mxu0 %v16141_v56  ;;  %v16203_v56 = vld [vmem:[%s24468_s1 + $0x1ee4] ss:$52 sps:$4 sm:$0xff]  }
  0x88   :  { %8218 = vmatpush1.bf16.msra.mxu1 %v16144_v57  ;;  %8166 = vmatprep.subr.bf16.mxu0 %v16149_v62  ;;  %v16206_v57 = vld [vmem:[%s24468_s1 + $0x2564] ss:$52 sps:$4 sm:$0xff]   ;;  %v16209_v62 = vld [vmem:[%s24468_s1 + $0x1e7c] ss:$52 sps:$4 sm:$0xff]  }
  0x89   :  { %8219 = vmatprep.subr.bf16.mxu1 %v16152_v3  ;;  %v16210_v3 = vld [vmem:[%s24468_s1 + $0x24f8] ss:$52 sps:$4 sm:$0xff]  }
  0x8a   :  { %8099 = vmatmul.mubr.bf16.gmra.mxu0 %v18837_v4 }
  0x8b   :  { %8152 = vmatmul.mubr.bf16.gmra.mxu1 %v18845_v7  ;;  %8167 = vmatpush1.bf16.msra.mxu0 %v16147_v5  ;;  %v16215_v5 = vld [vmem:[%s24468_s1 + $0x1e14] ss:$52 sps:$4 sm:$0xff]  }
  0x8c   :  { %8220 = vmatpush1.bf16.msra.mxu1 %v16150_v6  ;;  %8168 = vmatprep.subr.bf16.mxu0 %v16155_v8  ;;  %v16218_v6 = vld [vmem:[%s24468_s1 + $0x2494] ss:$52 sps:$4 sm:$0xff]   ;;  %v16213_v8 = vld [vmem:[%s24468_s1 + $0x1e10] ss:$52 sps:$4 sm:$0xff]  }
  0x8d   :  { %8221 = vmatprep.subr.bf16.mxu1 %v16158_v9  ;;  %8194 = vmatprep.mubr.bf16.mxu0 %v18873_v18  ;;  %v16216_v9 = vld [vmem:[%s24468_s1 + $0x2490] ss:$52 sps:$4 sm:$0xff]  }
  0x8e   :  { %8247 = vmatprep.mubr.bf16.mxu1 %v18875_v19 }
  0x8f   :  { %8169 = vmatpush1.bf16.msra.mxu0 %v16153_v16  ;;  %v7909_v16 = vsel %vm7907_vm0, 4294967295, %v18233_v15  ;;  %v16248_v15 = vld [vmem:[%s24468_s1 + $0x140] ss:$52 sps:$4 sm:$0xff]  }
  0x90   :  { %8222 = vmatpush1.bf16.msra.mxu1 %v16156_v17  ;;  %8170 = vmatprep.subr.bf16.mxu0 %v16161_v20  ;;  %v16219_v17 = vld [vmem:[%s24468_s1 + $0x1da8] ss:$52 sps:$4 sm:$0xff]  }
  0x91   :  { %8223 = vmatprep.subr.bf16.mxu1 %v16164_v21  ;;  %v16222_v20 = vld [vmem:[%s24468_s1 + $0x2428] ss:$52 sps:$4 sm:$0xff]   ;;  %v16227_v21 = vld [vmem:[%s24468_s1 + $0x1d44] ss:$52 sps:$4 sm:$0xff]  }
  0x93   :  { %8171 = vmatpush1.bf16.msra.mxu0 %v16159_v22  ;;  %v16230_v22 = vld [vmem:[%s24468_s1 + $0x23c4] ss:$52 sps:$4 sm:$0xff]  }
  0x94   :  { %8224 = vmatpush1.bf16.msra.mxu1 %v16162_v23  ;;  %8172 = vmatprep.subr.bf16.mxu0 %v16167_v24  ;;  %v15106_v23 = vcombine.high %v1455_v14, %v1455_v14  ;;  %v16225_v24 = vld [vmem:[%s24468_s1 + $0x1d40] ss:$52 sps:$4 sm:$0xff]  }
  0x95   :  { %8225 = vmatprep.subr.bf16.mxu1 %v16170_v25  ;;  %v16228_v25 = vld [vmem:[%s24468_s1 + $0x23c0] ss:$52 sps:$4 sm:$0xff]  }
  0x97   :  { %8173 = vmatpush1.bf16.msra.mxu0 %v16165_v26  ;;  %v41_v26 = vld [vmem:[%s24469_s0 + $0x40] sm:$0xff] }
  0x98   :  { %8226 = vmatpush1.bf16.msra.mxu1 %v16168_v27  ;;  %8174 = vmatprep.subr.bf16.mxu0 %v16173_v28  ;;  %v54_v27 = vld [vmem:[%s24469_s0 + $0xa8] sm:$0xff]  ;;  %v19033_v28 = vsel %vm7908_vm1, %v7909_v16, 0  ;;  %v16253_v16 = vld [vmem:[%s24468_s1 + $0x8fc] ss:$52 sps:$4 sm:$0xff]  }
  0x99   :  { %8227 = vmatprep.subr.bf16.mxu1 %v16176_v29  ;;  %v43_v29 = vld [vmem:[%s24469_s0 + $0x50] sm:$0xff] }
  0x9b   :  { %8175 = vmatpush1.bf16.msra.mxu0 %v16171_v30  ;;  %v56_v30 = vld [vmem:[%s24469_s0 + $0xb8] sm:$0xff] }
  0x9c   :  { %8228 = vmatpush1.bf16.msra.mxu1 %v16174_v31  ;;  %8176 = vmatprep.subr.bf16.mxu0 %v16179_v32  ;;  %v15105_v31 = vcombine.low %v1455_v14, %v1455_v14  ;;  %v16235_v32 = vld [vmem:[%s24468_s1 + $0x2e4] ss:$52 sps:$4 sm:$0xff]   ;;  %v16245_v14 = vld [vmem:[%s24468_s1 + $0x960] ss:$52 sps:$4 sm:$0xff]  }
  0x9d   :  { %8229 = vmatprep.subr.bf16.mxu1 %v16182_v33  ;;  %v7915_v33 = vand.u32 %v15106_v23, %v19033_v28  ;;  %v84_v23 = vld [vmem:[%s24469_s0 + $0x198] sm:$0xff] }
  0x9f   :  { %8177 = vmatpush1.bf16.msra.mxu0 %v16177_v34  ;;  %v68_v34 = vld [vmem:[%s24469_s0 + $0x118] sm:$0xff] }
  0xa0   :  { %8230 = vmatpush1.bf16.msra.mxu1 %v16180_v35  ;;  %8178 = vmatprep.subr.bf16.mxu0 %v16185_v36  ;;  %v81_v35 = vld [vmem:[%s24469_s0 + $0x180] sm:$0xff]  ;;  %v70_v36 = vld [vmem:[%s24469_s0 + $0x128] sm:$0xff] }
  0xa1   :  { %8231 = vmatprep.subr.bf16.mxu1 %v16188_v38  ;;  %v19054_v38 = vpack.c.bf16 %v54_v27, %v41_v26  ;;  %v16257_v27 = vld [vmem:[%s24468_s1 + $0x890] ss:$52 sps:$4 sm:$0xff]  }
  0xa3   :  { %8179 = vmatpush2.bf16.msra.mxu0 %v16183_v39  ;;  %v19056_v39 = vpack.c.bf16 %v56_v30, %v43_v29  ;;  %v16260_v29 = vld [vmem:[%s24468_s1 + $0x70] ss:$52 sps:$4 sm:$0xff]   ;;  %v16265_v30 = vld [vmem:[%s24468_s1 + $0x82c] ss:$52 sps:$4 sm:$0xff]  }
  0xa4   :  { %8232 = vmatpush2.bf16.msra.mxu1 %v16186_v40  ;;  %8180 = vmatprep.subr.bf16.mxu0 %v16191_v41  ;;  %v83_v40 = vld [vmem:[%s24469_s0 + $0x190] sm:$0xff] }
  0xa5   :  { %8233 = vmatprep.subr.bf16.mxu1 %v16194_v44  ;;  %v16233_v41 = vld [vmem:[%s24468_s1 + $0x2e0] ss:$52 sps:$4 sm:$0xff]   ;;  %v7912_v44 = vand.u32 %v15105_v31, %v19033_v28 }
  0xa6   :  { %v16268_v31 = vld [vmem:[%s24468_s1 + $0xc] ss:$52 sps:$4 sm:$0xff]  }
  0xa7   :  { %8181 = vmatpush2.bf16.msra.mxu0 %v16189_v45  ;;  %v16238_v45 = vld [vmem:[%s24468_s1 + $0x27c] ss:$52 sps:$4 sm:$0xff]  }
  0xa8   :  { %8234 = vmatpush2.bf16.msra.mxu1 %v16192_v46  ;;  %8182 = vmatprep.subr.bf16.mxu0 %v16197_v50  ;;  %v19068_v46 = vpack.c.bf16 %v81_v35, %v68_v34  ;;  %v16236_v50 = vld [vmem:[%s24468_s1 + $0x278] ss:$52 sps:$4 sm:$0xff]  }
  0xa9   :  { %8235 = vmatprep.subr.bf16.mxu1 %v16200_v51  ;;  %v67_v51 = vld [vmem:[%s24469_s0 + $0x110] sm:$0xff]  ;;  %v16271_v34 = vld [vmem:[%s24468_s1 + $0x7c4] ss:$52 sps:$4 sm:$0xff]  }
  0xaa   :  { %v16274_v35 = vld [vmem:[%s24468_s1 + $0x624] ss:$52 sps:$4 sm:$0xff]  }
  0xab   :  { %8183 = vmatpush2.bf16.msra.mxu0 %v16195_v52  ;;  %v19076_v52 = vpack.c.bf16 %v83_v40, %v70_v36  ;;  %v16269_v36 = vld [vmem:[%s24468_s1 + $0x7c0] ss:$52 sps:$4 sm:$0xff]  }
  0xac   :  { %8236 = vmatpush2.bf16.msra.mxu1 %v16198_v55  ;;  %8184 = vmatprep.subr.bf16.mxu0 %v16203_v56  ;;  %v16247_v55 = vld [vmem:[%s24468_s1 + $0x964] ss:$52 sps:$4 sm:$0xff]   ;;  %v16272_v40 = vld [vmem:[%s24468_s1 + $0x620] ss:$52 sps:$4 sm:$0xff]  }
  0xad   :  { %8237 = vmatprep.subr.bf16.mxu1 %v16206_v57  ;;  %v80_v56 = vld [vmem:[%s24469_s0 + $0x178] sm:$0xff]  ;;  %v69_v57 = vld [vmem:[%s24469_s0 + $0x120] sm:$0xff] }
  0xaf   :  { %8185 = vmatpush2.bf16.msra.mxu0 %v16201_v59  ;;  %v82_v59 = vld [vmem:[%s24469_s0 + $0x188] sm:$0xff] }
  0xb0   :  { %8238 = vmatpush2.bf16.msra.mxu1 %v16204_v60  ;;  %8186 = vmatprep.subr.bf16.mxu0 %v16209_v62  ;;  %v16241_v60 = vld [vmem:[%s24468_s1 + $0x214] ss:$52 sps:$4 sm:$0xff]   ;;  %v19097_v62 = vpack.c.bf16 %v80_v56, %v67_v51  ;;  %v16281_v56 = vld [vmem:[%s24468_s1 + $0x6f0] ss:$52 sps:$4 sm:$0xff]  }
  0xb1   :  { %8239 = vmatprep.subr.bf16.mxu1 %v16212_v1  ;;  %v19099_v1 = vpack.c.bf16 %v82_v59, %v69_v57  ;;  %v16283_v51 = vld [vmem:[%s24468_s1 + $0x6f4] ss:$52 sps:$4 sm:$0xff]   ;;  %v16284_v57 = vld [vmem:[%s24468_s1 + $0x550] ss:$52 sps:$4 sm:$0xff]   ;;  %v16289_v59 = vld [vmem:[%s24468_s1 + $0x68c] ss:$52 sps:$4 sm:$0xff]  }
  0xb3   :  { %8187 = vmatpush2.bf16.msra.mxu0 %v16207_v2  ;;  %v16239_v2 = vld [vmem:[%s24468_s1 + $0x210] ss:$52 sps:$4 sm:$0xff]  }
  0xb4   :  { %8240 = vmatpush2.bf16.msra.mxu1 %v16210_v3  ;;  %8188 = vmatprep.subr.bf16.mxu0 %v16215_v5  ;;  %v16244_v3 = vld [vmem:[%s24468_s1 + $0x1ac] ss:$52 sps:$4 sm:$0xff]   ;;  %v16242_v5 = vld [vmem:[%s24468_s1 + $0x1a8] ss:$52 sps:$4 sm:$0xff]  }
  0xb5   :  { %8241 = vmatprep.subr.bf16.mxu1 %v16218_v6  ;;  %v24478_v6 = vmov 0  }
  0xb7   :  { %8189 = vmatpush2.bf16.msra.mxu0 %v16213_v8  ;;  %v45_v8 = vld [vmem:[%s24469_s0 + $0x60] sm:$0xff] }
  0xb8   :  { %8242 = vmatpush2.bf16.msra.mxu1 %v16216_v9  ;;  %8190 = vmatprep.subr.bf16.mxu0 %v16221_v10  ;;  %v58_v9 = vld [vmem:[%s24469_s0 + $0xc8] sm:$0xff]  ;;  %v16250_v10 = vld [vmem:[%s24468_s1 + $0x144] ss:$52 sps:$4 sm:$0xff]  }
  0xb9   :  { %8243 = vmatprep.subr.bf16.mxu1 %v16224_v11  ;;  %v19123_v11 = vpack.c.bf16 %v58_v9, %v45_v8  ;;  %v16298_v8 = vld [vmem:[%s24468_s1 + $0x484] ss:$52 sps:$4 sm:$0xff]   ;;  %v16293_v9 = vld [vmem:[%s24468_s1 + $0xca0] ss:$52 sps:$4 sm:$0xff]  }
  0xbb   :  { %8191 = vmatpush2.bf16.msra.mxu0 %v16219_v17  ;;  %v16256_v17 = vld [vmem:[%s24468_s1 + $0xdc] ss:$52 sps:$4 sm:$0xff]  }
  0xbc   :  { %8244 = vmatpush2.bf16.msra.mxu1 %v16222_v20  ;;  %8192 = vmatprep.subr.bf16.mxu0 %v16227_v21  ;;  %v16251_v20 = vld [vmem:[%s24468_s1 + $0x8f8] ss:$52 sps:$4 sm:$0xff]  }
  0xbd   :  { %8245 = vmatprep.subr.bf16.mxu1 %v16230_v22  ;;  %v16254_v21 = vld [vmem:[%s24468_s1 + $0xd8] ss:$52 sps:$4 sm:$0xff]   ;;  %v71_v22 = vld [vmem:[%s24469_s0 + $0x130] sm:$0xff] }
  0xbe   :  { %v19158_v26 = vpack.c.bf16 %v84_v23, %v71_v22  ;;  %v16310_v22 = vld [vmem:[%s24468_s1 + $0x3b4] ss:$52 sps:$4 sm:$0xff]   ;;  %v16305_v23 = vld [vmem:[%s24468_s1 + $0xbd0] ss:$52 sps:$4 sm:$0xff]  }
  0xbf   :  { %8193 = vmatpush2.bf16.msra.mxu0 %v16225_v24  ;;  %v16259_v24 = vld [vmem:[%s24468_s1 + $0x894] ss:$52 sps:$4 sm:$0xff]  }
  0xc0   :  { %8246 = vmatpush2.bf16.msra.mxu1 %v16228_v25  ;;  %8282 = vmatprep.subr.bf16.mxu0 %v7915_v33  ;;  %v16262_v25 = vld [vmem:[%s24468_s1 + $0x74] ss:$52 sps:$4 sm:$0xff]  }
  0xc1   :  { %8321 = vmatprep.subr.bf16.mxu1 %v16235_v32  ;;  %v16263_v32 = vld [vmem:[%s24468_s1 + $0x828] ss:$52 sps:$4 sm:$0xff]  }
  0xc2   :  { %8195 = vmatmul.mubr.bf16.vlgmr.msra.gmra.mxu0 %v19054_v38  ;;  %v16266_v33 = vld [vmem:[%s24468_s1 + $0x8] ss:$52 sps:$4 sm:$0xff]  }
  0xc3   :  { %8248 = vmatmul.mubr.bf16.vlgmr.msra.gmra.mxu1 %v19056_v39  ;;  %8283 = vmatpush1.bf16.msra.mxu0 %v7912_v44  ;;  %v16280_v44 = vld [vmem:[%s24468_s1 + $0x5bc] ss:$52 sps:$4 sm:$0xff]  }
  0xc4   :  { %8322 = vmatpush1.bf16.msra.mxu1 %v16233_v41  ;;  %8204 = vmatprep.mubr.bf16.mxu0 %v19068_v46  ;;  %v16277_v41 = vld [vmem:[%s24468_s1 + $0x75c] ss:$52 sps:$4 sm:$0xff]  }
  0xc5   :  { %8323 = vmatprep.subr.bf16.mxu1 %v16238_v45  ;;  %8257 = vmatprep.mubr.bf16.mxu1 %v19076_v52  ;;  %v16275_v45 = vld [vmem:[%s24468_s1 + $0x758] ss:$52 sps:$4 sm:$0xff]  }
  0xc6   :  { %8374 = vmatprep.subr.bf16.mxu0 %v16247_v55  ;;  %v16286_v55 = vld [vmem:[%s24468_s1 + $0x554] ss:$52 sps:$4 sm:$0xff]  }
  0xc8   :  { %8324 = vmatpush1.bf16.msra.mxu1 %v16236_v50  ;;  %v16278_v50 = vld [vmem:[%s24468_s1 + $0x5b8] ss:$52 sps:$4 sm:$0xff]  }
  0xc9   :  { %8325 = vmatprep.subr.bf16.mxu1 %v16241_v60  ;;  %v16292_v60 = vld [vmem:[%s24468_s1 + $0x4ec] ss:$52 sps:$4 sm:$0xff]  }
  0xca   :  { %8205 = vmatmul.mubr.bf16.gmra.mxu0 %v19097_v62 }
  0xcb   :  { %8258 = vmatmul.mubr.bf16.gmra.mxu1 %v19099_v1  ;;  %8300 = vmatprep.mubr.bf16.mxu0 %v24478_v6 }
  0xcc   :  { %8326 = vmatpush1.bf16.msra.mxu1 %v16239_v2  ;;  %8353 = vmatprep.mubr.bf16.mxu1 %v18444_v53  ;;  %v16287_v2 = vld [vmem:[%s24468_s1 + $0x688] ss:$52 sps:$4 sm:$0xff]  }
  0xcd   :  { %8327 = vmatprep.subr.bf16.mxu1 %v16244_v3  ;;  %v16290_v3 = vld [vmem:[%s24468_s1 + $0x4e8] ss:$52 sps:$4 sm:$0xff]  }
  0xd0   :  { %8328 = vmatpush1.bf16.msra.mxu1 %v16242_v5  ;;  %v16295_v5 = vld [vmem:[%s24468_s1 + $0xca4] ss:$52 sps:$4 sm:$0xff]  }
  0xd1   :  { %8329 = vmatprep.subr.bf16.mxu1 %v16250_v10  ;;  %v16296_v10 = vld [vmem:[%s24468_s1 + $0x480] ss:$52 sps:$4 sm:$0xff]  }
  0xd2   :  { %15118 = vmatmul.mubr.msk.bf16.vlgmr.msra.gmra.mxu0 %vm7900_vm2, %v19123_v11 }
  0xd3   :  { %8375 = vmatpush1.bf16.msra.mxu0 %v16245_v14  ;;  %8310 = vmatprep.mubr.bf16.mxu0 %v24478_v6  ;;  %v16301_v14 = vld [vmem:[%s24468_s1 + $0xc3c] ss:$52 sps:$4 sm:$0xff]  }
  0xd4   :  { %8330 = vmatpush1.bf16.msra.mxu1 %v16248_v15  ;;  %8376 = vmatprep.subr.bf16.mxu0 %v16253_v16  ;;  %v16304_v15 = vld [vmem:[%s24468_s1 + $0x41c] ss:$52 sps:$4 sm:$0xff]   ;;  %v16299_v16 = vld [vmem:[%s24468_s1 + $0xc38] ss:$52 sps:$4 sm:$0xff]  }
  0xd5   :  { %8331 = vmatprep.subr.bf16.mxu1 %v16256_v17  ;;  %v16302_v17 = vld [vmem:[%s24468_s1 + $0x418] ss:$52 sps:$4 sm:$0xff]  }
  0xd7   :  { %8377 = vmatpush1.bf16.msra.mxu0 %v16251_v20  ;;  %v1466_v20 = vlaneseq }
  0xd8   :  { %8332 = vmatpush1.bf16.msra.mxu1 %v16254_v21  ;;  %8378 = vmatprep.subr.bf16.mxu0 %v16259_v24  ;;  %v16307_v21 = vld [vmem:[%s24468_s1 + $0xbd4] ss:$52 sps:$4 sm:$0xff]   ;;  %v16308_v24 = vld [vmem:[%s24468_s1 + $0x3b0] ss:$52 sps:$4 sm:$0xff]  }
  0xd9   :  { %8333 = vmatprep.subr.bf16.mxu1 %v16262_v25  ;;  %v19265_v25 = vshrl.u32 %v1466_v20, 7  ;;  %v16332_v20 = vld [vmem:[%s24468_s1 + $0xf10] ss:$52 sps:$4 sm:$0xff]  }
  0xda   :  { %15119 = vmatmul.mubr.msk.bf16.gmra.mxu0 %vm7900_vm2, %v19158_v26 }
  0xdb   :  { %8379 = vmatpush1.bf16.msra.mxu0 %v16257_v27  ;;  %8406 = vmatprep.mubr.bf16.mxu0 %v18446_v54  ;;  %v16313_v27 = vld [vmem:[%s24468_s1 + $0xb6c] ss:$52 sps:$4 sm:$0xff]  }
  0xdc   :  { %8334 = vmatpush1.bf16.msra.mxu1 %v16260_v29  ;;  %8380 = vmatprep.subr.bf16.mxu0 %v16265_v30  ;;  %v16316_v29 = vld [vmem:[%s24468_s1 + $0x34c] ss:$52 sps:$4 sm:$0xff]   ;;  %v16311_v30 = vld [vmem:[%s24468_s1 + $0xb68] ss:$52 sps:$4 sm:$0xff]  }
  0xdd   :  { %8335 = vmatprep.subr.bf16.mxu1 %v16268_v31  ;;  %v16314_v31 = vld [vmem:[%s24468_s1 + $0x348] ss:$52 sps:$4 sm:$0xff]  }
  0xdf   :  { %8381 = vmatpush1.bf16.msra.mxu0 %v16263_v32  ;;  %v16319_v32 = vld [vmem:[%s24468_s1 + $0xb04] ss:$52 sps:$4 sm:$0xff]  }
  0xe0   :  { %8336 = vmatpush1.bf16.msra.mxu1 %v16266_v33  ;;  %8382 = vmatprep.subr.bf16.mxu0 %v16271_v34  ;;  %v19283_v33 = vsub.s32 0, %v19265_v25  ;;  %v1462_v34 = vld [vmem:[%s24470_s2] sm:$0xff] }
  0xe1   :  { %8337 = vmatprep.subr.bf16.mxu1 %v16274_v35  ;;  %v16322_v35 = vld [vmem:[%s24468_s1 + $0xfe4] ss:$52 sps:$4 sm:$0xff]  }
  0xe2   :  { %24504 = vst [vmem:[#allocation2_spill] sm:$0xff] %v19283_v33 }
  0xe3   :  { %8383 = vmatpush1.bf16.msra.mxu0 %v16269_v36  ;;  %v19292_v36 = vsub.s32 1, %v19265_v25 }
  0xe4   :  { %8338 = vmatpush2.bf16.msra.mxu1 %v16272_v40  ;;  %8384 = vmatprep.subr.bf16.mxu0 %v16277_v41  ;;  %v16317_v40 = vld [vmem:[%s24468_s1 + $0xb00] ss:$52 sps:$4 sm:$0xff]   ;;  %v19298_v41 = vrot.slane %v1462_v34, %v19283_v33 }
  0xe5   :  { %8339 = vmatprep.subr.bf16.mxu1 %v16280_v44  ;;  %24505 = vst [vmem:[#allocation3_spill] sm:$0xff] %v19292_v36  ;;  %v16320_v44 = vld [vmem:[%s24468_s1 + $0xfe0] ss:$52 sps:$4 sm:$0xff]  }
  0xe7   :  { %8385 = vmatpush1.bf16.msra.mxu0 %v16275_v45  ;;  %v16325_v45 = vld [vmem:[%s24468_s1 + $0xa9c] ss:$52 sps:$4 sm:$0xff]  }
  0xe8   :  { %8340 = vmatpush2.bf16.msra.mxu1 %v16278_v50  ;;  %8386 = vmatprep.subr.bf16.mxu0 %v16283_v51  ;;  %v16328_v50 = vld [vmem:[%s24468_s1 + $0xf7c] ss:$52 sps:$4 sm:$0xff]   ;;  %v19310_v51 = vrot.slane %v1462_v34, %v19292_v36  ;;  %v16344_v34 = vld [vmem:[%s24468_s1 + $0xe40] ss:$52 sps:$4 sm:$0xff]  }
  0xe9   :  { %8341 = vmatprep.subr.bf16.mxu1 %v16286_v55 }
  0xeb   :  { %8387 = vmatpush1.bf16.msra.mxu0 %v16281_v56 }
  0xec   :  { %8342 = vmatpush2.bf16.msra.mxu1 %v16284_v57  ;;  %8388 = vmatprep.subr.bf16.mxu0 %v16289_v59  ;;  %v16323_v59 = vld [vmem:[%s24468_s1 + $0xa98] ss:$52 sps:$4 sm:$0xff]  }
  0xed   :  { %8343 = vmatprep.subr.bf16.mxu1 %v16292_v60  ;;  %v16326_v60 = vld [vmem:[%s24468_s1 + $0xf78] ss:$52 sps:$4 sm:$0xff]  }
  0xef   :  { %8389 = vmatpush1.bf16.msra.mxu0 %v16287_v2 }
  0xf0   :  { %8344 = vmatpush2.bf16.msra.mxu1 %v16290_v3  ;;  %8390 = vmatprep.subr.bf16.mxu0 %v16295_v5  ;;  %v16331_v5 = vld [vmem:[%s24468_s1 + $0xa34] ss:$52 sps:$4 sm:$0xff]  }
  0xf1   :  { %8345 = vmatprep.subr.bf16.mxu1 %v16298_v8  ;;  %v16334_v8 = vld [vmem:[%s24468_s1 + $0xf14] ss:$52 sps:$4 sm:$0xff]  }
  0xf3   :  { %8391 = vmatpush2.bf16.msra.mxu0 %v16293_v9 }
  0xf4   :  { %8346 = vmatpush2.bf16.msra.mxu1 %v16296_v10  ;;  %8392 = vmatprep.subr.bf16.mxu0 %v16301_v14 }
  0xf5   :  { %8347 = vmatprep.subr.bf16.mxu1 %v16304_v15 }
  0xf7   :  { %8393 = vmatpush2.bf16.msra.mxu0 %v16299_v16 }
  0xf8   :  { %8348 = vmatpush2.bf16.msra.mxu1 %v16302_v17  ;;  %8394 = vmatprep.subr.bf16.mxu0 %v16307_v21  ;;  %v16329_v17 = vld [vmem:[%s24468_s1 + $0xa30] ss:$52 sps:$4 sm:$0xff]  }
  0xf9   :  { %8349 = vmatprep.subr.bf16.mxu1 %v16310_v22  ;;  %v16337_v22 = vld [vmem:[%s24468_s1 + $0x9cc] ss:$52 sps:$4 sm:$0xff]  }
  0xfb   :  { %8395 = vmatpush2.bf16.msra.mxu0 %v16305_v23  ;;  %v16340_v23 = vld [vmem:[%s24468_s1 + $0xeac] ss:$52 sps:$4 sm:$0xff]  }
  0xfc   :  { %8350 = vmatpush2.bf16.msra.mxu1 %v16308_v24  ;;  %8396 = vmatprep.subr.bf16.mxu0 %v16313_v27  ;;  %v16335_v27 = vld [vmem:[%s24468_s1 + $0x9c8] ss:$52 sps:$4 sm:$0xff]  }
  0xfd   :  { %8351 = vmatprep.subr.bf16.mxu1 %v16316_v29  ;;  %v16338_v29 = vld [vmem:[%s24468_s1 + $0xea8] ss:$52 sps:$4 sm:$0xff]  }
  0xff   :  { %8397 = vmatpush2.bf16.msra.mxu0 %v16311_v30  ;;  %v16343_v30 = vld [vmem:[%s24468_s1 + $0x1664] ss:$52 sps:$4 sm:$0xff]  }
 0x100   :  { %8352 = vmatpush2.bf16.msra.mxu1 %v16314_v31  ;;  %8398 = vmatprep.subr.bf16.mxu0 %v16319_v32  ;;  %v16346_v31 = vld [vmem:[%s24468_s1 + $0xe44] ss:$52 sps:$4 sm:$0xff]   ;;  %v16341_v32 = vld [vmem:[%s24468_s1 + $0x1660] ss:$52 sps:$4 sm:$0xff]  }
 0x101   :  { %8427 = vmatprep.subr.bf16.mxu1 %v16322_v35  ;;  %v16349_v35 = vld [vmem:[%s24468_s1 + $0x15fc] ss:$52 sps:$4 sm:$0xff]  }
 0x102   :  { %v7984_v55 = vpop.f32.mrf.mxu0 }
 0x103   :  { %v8037_v56 = vpop.f32.mrf.mxu1  ;;  %8354 = vmatmul.mubr.bf16.vlgmr.msra.gmra.mxu1 %v18513_v12  ;;  %v7985_v57 = vadd.f32 %v7984_v55, %v19298_v41  ;;  %8399 = vmatpush2.bf16.msra.mxu0 %v16317_v40  ;;  %v16352_v40 = vld [vmem:[%s24468_s1 + $0xddc] ss:$52 sps:$4 sm:$0xff]   ;;  %v16355_v55 = vld [vmem:[%s24468_s1 + $0x1594] ss:$52 sps:$4 sm:$0xff]  }
 0x104   :  { %8428 = vmatpush1.bf16.msra.mxu1 %v16320_v44  ;;  %v7986_v2 = vpop.f32.mrf.mxu0  ;;  %8400 = vmatprep.subr.bf16.mxu0 %v16325_v45  ;;  %v16347_v44 = vld [vmem:[%s24468_s1 + $0x15f8] ss:$52 sps:$4 sm:$0xff]  }
 0x105   :  { %v8039_v3 = vpop.f32.mrf.mxu1  ;;  %8429 = vmatprep.subr.bf16.mxu1 %v16328_v50  ;;  %v19326_v9 = vadd.f32 %v8037_v56, %v7985_v57  ;;  %v7987_v10 = vadd.f32 %v7986_v2, %v19310_v51  ;;  %8363 = vmatprep.mubr.bf16.mxu1 %v18588_v37  ;;  %v16350_v50 = vld [vmem:[%s24468_s1 + $0xdd8] ss:$52 sps:$4 sm:$0xff]   ;;  %v16358_v56 = vld [vmem:[%s24468_s1 + $0xd74] ss:$52 sps:$4 sm:$0xff]  }
 0x106   :  { %v7988_v14 = vpop.f32.mrf.mxu0 }
 0x107   :  { %v19330_v15 = vadd.f32 %v8039_v3, %v7987_v10  ;;  %v7989_v16 = vadd.f32 %v7988_v14, %v19298_v41  ;;  %8401 = vmatpush2.bf16.msra.mxu0 %v16323_v59  ;;  %v8041_v21 = vpop.f32.mrf.mxu1  ;;  %v16353_v59 = vld [vmem:[%s24468_s1 + $0x1590] ss:$52 sps:$4 sm:$0xff]   ;;  %v16364_v10 = vld [vmem:[%s24468_s1 + $0xd0c] ss:$52 sps:$4 sm:$0xff]  }
 0x108   :  { %8430 = vmatpush1.bf16.msra.mxu1 %v16326_v60  ;;  %8402 = vmatprep.subr.bf16.mxu0 %v16331_v5  ;;  %v19377_v45 = vpop.f32.mrf.mxu0  ;;  %v16356_v60 = vld [vmem:[%s24468_s1 + $0xd70] ss:$52 sps:$4 sm:$0xff]  }
 0x109   :  { %8431 = vmatprep.subr.bf16.mxu1 %v16334_v8  ;;  %v19345_v24 = vadd.f32 %v8041_v21, %v7989_v16  ;;  %v19396_v3 = vpop.f32.mrf.mxu1  ;;  %v16361_v8 = vld [vmem:[%s24468_s1 + $0x152c] ss:$52 sps:$4 sm:$0xff]   ;;  %v16359_v16 = vld [vmem:[%s24468_s1 + $0x1528] ss:$52 sps:$4 sm:$0xff]  }
 0x10a   :  { %v7994_v57 = vpop.f32.mrf.mxu0 }
 0x10b   :  { %8364 = vmatmul.mubr.bf16.gmra.mxu1 %v18602_v42  ;;  %8403 = vmatpush2.bf16.msra.mxu0 %v16329_v17  ;;  %v7995_v2 = vadd.f32 %v7994_v57, %v19298_v41  ;;  %v16362_v17 = vld [vmem:[%s24468_s1 + $0xd08] ss:$52 sps:$4 sm:$0xff]  }
 0x10c   :  { %8432 = vmatpush1.bf16.msra.mxu1 %v16332_v20  ;;  %8404 = vmatprep.subr.bf16.mxu0 %v16337_v22  ;;  %v7996_v5 = vpop.f32.mrf.mxu0  ;;  %v8047_v20 = vpop.f32.mrf.mxu1  ;;  %v16382_v57 = vld [vmem:[%s24468_s1 + $0x1254] ss:$52 sps:$4 sm:$0xff]  }
 0x10d   :  { %8433 = vmatprep.subr.bf16.mxu1 %v16340_v23  ;;  %8459 = vmatprep.mubr.bf16.mxu1 %v18660_v63  ;;  %v7997_v14 = vadd.f32 %v7996_v5, %v19310_v51  ;;  %v19411_v22 = vadd.f32 %v8047_v20, %v7995_v2  ;;  %v16385_v2 = vld [vmem:[%s24468_s1 + $0x138c] ss:$52 sps:$4 sm:$0xff]  }
 0x10e   :  { %v7998_v21 = vpop.f32.mrf.mxu0  ;;  %v16388_v5 = vld [vmem:[%s24468_s1 + $0x11ec] ss:$52 sps:$4 sm:$0xff]  }
 0x10f   :  { %8405 = vmatpush2.bf16.msra.mxu0 %v16335_v27  ;;  %v7999_v23 = vadd.f32 %v7998_v21, %v19298_v41  ;;  %v8049_v27 = vpop.f32.mrf.mxu1  ;;  %v16365_v41 = vld [vmem:[%s24468_s1 + $0x14c0] ss:$52 sps:$4 sm:$0xff]   ;;  %v16397_v21 = vld [vmem:[%s24468_s1 + $0x193c] ss:$52 sps:$4 sm:$0xff]  }
 0x110   :  { %8434 = vmatpush1.bf16.msra.mxu1 %v16338_v29  ;;  %8480 = vmatprep.subr.bf16.mxu0 %v16343_v30  ;;  %v16367_v29 = vld [vmem:[%s24468_s1 + $0x14c4] ss:$52 sps:$4 sm:$0xff]   ;;  %v16392_v20 = vld [vmem:[%s24468_s1 + $0x1180] ss:$52 sps:$4 sm:$0xff]  }
 0x111   :  { %8435 = vmatprep.subr.bf16.mxu1 %v16346_v31  ;;  %v16370_v30 = vld [vmem:[%s24468_s1 + $0x1324] ss:$52 sps:$4 sm:$0xff]   ;;  %v19421_v31 = vadd.f32 %v8049_v27, %v7997_v14 }
 0x112   :  { %8407 = vmatmul.mubr.bf16.vlgmr.msra.gmra.mxu0 %v18515_v13  ;;  %v16391_v14 = vld [vmem:[%s24468_s1 + $0x19a4] ss:$52 sps:$4 sm:$0xff]  }
 0x113   :  { %8481 = vmatpush1.bf16.msra.mxu0 %v16341_v32  ;;  %8416 = vmatprep.mubr.bf16.mxu0 %v18604_v43  ;;  %v16368_v32 = vld [vmem:[%s24468_s1 + $0x1320] ss:$52 sps:$4 sm:$0xff]   ;;  %v16395_v27 = vld [vmem:[%s24468_s1 + $0x1938] ss:$52 sps:$4 sm:$0xff]  }
 0x114   :  { %8436 = vmatpush1.bf16.msra.mxu1 %v16344_v34  ;;  %8482 = vmatprep.subr.bf16.mxu0 %v16349_v35  ;;  %v8051_v34 = vpop.f32.mrf.mxu1 }
 0x115   :  { %8437 = vmatprep.subr.bf16.mxu1 %v16352_v40  ;;  %v19430_v35 = vadd.f32 %v8051_v34, %v7999_v23  ;;  %v16373_v40 = vld [vmem:[%s24468_s1 + $0x145c] ss:$52 sps:$4 sm:$0xff]  }
 0x116   :  { %v16400_v23 = vld [vmem:[%s24468_s1 + $0x111c] ss:$52 sps:$4 sm:$0xff]  }
 0x117   :  { %8483 = vmatpush1.bf16.msra.mxu0 %v16347_v44  ;;  %v16376_v44 = vld [vmem:[%s24468_s1 + $0x12bc] ss:$52 sps:$4 sm:$0xff]  }
 0x118   :  { %8438 = vmatpush1.bf16.msra.mxu1 %v16350_v50  ;;  %8484 = vmatprep.subr.bf16.mxu0 %v16355_v55  ;;  %v16371_v50 = vld [vmem:[%s24468_s1 + $0x1458] ss:$52 sps:$4 sm:$0xff]   ;;  %v16404_v34 = vld [vmem:[%s24468_s1 + $0x10b0] ss:$52 sps:$4 sm:$0xff]  }
 0x119   :  { %8439 = vmatprep.subr.bf16.mxu1 %v16358_v56  ;;  %v16374_v55 = vld [vmem:[%s24468_s1 + $0x12b8] ss:$52 sps:$4 sm:$0xff]   ;;  %v16379_v56 = vld [vmem:[%s24468_s1 + $0x13f4] ss:$52 sps:$4 sm:$0xff]  }
 0x11a   :  { %8417 = vmatmul.mubr.bf16.gmra.mxu0 %v18624_v49 }
 0x11b   :  { %8485 = vmatpush1.bf16.msra.mxu0 %v16353_v59  ;;  %8512 = vmatprep.mubr.bf16.mxu0 %v18662_v0  ;;  %v16377_v59 = vld [vmem:[%s24468_s1 + $0x13f0] ss:$52 sps:$4 sm:$0xff]  }
 0x11c   :  { %8440 = vmatpush1.bf16.msra.mxu1 %v16356_v60  ;;  %8486 = vmatprep.subr.bf16.mxu0 %v16361_v8  ;;  %v16380_v60 = vld [vmem:[%s24468_s1 + $0x1250] ss:$52 sps:$4 sm:$0xff]   ;;  %v16383_v8 = vld [vmem:[%s24468_s1 + $0x1388] ss:$52 sps:$4 sm:$0xff]  }
 0x11d   :  { %8441 = vmatprep.subr.bf16.mxu1 %v16364_v10  ;;  %v16386_v10 = vld [vmem:[%s24468_s1 + $0x11e8] ss:$52 sps:$4 sm:$0xff]  }
 0x11f   :  { %8487 = vmatpush1.bf16.msra.mxu0 %v16359_v16  ;;  %v16394_v16 = vld [vmem:[%s24468_s1 + $0x1184] ss:$52 sps:$4 sm:$0xff]  }
 0x120   :  { %8442 = vmatpush1.bf16.msra.mxu1 %v16362_v17  ;;  %8488 = vmatprep.subr.bf16.mxu0 %v16367_v29  ;;  %v16389_v17 = vld [vmem:[%s24468_s1 + $0x19a0] ss:$52 sps:$4 sm:$0xff]   ;;  %v16398_v29 = vld [vmem:[%s24468_s1 + $0x1118] ss:$52 sps:$4 sm:$0xff]  }
 0x121   :  { %8443 = vmatprep.subr.bf16.mxu1 %v16370_v30  ;;  %v16403_v30 = vld [vmem:[%s24468_s1 + $0x18d4] ss:$52 sps:$4 sm:$0xff]  }
 0x123   :  { %8489 = vmatpush1.bf16.msra.mxu0 %v16365_v41  ;;  %v16406_v41 = vld [vmem:[%s24468_s1 + $0x10b4] ss:$52 sps:$4 sm:$0xff]  }
 0x124   :  { %8444 = vmatpush2.bf16.msra.mxu1 %v16368_v32  ;;  %8490 = vmatprep.subr.bf16.mxu0 %v16373_v40  ;;  %v16401_v32 = vld [vmem:[%s24468_s1 + $0x18d0] ss:$52 sps:$4 sm:$0xff]   ;;  %v16409_v40 = vld [vmem:[%s24468_s1 + $0x186c] ss:$52 sps:$4 sm:$0xff]  }
 0x125   :  { %8445 = vmatprep.subr.bf16.mxu1 %v16376_v44  ;;  %v16412_v44 = vld [vmem:[%s24468_s1 + $0x104c] ss:$52 sps:$4 sm:$0xff]  }
 0x127   :  { %8491 = vmatpush1.bf16.msra.mxu0 %v16371_v50  ;;  %v16407_v50 = vld [vmem:[%s24468_s1 + $0x1868] ss:$52 sps:$4 sm:$0xff]  }
 0x128   :  { %8446 = vmatpush2.bf16.msra.mxu1 %v16374_v55  ;;  %8492 = vmatprep.subr.bf16.mxu0 %v16379_v56  ;;  %v16410_v55 = vld [vmem:[%s24468_s1 + $0x1048] ss:$52 sps:$4 sm:$0xff]   ;;  %v16415_v56 = vld [vmem:[%s24468_s1 + $0x1804] ss:$52 sps:$4 sm:$0xff]  }
 0x129   :  { %8447 = vmatprep.subr.bf16.mxu1 %v16382_v57  ;;  %v16418_v57 = vld [vmem:[%s24468_s1 + $0x1ce4] ss:$52 sps:$4 sm:$0xff]  }
 0x12b   :  { %8493 = vmatpush1.bf16.msra.mxu0 %v16377_v59  ;;  %v16413_v59 = vld [vmem:[%s24468_s1 + $0x1800] ss:$52 sps:$4 sm:$0xff]  }
 0x12c   :  { %8448 = vmatpush2.bf16.msra.mxu1 %v16380_v60  ;;  %8494 = vmatprep.subr.bf16.mxu0 %v16385_v2  ;;  %v16416_v60 = vld [vmem:[%s24468_s1 + $0x1ce0] ss:$52 sps:$4 sm:$0xff]   ;;  %v19528_v2 = vpop.f32.mrf.mxu0 }
 0x12d   :  { %8449 = vmatprep.subr.bf16.mxu1 %v16388_v5  ;;  %24506 = vst [vmem:[#allocation4_spill] sm:$0xff] %v19528_v2  ;;  %v19530_v5 = vpop.f32.mrf.mxu1 }
 0x12e   :  { %24507 = vst [vmem:[#allocation5_spill] sm:$0xff] %v19530_v5  ;;  %v16643_v5 = vld [vmem:[%s24468_s1 + $0xe48] ss:$52 sps:$4 sm:$0xff]  }
 0x12f   :  { %8495 = vmatpush1.bf16.msra.mxu0 %v16383_v8  ;;  %v16421_v8 = vld [vmem:[%s24468_s1 + $0x179c] ss:$52 sps:$4 sm:$0xff]  }
 0x130   :  { %8450 = vmatpush2.bf16.msra.mxu1 %v16386_v10  ;;  %8496 = vmatprep.subr.bf16.mxu0 %v16391_v14  ;;  %v16424_v10 = vld [vmem:[%s24468_s1 + $0x1c7c] ss:$52 sps:$4 sm:$0xff]   ;;  %v16419_v14 = vld [vmem:[%s24468_s1 + $0x1798] ss:$52 sps:$4 sm:$0xff]  }
 0x131   :  { %8451 = vmatprep.subr.bf16.mxu1 %v16394_v16  ;;  %v16422_v16 = vld [vmem:[%s24468_s1 + $0x1c78] ss:$52 sps:$4 sm:$0xff]  }
 0x133   :  { %8497 = vmatpush2.bf16.msra.mxu0 %v16389_v17 }
 0x134   :  { %8452 = vmatpush2.bf16.msra.mxu1 %v16392_v20  ;;  %8498 = vmatprep.subr.bf16.mxu0 %v16397_v21 }
 0x135   :  { %8453 = vmatprep.subr.bf16.mxu1 %v16400_v23 }
 0x137   :  { %8499 = vmatpush2.bf16.msra.mxu0 %v16395_v27 }
 0x138   :  { %8454 = vmatpush2.bf16.msra.mxu1 %v16398_v29  ;;  %8500 = vmatprep.subr.bf16.mxu0 %v16403_v30  ;;  %v16427_v29 = vld [vmem:[%s24468_s1 + $0x1734] ss:$52 sps:$4 sm:$0xff]  }
 0x139   :  { %8455 = vmatprep.subr.bf16.mxu1 %v16406_v41  ;;  %v16430_v30 = vld [vmem:[%s24468_s1 + $0x1c14] ss:$52 sps:$4 sm:$0xff]  }
 0x13b   :  { %8501 = vmatpush2.bf16.msra.mxu0 %v16401_v32 }
 0x13c   :  { %8456 = vmatpush2.bf16.msra.mxu1 %v16404_v34  ;;  %8502 = vmatprep.subr.bf16.mxu0 %v16409_v40  ;;  %v16428_v34 = vld [vmem:[%s24468_s1 + $0x1c10] ss:$52 sps:$4 sm:$0xff]  }
 0x13d   :  { %8457 = vmatprep.subr.bf16.mxu1 %v16412_v44 }
 0x13f   :  { %8503 = vmatpush2.bf16.msra.mxu0 %v16407_v50 }
 0x140   :  { %8458 = vmatpush2.bf16.msra.mxu1 %v16410_v55  ;;  %8504 = vmatprep.subr.bf16.mxu0 %v16415_v56 }
 0x141   :  { %8533 = vmatprep.subr.bf16.mxu1 %v16418_v57  ;;  %v16433_v57 = vld [vmem:[%s24468_s1 + $0x16cc] ss:$52 sps:$4 sm:$0xff]  }
 0x142   :  { %v8090_v17 = vpop.f32.mrf.mxu0 }
 0x143   :  { %v8143_v20 = vpop.f32.mrf.mxu1  ;;  %8460 = vmatmul.mubr.bf16.vlgmr.msra.gmra.mxu1 %v18789_v47  ;;  %v8091_v21 = vadd.f32 %v8090_v17, %v19326_v9  ;;  %8505 = vmatpush2.bf16.msra.mxu0 %v16413_v59  ;;  %v16425_v9 = vld [vmem:[%s24468_s1 + $0x1730] ss:$52 sps:$4 sm:$0xff]   ;;  %v16436_v59 = vld [vmem:[%s24468_s1 + $0x1bac] ss:$52 sps:$4 sm:$0xff]  }
 0x144   :  { %8534 = vmatpush1.bf16.msra.mxu1 %v16416_v60  ;;  %v8092_v23 = vpop.f32.mrf.mxu0  ;;  %8506 = vmatprep.subr.bf16.mxu0 %v16421_v8 }
 0x145   :  { %v8145_v27 = vpop.f32.mrf.mxu1  ;;  %8535 = vmatprep.subr.bf16.mxu1 %v16424_v10  ;;  %v19552_v41 = vadd.f32 %v8143_v20, %v8091_v21  ;;  %v8093_v32 = vadd.f32 %v8092_v23, %v19330_v15  ;;  %8469 = vmatprep.mubr.bf16.mxu1 %v18811_v58  ;;  %v16439_v21 = vld [vmem:[%s24468_s1 + $0x2364] ss:$52 sps:$4 sm:$0xff]  }
 0x146   :  { %v8094_v40 = vpop.f32.mrf.mxu0 }
 0x147   :  { %v8147_v44 = vpop.f32.mrf.mxu1  ;;  %v19562_v50 = vadd.f32 %v8145_v27, %v8093_v32  ;;  %v8095_v55 = vadd.f32 %v8094_v40, %v19345_v24  ;;  %8507 = vmatpush2.bf16.msra.mxu0 %v16419_v14  ;;  %v16431_v14 = vld [vmem:[%s24468_s1 + $0x16c8] ss:$52 sps:$4 sm:$0xff]  }
 0x148   :  { %8536 = vmatpush1.bf16.msra.mxu1 %v16422_v16  ;;  %v19565_v56 = vpop.f32.mrf.mxu0  ;;  %8508 = vmatprep.subr.bf16.mxu0 %v16427_v29  ;;  %v16434_v16 = vld [vmem:[%s24468_s1 + $0x1ba8] ss:$52 sps:$4 sm:$0xff]   ;;  %v16437_v29 = vld [vmem:[%s24468_s1 + $0x2360] ss:$52 sps:$4 sm:$0xff]  }
 0x149   :  { %v19567_v15 = vpop.f32.mrf.mxu1  ;;  %8537 = vmatprep.subr.bf16.mxu1 %v16430_v30  ;;  %v19575_v60 = vadd.f32 %v8147_v44, %v8095_v55  ;;  %v16440_v30 = vld [vmem:[%s24468_s1 + $0x1b40] ss:$52 sps:$4 sm:$0xff]   ;;  %v16448_v44 = vld [vmem:[%s24468_s1 + $0x1adc] ss:$52 sps:$4 sm:$0xff]  }
 0x14a   :  { %v8100_v8 = vpop.f32.mrf.mxu0 }
 0x14b   :  { %8470 = vmatmul.mubr.bf16.gmra.mxu1 %v18837_v4  ;;  %v8153_v24 = vpop.f32.mrf.mxu1  ;;  %v8101_v10 = vadd.f32 %v8100_v8, %v19411_v22  ;;  %8509 = vmatpush2.bf16.msra.mxu0 %v16425_v9  ;;  %v16442_v22 = vld [vmem:[%s24468_s1 + $0x1b44] ss:$52 sps:$4 sm:$0xff]   ;;  %v16454_v8 = vld [vmem:[%s24468_s1 + $0x1a74] ss:$52 sps:$4 sm:$0xff]  }
 0x14c   :  { %8538 = vmatpush1.bf16.msra.mxu1 %v16428_v34  ;;  %v8102_v17 = vpop.f32.mrf.mxu0  ;;  %8510 = vmatprep.subr.bf16.mxu0 %v16433_v57  ;;  %v16446_v57 = vld [vmem:[%s24468_s1 + $0x1ad8] ss:$52 sps:$4 sm:$0xff]  }
 0x14d   :  { %v8155_v20 = vpop.f32.mrf.mxu1  ;;  %8539 = vmatprep.subr.bf16.mxu1 %v16436_v59  ;;  %v8103_v23 = vadd.f32 %v8102_v17, %v19421_v31  ;;  %v19592_v27 = vadd.f32 %v8153_v24, %v8101_v10  ;;  %8565 = vmatprep.mubr.bf16.mxu1 %v18873_v18  ;;  %v16445_v31 = vld [vmem:[%s24468_s1 + $0x22fc] ss:$52 sps:$4 sm:$0xff]   ;;  %v16451_v59 = vld [vmem:[%s24468_s1 + $0x2294] ss:$52 sps:$4 sm:$0xff]  }
 0x14e   :  { %v8104_v32 = vpop.f32.mrf.mxu0  ;;  %v16449_v24 = vld [vmem:[%s24468_s1 + $0x2290] ss:$52 sps:$4 sm:$0xff]   ;;  %v16455_v17 = vld [vmem:[%s24468_s1 + $0x2228] ss:$52 sps:$4 sm:$0xff]  }
 0x14f   :  { %v8157_v9 = vpop.f32.mrf.mxu1  ;;  %v8105_v34 = vadd.f32 %v8104_v32, %v19430_v35  ;;  %v19602_v40 = vadd.f32 %v8155_v20, %v8103_v23  ;;  %8511 = vmatpush2.bf16.msra.mxu0 %v16431_v14  ;;  %v16443_v35 = vld [vmem:[%s24468_s1 + $0x22f8] ss:$52 sps:$4 sm:$0xff]   ;;  %v16452_v10 = vld [vmem:[%s24468_s1 + $0x1a70] ss:$52 sps:$4 sm:$0xff]   ;;  %v16458_v20 = vld [vmem:[%s24468_s1 + $0x1a08] ss:$52 sps:$4 sm:$0xff]  }
 0x150   :  { %8540 = vmatpush1.bf16.msra.mxu1 %v16434_v16  ;;  %8586 = vmatprep.subr.bf16.mxu0 %v16439_v21  ;;  %v16457_v14 = vld [vmem:[%s24468_s1 + $0x222c] ss:$52 sps:$4 sm:$0xff]   ;;  %v16463_v21 = vld [vmem:[%s24468_s1 + $0x21c4] ss:$52 sps:$4 sm:$0xff]   ;;  %v16472_v32 = vld [vmem:[%s24468_s1 + $0x1fbc] ss:$52 sps:$4 sm:$0xff]  }
 0x151   :  { %8541 = vmatprep.subr.bf16.mxu1 %v16442_v22  ;;  %v19610_v55 = vadd.f32 %v8157_v9, %v8105_v34  ;;  %v16460_v16 = vld [vmem:[%s24468_s1 + $0x1a0c] ss:$52 sps:$4 sm:$0xff]   ;;  %v16466_v22 = vld [vmem:[%s24468_s1 + $0x2024] ss:$52 sps:$4 sm:$0xff]  }
 0x152   :  { %8513 = vmatmul.mubr.bf16.vlgmr.msra.gmra.mxu0 %v18791_v48  ;;  %v16461_v23 = vld [vmem:[%s24468_s1 + $0x21c0] ss:$52 sps:$4 sm:$0xff]   ;;  %v16467_v9 = vld [vmem:[%s24468_s1 + $0x2158] ss:$52 sps:$4 sm:$0xff]  }
 0x153   :  { %8587 = vmatpush1.bf16.msra.mxu0 %v16437_v29  ;;  %8522 = vmatprep.mubr.bf16.mxu0 %v18819_v61  ;;  %v16464_v29 = vld [vmem:[%s24468_s1 + $0x2020] ss:$52 sps:$4 sm:$0xff]   ;;  %v16470_v34 = vld [vmem:[%s24468_s1 + $0x1fb8] ss:$52 sps:$4 sm:$0xff]  }
 0x154   :  { %8542 = vmatpush1.bf16.msra.mxu1 %v16440_v30  ;;  %8588 = vmatprep.subr.bf16.mxu0 %v16445_v31  ;;  %v16469_v30 = vld [vmem:[%s24468_s1 + $0x215c] ss:$52 sps:$4 sm:$0xff]   ;;  %v16475_v31 = vld [vmem:[%s24468_s1 + $0x20f4] ss:$52 sps:$4 sm:$0xff]  }
 0x155   :  { %8543 = vmatprep.subr.bf16.mxu1 %v16448_v44  ;;  %v16478_v44 = vld [vmem:[%s24468_s1 + $0x1f54] ss:$52 sps:$4 sm:$0xff]  }
 0x157   :  { %8589 = vmatpush1.bf16.msra.mxu0 %v16443_v35  ;;  %v16473_v35 = vld [vmem:[%s24468_s1 + $0x20f0] ss:$52 sps:$4 sm:$0xff]  }
 0x158   :  { %8544 = vmatpush1.bf16.msra.mxu1 %v16446_v57  ;;  %8590 = vmatprep.subr.bf16.mxu0 %v16451_v59  ;;  %v16476_v57 = vld [vmem:[%s24468_s1 + $0x1f50] ss:$52 sps:$4 sm:$0xff]   ;;  %v16481_v59 = vld [vmem:[%s24468_s1 + $0x208c] ss:$52 sps:$4 sm:$0xff]  }
 0x159   :  { %8545 = vmatprep.subr.bf16.mxu1 %v16454_v8  ;;  %v16484_v8 = vld [vmem:[%s24468_s1 + $0x1eec] ss:$52 sps:$4 sm:$0xff]  }
 0x15a   :  { %8523 = vmatmul.mubr.bf16.gmra.mxu0 %v18845_v7 }
 0x15b   :  { %8591 = vmatpush1.bf16.msra.mxu0 %v16449_v24  ;;  %8618 = vmatprep.mubr.bf16.mxu0 %v18875_v19  ;;  %v16479_v24 = vld [vmem:[%s24468_s1 + $0x2088] ss:$52 sps:$4 sm:$0xff]  }
 0x15c   :  { %8546 = vmatpush1.bf16.msra.mxu1 %v16452_v10  ;;  %8592 = vmatprep.subr.bf16.mxu0 %v16457_v14  ;;  %v16482_v10 = vld [vmem:[%s24468_s1 + $0x1ee8] ss:$52 sps:$4 sm:$0xff]   ;;  %v16487_v14 = vld [vmem:[%s24468_s1 + $0x26a4] ss:$52 sps:$4 sm:$0xff]  }
 0x15d   :  { %8547 = vmatprep.subr.bf16.mxu1 %v16460_v16  ;;  %v16490_v16 = vld [vmem:[%s24468_s1 + $0x1e84] ss:$52 sps:$4 sm:$0xff]  }
 0x15f   :  { %8593 = vmatpush1.bf16.msra.mxu0 %v16455_v17  ;;  %v16485_v17 = vld [vmem:[%s24468_s1 + $0x26a0] ss:$52 sps:$4 sm:$0xff]  }
 0x160   :  { %8548 = vmatpush1.bf16.msra.mxu1 %v16458_v20  ;;  %8594 = vmatprep.subr.bf16.mxu0 %v16463_v21  ;;  %v16488_v20 = vld [vmem:[%s24468_s1 + $0x1e80] ss:$52 sps:$4 sm:$0xff]   ;;  %v16493_v21 = vld [vmem:[%s24468_s1 + $0x263c] ss:$52 sps:$4 sm:$0xff]  }
 0x161   :  { %8549 = vmatprep.subr.bf16.mxu1 %v16466_v22  ;;  %v16496_v22 = vld [vmem:[%s24468_s1 + $0x1e1c] ss:$52 sps:$4 sm:$0xff]  }
 0x163   :  { %8595 = vmatpush1.bf16.msra.mxu0 %v16461_v23  ;;  %v16491_v23 = vld [vmem:[%s24468_s1 + $0x2638] ss:$52 sps:$4 sm:$0xff]  }
 0x164   :  { %8550 = vmatpush2.bf16.msra.mxu1 %v16464_v29  ;;  %8596 = vmatprep.subr.bf16.mxu0 %v16469_v30  ;;  %v16494_v29 = vld [vmem:[%s24468_s1 + $0x1e18] ss:$52 sps:$4 sm:$0xff]   ;;  %v16499_v30 = vld [vmem:[%s24468_s1 + $0x25d4] ss:$52 sps:$4 sm:$0xff]  }
 0x165   :  { %8551 = vmatprep.subr.bf16.mxu1 %v16472_v32  ;;  %v16502_v32 = vld [vmem:[%s24468_s1 + $0x1db4] ss:$52 sps:$4 sm:$0xff]  }
 0x167   :  { %8597 = vmatpush1.bf16.msra.mxu0 %v16467_v9  ;;  %v1456_v9 = vld [vmem:[%s24468_s1 + $0x2708] sm:$0x33] }
 0x168   :  { %8552 = vmatpush2.bf16.msra.mxu1 %v16470_v34  ;;  %8598 = vmatprep.subr.bf16.mxu0 %v16475_v31  ;;  %v16497_v34 = vld [vmem:[%s24468_s1 + $0x25d0] ss:$52 sps:$4 sm:$0xff]  }
 0x169   :  { %8553 = vmatprep.subr.bf16.mxu1 %v16478_v44  ;;  %v16500_v31 = vld [vmem:[%s24468_s1 + $0x1db0] ss:$52 sps:$4 sm:$0xff]   ;;  %v16505_v44 = vld [vmem:[%s24468_s1 + $0x256c] ss:$52 sps:$4 sm:$0xff]  }
 0x16b   :  { %8599 = vmatpush1.bf16.msra.mxu0 %v16473_v35  ;;  %v16508_v35 = vld [vmem:[%s24468_s1 + $0x1d4c] ss:$52 sps:$4 sm:$0xff]  }
 0x16c   :  { %8554 = vmatpush2.bf16.msra.mxu1 %v16476_v57  ;;  %8600 = vmatprep.subr.bf16.mxu0 %v16481_v59  ;;  %v15108_v57 = vcombine.high %v1456_v9, %v1456_v9  ;;  %v16503_v59 = vld [vmem:[%s24468_s1 + $0x2568] ss:$52 sps:$4 sm:$0xff]  }
 0x16d   :  { %8555 = vmatprep.subr.bf16.mxu1 %v16484_v8  ;;  %v16506_v8 = vld [vmem:[%s24468_s1 + $0x1d48] ss:$52 sps:$4 sm:$0xff]  }
 0x16f   :  { %8601 = vmatpush1.bf16.msra.mxu0 %v16479_v24  ;;  %v15107_v24 = vcombine.low %v1456_v9, %v1456_v9 }
 0x170   :  { %8556 = vmatpush2.bf16.msra.mxu1 %v16482_v10  ;;  %8602 = vmatprep.subr.bf16.mxu0 %v16487_v14  ;;  %v16511_v10 = vld [vmem:[%s24468_s1 + $0x2504] ss:$52 sps:$4 sm:$0xff]   ;;  %v7921_v14 = vand.u32 %v15108_v57, %v19033_v28 }
 0x171   :  { %8557 = vmatprep.subr.bf16.mxu1 %v16490_v16  ;;  %v16509_v16 = vld [vmem:[%s24468_s1 + $0x2500] ss:$52 sps:$4 sm:$0xff]  }
 0x173   :  { %8603 = vmatpush2.bf16.msra.mxu0 %v16485_v17  ;;  %v7918_v17 = vand.u32 %v15107_v24, %v19033_v28 }
 0x174   :  { %8558 = vmatpush2.bf16.msra.mxu1 %v16488_v20  ;;  %8604 = vmatprep.subr.bf16.mxu0 %v16493_v21  ;;  %v19753_v20 = vpop.f32.mrf.mxu0  ;;  %v19755_v21 = vpop.f32.mrf.mxu1 }
 0x175   :  { %8559 = vmatprep.subr.bf16.mxu1 %v16496_v22  ;;  %24508 = vst [vmem:[#allocation6_spill] sm:$0xff] %v19753_v20  ;;  %24509 = vst [vmem:[#allocation7_spill] sm:$0xff] %v19755_v21  ;;  %v16514_v22 = vld [vmem:[%s24468_s1 + $0x249c] ss:$52 sps:$4 sm:$0xff]  }
 0x177   :  { %8605 = vmatpush2.bf16.msra.mxu0 %v16491_v23  ;;  %v16528_v23 = vld [vmem:[%s24468_s1 + $0x96c] ss:$52 sps:$4 sm:$0xff]  }
 0x178   :  { %8560 = vmatpush2.bf16.msra.mxu1 %v16494_v29  ;;  %8606 = vmatprep.subr.bf16.mxu0 %v16499_v30  ;;  %v16512_v29 = vld [vmem:[%s24468_s1 + $0x2498] ss:$52 sps:$4 sm:$0xff]  }
 0x179   :  { %8561 = vmatprep.subr.bf16.mxu1 %v16502_v32 }
 0x17b   :  { %8607 = vmatpush2.bf16.msra.mxu0 %v16497_v34 }
 0x17c   :  { %8562 = vmatpush2.bf16.msra.mxu1 %v16500_v31  ;;  %8608 = vmatprep.subr.bf16.mxu0 %v16505_v44  ;;  %v16519_v44 = vld [vmem:[%s24468_s1 + $0x2434] ss:$52 sps:$4 sm:$0xff]  }
 0x17d   :  { %8563 = vmatprep.subr.bf16.mxu1 %v16508_v35 }
 0x17f   :  { %8609 = vmatpush2.bf16.msra.mxu0 %v16503_v59  ;;  %v16517_v59 = vld [vmem:[%s24468_s1 + $0x2430] ss:$52 sps:$4 sm:$0xff]  }
 0x180   :  { %8564 = vmatpush2.bf16.msra.mxu1 %v16506_v8  ;;  %8610 = vmatprep.subr.bf16.mxu0 %v16511_v10 }
 0x181   :  { %8653 = vmatprep.subr.bf16.mxu1 %v7921_v14 }
 0x182   :  { %v8196_v30 = vpop.f32.mrf.mxu0 }
 0x183   :  { %v8249_v32 = vpop.f32.mrf.mxu1  ;;  %8566 = vmatmul.mubr.bf16.vlgmr.msra.gmra.mxu1 %v19054_v38  ;;  %v8197_v9 = vadd.f32 %v8196_v30, %v19552_v41  ;;  %8611 = vmatpush2.bf16.msra.mxu0 %v16509_v16 }
 0x184   :  { %8654 = vmatpush1.bf16.msra.mxu1 %v7918_v17  ;;  %v8198_v34 = vpop.f32.mrf.mxu0  ;;  %8612 = vmatprep.subr.bf16.mxu0 %v16514_v22  ;;  %v16520_v22 = vld [vmem:[%s24468_s1 + $0x23c8] ss:$52 sps:$4 sm:$0xff]  }
 0x185   :  { %v8251_v31 = vpop.f32.mrf.mxu1  ;;  %8575 = vmatprep.mubr.bf16.mxu1 %v19068_v46  ;;  %v8250_v35 = vadd.f32 %v8249_v32, %v8197_v9  ;;  %v8199_v57 = vadd.f32 %v8198_v34, %v19562_v50  ;;  %8745 = vmatprep.subr.bf16.mxu1 %v16528_v23  ;;  %v16522_v50 = vld [vmem:[%s24468_s1 + $0x23cc] ss:$52 sps:$4 sm:$0xff]  }
 0x186   :  { %v8200_v41 = vpop.f32.mrf.mxu0  ;;  %v16525_v9 = vld [vmem:[%s24468_s1 + $0x2ec] ss:$52 sps:$4 sm:$0xff]  }
 0x187   :  { %v8253_v8 = vpop.f32.mrf.mxu1  ;;  %v8252_v24 = vadd.f32 %v8251_v31, %v8199_v57  ;;  %v8201_v10 = vadd.f32 %v8200_v41, %v19575_v60  ;;  %8613 = vmatpush2.bf16.msra.mxu0 %v16512_v29 }
 0x188   :  { %v19777_v14 = vpop.f32.mrf.mxu0  ;;  %8614 = vmatprep.subr.bf16.mxu0 %v16519_v44  ;;  %v16523_v44 = vld [vmem:[%s24468_s1 + $0x2e8] ss:$52 sps:$4 sm:$0xff]  }
 0x189   :  { %24510 = vst [vmem:[#allocation8_spill] sm:$0xff] %v19777_v14  ;;  %v19779_v16 = vpop.f32.mrf.mxu1  ;;  %v8254_v17 = vadd.f32 %v8253_v8, %v8201_v10 }
 0x18a   :  { %24511 = vst [vmem:[#allocation9_spill] sm:$0xff] %v19779_v16  ;;  %v8206_v23 = vpop.f32.mrf.mxu0 }
 0x18b   :  { %8576 = vmatmul.mubr.bf16.gmra.mxu1 %v19097_v62  ;;  %v8259_v30 = vpop.f32.mrf.mxu1  ;;  %v8207_v60 = vadd.f32 %v8206_v23, %v19592_v27  ;;  %8615 = vmatpush2.bf16.msra.mxu0 %v16517_v59  ;;  %v16526_v27 = vld [vmem:[%s24468_s1 + $0x968] ss:$52 sps:$4 sm:$0xff]  }
 0x18c   :  { %8671 = vmatprep.mubr.bf16.mxu1 %v24478_v6  ;;  %v8208_v29 = vpop.f32.mrf.mxu0  ;;  %8616 = vmatprep.subr.bf16.mxu0 %v16522_v50  ;;  %v16534_v50 = vld [vmem:[%s24468_s1 + $0x904] ss:$52 sps:$4 sm:$0xff]  }
 0x18d   :  { %v8261_v32 = vpop.f32.mrf.mxu1  ;;  %v8209_v34 = vadd.f32 %v8208_v29, %v19602_v40  ;;  %v8260_v31 = vadd.f32 %v8259_v30, %v8207_v60  ;;  %v16531_v40 = vld [vmem:[%s24468_s1 + $0x284] ss:$52 sps:$4 sm:$0xff]   ;;  %v16529_v30 = vld [vmem:[%s24468_s1 + $0x280] ss:$52 sps:$4 sm:$0xff]  }
 0x18e   :  { %v8210_v57 = vpop.f32.mrf.mxu0 }
 0x18f   :  { %v8263_v59 = vpop.f32.mrf.mxu1  ;;  %v8211_v41 = vadd.f32 %v8210_v57, %v19610_v55  ;;  %v8262_v8 = vadd.f32 %v8261_v32, %v8209_v34  ;;  %8617 = vmatpush2.bf16.msra.mxu0 %v16520_v22  ;;  %v16532_v55 = vld [vmem:[%s24468_s1 + $0x900] ss:$52 sps:$4 sm:$0xff]   ;;  %v16537_v32 = vld [vmem:[%s24468_s1 + $0x21c] ss:$52 sps:$4 sm:$0xff]  }
 0x190   :  { %v19801_v10 = vpop.f32.mrf.mxu0  ;;  %8692 = vmatprep.subr.bf16.mxu0 %v16525_v9  ;;  %v16540_v9 = vld [vmem:[%s24468_s1 + $0x89c] ss:$52 sps:$4 sm:$0xff]  }
 0x191   :  { %24512 = vst [vmem:[#allocation10_spill] sm:$0xff] %v19801_v10  ;;  %v8264_v23 = vadd.f32 %v8263_v59, %v8211_v41  ;;  %v16546_v41 = vld [vmem:[%s24468_s1 + $0x834] ss:$52 sps:$4 sm:$0xff]  }
 0x192   :  { %8619 = vmatmul.mubr.bf16.vlgmr.msra.gmra.mxu0 %v19056_v39  ;;  %v8302_v22 = vpop.f32.mrf.mxu0  ;;  %v16625_v10 = vld [vmem:[%s24468_s1 + $0xf80] ss:$52 sps:$4 sm:$0xff]  }
 0x193   :  { %15120 = vmatmul.mubr.msk.bf16.vlgmr.msra.gmra.mxu1 %vm7900_vm2, %v19123_v11  ;;  %v8303_v60 = vadd.f32 %v8302_v22, %v8250_v35  ;;  %8693 = vmatpush1.bf16.msra.mxu0 %v16523_v44  ;;  %v16535_v35 = vld [vmem:[%s24468_s1 + $0x218] ss:$52 sps:$4 sm:$0xff]  }
 0x194   :  { %8746 = vmatpush1.bf16.msra.mxu1 %v16526_v27  ;;  %v8304_v29 = vpop.f32.mrf.mxu0  ;;  %8694 = vmatprep.subr.bf16.mxu0 %v16531_v40  ;;  %v16538_v44 = vld [vmem:[%s24468_s1 + $0x898] ss:$52 sps:$4 sm:$0xff]  }
 0x195   :  { %8747 = vmatprep.subr.bf16.mxu1 %v16534_v50  ;;  %v19824_v34 = vadd.f32 %v8304_v29, %v8252_v24  ;;  %8628 = vmatprep.mubr.bf16.mxu0 %v19076_v52  ;;  %v16543_v24 = vld [vmem:[%s24468_s1 + $0x1b4] ss:$52 sps:$4 sm:$0xff]   ;;  %v10519_v40 = vmax.f32 %v8303_v60, 0.0 }
 0x196   :  { %8681 = vmatprep.mubr.bf16.mxu1 %v24478_v6  ;;  %v8306_v27 = vpop.f32.mrf.mxu0  ;;  %v16621_v6 = vld [vmem:[%s24468_s1 + $0xfec] ss:$52 sps:$4 sm:$0xff]  }
 0x197   :  { %24513 = vst [vmem:[#allocation11_spill] sm:$0xff] %v19824_v34  ;;  %v8307_v57 = vadd.f32 %v8306_v27, %v8254_v17  ;;  %8695 = vmatpush1.bf16.msra.mxu0 %v16529_v30  ;;  %v16541_v17 = vld [vmem:[%s24468_s1 + $0x1b0] ss:$52 sps:$4 sm:$0xff]   ;;  %v16727_v34 = vld [vmem:[%s24468_s1 + $0x1c18] ss:$52 sps:$4 sm:$0xff]  }
 0x198   :  { %8748 = vmatpush1.bf16.msra.mxu1 %v16532_v55  ;;  %v19834_v59 = vpop.f32.mrf.mxu0  ;;  %8696 = vmatprep.subr.bf16.mxu0 %v16537_v32  ;;  %v16544_v30 = vld [vmem:[%s24468_s1 + $0x830] ss:$52 sps:$4 sm:$0xff]   ;;  %v16549_v32 = vld [vmem:[%s24468_s1 + $0x14c] ss:$52 sps:$4 sm:$0xff]  }
 0x199   :  { %24514 = vst [vmem:[#allocation12_spill] sm:$0xff] %v19834_v59  ;;  %8749 = vmatprep.subr.bf16.mxu1 %v16540_v9  ;;  %v10532_v50 = vmax.f32 %v8307_v57, 0.0  ;;  %v16552_v9 = vld [vmem:[%s24468_s1 + $0x7cc] ss:$52 sps:$4 sm:$0xff]   ;;  %v16547_v57 = vld [vmem:[%s24468_s1 + $0x148] ss:$52 sps:$4 sm:$0xff]  }
 0x19a   :  { %8629 = vmatmul.mubr.bf16.gmra.mxu0 %v19099_v1  ;;  %v8312_v55 = vpop.f32.mrf.mxu0 }
 0x19b   :  { %15121 = vmatmul.mubr.msk.bf16.gmra.mxu1 %vm7900_vm2, %v19158_v26  ;;  %v19851_v22 = vpack.c.bf16 %v10532_v50, %v10519_v40  ;;  %v8313_v29 = vadd.f32 %v8312_v55, %v8260_v31  ;;  %8697 = vmatpush1.bf16.msra.mxu0 %v16535_v35  ;;  %v16550_v31 = vld [vmem:[%s24468_s1 + $0x7c8] ss:$52 sps:$4 sm:$0xff]  }
 0x19c   :  { %8750 = vmatpush1.bf16.msra.mxu1 %v16538_v44  ;;  %v8314_v60 = vpop.f32.mrf.mxu0  ;;  %8698 = vmatprep.subr.bf16.mxu0 %v16543_v24  ;;  %v16558_v24 = vld [vmem:[%s24468_s1 + $0x764] ss:$52 sps:$4 sm:$0xff]   ;;  %v16564_v55 = vld [vmem:[%s24468_s1 + $0x6fc] ss:$52 sps:$4 sm:$0xff]  }
 0x19d   :  { %24515 = vst [vmem:[#allocation13_spill] sm:$0xff] %v19851_v22  ;;  %8751 = vmatprep.subr.bf16.mxu1 %v16546_v41  ;;  %v19859_v27 = vadd.f32 %v8314_v60, %v8262_v8  ;;  %8724 = vmatprep.mubr.bf16.mxu0 %v18444_v53  ;;  %v16555_v8 = vld [vmem:[%s24468_s1 + $0xe4] ss:$52 sps:$4 sm:$0xff]   ;;  %v10545_v41 = vmax.f32 %v8313_v29, 0.0 }
 0x19e   :  { %8777 = vmatprep.mubr.bf16.mxu1 %v18446_v54  ;;  %v8316_v35 = vpop.f32.mrf.mxu0  ;;  %v16559_v29 = vld [vmem:[%s24468_s1 + $0x78] ss:$52 sps:$4 sm:$0xff]  }
 0x19f   :  { %24516 = vst [vmem:[#allocation14_spill] sm:$0xff] %v19859_v27  ;;  %v8317_v44 = vadd.f32 %v8316_v35, %v8264_v23  ;;  %8699 = vmatpush1.bf16.msra.mxu0 %v16541_v17  ;;  %v16553_v23 = vld [vmem:[%s24468_s1 + $0xe0] ss:$52 sps:$4 sm:$0xff]   ;;  %v16562_v60 = vld [vmem:[%s24468_s1 + $0x6f8] ss:$52 sps:$4 sm:$0xff]  }
 0x1a0   :  { %8752 = vmatpush1.bf16.msra.mxu1 %v16544_v30  ;;  %8700 = vmatprep.subr.bf16.mxu0 %v16549_v32  ;;  %v16556_v17 = vld [vmem:[%s24468_s1 + $0x760] ss:$52 sps:$4 sm:$0xff]   ;;  %v16561_v30 = vld [vmem:[%s24468_s1 + $0x7c] ss:$52 sps:$4 sm:$0xff]  }
 0x1a1   :  { %8753 = vmatprep.subr.bf16.mxu1 %v16552_v9  ;;  %v10558_v40 = vmax.f32 %v8317_v44, 0.0  ;;  %v16567_v32 = vld [vmem:[%s24468_s1 + $0x14] ss:$52 sps:$4 sm:$0xff]   ;;  %v16573_v35 = vld [vmem:[%s24468_s1 + $0x62c] ss:$52 sps:$4 sm:$0xff]  }
 0x1a2   :  { %v16570_v9 = vld [vmem:[%s24468_s1 + $0x694] ss:$52 sps:$4 sm:$0xff]   ;;  %v16576_v44 = vld [vmem:[%s24468_s1 + $0xcac] ss:$52 sps:$4 sm:$0xff]  }
 0x1a3   :  { %v19875_v50 = vpack.c.bf16 %v10558_v40, %v10545_v41  ;;  %8701 = vmatpush1.bf16.msra.mxu0 %v16547_v57  ;;  %v16565_v57 = vld [vmem:[%s24468_s1 + $0x10] ss:$52 sps:$4 sm:$0xff]  }
 0x1a4   :  { %8754 = vmatpush1.bf16.msra.mxu1 %v16550_v31  ;;  %8702 = vmatprep.subr.bf16.mxu0 %v16555_v8  ;;  %v16568_v31 = vld [vmem:[%s24468_s1 + $0x690] ss:$52 sps:$4 sm:$0xff]   ;;  %v16571_v8 = vld [vmem:[%s24468_s1 + $0x628] ss:$52 sps:$4 sm:$0xff]  }
 0x1a5   :  { %24517 = vst [vmem:[#allocation15_spill] sm:$0xff] %v19875_v50  ;;  %8755 = vmatprep.subr.bf16.mxu1 %v16558_v24  ;;  %v16574_v24 = vld [vmem:[%s24468_s1 + $0xca8] ss:$52 sps:$4 sm:$0xff]   ;;  %v16579_v41 = vld [vmem:[%s24468_s1 + $0x5c4] ss:$52 sps:$4 sm:$0xff]  }
 0x1a6   :  { %v16582_v40 = vld [vmem:[%s24468_s1 + $0xc44] ss:$52 sps:$4 sm:$0xff]   ;;  %v16624_v50 = vld [vmem:[%s24468_s1 + $0x166c] ss:$52 sps:$4 sm:$0xff]  }
 0x1a7   :  { %8703 = vmatpush1.bf16.msra.mxu0 %v16553_v23  ;;  %v16577_v23 = vld [vmem:[%s24468_s1 + $0x5c0] ss:$52 sps:$4 sm:$0xff]  }
 0x1a8   :  { %8756 = vmatpush1.bf16.msra.mxu1 %v16556_v17  ;;  %8704 = vmatprep.subr.bf16.mxu0 %v16561_v30  ;;  %v16580_v17 = vld [vmem:[%s24468_s1 + $0xc40] ss:$52 sps:$4 sm:$0xff]   ;;  %v16585_v30 = vld [vmem:[%s24468_s1 + $0x55c] ss:$52 sps:$4 sm:$0xff]  }
 0x1a9   :  { %8757 = vmatprep.subr.bf16.mxu1 %v16564_v55  ;;  %v16588_v55 = vld [vmem:[%s24468_s1 + $0xbdc] ss:$52 sps:$4 sm:$0xff]  }
 0x1ab   :  { %8705 = vmatpush1.bf16.msra.mxu0 %v16559_v29  ;;  %v16583_v29 = vld [vmem:[%s24468_s1 + $0x558] ss:$52 sps:$4 sm:$0xff]  }
 0x1ac   :  { %8758 = vmatpush1.bf16.msra.mxu1 %v16562_v60  ;;  %8706 = vmatprep.subr.bf16.mxu0 %v16567_v32  ;;  %v16586_v60 = vld [vmem:[%s24468_s1 + $0xbd8] ss:$52 sps:$4 sm:$0xff]   ;;  %v16591_v32 = vld [vmem:[%s24468_s1 + $0x4f4] ss:$52 sps:$4 sm:$0xff]  }
 0x1ad   :  { %8759 = vmatprep.subr.bf16.mxu1 %v16570_v9  ;;  %v16594_v9 = vld [vmem:[%s24468_s1 + $0xb74] ss:$52 sps:$4 sm:$0xff]  }
 0x1af   :  { %8707 = vmatpush1.bf16.msra.mxu0 %v16565_v57  ;;  %v16589_v57 = vld [vmem:[%s24468_s1 + $0x4f0] ss:$52 sps:$4 sm:$0xff]  }
 0x1b0   :  { %8760 = vmatpush1.bf16.msra.mxu1 %v16568_v31  ;;  %8708 = vmatprep.subr.bf16.mxu0 %v16573_v35  ;;  %v16592_v31 = vld [vmem:[%s24468_s1 + $0xb70] ss:$52 sps:$4 sm:$0xff]   ;;  %v16597_v35 = vld [vmem:[%s24468_s1 + $0x48c] ss:$52 sps:$4 sm:$0xff]  }
 0x1b1   :  { %8761 = vmatprep.subr.bf16.mxu1 %v16576_v44  ;;  %v16600_v44 = vld [vmem:[%s24468_s1 + $0xb0c] ss:$52 sps:$4 sm:$0xff]  }
 0x1b3   :  { %8709 = vmatpush2.bf16.msra.mxu0 %v16571_v8  ;;  %v16595_v8 = vld [vmem:[%s24468_s1 + $0x488] ss:$52 sps:$4 sm:$0xff]  }
 0x1b4   :  { %8762 = vmatpush2.bf16.msra.mxu1 %v16574_v24  ;;  %8710 = vmatprep.subr.bf16.mxu0 %v16579_v41  ;;  %v16598_v24 = vld [vmem:[%s24468_s1 + $0xb08] ss:$52 sps:$4 sm:$0xff]   ;;  %v19967_v41 = vpop.f32.mrf.mxu1 }
 0x1b5   :  { %8763 = vmatprep.subr.bf16.mxu1 %v16582_v40  ;;  %24518 = vst [vmem:[#allocation16_spill] sm:$0xff] %v19967_v41  ;;  %v16603_v40 = vld [vmem:[%s24468_s1 + $0x424] ss:$52 sps:$4 sm:$0xff]  }
 0x1b7   :  { %8711 = vmatpush2.bf16.msra.mxu0 %v16577_v23  ;;  %v16606_v23 = vld [vmem:[%s24468_s1 + $0xaa4] ss:$52 sps:$4 sm:$0xff]  }
 0x1b8   :  { %8764 = vmatpush2.bf16.msra.mxu1 %v16580_v17  ;;  %8712 = vmatprep.subr.bf16.mxu0 %v16585_v30  ;;  %v16601_v17 = vld [vmem:[%s24468_s1 + $0x420] ss:$52 sps:$4 sm:$0xff]  }
 0x1b9   :  { %8765 = vmatprep.subr.bf16.mxu1 %v16588_v55  ;;  %v16604_v30 = vld [vmem:[%s24468_s1 + $0xaa0] ss:$52 sps:$4 sm:$0xff]  }
 0x1bb   :  { %8713 = vmatpush2.bf16.msra.mxu0 %v16583_v29 }
 0x1bc   :  { %8766 = vmatpush2.bf16.msra.mxu1 %v16586_v60  ;;  %8714 = vmatprep.subr.bf16.mxu0 %v16591_v32  ;;  %v16609_v60 = vld [vmem:[%s24468_s1 + $0x3bc] ss:$52 sps:$4 sm:$0xff]  }
 0x1bd   :  { %8767 = vmatprep.subr.bf16.mxu1 %v16594_v9  ;;  %v16612_v32 = vld [vmem:[%s24468_s1 + $0xa3c] ss:$52 sps:$4 sm:$0xff]   ;;  %v16607_v9 = vld [vmem:[%s24468_s1 + $0x3b8] ss:$52 sps:$4 sm:$0xff]  }
 0x1bf   :  { %8715 = vmatpush2.bf16.msra.mxu0 %v16589_v57  ;;  %v16610_v57 = vld [vmem:[%s24468_s1 + $0xa38] ss:$52 sps:$4 sm:$0xff]  }
 0x1c0   :  { %8768 = vmatpush2.bf16.msra.mxu1 %v16592_v31  ;;  %8716 = vmatprep.subr.bf16.mxu0 %v16597_v35  ;;  %v24482_v35 = vsub.s32 3, %v19265_v25 }
 0x1c1   :  { %8769 = vmatprep.subr.bf16.mxu1 %v16600_v44 }
 0x1c3   :  { %v8355_v55 = vpop.f32.mrf.mxu1  ;;  %8717 = vmatpush2.bf16.msra.mxu0 %v16595_v8  ;;  %v16615_v8 = vld [vmem:[%s24468_s1 + $0x354] ss:$52 sps:$4 sm:$0xff]  }
 0x1c4   :  { %8770 = vmatpush2.bf16.msra.mxu1 %v16598_v24  ;;  %8718 = vmatprep.subr.bf16.mxu0 %v16603_v40  ;;  %v16618_v24 = vld [vmem:[%s24468_s1 + $0x9d4] ss:$52 sps:$4 sm:$0xff]   ;;  %v20003_v40 = vsub.s32 2, %v19265_v25 }
 0x1c5   :  { %v8357_v29 = vpop.f32.mrf.mxu1  ;;  %8771 = vmatprep.subr.bf16.mxu1 %v16606_v23  ;;  %v16613_v23 = vld [vmem:[%s24468_s1 + $0x350] ss:$52 sps:$4 sm:$0xff]  }
 0x1c6   :  { %24520 = vst [vmem:[#allocation18_spill] sm:$0xff] %v20003_v40 }
 0x1c7   :  { %v8359_v31 = vpop.f32.mrf.mxu1  ;;  %8719 = vmatpush2.bf16.msra.mxu0 %v16601_v17  ;;  %v16616_v17 = vld [vmem:[%s24468_s1 + $0x9d0] ss:$52 sps:$4 sm:$0xff]  }
 0x1c8   :  { %8772 = vmatpush2.bf16.msra.mxu1 %v16604_v30  ;;  %8720 = vmatprep.subr.bf16.mxu0 %v16609_v60  ;;  %v18228_v60 = vld [vmem:[%s24470_s2] sm:$0xff] }
 0x1c9   :  { %v19994_v44 = vpop.f32.mrf.mxu1  ;;  %8773 = vmatprep.subr.bf16.mxu1 %v16612_v32  ;;  %v20016_v32 = vrot.slane %v18228_v60, %v24482_v35  ;;  %v1477_v27 = vrot.slane %v18228_v60, %v20003_v40  ;;  %v16619_v35 = vld [vmem:[%s24468_s1 + $0xfe8] ss:$52 sps:$4 sm:$0xff]   ;;  %v16630_v60 = vld [vmem:[%s24468_s1 + $0x1604] ss:$52 sps:$4 sm:$0xff]  }
 0x1ca   :  { %24519 = vst [vmem:[#allocation17_spill] sm:$0xff] %v19994_v44 }
 0x1cb   :  { %v8365_v30 = vpop.f32.mrf.mxu1  ;;  %8721 = vmatpush2.bf16.msra.mxu0 %v16607_v9  ;;  %v16622_v9 = vld [vmem:[%s24468_s1 + $0x1668] ss:$52 sps:$4 sm:$0xff]   ;;  %v8356_v41 = vadd.f32 %v8355_v55, %v1477_v27 }
 0x1cc   :  { %8774 = vmatpush2.bf16.msra.mxu1 %v16610_v57  ;;  %8722 = vmatprep.subr.bf16.mxu0 %v16615_v8  ;;  %v16627_v8 = vld [vmem:[%s24468_s1 + $0xf84] ss:$52 sps:$4 sm:$0xff]   ;;  %v16633_v55 = vld [vmem:[%s24468_s1 + $0xf1c] ss:$52 sps:$4 sm:$0xff]  }
 0x1cd   :  { %8775 = vmatprep.subr.bf16.mxu1 %v16618_v24  ;;  %v8367_v22 = vpop.f32.mrf.mxu1  ;;  %v20035_v24 = vpop.f32.mrf.mxu0 }
 0x1ce   :  { %v8368_v57 = vadd.f32 %v8367_v22, %v20016_v32  ;;  %24521 = vst [vmem:[#allocation19_spill] sm:$0xff] %v20035_v24  ;;  %v16628_v22 = vld [vmem:[%s24468_s1 + $0x1600] ss:$52 sps:$4 sm:$0xff]   ;;  %v8360_v24 = vadd.f32 %v8359_v31, %v1477_v27 }
 0x1cf   :  { %8723 = vmatpush2.bf16.msra.mxu0 %v16613_v23 }
 0x1d0   :  { %8776 = vmatpush2.bf16.msra.mxu1 %v16616_v17  ;;  %8798 = vmatprep.subr.bf16.mxu0 %v16621_v6  ;;  %v8358_v6 = vadd.f32 %v8357_v29, %v20016_v32  ;;  %v16636_v17 = vld [vmem:[%s24468_s1 + $0x159c] ss:$52 sps:$4 sm:$0xff]  }
 0x1d1   :  { %8851 = vmatprep.subr.bf16.mxu1 %v16624_v50 }
 0x1d2   :  { %v8408_v21 = vpop.f32.mrf.mxu0  ;;  %8725 = vmatmul.mubr.bf16.vlgmr.msra.gmra.mxu0 %v18513_v12 }
 0x1d3   :  { %8778 = vmatmul.mubr.bf16.vlgmr.msra.gmra.mxu1 %v18515_v13  ;;  %v20049_v50 = vadd.f32 %v8408_v21, %v8356_v41  ;;  %8799 = vmatpush1.bf16.msra.mxu0 %v16619_v35  ;;  %v16631_v21 = vld [vmem:[%s24468_s1 + $0xf18] ss:$52 sps:$4 sm:$0xff]   ;;  %v16639_v35 = vld [vmem:[%s24468_s1 + $0xeb4] ss:$52 sps:$4 sm:$0xff]  }
 0x1d4   :  { %8852 = vmatpush1.bf16.msra.mxu1 %v16622_v9  ;;  %v8410_v23 = vpop.f32.mrf.mxu0  ;;  %8800 = vmatprep.subr.bf16.mxu0 %v16627_v8  ;;  %v16634_v41 = vld [vmem:[%s24468_s1 + $0x1598] ss:$52 sps:$4 sm:$0xff]   ;;  %v8366_v9 = vadd.f32 %v8365_v30, %v1477_v27 }
 0x1d5   :  { %8853 = vmatprep.subr.bf16.mxu1 %v16630_v60  ;;  %v20057_v20 = vadd.f32 %v8410_v23, %v8358_v6  ;;  %8734 = vmatprep.mubr.bf16.mxu0 %v18588_v37  ;;  %v16642_v60 = vld [vmem:[%s24468_s1 + $0x1534] ss:$52 sps:$4 sm:$0xff]   ;;  %v16637_v6 = vld [vmem:[%s24468_s1 + $0xeb0] ss:$52 sps:$4 sm:$0xff]  }
 0x1d6   :  { %8787 = vmatprep.mubr.bf16.mxu1 %v18604_v43  ;;  %v8412_v29 = vpop.f32.mrf.mxu0 }
 0x1d7   :  { %v20070_v31 = vadd.f32 %v8412_v29, %v8360_v24  ;;  %8801 = vmatpush1.bf16.msra.mxu0 %v16625_v10  ;;  %v16640_v24 = vld [vmem:[%s24468_s1 + $0x1530] ss:$52 sps:$4 sm:$0xff]   ;;  %v16645_v10 = vld [vmem:[%s24468_s1 + $0xe4c] ss:$52 sps:$4 sm:$0xff]  }
 0x1d8   :  { %8854 = vmatpush1.bf16.msra.mxu1 %v16628_v22  ;;  %v20072_v8 = vpop.f32.mrf.mxu0  ;;  %8802 = vmatprep.subr.bf16.mxu0 %v16633_v55  ;;  %v8369_v22 = vpop.f32.mrf.mxu1 }
 0x1d9   :  { %24522 = vst [vmem:[#allocation20_spill] sm:$0xff] %v20072_v8  ;;  %8855 = vmatprep.subr.bf16.mxu1 %v16636_v17  ;;  %v8370_v23 = vadd.f32 %v8369_v22, %v1477_v27  ;;  %v16648_v17 = vld [vmem:[%s24468_s1 + $0x14cc] ss:$52 sps:$4 sm:$0xff]   ;;  %v16646_v27 = vld [vmem:[%s24468_s1 + $0x14c8] ss:$52 sps:$4 sm:$0xff]  }
 0x1da   :  { %v8418_v30 = vpop.f32.mrf.mxu0  ;;  %8735 = vmatmul.mubr.bf16.gmra.mxu0 %v18602_v42  ;;  %v16666_v22 = vld [vmem:[%s24468_s1 + $0x1394] ss:$52 sps:$4 sm:$0xff]  }
 0x1db   :  { %8788 = vmatmul.mubr.bf16.gmra.mxu1 %v18624_v49  ;;  %8803 = vmatpush1.bf16.msra.mxu0 %v16631_v21  ;;  %v20088_v55 = vadd.f32 %v8418_v30, %v8366_v9  ;;  %v16649_v9 = vld [vmem:[%s24468_s1 + $0xde0] ss:$52 sps:$4 sm:$0xff]   ;;  %v16658_v30 = vld [vmem:[%s24468_s1 + $0x13f8] ss:$52 sps:$4 sm:$0xff]  }
 0x1dc   :  { %8856 = vmatpush1.bf16.msra.mxu1 %v16634_v41  ;;  %8804 = vmatprep.subr.bf16.mxu0 %v16639_v35  ;;  %v8420_v29 = vpop.f32.mrf.mxu0  ;;  %v16654_v35 = vld [vmem:[%s24468_s1 + $0x1464] ss:$52 sps:$4 sm:$0xff]  }
 0x1dd   :  { %8857 = vmatprep.subr.bf16.mxu1 %v16642_v60  ;;  %v20096_v2 = vadd.f32 %v8420_v29, %v8368_v57  ;;  %8830 = vmatprep.mubr.bf16.mxu0 %v18660_v63  ;;  %v16651_v57 = vld [vmem:[%s24468_s1 + $0xde4] ss:$52 sps:$4 sm:$0xff]   ;;  %v16652_v60 = vld [vmem:[%s24468_s1 + $0x1460] ss:$52 sps:$4 sm:$0xff]  }
 0x1de   :  { %8883 = vmatprep.mubr.bf16.mxu1 %v18662_v0  ;;  %v8422_v21 = vpop.f32.mrf.mxu0  ;;  %v16669_v29 = vld [vmem:[%s24468_s1 + $0x132c] ss:$52 sps:$4 sm:$0xff]  }
 0x1df   :  { %8805 = vmatpush1.bf16.msra.mxu0 %v16637_v6  ;;  %v20103_v41 = vadd.f32 %v8422_v21, %v8370_v23  ;;  %v16657_v6 = vld [vmem:[%s24468_s1 + $0xd7c] ss:$52 sps:$4 sm:$0xff]   ;;  %v16672_v21 = vld [vmem:[%s24468_s1 + $0x19ac] ss:$52 sps:$4 sm:$0xff]  }
 0x1e0   :  { %8858 = vmatpush1.bf16.msra.mxu1 %v16640_v24  ;;  %8806 = vmatprep.subr.bf16.mxu0 %v16645_v10  ;;  %v16660_v24 = vld [vmem:[%s24468_s1 + $0x13fc] ss:$52 sps:$4 sm:$0xff]   ;;  %v16655_v10 = vld [vmem:[%s24468_s1 + $0xd78] ss:$52 sps:$4 sm:$0xff]  }
 0x1e1   :  { %8859 = vmatprep.subr.bf16.mxu1 %v16648_v17  ;;  %v16661_v23 = vld [vmem:[%s24468_s1 + $0xd10] ss:$52 sps:$4 sm:$0xff]  }
 0x1e2   :  { %v16664_v17 = vld [vmem:[%s24468_s1 + $0x1390] ss:$52 sps:$4 sm:$0xff]  }
 0x1e3   :  { %8807 = vmatpush1.bf16.msra.mxu0 %v16643_v5  ;;  %v16663_v5 = vld [vmem:[%s24468_s1 + $0xd14] ss:$52 sps:$4 sm:$0xff]  }
 0x1e4   :  { %8860 = vmatpush1.bf16.msra.mxu1 %v16646_v27  ;;  %8808 = vmatprep.subr.bf16.mxu0 %v16651_v57  ;;  %v16667_v27 = vld [vmem:[%s24468_s1 + $0x1328] ss:$52 sps:$4 sm:$0xff]  }
 0x1e5   :  { %8861 = vmatprep.subr.bf16.mxu1 %v16654_v35  ;;  %v16670_v57 = vld [vmem:[%s24468_s1 + $0x19a8] ss:$52 sps:$4 sm:$0xff]   ;;  %v16675_v35 = vld [vmem:[%s24468_s1 + $0x12c4] ss:$52 sps:$4 sm:$0xff]  }
 0x1e7   :  { %8809 = vmatpush1.bf16.msra.mxu0 %v16649_v9  ;;  %v16678_v9 = vld [vmem:[%s24468_s1 + $0x1944] ss:$52 sps:$4 sm:$0xff]  }
 0x1e8   :  { %8862 = vmatpush1.bf16.msra.mxu1 %v16652_v60  ;;  %8810 = vmatprep.subr.bf16.mxu0 %v16657_v6  ;;  %v16673_v60 = vld [vmem:[%s24468_s1 + $0x12c0] ss:$52 sps:$4 sm:$0xff]  }
 0x1e9   :  { %8863 = vmatprep.subr.bf16.mxu1 %v16660_v24  ;;  %v16676_v6 = vld [vmem:[%s24468_s1 + $0x1940] ss:$52 sps:$4 sm:$0xff]   ;;  %v16681_v24 = vld [vmem:[%s24468_s1 + $0x125c] ss:$52 sps:$4 sm:$0xff]  }
 0x1eb   :  { %8811 = vmatpush1.bf16.msra.mxu0 %v16655_v10  ;;  %v16684_v10 = vld [vmem:[%s24468_s1 + $0x18dc] ss:$52 sps:$4 sm:$0xff]  }
 0x1ec   :  { %8864 = vmatpush1.bf16.msra.mxu1 %v16658_v30  ;;  %8812 = vmatprep.subr.bf16.mxu0 %v16663_v5  ;;  %v16679_v30 = vld [vmem:[%s24468_s1 + $0x1258] ss:$52 sps:$4 sm:$0xff]  }
 0x1ed   :  { %8865 = vmatprep.subr.bf16.mxu1 %v16666_v22  ;;  %v16682_v5 = vld [vmem:[%s24468_s1 + $0x18d8] ss:$52 sps:$4 sm:$0xff]   ;;  %v16687_v22 = vld [vmem:[%s24468_s1 + $0x11f4] ss:$52 sps:$4 sm:$0xff]  }
 0x1ef   :  { %8813 = vmatpush1.bf16.msra.mxu0 %v16661_v23  ;;  %v16690_v23 = vld [vmem:[%s24468_s1 + $0x1874] ss:$52 sps:$4 sm:$0xff]  }
 0x1f0   :  { %8866 = vmatpush1.bf16.msra.mxu1 %v16664_v17  ;;  %8814 = vmatprep.subr.bf16.mxu0 %v16669_v29  ;;  %v16685_v17 = vld [vmem:[%s24468_s1 + $0x11f0] ss:$52 sps:$4 sm:$0xff]  }
 0x1f1   :  { %8867 = vmatprep.subr.bf16.mxu1 %v16672_v21  ;;  %v16688_v29 = vld [vmem:[%s24468_s1 + $0x1870] ss:$52 sps:$4 sm:$0xff]   ;;  %v16693_v21 = vld [vmem:[%s24468_s1 + $0x118c] ss:$52 sps:$4 sm:$0xff]  }
 0x1f3   :  { %8815 = vmatpush2.bf16.msra.mxu0 %v16667_v27  ;;  %v16696_v27 = vld [vmem:[%s24468_s1 + $0x180c] ss:$52 sps:$4 sm:$0xff]  }
 0x1f4   :  { %8868 = vmatpush2.bf16.msra.mxu1 %v16670_v57  ;;  %8816 = vmatprep.subr.bf16.mxu0 %v16675_v35  ;;  %v20195_v57 = vpop.f32.mrf.mxu1  ;;  %v16691_v35 = vld [vmem:[%s24468_s1 + $0x1188] ss:$52 sps:$4 sm:$0xff]  }
 0x1f5   :  { %8869 = vmatprep.subr.bf16.mxu1 %v16678_v9  ;;  %v16694_v9 = vld [vmem:[%s24468_s1 + $0x1808] ss:$52 sps:$4 sm:$0xff]  }
 0x1f7   :  { %8817 = vmatpush2.bf16.msra.mxu0 %v16673_v60  ;;  %v16699_v60 = vld [vmem:[%s24468_s1 + $0x1124] ss:$52 sps:$4 sm:$0xff]  }
 0x1f8   :  { %8870 = vmatpush2.bf16.msra.mxu1 %v16676_v6  ;;  %8818 = vmatprep.subr.bf16.mxu0 %v16681_v24  ;;  %v16702_v6 = vld [vmem:[%s24468_s1 + $0x17a4] ss:$52 sps:$4 sm:$0xff]  }
 0x1f9   :  { %8871 = vmatprep.subr.bf16.mxu1 %v16684_v10 }
 0x1fb   :  { %8819 = vmatpush2.bf16.msra.mxu0 %v16679_v30  ;;  %v16697_v30 = vld [vmem:[%s24468_s1 + $0x1120] ss:$52 sps:$4 sm:$0xff]  }
 0x1fc   :  { %8872 = vmatpush2.bf16.msra.mxu1 %v16682_v5  ;;  %8820 = vmatprep.subr.bf16.mxu0 %v16687_v22  ;;  %v16700_v5 = vld [vmem:[%s24468_s1 + $0x17a0] ss:$52 sps:$4 sm:$0xff]  }
 0x1fd   :  { %8873 = vmatprep.subr.bf16.mxu1 %v16690_v23  ;;  %v16705_v23 = vld [vmem:[%s24468_s1 + $0x10bc] ss:$52 sps:$4 sm:$0xff]  }
 0x1ff   :  { %8821 = vmatpush2.bf16.msra.mxu0 %v16685_v17 }
 0x200   :  { %8874 = vmatpush2.bf16.msra.mxu1 %v16688_v29  ;;  %8822 = vmatprep.subr.bf16.mxu0 %v16693_v21 }
 0x201   :  { %8875 = vmatprep.subr.bf16.mxu1 %v16696_v27  ;;  %v16703_v27 = vld [vmem:[%s24468_s1 + $0x10b8] ss:$52 sps:$4 sm:$0xff]  }
 0x203   :  { %v8461_v24 = vpop.f32.mrf.mxu1  ;;  %8823 = vmatpush2.bf16.msra.mxu0 %v16691_v35  ;;  %v16706_v35 = vld [vmem:[%s24468_s1 + $0x1738] ss:$52 sps:$4 sm:$0xff]  }
 0x204   :  { %v8462_v10 = vadd.f32 %v8461_v24, %v20049_v50  ;;  %8876 = vmatpush2.bf16.msra.mxu1 %v16694_v9  ;;  %8824 = vmatprep.subr.bf16.mxu0 %v16699_v60  ;;  %v16708_v50 = vld [vmem:[%s24468_s1 + $0x173c] ss:$52 sps:$4 sm:$0xff]  }
 0x205   :  { %v8463_v22 = vpop.f32.mrf.mxu1  ;;  %8877 = vmatprep.subr.bf16.mxu1 %v16702_v6  ;;  %v16709_v24 = vld [vmem:[%s24468_s1 + $0x1050] ss:$52 sps:$4 sm:$0xff]  }
 0x206   :  { %v8464_v17 = vadd.f32 %v8463_v22, %v20057_v20  ;;  %v16711_v20 = vld [vmem:[%s24468_s1 + $0x1054] ss:$52 sps:$4 sm:$0xff]   ;;  %v16717_v22 = vld [vmem:[%s24468_s1 + $0x1cec] ss:$52 sps:$4 sm:$0xff]  }
 0x207   :  { %v8465_v29 = vpop.f32.mrf.mxu1  ;;  %8825 = vmatpush2.bf16.msra.mxu0 %v16697_v30  ;;  %v16712_v30 = vld [vmem:[%s24468_s1 + $0x16d0] ss:$52 sps:$4 sm:$0xff]  }
 0x208   :  { %v8466_v21 = vadd.f32 %v8465_v29, %v20070_v31  ;;  %8878 = vmatpush2.bf16.msra.mxu1 %v16700_v5  ;;  %8826 = vmatprep.subr.bf16.mxu0 %v16705_v23  ;;  %v16714_v31 = vld [vmem:[%s24468_s1 + $0x16d4] ss:$52 sps:$4 sm:$0xff]  }
 0x209   :  { %v20230_v9 = vpop.f32.mrf.mxu1  ;;  %8879 = vmatprep.subr.bf16.mxu1 %v16708_v50  ;;  %v16715_v50 = vld [vmem:[%s24468_s1 + $0x1ce8] ss:$52 sps:$4 sm:$0xff]  }
 0x20a   :  { %24523 = vst [vmem:[#allocation21_spill] sm:$0xff] %v20230_v9  ;;  %v16718_v29 = vld [vmem:[%s24468_s1 + $0x2368] ss:$52 sps:$4 sm:$0xff]  }
 0x20b   :  { %v8471_v60 = vpop.f32.mrf.mxu1  ;;  %8827 = vmatpush2.bf16.msra.mxu0 %v16703_v27 }
 0x20c   :  { %v8472_v6 = vadd.f32 %v8471_v60, %v20088_v55  ;;  %8880 = vmatpush2.bf16.msra.mxu1 %v16706_v35  ;;  %8828 = vmatprep.subr.bf16.mxu0 %v16711_v20  ;;  %v16720_v55 = vld [vmem:[%s24468_s1 + $0x236c] ss:$52 sps:$4 sm:$0xff]   ;;  %v16723_v20 = vld [vmem:[%s24468_s1 + $0x1c84] ss:$52 sps:$4 sm:$0xff]  }
 0x20d   :  { %v8473_v5 = vpop.f32.mrf.mxu1  ;;  %8881 = vmatprep.subr.bf16.mxu1 %v16714_v31  ;;  %v20265_v31 = vpop.f32.mrf.mxu0  ;;  %v16721_v60 = vld [vmem:[%s24468_s1 + $0x1c80] ss:$52 sps:$4 sm:$0xff]  }
 0x20e   :  { %v8474_v23 = vadd.f32 %v8473_v5, %v20096_v2  ;;  %v16726_v2 = vld [vmem:[%s24468_s1 + $0x2304] ss:$52 sps:$4 sm:$0xff]  }
 0x20f   :  { %v8475_v27 = vpop.f32.mrf.mxu1  ;;  %8829 = vmatpush2.bf16.msra.mxu0 %v16709_v24 }
 0x210   :  { %v8476_v35 = vadd.f32 %v8475_v27, %v20103_v41  ;;  %8882 = vmatpush2.bf16.msra.mxu1 %v16712_v30  ;;  %8904 = vmatprep.subr.bf16.mxu0 %v16717_v22  ;;  %v16724_v41 = vld [vmem:[%s24468_s1 + $0x2300] ss:$52 sps:$4 sm:$0xff]   ;;  %v16729_v30 = vld [vmem:[%s24468_s1 + $0x1c1c] ss:$52 sps:$4 sm:$0xff]  }
 0x211   :  { %8957 = vmatprep.subr.bf16.mxu1 %v16720_v55  ;;  %v16732_v55 = vld [vmem:[%s24468_s1 + $0x229c] ss:$52 sps:$4 sm:$0xff]  }
 0x212   :  { %v8514_v24 = vpop.f32.mrf.mxu0  ;;  %8831 = vmatmul.mubr.bf16.vlgmr.msra.gmra.mxu0 %v18789_v47 }
 0x213   :  { %8884 = vmatmul.mubr.bf16.vlgmr.msra.gmra.mxu1 %v18791_v48  ;;  %v20278_v5 = vadd.f32 %v8514_v24, %v8462_v10  ;;  %8905 = vmatpush1.bf16.msra.mxu0 %v16715_v50  ;;  %v16730_v10 = vld [vmem:[%s24468_s1 + $0x2298] ss:$52 sps:$4 sm:$0xff]   ;;  %v16733_v24 = vld [vmem:[%s24468_s1 + $0x1bb0] ss:$52 sps:$4 sm:$0xff]  }
 0x214   :  { %8958 = vmatpush1.bf16.msra.mxu1 %v16718_v29  ;;  %v8516_v22 = vpop.f32.mrf.mxu0  ;;  %8906 = vmatprep.subr.bf16.mxu0 %v16723_v20  ;;  %v16735_v29 = vld [vmem:[%s24468_s1 + $0x1bb4] ss:$52 sps:$4 sm:$0xff]  }
 0x215   :  { %8959 = vmatprep.subr.bf16.mxu1 %v16726_v2  ;;  %v20283_v27 = vadd.f32 %v8516_v22, %v8464_v17  ;;  %8840 = vmatprep.mubr.bf16.mxu0 %v18811_v58  ;;  %v16738_v2 = vld [vmem:[%s24468_s1 + $0x2234] ss:$52 sps:$4 sm:$0xff]  }
 0x216   :  { %8893 = vmatprep.mubr.bf16.mxu1 %v18819_v61  ;;  %v8518_v50 = vpop.f32.mrf.mxu0 }
 0x217   :  { %v20296_v20 = vadd.f32 %v8518_v50, %v8466_v21  ;;  %8907 = vmatpush1.bf16.msra.mxu0 %v16721_v60  ;;  %v16736_v21 = vld [vmem:[%s24468_s1 + $0x2230] ss:$52 sps:$4 sm:$0xff]  }
 0x218   :  { %8960 = vmatpush1.bf16.msra.mxu1 %v16724_v41  ;;  %v20298_v17 = vpop.f32.mrf.mxu0  ;;  %8908 = vmatprep.subr.bf16.mxu0 %v16729_v30  ;;  %v16741_v41 = vld [vmem:[%s24468_s1 + $0x1b4c] ss:$52 sps:$4 sm:$0xff]  }
 0x219   :  { %24524 = vst [vmem:[#allocation22_spill] sm:$0xff] %v20298_v17  ;;  %8961 = vmatprep.subr.bf16.mxu1 %v16732_v55  ;;  %v16744_v30 = vld [vmem:[%s24468_s1 + $0x21cc] ss:$52 sps:$4 sm:$0xff]  }
 0x21a   :  { %v8524_v22 = vpop.f32.mrf.mxu0  ;;  %8841 = vmatmul.mubr.bf16.gmra.mxu0 %v18837_v4 }
 0x21b   :  { %8894 = vmatmul.mubr.bf16.gmra.mxu1 %v18845_v7  ;;  %v20311_v60 = vadd.f32 %v8524_v22, %v8472_v6  ;;  %8909 = vmatpush1.bf16.msra.mxu0 %v16727_v34  ;;  %v16739_v6 = vld [vmem:[%s24468_s1 + $0x1b48] ss:$52 sps:$4 sm:$0xff]   ;;  %v16745_v22 = vld [vmem:[%s24468_s1 + $0x1ae0] ss:$52 sps:$4 sm:$0xff]  }
 0x21c   :  { %8962 = vmatpush1.bf16.msra.mxu1 %v16730_v10  ;;  %v8526_v55 = vpop.f32.mrf.mxu0  ;;  %8910 = vmatprep.subr.bf16.mxu0 %v16735_v29  ;;  %v16742_v34 = vld [vmem:[%s24468_s1 + $0x21c8] ss:$52 sps:$4 sm:$0xff]   ;;  %v16747_v29 = vld [vmem:[%s24468_s1 + $0x1ae4] ss:$52 sps:$4 sm:$0xff]  }
 0x21d   :  { %8963 = vmatprep.subr.bf16.mxu1 %v16738_v2  ;;  %v20319_v50 = vadd.f32 %v8526_v55, %v8474_v23  ;;  %8936 = vmatprep.mubr.bf16.mxu0 %v18873_v18  ;;  %v16750_v23 = vld [vmem:[%s24468_s1 + $0x2164] ss:$52 sps:$4 sm:$0xff]   ;;  %v16748_v55 = vld [vmem:[%s24468_s1 + $0x2160] ss:$52 sps:$4 sm:$0xff]  }
 0x21e   :  { %8989 = vmatprep.mubr.bf16.mxu1 %v18875_v19  ;;  %v8528_v10 = vpop.f32.mrf.mxu0 }
 0x21f   :  { %v20332_v2 = vadd.f32 %v8528_v10, %v8476_v35  ;;  %8911 = vmatpush1.bf16.msra.mxu0 %v16733_v24  ;;  %v16753_v35 = vld [vmem:[%s24468_s1 + $0x1a7c] ss:$52 sps:$4 sm:$0xff]  }
 0x220   :  { %8964 = vmatpush1.bf16.msra.mxu1 %v16736_v21  ;;  %8912 = vmatprep.subr.bf16.mxu0 %v16741_v41  ;;  %v16756_v24 = vld [vmem:[%s24468_s1 + $0x20fc] ss:$52 sps:$4 sm:$0xff]   ;;  %v16751_v21 = vld [vmem:[%s24468_s1 + $0x1a78] ss:$52 sps:$4 sm:$0xff]  }
 0x221   :  { %8965 = vmatprep.subr.bf16.mxu1 %v16744_v30  ;;  %v16754_v41 = vld [vmem:[%s24468_s1 + $0x20f8] ss:$52 sps:$4 sm:$0xff]   ;;  %v16759_v30 = vld [vmem:[%s24468_s1 + $0x1a14] ss:$52 sps:$4 sm:$0xff]   ;;  %v16760_v10 = vld [vmem:[%s24468_s1 + $0x2090] ss:$52 sps:$4 sm:$0xff]  }
 0x223   :  { %8913 = vmatpush1.bf16.msra.mxu0 %v16739_v6  ;;  %v16762_v6 = vld [vmem:[%s24468_s1 + $0x2094] ss:$52 sps:$4 sm:$0xff]  }
 0x224   :  { %8966 = vmatpush1.bf16.msra.mxu1 %v16742_v34  ;;  %8914 = vmatprep.subr.bf16.mxu0 %v16747_v29  ;;  %v16757_v34 = vld [vmem:[%s24468_s1 + $0x1a10] ss:$52 sps:$4 sm:$0xff]   ;;  %v16765_v29 = vld [vmem:[%s24468_s1 + $0x202c] ss:$52 sps:$4 sm:$0xff]  }
 0x225   :  { %8967 = vmatprep.subr.bf16.mxu1 %v16750_v23  ;;  %v16768_v23 = vld [vmem:[%s24468_s1 + $0x26ac] ss:$52 sps:$4 sm:$0xff]  }
 0x227   :  { %8915 = vmatpush1.bf16.msra.mxu0 %v16745_v22  ;;  %v16763_v22 = vld [vmem:[%s24468_s1 + $0x2028] ss:$52 sps:$4 sm:$0xff]  }
 0x228   :  { %8968 = vmatpush1.bf16.msra.mxu1 %v16748_v55  ;;  %8916 = vmatprep.subr.bf16.mxu0 %v16753_v35  ;;  %v16766_v55 = vld [vmem:[%s24468_s1 + $0x26a8] ss:$52 sps:$4 sm:$0xff]   ;;  %v16771_v35 = vld [vmem:[%s24468_s1 + $0x1fc4] ss:$52 sps:$4 sm:$0xff]  }
 0x229   :  { %8969 = vmatprep.subr.bf16.mxu1 %v16756_v24  ;;  %v16774_v24 = vld [vmem:[%s24468_s1 + $0x2644] ss:$52 sps:$4 sm:$0xff]  }
 0x22b   :  { %8917 = vmatpush1.bf16.msra.mxu0 %v16751_v21  ;;  %v16769_v21 = vld [vmem:[%s24468_s1 + $0x1fc0] ss:$52 sps:$4 sm:$0xff]  }
 0x22c   :  { %8970 = vmatpush1.bf16.msra.mxu1 %v16754_v41  ;;  %8918 = vmatprep.subr.bf16.mxu0 %v16759_v30  ;;  %v16772_v41 = vld [vmem:[%s24468_s1 + $0x2640] ss:$52 sps:$4 sm:$0xff]   ;;  %v16777_v30 = vld [vmem:[%s24468_s1 + $0x1f5c] ss:$52 sps:$4 sm:$0xff]  }
 0x22d   :  { %8971 = vmatprep.subr.bf16.mxu1 %v16762_v6  ;;  %v16780_v6 = vld [vmem:[%s24468_s1 + $0x25dc] ss:$52 sps:$4 sm:$0xff]  }
 0x22f   :  { %8919 = vmatpush1.bf16.msra.mxu0 %v16757_v34  ;;  %v16775_v34 = vld [vmem:[%s24468_s1 + $0x1f58] ss:$52 sps:$4 sm:$0xff]  }
 0x230   :  { %8972 = vmatpush1.bf16.msra.mxu1 %v16760_v10  ;;  %8920 = vmatprep.subr.bf16.mxu0 %v16765_v29  ;;  %v16778_v10 = vld [vmem:[%s24468_s1 + $0x25d8] ss:$52 sps:$4 sm:$0xff]   ;;  %v16783_v29 = vld [vmem:[%s24468_s1 + $0x1ef4] ss:$52 sps:$4 sm:$0xff]  }
 0x231   :  { %8973 = vmatprep.subr.bf16.mxu1 %v16768_v23  ;;  %v16786_v23 = vld [vmem:[%s24468_s1 + $0x2574] ss:$52 sps:$4 sm:$0xff]  }
 0x233   :  { %8921 = vmatpush2.bf16.msra.mxu0 %v16763_v22  ;;  %v16781_v22 = vld [vmem:[%s24468_s1 + $0x1ef0] ss:$52 sps:$4 sm:$0xff]  }
 0x234   :  { %8974 = vmatpush2.bf16.msra.mxu1 %v16766_v55  ;;  %8922 = vmatprep.subr.bf16.mxu0 %v16771_v35  ;;  %v16784_v55 = vld [vmem:[%s24468_s1 + $0x2570] ss:$52 sps:$4 sm:$0xff]   ;;  %v16789_v35 = vld [vmem:[%s24468_s1 + $0x1e8c] ss:$52 sps:$4 sm:$0xff]  }
 0x235   :  { %8975 = vmatprep.subr.bf16.mxu1 %v16774_v24  ;;  %v16792_v24 = vld [vmem:[%s24468_s1 + $0x250c] ss:$52 sps:$4 sm:$0xff]  }
 0x237   :  { %8923 = vmatpush2.bf16.msra.mxu0 %v16769_v21  ;;  %v16787_v21 = vld [vmem:[%s24468_s1 + $0x1e88] ss:$52 sps:$4 sm:$0xff]  }
 0x238   :  { %8976 = vmatpush2.bf16.msra.mxu1 %v16772_v41  ;;  %8924 = vmatprep.subr.bf16.mxu0 %v16777_v30  ;;  %v16790_v41 = vld [vmem:[%s24468_s1 + $0x2508] ss:$52 sps:$4 sm:$0xff]   ;;  %v20427_v30 = vpop.f32.mrf.mxu1 }
 0x239   :  { %8977 = vmatprep.subr.bf16.mxu1 %v16780_v6  ;;  %v16795_v6 = vld [vmem:[%s24468_s1 + $0x1e24] ss:$52 sps:$4 sm:$0xff]  }
 0x23b   :  { %8925 = vmatpush2.bf16.msra.mxu0 %v16775_v34  ;;  %v16798_v34 = vld [vmem:[%s24468_s1 + $0x24a4] ss:$52 sps:$4 sm:$0xff]  }
 0x23c   :  { %8978 = vmatpush2.bf16.msra.mxu1 %v16778_v10  ;;  %8926 = vmatprep.subr.bf16.mxu0 %v16783_v29  ;;  %v16793_v10 = vld [vmem:[%s24468_s1 + $0x1e20] ss:$52 sps:$4 sm:$0xff]  }
 0x23d   :  { %8979 = vmatprep.subr.bf16.mxu1 %v16786_v23 }
 0x23f   :  { %8927 = vmatpush2.bf16.msra.mxu0 %v16781_v22  ;;  %v16796_v22 = vld [vmem:[%s24468_s1 + $0x24a0] ss:$52 sps:$4 sm:$0xff]  }
 0x240   :  { %8980 = vmatpush2.bf16.msra.mxu1 %v16784_v55  ;;  %8928 = vmatprep.subr.bf16.mxu0 %v16789_v35  ;;  %v16801_v55 = vld [vmem:[%s24468_s1 + $0x1dbc] ss:$52 sps:$4 sm:$0xff]  }
 0x241   :  { %8981 = vmatprep.subr.bf16.mxu1 %v16792_v24  ;;  %v16804_v24 = vld [vmem:[%s24468_s1 + $0x243c] ss:$52 sps:$4 sm:$0xff]  }
 0x243   :  { %v8567_v29 = vpop.f32.mrf.mxu1  ;;  %8929 = vmatpush2.bf16.msra.mxu0 %v16787_v21 }
 0x244   :  { %v8568_v23 = vadd.f32 %v8567_v29, %v20278_v5  ;;  %8982 = vmatpush2.bf16.msra.mxu1 %v16790_v41  ;;  %8930 = vmatprep.subr.bf16.mxu0 %v16795_v6  ;;  %v1457_v5 = vld [vmem:[%s24468_s1 + $0x2710] sm:$0x33]  ;;  %v16799_v6 = vld [vmem:[%s24468_s1 + $0x1db8] ss:$52 sps:$4 sm:$0xff]  }
 0x245   :  { %v8569_v35 = vpop.f32.mrf.mxu1  ;;  %8983 = vmatprep.subr.bf16.mxu1 %v16798_v34  ;;  %v16802_v34 = vld [vmem:[%s24468_s1 + $0x2438] ss:$52 sps:$4 sm:$0xff]  }
 0x246   :  { %v8570_v21 = vadd.f32 %v8569_v35, %v20283_v27  ;;  %v16807_v27 = vld [vmem:[%s24468_s1 + $0x1d54] ss:$52 sps:$4 sm:$0xff]  }
 0x247   :  { %v8571_v41 = vpop.f32.mrf.mxu1  ;;  %8931 = vmatpush2.bf16.msra.mxu0 %v16793_v10  ;;  %v15110_v10 = vcombine.high %v1457_v5, %v1457_v5 }
 0x248   :  { %v8572_v29 = vadd.f32 %v8571_v41, %v20296_v20  ;;  %8984 = vmatpush2.bf16.msra.mxu1 %v16796_v22  ;;  %8932 = vmatprep.subr.bf16.mxu0 %v16801_v55  ;;  %v16810_v20 = vld [vmem:[%s24468_s1 + $0x23d4] ss:$52 sps:$4 sm:$0xff]   ;;  %v16805_v41 = vld [vmem:[%s24468_s1 + $0x1d50] ss:$52 sps:$4 sm:$0xff]  }
 0x249   :  { %v20459_v17 = vpop.f32.mrf.mxu1  ;;  %8985 = vmatprep.subr.bf16.mxu1 %v16804_v24  ;;  %v16808_v55 = vld [vmem:[%s24468_s1 + $0x23d0] ss:$52 sps:$4 sm:$0xff]   ;;  %v15109_v24 = vcombine.low %v1457_v5, %v1457_v5  ;;  %v7927_v59 = vand.u32 %v15110_v10, %v19033_v28  ;;  %v8530_v10 = vpop.f32.mrf.mxu0 }
 0x24a   :  { %24525 = vst [vmem:[#allocation23_spill] sm:$0xff] %v20459_v17  ;;  %v16813_v5 = vld [vmem:[%s24468_s1 + $0x2f0] ss:$52 sps:$4 sm:$0xff]  }
 0x24b   :  { %v8577_v22 = vpop.f32.mrf.mxu1  ;;  %8933 = vmatpush2.bf16.msra.mxu0 %v16799_v6 }
 0x24c   :  { %v8578_v35 = vadd.f32 %v8577_v22, %v20311_v60  ;;  %8986 = vmatpush2.bf16.msra.mxu1 %v16802_v34  ;;  %8934 = vmatprep.subr.bf16.mxu0 %v16807_v27  ;;  %v16815_v60 = vld [vmem:[%s24468_s1 + $0x2f4] ss:$52 sps:$4 sm:$0xff]   ;;  %v7924_v27 = vand.u32 %v15109_v24, %v19033_v28 }
 0x24d   :  { %v8579_v17 = vpop.f32.mrf.mxu1  ;;  %8987 = vmatprep.subr.bf16.mxu1 %v16810_v20  ;;  %v16818_v20 = vld [vmem:[%s24468_s1 + $0x28c] ss:$52 sps:$4 sm:$0xff]  }
 0x24e   :  { %v8580_v6 = vadd.f32 %v8579_v17, %v20319_v50  ;;  %v16827_v17 = vld [vmem:[%s24468_s1 + $0x974] ss:$52 sps:$4 sm:$0xff]  }
 0x24f   :  { %v8581_v34 = vpop.f32.mrf.mxu1  ;;  %8935 = vmatpush2.bf16.msra.mxu0 %v16805_v41  ;;  %v16816_v41 = vld [vmem:[%s24468_s1 + $0x288] ss:$52 sps:$4 sm:$0xff]  }
 0x250   :  { %v20480_v22 = vadd.f32 %v8581_v34, %v20332_v2  ;;  %8988 = vmatpush2.bf16.msra.mxu1 %v16808_v55  ;;  %9024 = vmatprep.subr.bf16.mxu0 %v7927_v59  ;;  %v8372_v34 = vadd.f32 %v20195_v57, %v20016_v32  ;;  %v16824_v57 = vld [vmem:[%s24468_s1 + $0x1bc] ss:$52 sps:$4 sm:$0xff]  }
 0x251   :  { %v8583_v9 = vpop.f32.mrf.mxu1  ;;  %9063 = vmatprep.subr.bf16.mxu1 %v16815_v60  ;;  %v16821_v60 = vld [vmem:[%s24468_s1 + $0x224] ss:$52 sps:$4 sm:$0xff]  }
 0x252   :  { %v8620_v50 = vpop.f32.mrf.mxu0  ;;  %8937 = vmatmul.mubr.bf16.vlgmr.msra.gmra.mxu0 %v19054_v38 }
 0x253   :  { %8990 = vmatmul.mubr.bf16.vlgmr.msra.gmra.mxu1 %v19056_v39  ;;  %v8673_v2 = vpop.f32.mrf.mxu1  ;;  %v8621_v55 = vadd.f32 %v8620_v50, %v8568_v23  ;;  %9025 = vmatpush1.bf16.msra.mxu0 %v7924_v27 }
 0x254   :  { %9064 = vmatpush1.bf16.msra.mxu1 %v16813_v5  ;;  %v8622_v24 = vpop.f32.mrf.mxu0  ;;  %8946 = vmatprep.mubr.bf16.mxu0 %v19068_v46  ;;  %v16819_v5 = vld [vmem:[%s24468_s1 + $0x220] ss:$52 sps:$4 sm:$0xff]  }
 0x255   :  { %v8675_v59 = vpop.f32.mrf.mxu1  ;;  %9065 = vmatprep.subr.bf16.mxu1 %v16818_v20  ;;  %v8674_v16 = vadd.f32 %v8673_v2, %v8621_v55  ;;  %v8623_v8 = vadd.f32 %v8622_v24, %v8570_v21  ;;  %8999 = vmatprep.mubr.bf16.mxu1 %v19076_v52  ;;  %v8425_v21 = vadd.f32 %v20265_v31, %v8372_v34 }
 0x256   :  { %9116 = vmatprep.subr.bf16.mxu0 %v16827_v17  ;;  %v8624_v23 = vpop.f32.mrf.mxu0 }
 0x257   :  { %v8677_v27 = vpop.f32.mrf.mxu1  ;;  %v20507_v20 = vadd.f32 %v8675_v59, %v8623_v8  ;;  %v8625_v50 = vadd.f32 %v8624_v23, %v8572_v29  ;;  %v16822_v8 = vld [vmem:[%s24468_s1 + $0x1b8] ss:$52 sps:$4 sm:$0xff]   ;;  %v8478_v29 = vadd.f32 %v20427_v30, %v8425_v21  ;;  %v16830_v23 = vld [vmem:[%s24468_s1 + $0x154] ss:$52 sps:$4 sm:$0xff]  }
 0x258   :  { %9066 = vmatpush1.bf16.msra.mxu1 %v16816_v41  ;;  %v20509_v44 = vpop.f32.mrf.mxu0  ;;  %v10521_v41 = vmax.f32 %v8674_v16, 0.0  ;;  %v16825_v16 = vld [vmem:[%s24468_s1 + $0x970] ss:$52 sps:$4 sm:$0xff]   ;;  %v16833_v21 = vld [vmem:[%s24468_s1 + $0x90c] ss:$52 sps:$4 sm:$0xff]  }
 0x259   :  { %24526 = vst [vmem:[#allocation24_spill] sm:$0xff] %v20507_v20  ;;  %v20511_v14 = vpop.f32.mrf.mxu1  ;;  %9067 = vmatprep.subr.bf16.mxu1 %v16821_v60  ;;  %v8678_v17 = vadd.f32 %v8677_v27, %v8625_v50  ;;  %v24527_v60 = vmov 0   ;;  %v8531_v27 = vadd.f32 %v8530_v10, %v8478_v29  ;;  %v16836_v29 = vld [vmem:[%s24468_s1 + $0xec] ss:$52 sps:$4 sm:$0xff]  }
 0x25a   :  { %v8630_v2 = vpop.f32.mrf.mxu0  ;;  %8947 = vmatmul.mubr.bf16.gmra.mxu0 %v19097_v62 }
 0x25b   :  { %v8683_v55 = vpop.f32.mrf.mxu1  ;;  %9000 = vmatmul.mubr.bf16.gmra.mxu1 %v19099_v1  ;;  %v10534_v24 = vmax.f32 %v8678_v17, 0.0  ;;  %v8631_v59 = vadd.f32 %v8630_v2, %v8578_v35  ;;  %9042 = vmatprep.mubr.bf16.mxu0 %v24527_v60  ;;  %v16828_v35 = vld [vmem:[%s24468_s1 + $0x150] ss:$52 sps:$4 sm:$0xff]   ;;  %v8584_v17 = vadd.f32 %v8583_v9, %v8531_v27  ;;  %v16831_v9 = vld [vmem:[%s24468_s1 + $0x908] ss:$52 sps:$4 sm:$0xff]  }
 0x25c   :  { %9068 = vmatpush1.bf16.msra.mxu1 %v16819_v5  ;;  %v8632_v31 = vpop.f32.mrf.mxu0  ;;  %9095 = vmatprep.mubr.bf16.mxu1 %v18444_v53 }
 0x25d   :  { %v8685_v34 = vpop.f32.mrf.mxu1  ;;  %9069 = vmatprep.subr.bf16.mxu1 %v16824_v57  ;;  %v20528_v50 = vpack.c.bf16 %v10534_v24, %v10521_v41  ;;  %v8633_v20 = vadd.f32 %v8632_v31, %v8580_v6  ;;  %v8684_v30 = vadd.f32 %v8683_v55, %v8631_v59  ;;  %v16839_v31 = vld [vmem:[%s24468_s1 + $0x8a4] ss:$52 sps:$4 sm:$0xff]  }
 0x25e   :  { %v8634_v5 = vpop.f32.mrf.mxu0 }
 0x25f   :  { %24528 = vst [vmem:[#allocation25_spill] sm:$0xff] %v20528_v50  ;;  %v8687_v57 = vpop.f32.mrf.mxu1  ;;  %v8635_v10 = vadd.f32 %v8634_v5, %v20480_v22  ;;  %v8686_v2 = vadd.f32 %v8685_v34, %v8633_v20  ;;  %v10547_v59 = vmax.f32 %v8684_v30, 0.0  ;;  %v16842_v34 = vld [vmem:[%s24468_s1 + $0x84] ss:$52 sps:$4 sm:$0xff]   ;;  %v16845_v5 = vld [vmem:[%s24468_s1 + $0x83c] ss:$52 sps:$4 sm:$0xff]  }
 0x260   :  { %9070 = vmatpush1.bf16.msra.mxu1 %v16822_v8  ;;  %v8636_v6 = vpop.f32.mrf.mxu0  ;;  %v16834_v8 = vld [vmem:[%s24468_s1 + $0xe8] ss:$52 sps:$4 sm:$0xff]  }
 0x261   :  { %v8689_v55 = vpop.f32.mrf.mxu1  ;;  %9071 = vmatprep.subr.bf16.mxu1 %v16830_v23  ;;  %v8637_v41 = vadd.f32 %v8636_v6, %v8584_v17  ;;  %v8688_v24 = vadd.f32 %v8687_v57, %v8635_v10  ;;  %v10548_v23 = vmax.f32 %v8686_v2, 0.0  ;;  %v16843_v17 = vld [vmem:[%s24468_s1 + $0x838] ss:$52 sps:$4 sm:$0xff]   ;;  %v16851_v2 = vld [vmem:[%s24468_s1 + $0x7d4] ss:$52 sps:$4 sm:$0xff]  }
 0x262   :  { %15122 = vmatmul.mubr.msk.bf16.vlgmr.msra.gmra.mxu0 %vm7900_vm2, %v19123_v11  ;;  %v16846_v10 = vld [vmem:[%s24468_s1 + $0x18] ss:$52 sps:$4 sm:$0xff]   ;;  %v16854_v6 = vld [vmem:[%s24468_s1 + $0x634] ss:$52 sps:$4 sm:$0xff]  }
 0x263   :  { %v10560_v22 = vmax.f32 %v8688_v24, 0.0  ;;  %v8690_v20 = vadd.f32 %v8689_v55, %v8637_v41  ;;  %9117 = vmatpush1.bf16.msra.mxu0 %v16825_v16  ;;  %9052 = vmatprep.mubr.bf16.mxu0 %v24527_v60  ;;  %v16837_v16 = vld [vmem:[%s24468_s1 + $0x8a0] ss:$52 sps:$4 sm:$0xff]   ;;  %v16849_v55 = vld [vmem:[%s24468_s1 + $0x7d0] ss:$52 sps:$4 sm:$0xff]  }
 0x264   :  { %9072 = vmatpush1.bf16.msra.mxu1 %v16828_v35  ;;  %9118 = vmatprep.subr.bf16.mxu0 %v16833_v21  ;;  %v16840_v35 = vld [vmem:[%s24468_s1 + $0x80] ss:$52 sps:$4 sm:$0xff]   ;;  %v16848_v21 = vld [vmem:[%s24468_s1 + $0x1c] ss:$52 sps:$4 sm:$0xff]  }
 0x265   :  { %9073 = vmatprep.subr.bf16.mxu1 %v16836_v29  ;;  %v20557_v27 = vpack.c.bf16 %v10560_v22, %v10547_v59  ;;  %v10561_v30 = vmax.f32 %v8690_v20, 0.0  ;;  %v16852_v29 = vld [vmem:[%s24468_s1 + $0x630] ss:$52 sps:$4 sm:$0xff]   ;;  %v16857_v41 = vld [vmem:[%s24468_s1 + $0x76c] ss:$52 sps:$4 sm:$0xff]  }
 0x266   :  { %v16860_v24 = vld [vmem:[%s24468_s1 + $0x5cc] ss:$52 sps:$4 sm:$0xff]   ;;  %v16858_v59 = vld [vmem:[%s24468_s1 + $0x5c8] ss:$52 sps:$4 sm:$0xff]   ;;  %v16863_v22 = vld [vmem:[%s24468_s1 + $0x704] ss:$52 sps:$4 sm:$0xff]  }
 0x267   :  { %24529 = vst [vmem:[#allocation26_spill] sm:$0xff] %v20557_v27  ;;  %9119 = vmatpush1.bf16.msra.mxu0 %v16831_v9  ;;  %v20569_v57 = vpack.c.bf16 %v10561_v30, %v10548_v23  ;;  %v16855_v9 = vld [vmem:[%s24468_s1 + $0x768] ss:$52 sps:$4 sm:$0xff]   ;;  %v16866_v20 = vld [vmem:[%s24468_s1 + $0x564] ss:$52 sps:$4 sm:$0xff]  }
 0x268   :  { %9074 = vmatpush1.bf16.msra.mxu1 %v16834_v8  ;;  %9120 = vmatprep.subr.bf16.mxu0 %v16839_v31  ;;  %v16861_v8 = vld [vmem:[%s24468_s1 + $0x700] ss:$52 sps:$4 sm:$0xff]   ;;  %v16872_v23 = vld [vmem:[%s24468_s1 + $0x4fc] ss:$52 sps:$4 sm:$0xff]   ;;  %v16867_v30 = vld [vmem:[%s24468_s1 + $0x698] ss:$52 sps:$4 sm:$0xff]  }
 0x269   :  { %24530 = vst [vmem:[#allocation27_spill] sm:$0xff] %v20569_v57  ;;  %9075 = vmatprep.subr.bf16.mxu1 %v16842_v34  ;;  %v16864_v31 = vld [vmem:[%s24468_s1 + $0x560] ss:$52 sps:$4 sm:$0xff]   ;;  %v16869_v34 = vld [vmem:[%s24468_s1 + $0x69c] ss:$52 sps:$4 sm:$0xff]  }
 0x26a   :  { %15123 = vmatmul.mubr.msk.bf16.gmra.mxu0 %vm7900_vm2, %v19158_v26  ;;  %v16924_v27 = vld [vmem:[%s24468_s1 + $0xe50] ss:$52 sps:$4 sm:$0xff]   ;;  %v16929_v57 = vld [vmem:[%s24468_s1 + $0x160c] ss:$52 sps:$4 sm:$0xff]  }
 0x26b   :  { %9121 = vmatpush1.bf16.msra.mxu0 %v16837_v16  ;;  %9148 = vmatprep.mubr.bf16.mxu0 %v18446_v54  ;;  %v16870_v16 = vld [vmem:[%s24468_s1 + $0x4f8] ss:$52 sps:$4 sm:$0xff]  }
 0x26c   :  { %9076 = vmatpush1.bf16.msra.mxu1 %v16840_v35  ;;  %9122 = vmatprep.subr.bf16.mxu0 %v16845_v5  ;;  %v16875_v35 = vld [vmem:[%s24468_s1 + $0xcb4] ss:$52 sps:$4 sm:$0xff]  }
 0x26d   :  { %9077 = vmatprep.subr.bf16.mxu1 %v16848_v21  ;;  %v16878_v5 = vld [vmem:[%s24468_s1 + $0x494] ss:$52 sps:$4 sm:$0xff]   ;;  %v16873_v21 = vld [vmem:[%s24468_s1 + $0xcb0] ss:$52 sps:$4 sm:$0xff]  }
 0x26f   :  { %9123 = vmatpush1.bf16.msra.mxu0 %v16843_v17  ;;  %v16876_v17 = vld [vmem:[%s24468_s1 + $0x490] ss:$52 sps:$4 sm:$0xff]  }
 0x270   :  { %9078 = vmatpush1.bf16.msra.mxu1 %v16846_v10  ;;  %9124 = vmatprep.subr.bf16.mxu0 %v16851_v2  ;;  %v16881_v10 = vld [vmem:[%s24468_s1 + $0xc4c] ss:$52 sps:$4 sm:$0xff]  }
 0x271   :  { %9079 = vmatprep.subr.bf16.mxu1 %v16854_v6  ;;  %v16884_v2 = vld [vmem:[%s24468_s1 + $0x42c] ss:$52 sps:$4 sm:$0xff]   ;;  %v16879_v6 = vld [vmem:[%s24468_s1 + $0xc48] ss:$52 sps:$4 sm:$0xff]  }
 0x273   :  { %9125 = vmatpush1.bf16.msra.mxu0 %v16849_v55  ;;  %v16882_v55 = vld [vmem:[%s24468_s1 + $0x428] ss:$52 sps:$4 sm:$0xff]  }
 0x274   :  { %9080 = vmatpush2.bf16.msra.mxu1 %v16852_v29  ;;  %9126 = vmatprep.subr.bf16.mxu0 %v16857_v41  ;;  %v16887_v29 = vld [vmem:[%s24468_s1 + $0xbe4] ss:$52 sps:$4 sm:$0xff]  }
 0x275   :  { %9081 = vmatprep.subr.bf16.mxu1 %v16860_v24  ;;  %v16890_v41 = vld [vmem:[%s24468_s1 + $0x3c4] ss:$52 sps:$4 sm:$0xff]   ;;  %v16885_v24 = vld [vmem:[%s24468_s1 + $0xbe0] ss:$52 sps:$4 sm:$0xff]  }
 0x277   :  { %9127 = vmatpush1.bf16.msra.mxu0 %v16855_v9  ;;  %v16888_v9 = vld [vmem:[%s24468_s1 + $0x3c0] ss:$52 sps:$4 sm:$0xff]  }
 0x278   :  { %9082 = vmatpush2.bf16.msra.mxu1 %v16858_v59  ;;  %9128 = vmatprep.subr.bf16.mxu0 %v16863_v22  ;;  %v16893_v59 = vld [vmem:[%s24468_s1 + $0xb7c] ss:$52 sps:$4 sm:$0xff]  }
 0x279   :  { %9083 = vmatprep.subr.bf16.mxu1 %v16866_v20  ;;  %v16896_v22 = vld [vmem:[%s24468_s1 + $0x35c] ss:$52 sps:$4 sm:$0xff]   ;;  %v16891_v20 = vld [vmem:[%s24468_s1 + $0xb78] ss:$52 sps:$4 sm:$0xff]  }
 0x27b   :  { %9129 = vmatpush1.bf16.msra.mxu0 %v16861_v8  ;;  %v16894_v8 = vld [vmem:[%s24468_s1 + $0x358] ss:$52 sps:$4 sm:$0xff]  }
 0x27c   :  { %9084 = vmatpush2.bf16.msra.mxu1 %v16864_v31  ;;  %9130 = vmatprep.subr.bf16.mxu0 %v16869_v34  ;;  %v24483_v31 = vsub.s32 4, %v19265_v25  ;;  %v16899_v34 = vld [vmem:[%s24468_s1 + $0xb14] ss:$52 sps:$4 sm:$0xff]  }
 0x27d   :  { %9085 = vmatprep.subr.bf16.mxu1 %v16872_v23  ;;  %v16902_v23 = vld [vmem:[%s24468_s1 + $0xff4] ss:$52 sps:$4 sm:$0xff]  }
 0x27f   :  { %9131 = vmatpush1.bf16.msra.mxu0 %v16867_v30  ;;  %v16897_v30 = vld [vmem:[%s24468_s1 + $0xb10] ss:$52 sps:$4 sm:$0xff]  }
 0x280   :  { %9086 = vmatpush2.bf16.msra.mxu1 %v16870_v16  ;;  %9132 = vmatprep.subr.bf16.mxu0 %v16875_v35  ;;  %v16900_v16 = vld [vmem:[%s24468_s1 + $0xff0] ss:$52 sps:$4 sm:$0xff]   ;;  %v1488_v35 = vsub.s32 5, %v19265_v25 }
 0x281   :  { %9087 = vmatprep.subr.bf16.mxu1 %v16878_v5  ;;  %v18229_v5 = vld [vmem:[%s24470_s2] sm:$0xff] }
 0x283   :  { %9133 = vmatpush2.bf16.msra.mxu0 %v16873_v21  ;;  %v1485_v21 = vrot.slane %v18229_v5, %v24483_v31  ;;  %v16921_v31 = vld [vmem:[%s24468_s1 + $0x1670] ss:$52 sps:$4 sm:$0xff]  }
 0x284   :  { %9088 = vmatpush2.bf16.msra.mxu1 %v16876_v17  ;;  %9134 = vmatprep.subr.bf16.mxu0 %v16881_v10  ;;  %v16905_v17 = vld [vmem:[%s24468_s1 + $0xaac] ss:$52 sps:$4 sm:$0xff]  }
 0x285   :  { %9089 = vmatprep.subr.bf16.mxu1 %v16884_v2  ;;  %v16908_v10 = vld [vmem:[%s24468_s1 + $0xf8c] ss:$52 sps:$4 sm:$0xff]   ;;  %v20704_v2 = vrot.slane %v18229_v5, %v1488_v35  ;;  %v16917_v5 = vld [vmem:[%s24468_s1 + $0x9dc] ss:$52 sps:$4 sm:$0xff]  }
 0x287   :  { %9135 = vmatpush2.bf16.msra.mxu0 %v16879_v6  ;;  %24531 = vst [vmem:[#allocation28_spill] sm:$0xff] %v20704_v2  ;;  %v16903_v6 = vld [vmem:[%s24468_s1 + $0xaa8] ss:$52 sps:$4 sm:$0xff]  }
 0x288   :  { %9090 = vmatpush2.bf16.msra.mxu1 %v16882_v55  ;;  %9136 = vmatprep.subr.bf16.mxu0 %v16887_v29  ;;  %v16906_v55 = vld [vmem:[%s24468_s1 + $0xf88] ss:$52 sps:$4 sm:$0xff]  }
 0x289   :  { %9091 = vmatprep.subr.bf16.mxu1 %v16890_v41 }
 0x28b   :  { %9137 = vmatpush2.bf16.msra.mxu0 %v16885_v24  ;;  %v16911_v24 = vld [vmem:[%s24468_s1 + $0xa44] ss:$52 sps:$4 sm:$0xff]  }
 0x28c   :  { %9092 = vmatpush2.bf16.msra.mxu1 %v16888_v9  ;;  %9138 = vmatprep.subr.bf16.mxu0 %v16893_v59 }
 0x28d   :  { %9093 = vmatprep.subr.bf16.mxu1 %v16896_v22 }
 0x28f   :  { %9139 = vmatpush2.bf16.msra.mxu0 %v16891_v20  ;;  %v16914_v20 = vld [vmem:[%s24468_s1 + $0xf24] ss:$52 sps:$4 sm:$0xff]  }
 0x290   :  { %9094 = vmatpush2.bf16.msra.mxu1 %v16894_v8  ;;  %9140 = vmatprep.subr.bf16.mxu0 %v16899_v34 }
 0x291   :  { %9169 = vmatprep.subr.bf16.mxu1 %v16902_v23  ;;  %v16909_v23 = vld [vmem:[%s24468_s1 + $0xa40] ss:$52 sps:$4 sm:$0xff]  }
 0x292   :  { %v8726_v29 = vpop.f32.mrf.mxu0 }
 0x293   :  { %v8779_v41 = vpop.f32.mrf.mxu1  ;;  %9096 = vmatmul.mubr.bf16.vlgmr.msra.gmra.mxu1 %v18513_v12  ;;  %v8727_v9 = vadd.f32 %v8726_v29, %v1485_v21  ;;  %9141 = vmatpush2.bf16.msra.mxu0 %v16897_v30  ;;  %v16912_v30 = vld [vmem:[%s24468_s1 + $0xf20] ss:$52 sps:$4 sm:$0xff]  }
 0x294   :  { %9170 = vmatpush1.bf16.msra.mxu1 %v16900_v16  ;;  %v8728_v59 = vpop.f32.mrf.mxu0  ;;  %9142 = vmatprep.subr.bf16.mxu0 %v16905_v17 }
 0x295   :  { %v8781_v22 = vpop.f32.mrf.mxu1  ;;  %9171 = vmatprep.subr.bf16.mxu1 %v16908_v10  ;;  %v20719_v8 = vadd.f32 %v8779_v41, %v8727_v9  ;;  %v8729_v34 = vadd.f32 %v8728_v59, %v20704_v2  ;;  %9105 = vmatprep.mubr.bf16.mxu1 %v18588_v37  ;;  %v16920_v9 = vld [vmem:[%s24468_s1 + $0xebc] ss:$52 sps:$4 sm:$0xff]  }
 0x296   :  { %v8730_v16 = vpop.f32.mrf.mxu0 }
 0x297   :  { %v8783_v35 = vpop.f32.mrf.mxu1  ;;  %v20732_v17 = vadd.f32 %v8781_v22, %v8729_v34  ;;  %v8731_v10 = vadd.f32 %v8730_v16, %v1485_v21  ;;  %9143 = vmatpush2.bf16.msra.mxu0 %v16903_v6  ;;  %v16915_v22 = vld [vmem:[%s24468_s1 + $0x9d8] ss:$52 sps:$4 sm:$0xff]   ;;  %v16926_v16 = vld [vmem:[%s24468_s1 + $0xe54] ss:$52 sps:$4 sm:$0xff]  }
 0x298   :  { %9172 = vmatpush1.bf16.msra.mxu1 %v16906_v55  ;;  %v20734_v29 = vpop.f32.mrf.mxu0  ;;  %9144 = vmatprep.subr.bf16.mxu0 %v16911_v24  ;;  %v16918_v6 = vld [vmem:[%s24468_s1 + $0xeb8] ss:$52 sps:$4 sm:$0xff]   ;;  %v16923_v55 = vld [vmem:[%s24468_s1 + $0x1674] ss:$52 sps:$4 sm:$0xff]  }
 0x299   :  { %24532 = vst [vmem:[#allocation29_spill] sm:$0xff] %v20734_v29  ;;  %v20736_v41 = vpop.f32.mrf.mxu1  ;;  %9173 = vmatprep.subr.bf16.mxu1 %v16914_v20  ;;  %v20741_v59 = vadd.f32 %v8783_v35, %v8731_v10  ;;  %v17689_v29 = vld [vmem:[%s24468_s1 + $0x2a0] ss:$52 sps:$4 sm:$0xff]  }
 0x29a   :  { %24533 = vst [vmem:[#allocation30_spill] sm:$0xff] %v20736_v41  ;;  %v8736_v24 = vpop.f32.mrf.mxu0 }
 0x29b   :  { %v8789_v20 = vpop.f32.mrf.mxu1  ;;  %9106 = vmatmul.mubr.bf16.gmra.mxu1 %v18602_v42  ;;  %9145 = vmatpush2.bf16.msra.mxu0 %v16909_v23  ;;  %v8737_v34 = vadd.f32 %v8736_v24, %v1485_v21 }
 0x29c   :  { %9174 = vmatpush1.bf16.msra.mxu1 %v16912_v30  ;;  %9146 = vmatprep.subr.bf16.mxu0 %v16917_v5  ;;  %v8738_v35 = vpop.f32.mrf.mxu0 }
 0x29d   :  { %9175 = vmatprep.subr.bf16.mxu1 %v16920_v9  ;;  %v8791_v10 = vpop.f32.mrf.mxu1  ;;  %v8739_v23 = vadd.f32 %v8738_v35, %v20704_v2  ;;  %v20763_v30 = vadd.f32 %v8789_v20, %v8737_v34  ;;  %9201 = vmatprep.mubr.bf16.mxu1 %v18660_v63  ;;  %v16932_v35 = vld [vmem:[%s24468_s1 + $0xdec] ss:$52 sps:$4 sm:$0xff]   ;;  %v16927_v34 = vld [vmem:[%s24468_s1 + $0x1608] ss:$52 sps:$4 sm:$0xff]  }
 0x29e   :  { %v8740_v5 = vpop.f32.mrf.mxu0  ;;  %v17690_v2 = vld [vmem:[%s24468_s1 + $0x920] ss:$52 sps:$4 sm:$0xff]  }
 0x29f   :  { %9147 = vmatpush2.bf16.msra.mxu0 %v16915_v22  ;;  %v8741_v9 = vadd.f32 %v8740_v5, %v1485_v21  ;;  %v20766_v24 = vadd.f32 %v8791_v10, %v8739_v23  ;;  %v8793_v20 = vpop.f32.mrf.mxu1  ;;  %v16930_v21 = vld [vmem:[%s24468_s1 + $0xde8] ss:$52 sps:$4 sm:$0xff]   ;;  %v16936_v10 = vld [vmem:[%s24468_s1 + $0xd80] ss:$52 sps:$4 sm:$0xff]   ;;  %v16942_v23 = vld [vmem:[%s24468_s1 + $0xd18] ss:$52 sps:$4 sm:$0xff]  }
 0x2a0   :  { %9176 = vmatpush1.bf16.msra.mxu1 %v16918_v6  ;;  %9222 = vmatprep.subr.bf16.mxu0 %v16923_v55  ;;  %v16935_v6 = vld [vmem:[%s24468_s1 + $0x15a4] ss:$52 sps:$4 sm:$0xff]   ;;  %v16947_v5 = vld [vmem:[%s24468_s1 + $0x14d4] ss:$52 sps:$4 sm:$0xff]  }
 0x2a1   :  { %9177 = vmatprep.subr.bf16.mxu1 %v16926_v16  ;;  %v20780_v22 = vadd.f32 %v8793_v20, %v8741_v9  ;;  %v16938_v55 = vld [vmem:[%s24468_s1 + $0xd84] ss:$52 sps:$4 sm:$0xff]   ;;  %v16933_v16 = vld [vmem:[%s24468_s1 + $0x15a0] ss:$52 sps:$4 sm:$0xff]  }
 0x2a2   :  { %9149 = vmatmul.mubr.bf16.vlgmr.msra.gmra.mxu0 %v18515_v13  ;;  %v16950_v9 = vld [vmem:[%s24468_s1 + $0x1334] ss:$52 sps:$4 sm:$0xff]   ;;  %v16948_v20 = vld [vmem:[%s24468_s1 + $0x1330] ss:$52 sps:$4 sm:$0xff]  }
 0x2a3   :  { %9223 = vmatpush1.bf16.msra.mxu0 %v16921_v31  ;;  %9158 = vmatprep.mubr.bf16.mxu0 %v18604_v43  ;;  %v16939_v31 = vld [vmem:[%s24468_s1 + $0x1538] ss:$52 sps:$4 sm:$0xff]  }
 0x2a4   :  { %9178 = vmatpush1.bf16.msra.mxu1 %v16924_v27  ;;  %9224 = vmatprep.subr.bf16.mxu0 %v16929_v57  ;;  %v16941_v27 = vld [vmem:[%s24468_s1 + $0x153c] ss:$52 sps:$4 sm:$0xff]  }
 0x2a5   :  { %9179 = vmatprep.subr.bf16.mxu1 %v16932_v35  ;;  %v16944_v57 = vld [vmem:[%s24468_s1 + $0xd1c] ss:$52 sps:$4 sm:$0xff]  }
 0x2a6   :  { %v16945_v35 = vld [vmem:[%s24468_s1 + $0x14d0] ss:$52 sps:$4 sm:$0xff]  }
 0x2a7   :  { %9225 = vmatpush1.bf16.msra.mxu0 %v16927_v34  ;;  %v16953_v34 = vld [vmem:[%s24468_s1 + $0x146c] ss:$52 sps:$4 sm:$0xff]  }
 0x2a8   :  { %9180 = vmatpush1.bf16.msra.mxu1 %v16930_v21  ;;  %9226 = vmatprep.subr.bf16.mxu0 %v16935_v6  ;;  %v16956_v21 = vld [vmem:[%s24468_s1 + $0x12cc] ss:$52 sps:$4 sm:$0xff]   ;;  %v16951_v6 = vld [vmem:[%s24468_s1 + $0x1468] ss:$52 sps:$4 sm:$0xff]  }
 0x2a9   :  { %9181 = vmatprep.subr.bf16.mxu1 %v16938_v55  ;;  %v16954_v55 = vld [vmem:[%s24468_s1 + $0x12c8] ss:$52 sps:$4 sm:$0xff]  }
 0x2aa   :  { %9159 = vmatmul.mubr.bf16.gmra.mxu0 %v18624_v49 }
 0x2ab   :  { %9227 = vmatpush1.bf16.msra.mxu0 %v16933_v16  ;;  %9254 = vmatprep.mubr.bf16.mxu0 %v18662_v0  ;;  %v16959_v16 = vld [vmem:[%s24468_s1 + $0x1404] ss:$52 sps:$4 sm:$0xff]  }
 0x2ac   :  { %9182 = vmatpush1.bf16.msra.mxu1 %v16936_v10  ;;  %9228 = vmatprep.subr.bf16.mxu0 %v16941_v27  ;;  %v16962_v10 = vld [vmem:[%s24468_s1 + $0x1264] ss:$52 sps:$4 sm:$0xff]   ;;  %v16957_v27 = vld [vmem:[%s24468_s1 + $0x1400] ss:$52 sps:$4 sm:$0xff]  }
 0x2ad   :  { %9183 = vmatprep.subr.bf16.mxu1 %v16944_v57  ;;  %v16960_v57 = vld [vmem:[%s24468_s1 + $0x1260] ss:$52 sps:$4 sm:$0xff]  }
 0x2af   :  { %9229 = vmatpush1.bf16.msra.mxu0 %v16939_v31  ;;  %v16965_v31 = vld [vmem:[%s24468_s1 + $0x139c] ss:$52 sps:$4 sm:$0xff]  }
 0x2b0   :  { %9184 = vmatpush1.bf16.msra.mxu1 %v16942_v23  ;;  %9230 = vmatprep.subr.bf16.mxu0 %v16947_v5  ;;  %v16968_v23 = vld [vmem:[%s24468_s1 + $0x11fc] ss:$52 sps:$4 sm:$0xff]   ;;  %v16963_v5 = vld [vmem:[%s24468_s1 + $0x1398] ss:$52 sps:$4 sm:$0xff]  }
 0x2b1   :  { %9185 = vmatprep.subr.bf16.mxu1 %v16950_v9  ;;  %v16966_v9 = vld [vmem:[%s24468_s1 + $0x11f8] ss:$52 sps:$4 sm:$0xff]  }
 0x2b3   :  { %9231 = vmatpush1.bf16.msra.mxu0 %v16945_v35  ;;  %v16971_v35 = vld [vmem:[%s24468_s1 + $0x19b4] ss:$52 sps:$4 sm:$0xff]  }
 0x2b4   :  { %9186 = vmatpush2.bf16.msra.mxu1 %v16948_v20  ;;  %9232 = vmatprep.subr.bf16.mxu0 %v16953_v34  ;;  %v16974_v20 = vld [vmem:[%s24468_s1 + $0x1194] ss:$52 sps:$4 sm:$0xff]   ;;  %v16969_v34 = vld [vmem:[%s24468_s1 + $0x19b0] ss:$52 sps:$4 sm:$0xff]  }
 0x2b5   :  { %9187 = vmatprep.subr.bf16.mxu1 %v16956_v21  ;;  %v16972_v21 = vld [vmem:[%s24468_s1 + $0x1190] ss:$52 sps:$4 sm:$0xff]  }
 0x2b7   :  { %9233 = vmatpush1.bf16.msra.mxu0 %v16951_v6  ;;  %v16977_v6 = vld [vmem:[%s24468_s1 + $0x194c] ss:$52 sps:$4 sm:$0xff]  }
 0x2b8   :  { %9188 = vmatpush2.bf16.msra.mxu1 %v16954_v55  ;;  %9234 = vmatprep.subr.bf16.mxu0 %v16959_v16  ;;  %v16980_v55 = vld [vmem:[%s24468_s1 + $0x112c] ss:$52 sps:$4 sm:$0xff]   ;;  %v16975_v16 = vld [vmem:[%s24468_s1 + $0x1948] ss:$52 sps:$4 sm:$0xff]  }
 0x2b9   :  { %9189 = vmatprep.subr.bf16.mxu1 %v16962_v10  ;;  %v16978_v10 = vld [vmem:[%s24468_s1 + $0x1128] ss:$52 sps:$4 sm:$0xff]  }
 0x2bb   :  { %9235 = vmatpush1.bf16.msra.mxu0 %v16957_v27  ;;  %v16983_v27 = vld [vmem:[%s24468_s1 + $0x18e4] ss:$52 sps:$4 sm:$0xff]  }
 0x2bc   :  { %9190 = vmatpush2.bf16.msra.mxu1 %v16960_v57  ;;  %9236 = vmatprep.subr.bf16.mxu0 %v16965_v31  ;;  %v16986_v57 = vld [vmem:[%s24468_s1 + $0x10c4] ss:$52 sps:$4 sm:$0xff]   ;;  %v16981_v31 = vld [vmem:[%s24468_s1 + $0x18e0] ss:$52 sps:$4 sm:$0xff]  }
 0x2bd   :  { %9191 = vmatprep.subr.bf16.mxu1 %v16968_v23  ;;  %v16984_v23 = vld [vmem:[%s24468_s1 + $0x10c0] ss:$52 sps:$4 sm:$0xff]  }
 0x2bf   :  { %9237 = vmatpush1.bf16.msra.mxu0 %v16963_v5  ;;  %v16989_v5 = vld [vmem:[%s24468_s1 + $0x187c] ss:$52 sps:$4 sm:$0xff]  }
 0x2c0   :  { %9192 = vmatpush2.bf16.msra.mxu1 %v16966_v9  ;;  %9238 = vmatprep.subr.bf16.mxu0 %v16971_v35  ;;  %v16992_v9 = vld [vmem:[%s24468_s1 + $0x105c] ss:$52 sps:$4 sm:$0xff]   ;;  %v16987_v35 = vld [vmem:[%s24468_s1 + $0x1878] ss:$52 sps:$4 sm:$0xff]  }
 0x2c1   :  { %9193 = vmatprep.subr.bf16.mxu1 %v16974_v20  ;;  %v16990_v20 = vld [vmem:[%s24468_s1 + $0x1058] ss:$52 sps:$4 sm:$0xff]  }
 0x2c3   :  { %9239 = vmatpush2.bf16.msra.mxu0 %v16969_v34  ;;  %v16995_v34 = vld [vmem:[%s24468_s1 + $0x1814] ss:$52 sps:$4 sm:$0xff]  }
 0x2c4   :  { %9194 = vmatpush2.bf16.msra.mxu1 %v16972_v21  ;;  %9240 = vmatprep.subr.bf16.mxu0 %v16977_v6  ;;  %v16998_v21 = vld [vmem:[%s24468_s1 + $0x1cf4] ss:$52 sps:$4 sm:$0xff]   ;;  %v16993_v6 = vld [vmem:[%s24468_s1 + $0x1810] ss:$52 sps:$4 sm:$0xff]  }
 0x2c5   :  { %9195 = vmatprep.subr.bf16.mxu1 %v16980_v55  ;;  %v16996_v55 = vld [vmem:[%s24468_s1 + $0x1cf0] ss:$52 sps:$4 sm:$0xff]  }
 0x2c7   :  { %9241 = vmatpush2.bf16.msra.mxu0 %v16975_v16  ;;  %v20918_v16 = vpop.f32.mrf.mxu0 }
 0x2c8   :  { %9196 = vmatpush2.bf16.msra.mxu1 %v16978_v10  ;;  %9242 = vmatprep.subr.bf16.mxu0 %v16983_v27  ;;  %24534 = vst [vmem:[#allocation31_spill] sm:$0xff] %v20918_v16  ;;  %v20920_v10 = vpop.f32.mrf.mxu1  ;;  %v17001_v27 = vld [vmem:[%s24468_s1 + $0x17ac] ss:$52 sps:$4 sm:$0xff]  }
 0x2c9   :  { %9197 = vmatprep.subr.bf16.mxu1 %v16986_v57  ;;  %24535 = vst [vmem:[#allocation32_spill] sm:$0xff] %v20920_v10  ;;  %v17004_v57 = vld [vmem:[%s24468_s1 + $0x1c8c] ss:$52 sps:$4 sm:$0xff]   ;;  %v17010_v10 = vld [vmem:[%s24468_s1 + $0x1c24] ss:$52 sps:$4 sm:$0xff]  }
 0x2cb   :  { %9243 = vmatpush2.bf16.msra.mxu0 %v16981_v31  ;;  %v16999_v31 = vld [vmem:[%s24468_s1 + $0x17a8] ss:$52 sps:$4 sm:$0xff]  }
 0x2cc   :  { %9198 = vmatpush2.bf16.msra.mxu1 %v16984_v23  ;;  %9244 = vmatprep.subr.bf16.mxu0 %v16989_v5 }
 0x2cd   :  { %9199 = vmatprep.subr.bf16.mxu1 %v16992_v9 }
 0x2cf   :  { %9245 = vmatpush2.bf16.msra.mxu0 %v16987_v35  ;;  %v17002_v35 = vld [vmem:[%s24468_s1 + $0x1c88] ss:$52 sps:$4 sm:$0xff]  }
 0x2d0   :  { %9200 = vmatpush2.bf16.msra.mxu1 %v16990_v20  ;;  %9246 = vmatprep.subr.bf16.mxu0 %v16995_v34 }
 0x2d1   :  { %9275 = vmatprep.subr.bf16.mxu1 %v16998_v21  ;;  %v17007_v21 = vld [vmem:[%s24468_s1 + $0x1744] ss:$52 sps:$4 sm:$0xff]  }
 0x2d2   :  { %v8832_v23 = vpop.f32.mrf.mxu0 }
 0x2d3   :  { %v8885_v5 = vpop.f32.mrf.mxu1  ;;  %9202 = vmatmul.mubr.bf16.vlgmr.msra.gmra.mxu1 %v18789_v47  ;;  %v8833_v9 = vadd.f32 %v8832_v23, %v20719_v8  ;;  %9247 = vmatpush2.bf16.msra.mxu0 %v16993_v6  ;;  %v17005_v6 = vld [vmem:[%s24468_s1 + $0x1740] ss:$52 sps:$4 sm:$0xff]  }
 0x2d4   :  { %9276 = vmatpush1.bf16.msra.mxu1 %v16996_v55  ;;  %v8834_v20 = vpop.f32.mrf.mxu0  ;;  %9248 = vmatprep.subr.bf16.mxu0 %v17001_v27  ;;  %v17008_v55 = vld [vmem:[%s24468_s1 + $0x1c20] ss:$52 sps:$4 sm:$0xff]  }
 0x2d5   :  { %v8887_v34 = vpop.f32.mrf.mxu1  ;;  %9277 = vmatprep.subr.bf16.mxu1 %v17004_v57  ;;  %v20942_v16 = vadd.f32 %v8885_v5, %v8833_v9  ;;  %v8835_v8 = vadd.f32 %v8834_v20, %v20732_v17  ;;  %9211 = vmatprep.mubr.bf16.mxu1 %v18811_v58  ;;  %v17013_v9 = vld [vmem:[%s24468_s1 + $0x16dc] ss:$52 sps:$4 sm:$0xff]  }
 0x2d6   :  { %v8836_v27 = vpop.f32.mrf.mxu0  ;;  %v17016_v20 = vld [vmem:[%s24468_s1 + $0x1bbc] ss:$52 sps:$4 sm:$0xff]  }
 0x2d7   :  { %v8889_v57 = vpop.f32.mrf.mxu1  ;;  %v20952_v23 = vadd.f32 %v8887_v34, %v8835_v8  ;;  %v8837_v50 = vadd.f32 %v8836_v27, %v20741_v59  ;;  %9249 = vmatpush2.bf16.msra.mxu0 %v16999_v31  ;;  %v17019_v27 = vld [vmem:[%s24468_s1 + $0x2374] ss:$52 sps:$4 sm:$0xff]  }
 0x2d8   :  { %9278 = vmatpush1.bf16.msra.mxu1 %v17002_v35  ;;  %v20955_v5 = vpop.f32.mrf.mxu0  ;;  %9250 = vmatprep.subr.bf16.mxu0 %v17007_v21  ;;  %v17014_v35 = vld [vmem:[%s24468_s1 + $0x1bb8] ss:$52 sps:$4 sm:$0xff]  }
 0x2d9   :  { %24536 = vst [vmem:[#allocation33_spill] sm:$0xff] %v20955_v5  ;;  %v20957_v17 = vpop.f32.mrf.mxu1  ;;  %9279 = vmatprep.subr.bf16.mxu1 %v17010_v10  ;;  %v20965_v34 = vadd.f32 %v8889_v57, %v8837_v50  ;;  %v17011_v10 = vld [vmem:[%s24468_s1 + $0x16d8] ss:$52 sps:$4 sm:$0xff]   ;;  %v17017_v57 = vld [vmem:[%s24468_s1 + $0x2370] ss:$52 sps:$4 sm:$0xff]  }
 0x2da   :  { %24537 = vst [vmem:[#allocation34_spill] sm:$0xff] %v20957_v17  ;;  %v8842_v8 = vpop.f32.mrf.mxu0 }
 0x2db   :  { %9212 = vmatmul.mubr.bf16.gmra.mxu1 %v18837_v4  ;;  %v8895_v59 = vpop.f32.mrf.mxu1  ;;  %v8843_v31 = vadd.f32 %v8842_v8, %v20763_v30  ;;  %9251 = vmatpush2.bf16.msra.mxu0 %v17005_v6  ;;  %v17022_v30 = vld [vmem:[%s24468_s1 + $0x1b54] ss:$52 sps:$4 sm:$0xff]  }
 0x2dc   :  { %9280 = vmatpush1.bf16.msra.mxu1 %v17008_v55  ;;  %v8844_v21 = vpop.f32.mrf.mxu0  ;;  %9252 = vmatprep.subr.bf16.mxu0 %v17013_v9  ;;  %v17020_v9 = vld [vmem:[%s24468_s1 + $0x1b50] ss:$52 sps:$4 sm:$0xff]  }
 0x2dd   :  { %v8897_v50 = vpop.f32.mrf.mxu1  ;;  %9281 = vmatprep.subr.bf16.mxu1 %v17016_v20  ;;  %v8845_v6 = vadd.f32 %v8844_v21, %v20766_v24  ;;  %v20982_v55 = vadd.f32 %v8895_v59, %v8843_v31  ;;  %9307 = vmatprep.mubr.bf16.mxu1 %v18873_v18  ;;  %v17025_v24 = vld [vmem:[%s24468_s1 + $0x230c] ss:$52 sps:$4 sm:$0xff]  }
 0x2de   :  { %v8846_v20 = vpop.f32.mrf.mxu0  ;;  %v17028_v59 = vld [vmem:[%s24468_s1 + $0x1aec] ss:$52 sps:$4 sm:$0xff]  }
 0x2df   :  { %v8899_v8 = vpop.f32.mrf.mxu1  ;;  %v8847_v17 = vadd.f32 %v8846_v20, %v20780_v22  ;;  %v20992_v5 = vadd.f32 %v8897_v50, %v8845_v6  ;;  %9253 = vmatpush2.bf16.msra.mxu0 %v17011_v10  ;;  %v17023_v22 = vld [vmem:[%s24468_s1 + $0x2308] ss:$52 sps:$4 sm:$0xff]   ;;  %v17029_v21 = vld [vmem:[%s24468_s1 + $0x22a0] ss:$52 sps:$4 sm:$0xff]   ;;  %v17035_v6 = vld [vmem:[%s24468_s1 + $0x2238] ss:$52 sps:$4 sm:$0xff]  }
 0x2e0   :  { %9282 = vmatpush1.bf16.msra.mxu1 %v17014_v35  ;;  %9328 = vmatprep.subr.bf16.mxu0 %v17019_v27  ;;  %v17026_v10 = vld [vmem:[%s24468_s1 + $0x1ae8] ss:$52 sps:$4 sm:$0xff]   ;;  %v17031_v35 = vld [vmem:[%s24468_s1 + $0x22a4] ss:$52 sps:$4 sm:$0xff]   ;;  %v17032_v50 = vld [vmem:[%s24468_s1 + $0x1a80] ss:$52 sps:$4 sm:$0xff]  }
 0x2e1   :  { %9283 = vmatprep.subr.bf16.mxu1 %v17022_v30  ;;  %v21000_v31 = vadd.f32 %v8899_v8, %v8847_v17  ;;  %v17034_v17 = vld [vmem:[%s24468_s1 + $0x1a84] ss:$52 sps:$4 sm:$0xff]   ;;  %v17037_v27 = vld [vmem:[%s24468_s1 + $0x223c] ss:$52 sps:$4 sm:$0xff]   ;;  %v17046_v20 = vld [vmem:[%s24468_s1 + $0x2034] ss:$52 sps:$4 sm:$0xff]  }
 0x2e2   :  { %9255 = vmatmul.mubr.bf16.vlgmr.msra.gmra.mxu0 %v18791_v48  ;;  %v17040_v30 = vld [vmem:[%s24468_s1 + $0x1a1c] ss:$52 sps:$4 sm:$0xff]  }
 0x2e3   :  { %9329 = vmatpush1.bf16.msra.mxu0 %v17017_v57  ;;  %9264 = vmatprep.mubr.bf16.mxu0 %v18819_v61  ;;  %v17038_v57 = vld [vmem:[%s24468_s1 + $0x1a18] ss:$52 sps:$4 sm:$0xff]   ;;  %v17041_v8 = vld [vmem:[%s24468_s1 + $0x21d0] ss:$52 sps:$4 sm:$0xff]  }
 0x2e4   :  { %9284 = vmatpush1.bf16.msra.mxu1 %v17020_v9  ;;  %9330 = vmatprep.subr.bf16.mxu0 %v17025_v24  ;;  %v17043_v9 = vld [vmem:[%s24468_s1 + $0x21d4] ss:$52 sps:$4 sm:$0xff]   ;;  %v17044_v24 = vld [vmem:[%s24468_s1 + $0x2030] ss:$52 sps:$4 sm:$0xff]  }
 0x2e5   :  { %9285 = vmatprep.subr.bf16.mxu1 %v17028_v59  ;;  %v17049_v59 = vld [vmem:[%s24468_s1 + $0x216c] ss:$52 sps:$4 sm:$0xff]  }
 0x2e7   :  { %9331 = vmatpush1.bf16.msra.mxu0 %v17023_v22  ;;  %v17052_v22 = vld [vmem:[%s24468_s1 + $0x1fcc] ss:$52 sps:$4 sm:$0xff]  }
 0x2e8   :  { %9286 = vmatpush1.bf16.msra.mxu1 %v17026_v10  ;;  %9332 = vmatprep.subr.bf16.mxu0 %v17031_v35  ;;  %v17047_v10 = vld [vmem:[%s24468_s1 + $0x2168] ss:$52 sps:$4 sm:$0xff]  }
 0x2e9   :  { %9287 = vmatprep.subr.bf16.mxu1 %v17034_v17  ;;  %v17050_v35 = vld [vmem:[%s24468_s1 + $0x1fc8] ss:$52 sps:$4 sm:$0xff]   ;;  %v17055_v17 = vld [vmem:[%s24468_s1 + $0x2104] ss:$52 sps:$4 sm:$0xff]  }
 0x2ea   :  { %9265 = vmatmul.mubr.bf16.gmra.mxu0 %v18845_v7 }
 0x2eb   :  { %9333 = vmatpush1.bf16.msra.mxu0 %v17029_v21  ;;  %9360 = vmatprep.mubr.bf16.mxu0 %v18875_v19  ;;  %v17058_v21 = vld [vmem:[%s24468_s1 + $0x1f64] ss:$52 sps:$4 sm:$0xff]  }
 0x2ec   :  { %9288 = vmatpush1.bf16.msra.mxu1 %v17032_v50  ;;  %9334 = vmatprep.subr.bf16.mxu0 %v17037_v27  ;;  %v17053_v50 = vld [vmem:[%s24468_s1 + $0x2100] ss:$52 sps:$4 sm:$0xff]  }
 0x2ed   :  { %9289 = vmatprep.subr.bf16.mxu1 %v17040_v30  ;;  %v17056_v27 = vld [vmem:[%s24468_s1 + $0x1f60] ss:$52 sps:$4 sm:$0xff]   ;;  %v17061_v30 = vld [vmem:[%s24468_s1 + $0x209c] ss:$52 sps:$4 sm:$0xff]  }
 0x2ef   :  { %9335 = vmatpush1.bf16.msra.mxu0 %v17035_v6  ;;  %v17064_v6 = vld [vmem:[%s24468_s1 + $0x1efc] ss:$52 sps:$4 sm:$0xff]  }
 0x2f0   :  { %9290 = vmatpush1.bf16.msra.mxu1 %v17038_v57  ;;  %9336 = vmatprep.subr.bf16.mxu0 %v17043_v9  ;;  %v17059_v57 = vld [vmem:[%s24468_s1 + $0x2098] ss:$52 sps:$4 sm:$0xff]  }
 0x2f1   :  { %9291 = vmatprep.subr.bf16.mxu1 %v17046_v20  ;;  %v17062_v9 = vld [vmem:[%s24468_s1 + $0x1ef8] ss:$52 sps:$4 sm:$0xff]   ;;  %v17067_v20 = vld [vmem:[%s24468_s1 + $0x26b4] ss:$52 sps:$4 sm:$0xff]  }
 0x2f3   :  { %9337 = vmatpush1.bf16.msra.mxu0 %v17041_v8  ;;  %v17070_v8 = vld [vmem:[%s24468_s1 + $0x1e94] ss:$52 sps:$4 sm:$0xff]  }
 0x2f4   :  { %9292 = vmatpush2.bf16.msra.mxu1 %v17044_v24  ;;  %9338 = vmatprep.subr.bf16.mxu0 %v17049_v59  ;;  %v17065_v24 = vld [vmem:[%s24468_s1 + $0x26b0] ss:$52 sps:$4 sm:$0xff]  }
 0x2f5   :  { %9293 = vmatprep.subr.bf16.mxu1 %v17052_v22  ;;  %v17068_v59 = vld [vmem:[%s24468_s1 + $0x1e90] ss:$52 sps:$4 sm:$0xff]   ;;  %v17073_v22 = vld [vmem:[%s24468_s1 + $0x264c] ss:$52 sps:$4 sm:$0xff]  }
 0x2f7   :  { %9339 = vmatpush1.bf16.msra.mxu0 %v17047_v10  ;;  %v17076_v10 = vld [vmem:[%s24468_s1 + $0x1e2c] ss:$52 sps:$4 sm:$0xff]  }
 0x2f8   :  { %9294 = vmatpush2.bf16.msra.mxu1 %v17050_v35  ;;  %9340 = vmatprep.subr.bf16.mxu0 %v17055_v17  ;;  %v17071_v35 = vld [vmem:[%s24468_s1 + $0x2648] ss:$52 sps:$4 sm:$0xff]  }
 0x2f9   :  { %9295 = vmatprep.subr.bf16.mxu1 %v17058_v21  ;;  %v17074_v17 = vld [vmem:[%s24468_s1 + $0x1e28] ss:$52 sps:$4 sm:$0xff]   ;;  %v17079_v21 = vld [vmem:[%s24468_s1 + $0x25e4] ss:$52 sps:$4 sm:$0xff]  }
 0x2fb   :  { %9341 = vmatpush1.bf16.msra.mxu0 %v17053_v50  ;;  %v17082_v50 = vld [vmem:[%s24468_s1 + $0x1dc4] ss:$52 sps:$4 sm:$0xff]  }
 0x2fc   :  { %9296 = vmatpush2.bf16.msra.mxu1 %v17056_v27  ;;  %9342 = vmatprep.subr.bf16.mxu0 %v17061_v30  ;;  %v1458_v27 = vld [vmem:[%s24468_s1 + $0x2718] sm:$0x33]  ;;  %v17077_v30 = vld [vmem:[%s24468_s1 + $0x25e0] ss:$52 sps:$4 sm:$0xff]  }
 0x2fd   :  { %9297 = vmatprep.subr.bf16.mxu1 %v17064_v6  ;;  %v17080_v6 = vld [vmem:[%s24468_s1 + $0x1dc0] ss:$52 sps:$4 sm:$0xff]  }
 0x2ff   :  { %9343 = vmatpush1.bf16.msra.mxu0 %v17059_v57  ;;  %v17085_v57 = vld [vmem:[%s24468_s1 + $0x257c] ss:$52 sps:$4 sm:$0xff]  }
 0x300   :  { %9298 = vmatpush2.bf16.msra.mxu1 %v17062_v9  ;;  %9344 = vmatprep.subr.bf16.mxu0 %v17067_v20  ;;  %v17088_v9 = vld [vmem:[%s24468_s1 + $0x1d5c] ss:$52 sps:$4 sm:$0xff]   ;;  %v15112_v20 = vcombine.high %v1458_v27, %v1458_v27 }
 0x301   :  { %9299 = vmatprep.subr.bf16.mxu1 %v17070_v8  ;;  %v17083_v8 = vld [vmem:[%s24468_s1 + $0x2578] ss:$52 sps:$4 sm:$0xff]  }
 0x303   :  { %9345 = vmatpush2.bf16.msra.mxu0 %v17065_v24  ;;  %v17086_v24 = vld [vmem:[%s24468_s1 + $0x1d58] ss:$52 sps:$4 sm:$0xff]  }
 0x304   :  { %9300 = vmatpush2.bf16.msra.mxu1 %v17068_v59  ;;  %9346 = vmatprep.subr.bf16.mxu0 %v17073_v22  ;;  %v15111_v59 = vcombine.low %v1458_v27, %v1458_v27  ;;  %v17091_v22 = vld [vmem:[%s24468_s1 + $0x2514] ss:$52 sps:$4 sm:$0xff]   ;;  %v17094_v27 = vld [vmem:[%s24468_s1 + $0x24ac] ss:$52 sps:$4 sm:$0xff]  }
 0x305   :  { %9301 = vmatprep.subr.bf16.mxu1 %v17076_v10  ;;  %v7933_v10 = vand.u32 %v15112_v20, %v19033_v28  ;;  %v17092_v20 = vld [vmem:[%s24468_s1 + $0x24a8] ss:$52 sps:$4 sm:$0xff]  }
 0x307   :  { %9347 = vmatpush2.bf16.msra.mxu0 %v17071_v35  ;;  %v17089_v35 = vld [vmem:[%s24468_s1 + $0x2510] ss:$52 sps:$4 sm:$0xff]  }
 0x308   :  { %9302 = vmatpush2.bf16.msra.mxu1 %v17074_v17  ;;  %9348 = vmatprep.subr.bf16.mxu0 %v17079_v21  ;;  %v7930_v17 = vand.u32 %v15111_v59, %v19033_v28  ;;  %v21143_v21 = vpop.f32.mrf.mxu0  ;;  %v17099_v59 = vld [vmem:[%s24468_s1 + $0x2444] ss:$52 sps:$4 sm:$0xff]  }
 0x309   :  { %9303 = vmatprep.subr.bf16.mxu1 %v17082_v50  ;;  %24538 = vst [vmem:[#allocation35_spill] sm:$0xff] %v21143_v21  ;;  %v21145_v50 = vpop.f32.mrf.mxu1 }
 0x30a   :  { %24539 = vst [vmem:[#allocation36_spill] sm:$0xff] %v21145_v50 }
 0x30b   :  { %9349 = vmatpush2.bf16.msra.mxu0 %v17077_v30  ;;  %v17108_v30 = vld [vmem:[%s24468_s1 + $0x97c] ss:$52 sps:$4 sm:$0xff]  }
 0x30c   :  { %9304 = vmatpush2.bf16.msra.mxu1 %v17080_v6  ;;  %9350 = vmatprep.subr.bf16.mxu0 %v17085_v57 }
 0x30d   :  { %9305 = vmatprep.subr.bf16.mxu1 %v17088_v9 }
 0x30f   :  { %9351 = vmatpush2.bf16.msra.mxu0 %v17083_v8 }
 0x310   :  { %9306 = vmatpush2.bf16.msra.mxu1 %v17086_v24  ;;  %9352 = vmatprep.subr.bf16.mxu0 %v17091_v22 }
 0x311   :  { %9395 = vmatprep.subr.bf16.mxu1 %v7933_v10 }
 0x312   :  { %v8938_v6 = vpop.f32.mrf.mxu0 }
 0x313   :  { %v8991_v57 = vpop.f32.mrf.mxu1  ;;  %9308 = vmatmul.mubr.bf16.vlgmr.msra.gmra.mxu1 %v19054_v38  ;;  %v8939_v9 = vadd.f32 %v8938_v6, %v20942_v16  ;;  %9353 = vmatpush2.bf16.msra.mxu0 %v17089_v35 }
 0x314   :  { %9396 = vmatpush1.bf16.msra.mxu1 %v7930_v17  ;;  %v8940_v8 = vpop.f32.mrf.mxu0  ;;  %9354 = vmatprep.subr.bf16.mxu0 %v17094_v27  ;;  %v17097_v17 = vld [vmem:[%s24468_s1 + $0x2440] ss:$52 sps:$4 sm:$0xff]  }
 0x315   :  { %v8993_v24 = vpop.f32.mrf.mxu1  ;;  %9317 = vmatprep.mubr.bf16.mxu1 %v19068_v46  ;;  %v8992_v22 = vadd.f32 %v8991_v57, %v8939_v9  ;;  %v8941_v10 = vadd.f32 %v8940_v8, %v20952_v23  ;;  %9487 = vmatprep.subr.bf16.mxu1 %v17108_v30  ;;  %v17102_v23 = vld [vmem:[%s24468_s1 + $0x23dc] ss:$52 sps:$4 sm:$0xff]  }
 0x316   :  { %v8942_v16 = vpop.f32.mrf.mxu0 }
 0x317   :  { %v8995_v35 = vpop.f32.mrf.mxu1  ;;  %v8994_v6 = vadd.f32 %v8993_v24, %v8941_v10  ;;  %v8943_v50 = vadd.f32 %v8942_v16, %v20965_v34  ;;  %9355 = vmatpush2.bf16.msra.mxu0 %v17092_v20  ;;  %v17100_v20 = vld [vmem:[%s24468_s1 + $0x23d8] ss:$52 sps:$4 sm:$0xff]  }
 0x318   :  { %v21167_v27 = vpop.f32.mrf.mxu0  ;;  %9356 = vmatprep.subr.bf16.mxu0 %v17099_v59 }
 0x319   :  { %24540 = vst [vmem:[#allocation37_spill] sm:$0xff] %v21167_v27  ;;  %v21169_v21 = vpop.f32.mrf.mxu1  ;;  %v8996_v30 = vadd.f32 %v8995_v35, %v8943_v50  ;;  %v17105_v50 = vld [vmem:[%s24468_s1 + $0x2fc] ss:$52 sps:$4 sm:$0xff]  }
 0x31a   :  { %24541 = vst [vmem:[#allocation38_spill] sm:$0xff] %v21169_v21  ;;  %v8948_v57 = vpop.f32.mrf.mxu0  ;;  %v17677_v27 = vld [vmem:[%s24468_s1 + $0x2450] ss:$52 sps:$4 sm:$0xff]  }
 0x31b   :  { %9318 = vmatmul.mubr.bf16.gmra.mxu1 %v19097_v62  ;;  %v9001_v9 = vpop.f32.mrf.mxu1  ;;  %v8949_v34 = vadd.f32 %v8948_v57, %v20982_v55  ;;  %9357 = vmatpush2.bf16.msra.mxu0 %v17097_v17  ;;  %v17103_v57 = vld [vmem:[%s24468_s1 + $0x2f8] ss:$52 sps:$4 sm:$0xff]  }
 0x31c   :  { %9413 = vmatprep.mubr.bf16.mxu1 %v24527_v60  ;;  %v8950_v8 = vpop.f32.mrf.mxu0  ;;  %9358 = vmatprep.subr.bf16.mxu0 %v17102_v23  ;;  %v17106_v23 = vld [vmem:[%s24468_s1 + $0x978] ss:$52 sps:$4 sm:$0xff]  }
 0x31d   :  { %v9003_v24 = vpop.f32.mrf.mxu1  ;;  %v8951_v59 = vadd.f32 %v8950_v8, %v20992_v5  ;;  %v9002_v10 = vadd.f32 %v9001_v9, %v8949_v34  ;;  %v17111_v5 = vld [vmem:[%s24468_s1 + $0x294] ss:$52 sps:$4 sm:$0xff]   ;;  %v17109_v8 = vld [vmem:[%s24468_s1 + $0x290] ss:$52 sps:$4 sm:$0xff]  }
 0x31e   :  { %v8952_v16 = vpop.f32.mrf.mxu0 }
 0x31f   :  { %v9005_v35 = vpop.f32.mrf.mxu1  ;;  %v8953_v55 = vadd.f32 %v8952_v16, %v21000_v31  ;;  %v9004_v17 = vadd.f32 %v9003_v24, %v8951_v59  ;;  %9359 = vmatpush2.bf16.msra.mxu0 %v17100_v20  ;;  %v17114_v31 = vld [vmem:[%s24468_s1 + $0x914] ss:$52 sps:$4 sm:$0xff]   ;;  %v17112_v24 = vld [vmem:[%s24468_s1 + $0x910] ss:$52 sps:$4 sm:$0xff]   ;;  %v17117_v59 = vld [vmem:[%s24468_s1 + $0x22c] ss:$52 sps:$4 sm:$0xff]  }
 0x320   :  { %v21191_v21 = vpop.f32.mrf.mxu0  ;;  %9434 = vmatprep.subr.bf16.mxu0 %v17105_v50 }
 0x321   :  { %24542 = vst [vmem:[#allocation39_spill] sm:$0xff] %v21191_v21  ;;  %v9006_v9 = vadd.f32 %v9005_v35, %v8953_v55  ;;  %v17213_v21 = vld [vmem:[%s24468_s1 + $0xf2c] ss:$52 sps:$4 sm:$0xff]  }
 0x322   :  { %9361 = vmatmul.mubr.bf16.vlgmr.msra.gmra.mxu0 %v19056_v39  ;;  %v9044_v34 = vpop.f32.mrf.mxu0 }
 0x323   :  { %15124 = vmatmul.mubr.msk.bf16.vlgmr.msra.gmra.mxu1 %vm7900_vm2, %v19123_v11  ;;  %v9045_v20 = vadd.f32 %v9044_v34, %v8992_v22  ;;  %9435 = vmatpush1.bf16.msra.mxu0 %v17103_v57  ;;  %v17120_v22 = vld [vmem:[%s24468_s1 + $0x8ac] ss:$52 sps:$4 sm:$0xff]   ;;  %v17115_v57 = vld [vmem:[%s24468_s1 + $0x228] ss:$52 sps:$4 sm:$0xff]  }
 0x324   :  { %9488 = vmatpush1.bf16.msra.mxu1 %v17106_v23  ;;  %v9046_v50 = vpop.f32.mrf.mxu0  ;;  %9436 = vmatprep.subr.bf16.mxu0 %v17111_v5  ;;  %v17118_v23 = vld [vmem:[%s24468_s1 + $0x8a8] ss:$52 sps:$4 sm:$0xff]  }
 0x325   :  { %9489 = vmatprep.subr.bf16.mxu1 %v17114_v31  ;;  %v21214_v16 = vadd.f32 %v9046_v50, %v8994_v6  ;;  %9370 = vmatprep.mubr.bf16.mxu0 %v19076_v52  ;;  %v17123_v6 = vld [vmem:[%s24468_s1 + $0x1c4] ss:$52 sps:$4 sm:$0xff]   ;;  %v10523_v31 = vmax.f32 %v9045_v20, 0.0  ;;  %v17124_v20 = vld [vmem:[%s24468_s1 + $0x840] ss:$52 sps:$4 sm:$0xff]  }
 0x326   :  { %9423 = vmatprep.mubr.bf16.mxu1 %v24527_v60  ;;  %v9048_v35 = vpop.f32.mrf.mxu0 }
 0x327   :  { %24543 = vst [vmem:[#allocation40_spill] sm:$0xff] %v21214_v16  ;;  %v9049_v55 = vadd.f32 %v9048_v35, %v8996_v30  ;;  %9437 = vmatpush1.bf16.msra.mxu0 %v17109_v8  ;;  %v17126_v30 = vld [vmem:[%s24468_s1 + $0x844] ss:$52 sps:$4 sm:$0xff]   ;;  %v17129_v35 = vld [vmem:[%s24468_s1 + $0x15c] ss:$52 sps:$4 sm:$0xff]  }
 0x328   :  { %9490 = vmatpush1.bf16.msra.mxu1 %v17112_v24  ;;  %v21224_v5 = vpop.f32.mrf.mxu0  ;;  %9438 = vmatprep.subr.bf16.mxu0 %v17117_v59  ;;  %v17121_v59 = vld [vmem:[%s24468_s1 + $0x1c0] ss:$52 sps:$4 sm:$0xff]  }
 0x329   :  { %24544 = vst [vmem:[#allocation41_spill] sm:$0xff] %v21224_v5  ;;  %9491 = vmatprep.subr.bf16.mxu1 %v17120_v22  ;;  %v10536_v34 = vmax.f32 %v9049_v55, 0.0  ;;  %v17408_v16 = vld [vmem:[%s24468_s1 + $0x160] ss:$52 sps:$4 sm:$0xff]  }
 0x32a   :  { %9371 = vmatmul.mubr.bf16.gmra.mxu0 %v19099_v1  ;;  %v9054_v8 = vpop.f32.mrf.mxu0 }
 0x32b   :  { %15125 = vmatmul.mubr.msk.bf16.gmra.mxu1 %vm7900_vm2, %v19158_v26  ;;  %v21235_v24 = vpack.c.bf16 %v10536_v34, %v10523_v31  ;;  %v9055_v50 = vadd.f32 %v9054_v8, %v9002_v10  ;;  %9439 = vmatpush1.bf16.msra.mxu0 %v17115_v57  ;;  %v17132_v10 = vld [vmem:[%s24468_s1 + $0x7dc] ss:$52 sps:$4 sm:$0xff]  }
 0x32c   :  { %9492 = vmatpush1.bf16.msra.mxu1 %v17118_v23  ;;  %v9056_v22 = vpop.f32.mrf.mxu0  ;;  %9440 = vmatprep.subr.bf16.mxu0 %v17123_v6  ;;  %v17127_v6 = vld [vmem:[%s24468_s1 + $0x158] ss:$52 sps:$4 sm:$0xff]  }
 0x32d   :  { %24545 = vst [vmem:[#allocation42_spill] sm:$0xff] %v21235_v24  ;;  %9493 = vmatprep.subr.bf16.mxu1 %v17126_v30  ;;  %v21249_v55 = vadd.f32 %v9056_v22, %v9004_v17  ;;  %9466 = vmatprep.mubr.bf16.mxu0 %v18444_v53  ;;  %v17130_v30 = vld [vmem:[%s24468_s1 + $0x7d8] ss:$52 sps:$4 sm:$0xff]   ;;  %v17135_v17 = vld [vmem:[%s24468_s1 + $0xf4] ss:$52 sps:$4 sm:$0xff]   ;;  %v10549_v31 = vmax.f32 %v9055_v50, 0.0 }
 0x32e   :  { %9519 = vmatprep.mubr.bf16.mxu1 %v18446_v54  ;;  %v9058_v57 = vpop.f32.mrf.mxu0  ;;  %v17141_v22 = vld [vmem:[%s24468_s1 + $0x8c] ss:$52 sps:$4 sm:$0xff]  }
 0x32f   :  { %24546 = vst [vmem:[#allocation43_spill] sm:$0xff] %v21249_v55  ;;  %v9059_v23 = vadd.f32 %v9058_v57, %v9006_v9  ;;  %9441 = vmatpush1.bf16.msra.mxu0 %v17121_v59  ;;  %v17138_v9 = vld [vmem:[%s24468_s1 + $0x774] ss:$52 sps:$4 sm:$0xff]   ;;  %v17133_v59 = vld [vmem:[%s24468_s1 + $0xf0] ss:$52 sps:$4 sm:$0xff]  }
 0x330   :  { %9494 = vmatpush1.bf16.msra.mxu1 %v17124_v20  ;;  %9442 = vmatprep.subr.bf16.mxu0 %v17129_v35  ;;  %v17136_v20 = vld [vmem:[%s24468_s1 + $0x770] ss:$52 sps:$4 sm:$0xff]   ;;  %v17144_v50 = vld [vmem:[%s24468_s1 + $0x70c] ss:$52 sps:$4 sm:$0xff]   ;;  %v17139_v35 = vld [vmem:[%s24468_s1 + $0x88] ss:$52 sps:$4 sm:$0xff]   ;;  %v21414_v24 = vpop.f32.mrf.mxu0 }
 0x331   :  { %9495 = vmatprep.subr.bf16.mxu1 %v17132_v10  ;;  %v10562_v34 = vmax.f32 %v9059_v23, 0.0  ;;  %v17142_v10 = vld [vmem:[%s24468_s1 + $0x708] ss:$52 sps:$4 sm:$0xff]   ;;  %v17147_v57 = vld [vmem:[%s24468_s1 + $0x24] ss:$52 sps:$4 sm:$0xff]   ;;  %24550 = vst [vmem:[#allocation47_spill] sm:$0xff] %v21414_v24 }
 0x332   :  { %v17150_v23 = vld [vmem:[%s24468_s1 + $0x6a4] ss:$52 sps:$4 sm:$0xff]  }
 0x333   :  { %v21265_v8 = vpack.c.bf16 %v10562_v34, %v10549_v31  ;;  %9443 = vmatpush1.bf16.msra.mxu0 %v17127_v6  ;;  %v17145_v6 = vld [vmem:[%s24468_s1 + $0x20] ss:$52 sps:$4 sm:$0xff]   ;;  %v17151_v31 = vld [vmem:[%s24468_s1 + $0x638] ss:$52 sps:$4 sm:$0xff]  }
 0x334   :  { %9496 = vmatpush1.bf16.msra.mxu1 %v17130_v30  ;;  %9444 = vmatprep.subr.bf16.mxu0 %v17135_v17  ;;  %v17148_v30 = vld [vmem:[%s24468_s1 + $0x6a0] ss:$52 sps:$4 sm:$0xff]   ;;  %v17153_v17 = vld [vmem:[%s24468_s1 + $0x63c] ss:$52 sps:$4 sm:$0xff]   ;;  %v17154_v34 = vld [vmem:[%s24468_s1 + $0xcb8] ss:$52 sps:$4 sm:$0xff]  }
 0x335   :  { %24547 = vst [vmem:[#allocation44_spill] sm:$0xff] %v21265_v8  ;;  %9497 = vmatprep.subr.bf16.mxu1 %v17138_v9  ;;  %v17156_v9 = vld [vmem:[%s24468_s1 + $0xcbc] ss:$52 sps:$4 sm:$0xff]  }
 0x337   :  { %9445 = vmatpush1.bf16.msra.mxu0 %v17133_v59  ;;  %v17159_v59 = vld [vmem:[%s24468_s1 + $0x5d4] ss:$52 sps:$4 sm:$0xff]  }
 0x338   :  { %9498 = vmatpush1.bf16.msra.mxu1 %v17136_v20  ;;  %9446 = vmatprep.subr.bf16.mxu0 %v17141_v22  ;;  %v17162_v20 = vld [vmem:[%s24468_s1 + $0xc54] ss:$52 sps:$4 sm:$0xff]   ;;  %v17157_v22 = vld [vmem:[%s24468_s1 + $0x5d0] ss:$52 sps:$4 sm:$0xff]  }
 0x339   :  { %9499 = vmatprep.subr.bf16.mxu1 %v17144_v50  ;;  %v17160_v50 = vld [vmem:[%s24468_s1 + $0xc50] ss:$52 sps:$4 sm:$0xff]  }
 0x33b   :  { %9447 = vmatpush1.bf16.msra.mxu0 %v17139_v35  ;;  %v17165_v35 = vld [vmem:[%s24468_s1 + $0x56c] ss:$52 sps:$4 sm:$0xff]  }
 0x33c   :  { %9500 = vmatpush1.bf16.msra.mxu1 %v17142_v10  ;;  %9448 = vmatprep.subr.bf16.mxu0 %v17147_v57  ;;  %v17168_v10 = vld [vmem:[%s24468_s1 + $0xbec] ss:$52 sps:$4 sm:$0xff]   ;;  %v17163_v57 = vld [vmem:[%s24468_s1 + $0x568] ss:$52 sps:$4 sm:$0xff]  }
 0x33d   :  { %9501 = vmatprep.subr.bf16.mxu1 %v17150_v23  ;;  %v17166_v23 = vld [vmem:[%s24468_s1 + $0xbe8] ss:$52 sps:$4 sm:$0xff]  }
 0x33f   :  { %9449 = vmatpush1.bf16.msra.mxu0 %v17145_v6  ;;  %v17171_v6 = vld [vmem:[%s24468_s1 + $0x504] ss:$52 sps:$4 sm:$0xff]  }
 0x340   :  { %9502 = vmatpush1.bf16.msra.mxu1 %v17148_v30  ;;  %9450 = vmatprep.subr.bf16.mxu0 %v17153_v17  ;;  %v17174_v30 = vld [vmem:[%s24468_s1 + $0xb84] ss:$52 sps:$4 sm:$0xff]   ;;  %v17169_v17 = vld [vmem:[%s24468_s1 + $0x500] ss:$52 sps:$4 sm:$0xff]  }
 0x341   :  { %9503 = vmatprep.subr.bf16.mxu1 %v17156_v9  ;;  %v17172_v9 = vld [vmem:[%s24468_s1 + $0xb80] ss:$52 sps:$4 sm:$0xff]  }
 0x343   :  { %9451 = vmatpush2.bf16.msra.mxu0 %v17151_v31  ;;  %v17177_v31 = vld [vmem:[%s24468_s1 + $0x49c] ss:$52 sps:$4 sm:$0xff]  }
 0x344   :  { %9504 = vmatpush2.bf16.msra.mxu1 %v17154_v34  ;;  %9452 = vmatprep.subr.bf16.mxu0 %v17159_v59  ;;  %v17180_v34 = vld [vmem:[%s24468_s1 + $0xb1c] ss:$52 sps:$4 sm:$0xff]   ;;  %v17175_v59 = vld [vmem:[%s24468_s1 + $0x498] ss:$52 sps:$4 sm:$0xff]  }
 0x345   :  { %9505 = vmatprep.subr.bf16.mxu1 %v17162_v20  ;;  %v17178_v20 = vld [vmem:[%s24468_s1 + $0xb18] ss:$52 sps:$4 sm:$0xff]  }
 0x347   :  { %9453 = vmatpush2.bf16.msra.mxu0 %v17157_v22  ;;  %v17183_v22 = vld [vmem:[%s24468_s1 + $0x434] ss:$52 sps:$4 sm:$0xff]  }
 0x348   :  { %9506 = vmatpush2.bf16.msra.mxu1 %v17160_v50  ;;  %9454 = vmatprep.subr.bf16.mxu0 %v17165_v35  ;;  %v17186_v50 = vld [vmem:[%s24468_s1 + $0xab4] ss:$52 sps:$4 sm:$0xff]   ;;  %v21363_v35 = vpop.f32.mrf.mxu1 }
 0x349   :  { %9507 = vmatprep.subr.bf16.mxu1 %v17168_v10  ;;  %24548 = vst [vmem:[#allocation45_spill] sm:$0xff] %v21363_v35  ;;  %v17181_v10 = vld [vmem:[%s24468_s1 + $0x430] ss:$52 sps:$4 sm:$0xff]  }
 0x34b   :  { %9455 = vmatpush2.bf16.msra.mxu0 %v17163_v57  ;;  %v17184_v57 = vld [vmem:[%s24468_s1 + $0xab0] ss:$52 sps:$4 sm:$0xff]  }
 0x34c   :  { %9508 = vmatpush2.bf16.msra.mxu1 %v17166_v23  ;;  %9456 = vmatprep.subr.bf16.mxu0 %v17171_v6  ;;  %v17189_v6 = vld [vmem:[%s24468_s1 + $0x3cc] ss:$52 sps:$4 sm:$0xff]  }
 0x34d   :  { %9509 = vmatprep.subr.bf16.mxu1 %v17174_v30  ;;  %v17192_v30 = vld [vmem:[%s24468_s1 + $0xa4c] ss:$52 sps:$4 sm:$0xff]  }
 0x34f   :  { %9457 = vmatpush2.bf16.msra.mxu0 %v17169_v17  ;;  %v17187_v17 = vld [vmem:[%s24468_s1 + $0x3c8] ss:$52 sps:$4 sm:$0xff]  }
 0x350   :  { %9510 = vmatpush2.bf16.msra.mxu1 %v17172_v9  ;;  %9458 = vmatprep.subr.bf16.mxu0 %v17177_v31  ;;  %v17190_v9 = vld [vmem:[%s24468_s1 + $0xa48] ss:$52 sps:$4 sm:$0xff]  }
 0x351   :  { %9511 = vmatprep.subr.bf16.mxu1 %v17180_v34  ;;  %v17195_v34 = vld [vmem:[%s24468_s1 + $0x364] ss:$52 sps:$4 sm:$0xff]  }
 0x353   :  { %9459 = vmatpush2.bf16.msra.mxu0 %v17175_v59  ;;  %v9097_v23 = vpop.f32.mrf.mxu1  ;;  %v17198_v59 = vld [vmem:[%s24468_s1 + $0x9e4] ss:$52 sps:$4 sm:$0xff]  }
 0x354   :  { %9512 = vmatpush2.bf16.msra.mxu1 %v17178_v20  ;;  %9460 = vmatprep.subr.bf16.mxu0 %v17183_v22  ;;  %v1492_v20 = vsub.s32 6, %v19265_v25  ;;  %v1496_v22 = vsub.s32 7, %v19265_v25 }
 0x355   :  { %9513 = vmatprep.subr.bf16.mxu1 %v17186_v50  ;;  %v9099_v31 = vpop.f32.mrf.mxu1  ;;  %v17193_v50 = vld [vmem:[%s24468_s1 + $0x360] ss:$52 sps:$4 sm:$0xff]  }
 0x357   :  { %9461 = vmatpush2.bf16.msra.mxu0 %v17181_v10  ;;  %v17196_v10 = vld [vmem:[%s24468_s1 + $0x9e0] ss:$52 sps:$4 sm:$0xff]  }
 0x358   :  { %9514 = vmatpush2.bf16.msra.mxu1 %v17184_v57  ;;  %9462 = vmatprep.subr.bf16.mxu0 %v17189_v6  ;;  %v9101_v57 = vpop.f32.mrf.mxu1  ;;  %v17201_v6 = vld [vmem:[%s24468_s1 + $0xffc] ss:$52 sps:$4 sm:$0xff]  }
 0x359   :  { %9515 = vmatprep.subr.bf16.mxu1 %v17192_v30  ;;  %v17204_v30 = vld [vmem:[%s24468_s1 + $0x167c] ss:$52 sps:$4 sm:$0xff]  }
 0x35a   :  { %v21416_v55 = vpop.f32.mrf.mxu1 }
 0x35b   :  { %9463 = vmatpush2.bf16.msra.mxu0 %v17187_v17  ;;  %v18230_v17 = vld [vmem:[%s24470_s2] sm:$0xff]  ;;  %24551 = vst [vmem:[#allocation48_spill] sm:$0xff] %v21416_v55 }
 0x35c   :  { %9516 = vmatpush2.bf16.msra.mxu1 %v17190_v9  ;;  %9464 = vmatprep.subr.bf16.mxu0 %v17195_v34  ;;  %v1493_v9 = vrot.slane %v18230_v17, %v1492_v20  ;;  %v21406_v8 = vrot.slane %v18230_v17, %v1496_v22  ;;  %v17199_v34 = vld [vmem:[%s24468_s1 + $0xff8] ss:$52 sps:$4 sm:$0xff]   ;;  %v17207_v20 = vld [vmem:[%s24468_s1 + $0xf94] ss:$52 sps:$4 sm:$0xff]   ;;  %v9107_v17 = vpop.f32.mrf.mxu1 }
 0x35d   :  { %9517 = vmatprep.subr.bf16.mxu1 %v17198_v59  ;;  %v17202_v59 = vld [vmem:[%s24468_s1 + $0x1678] ss:$52 sps:$4 sm:$0xff]   ;;  %v17210_v22 = vld [vmem:[%s24468_s1 + $0x1614] ss:$52 sps:$4 sm:$0xff]  }
 0x35e   :  { %24549 = vst [vmem:[#allocation46_spill] sm:$0xff] %v21406_v8  ;;  %v9100_v24 = vadd.f32 %v9099_v31, %v21406_v8  ;;  %v17216_v31 = vld [vmem:[%s24468_s1 + $0x15ac] ss:$52 sps:$4 sm:$0xff]  }
 0x35f   :  { %9465 = vmatpush2.bf16.msra.mxu0 %v17193_v50  ;;  %v9098_v50 = vadd.f32 %v9097_v23, %v1493_v9  ;;  %v17208_v23 = vld [vmem:[%s24468_s1 + $0x1610] ss:$52 sps:$4 sm:$0xff]  }
 0x360   :  { %9518 = vmatpush2.bf16.msra.mxu1 %v17196_v10  ;;  %9540 = vmatprep.subr.bf16.mxu0 %v17201_v6  ;;  %v17205_v6 = vld [vmem:[%s24468_s1 + $0xf90] ss:$52 sps:$4 sm:$0xff]  }
 0x361   :  { %9593 = vmatprep.subr.bf16.mxu1 %v17204_v30 }
 0x362   :  { %v9150_v10 = vpop.f32.mrf.mxu0  ;;  %9467 = vmatmul.mubr.bf16.vlgmr.msra.gmra.mxu0 %v18513_v12 }
 0x363   :  { %9520 = vmatmul.mubr.bf16.vlgmr.msra.gmra.mxu1 %v18515_v13  ;;  %v21427_v35 = vadd.f32 %v9150_v10, %v9098_v50  ;;  %9541 = vmatpush1.bf16.msra.mxu0 %v17199_v34  ;;  %v9102_v34 = vadd.f32 %v9101_v57, %v1493_v9  ;;  %v9109_v10 = vpop.f32.mrf.mxu1  ;;  %v17214_v57 = vld [vmem:[%s24468_s1 + $0x15a8] ss:$52 sps:$4 sm:$0xff]  }
 0x364   :  { %9594 = vmatpush1.bf16.msra.mxu1 %v17202_v59  ;;  %v9152_v30 = vpop.f32.mrf.mxu0  ;;  %9542 = vmatprep.subr.bf16.mxu0 %v17207_v20  ;;  %v17211_v20 = vld [vmem:[%s24468_s1 + $0xf28] ss:$52 sps:$4 sm:$0xff]  }
 0x365   :  { %9595 = vmatprep.subr.bf16.mxu1 %v17210_v22  ;;  %v21441_v59 = vadd.f32 %v9152_v30, %v9100_v24  ;;  %9476 = vmatprep.mubr.bf16.mxu0 %v18588_v37  ;;  %v9108_v24 = vadd.f32 %v9107_v17, %v1493_v9  ;;  %v17219_v30 = vld [vmem:[%s24468_s1 + $0xec4] ss:$52 sps:$4 sm:$0xff]   ;;  %v17220_v17 = vld [vmem:[%s24468_s1 + $0x1540] ss:$52 sps:$4 sm:$0xff]  }
 0x366   :  { %9529 = vmatprep.mubr.bf16.mxu1 %v18604_v43  ;;  %v9154_v50 = vpop.f32.mrf.mxu0 }
 0x367   :  { %v21445_v55 = vadd.f32 %v9154_v50, %v9102_v34  ;;  %9543 = vmatpush1.bf16.msra.mxu0 %v17205_v6  ;;  %v17222_v6 = vld [vmem:[%s24468_s1 + $0x1544] ss:$52 sps:$4 sm:$0xff]   ;;  %v9111_v50 = vpop.f32.mrf.mxu1 }
 0x368   :  { %9596 = vmatpush1.bf16.msra.mxu1 %v17208_v23  ;;  %v21453_v22 = vpop.f32.mrf.mxu0  ;;  %9544 = vmatprep.subr.bf16.mxu0 %v17213_v21  ;;  %v9110_v23 = vadd.f32 %v9109_v10, %v21406_v8  ;;  %v17217_v21 = vld [vmem:[%s24468_s1 + $0xec0] ss:$52 sps:$4 sm:$0xff]   ;;  %v17225_v10 = vld [vmem:[%s24468_s1 + $0xe5c] ss:$52 sps:$4 sm:$0xff]  }
 0x369   :  { %24552 = vst [vmem:[#allocation49_spill] sm:$0xff] %v21453_v22  ;;  %9597 = vmatprep.subr.bf16.mxu1 %v17216_v31  ;;  %v9112_v22 = vadd.f32 %v9111_v50, %v1493_v9  ;;  %v17223_v9 = vld [vmem:[%s24468_s1 + $0xe58] ss:$52 sps:$4 sm:$0xff]   ;;  %v17229_v50 = vld [vmem:[%s24468_s1 + $0xdf0] ss:$52 sps:$4 sm:$0xff]  }
 0x36a   :  { %v9160_v34 = vpop.f32.mrf.mxu0  ;;  %9477 = vmatmul.mubr.bf16.gmra.mxu0 %v18602_v42 }
 0x36b   :  { %9530 = vmatmul.mubr.bf16.gmra.mxu1 %v18624_v49  ;;  %9545 = vmatpush1.bf16.msra.mxu0 %v17211_v20  ;;  %v21470_v31 = vadd.f32 %v9160_v34, %v9108_v24  ;;  %v17228_v20 = vld [vmem:[%s24468_s1 + $0x14dc] ss:$52 sps:$4 sm:$0xff]   ;;  %v17234_v34 = vld [vmem:[%s24468_s1 + $0x1474] ss:$52 sps:$4 sm:$0xff]  }
 0x36c   :  { %9598 = vmatpush1.bf16.msra.mxu1 %v17214_v57  ;;  %9546 = vmatprep.subr.bf16.mxu0 %v17219_v30  ;;  %v9162_v57 = vpop.f32.mrf.mxu0  ;;  %v17226_v30 = vld [vmem:[%s24468_s1 + $0x14d8] ss:$52 sps:$4 sm:$0xff]  }
 0x36d   :  { %9599 = vmatprep.subr.bf16.mxu1 %v17222_v6  ;;  %v21478_v8 = vadd.f32 %v9162_v57, %v9110_v23  ;;  %9572 = vmatprep.mubr.bf16.mxu0 %v18660_v63  ;;  %v17231_v23 = vld [vmem:[%s24468_s1 + $0xdf4] ss:$52 sps:$4 sm:$0xff]   ;;  %v17243_v57 = vld [vmem:[%s24468_s1 + $0xd24] ss:$52 sps:$4 sm:$0xff]  }
 0x36e   :  { %9625 = vmatprep.mubr.bf16.mxu1 %v18662_v0  ;;  %v9164_v24 = vpop.f32.mrf.mxu0 }
 0x36f   :  { %9547 = vmatpush1.bf16.msra.mxu0 %v17217_v21  ;;  %v21488_v6 = vadd.f32 %v9164_v24, %v9112_v22  ;;  %v17232_v22 = vld [vmem:[%s24468_s1 + $0x1470] ss:$52 sps:$4 sm:$0xff]   ;;  %v17237_v21 = vld [vmem:[%s24468_s1 + $0xd8c] ss:$52 sps:$4 sm:$0xff]  }
 0x370   :  { %9600 = vmatpush1.bf16.msra.mxu1 %v17220_v17  ;;  %9548 = vmatprep.subr.bf16.mxu0 %v17225_v10  ;;  %v17240_v17 = vld [vmem:[%s24468_s1 + $0x140c] ss:$52 sps:$4 sm:$0xff]   ;;  %v17235_v10 = vld [vmem:[%s24468_s1 + $0xd88] ss:$52 sps:$4 sm:$0xff]   ;;  %v17246_v24 = vld [vmem:[%s24468_s1 + $0x13a4] ss:$52 sps:$4 sm:$0xff]  }
 0x371   :  { %9601 = vmatprep.subr.bf16.mxu1 %v17228_v20  ;;  %v17238_v20 = vld [vmem:[%s24468_s1 + $0x1408] ss:$52 sps:$4 sm:$0xff]  }
 0x373   :  { %9549 = vmatpush1.bf16.msra.mxu0 %v17223_v9  ;;  %v17241_v9 = vld [vmem:[%s24468_s1 + $0xd20] ss:$52 sps:$4 sm:$0xff]  }
 0x374   :  { %9602 = vmatpush1.bf16.msra.mxu1 %v17226_v30  ;;  %9550 = vmatprep.subr.bf16.mxu0 %v17231_v23  ;;  %v17244_v30 = vld [vmem:[%s24468_s1 + $0x13a0] ss:$52 sps:$4 sm:$0xff]   ;;  %v17249_v23 = vld [vmem:[%s24468_s1 + $0x133c] ss:$52 sps:$4 sm:$0xff]  }
 0x375   :  { %9603 = vmatprep.subr.bf16.mxu1 %v17234_v34  ;;  %v17252_v34 = vld [vmem:[%s24468_s1 + $0x19bc] ss:$52 sps:$4 sm:$0xff]  }
 0x377   :  { %9551 = vmatpush1.bf16.msra.mxu0 %v17229_v50  ;;  %v17247_v50 = vld [vmem:[%s24468_s1 + $0x1338] ss:$52 sps:$4 sm:$0xff]  }
 0x378   :  { %9604 = vmatpush1.bf16.msra.mxu1 %v17232_v22  ;;  %9552 = vmatprep.subr.bf16.mxu0 %v17237_v21  ;;  %v17250_v22 = vld [vmem:[%s24468_s1 + $0x19b8] ss:$52 sps:$4 sm:$0xff]   ;;  %v17255_v21 = vld [vmem:[%s24468_s1 + $0x12d4] ss:$52 sps:$4 sm:$0xff]  }
 0x379   :  { %9605 = vmatprep.subr.bf16.mxu1 %v17240_v17  ;;  %v17258_v17 = vld [vmem:[%s24468_s1 + $0x1954] ss:$52 sps:$4 sm:$0xff]  }
 0x37b   :  { %9553 = vmatpush1.bf16.msra.mxu0 %v17235_v10  ;;  %v17253_v10 = vld [vmem:[%s24468_s1 + $0x12d0] ss:$52 sps:$4 sm:$0xff]  }
 0x37c   :  { %9606 = vmatpush1.bf16.msra.mxu1 %v17238_v20  ;;  %9554 = vmatprep.subr.bf16.mxu0 %v17243_v57  ;;  %v17256_v20 = vld [vmem:[%s24468_s1 + $0x1950] ss:$52 sps:$4 sm:$0xff]   ;;  %v17261_v57 = vld [vmem:[%s24468_s1 + $0x126c] ss:$52 sps:$4 sm:$0xff]  }
 0x37d   :  { %9607 = vmatprep.subr.bf16.mxu1 %v17246_v24  ;;  %v17264_v24 = vld [vmem:[%s24468_s1 + $0x18ec] ss:$52 sps:$4 sm:$0xff]  }
 0x37f   :  { %9555 = vmatpush1.bf16.msra.mxu0 %v17241_v9  ;;  %v17259_v9 = vld [vmem:[%s24468_s1 + $0x1268] ss:$52 sps:$4 sm:$0xff]  }
 0x380   :  { %9608 = vmatpush1.bf16.msra.mxu1 %v17244_v30  ;;  %9556 = vmatprep.subr.bf16.mxu0 %v17249_v23  ;;  %v17262_v30 = vld [vmem:[%s24468_s1 + $0x18e8] ss:$52 sps:$4 sm:$0xff]   ;;  %v17267_v23 = vld [vmem:[%s24468_s1 + $0x1204] ss:$52 sps:$4 sm:$0xff]  }
 0x381   :  { %9609 = vmatprep.subr.bf16.mxu1 %v17252_v34  ;;  %v17270_v34 = vld [vmem:[%s24468_s1 + $0x1884] ss:$52 sps:$4 sm:$0xff]  }
 0x383   :  { %9557 = vmatpush2.bf16.msra.mxu0 %v17247_v50  ;;  %v17265_v50 = vld [vmem:[%s24468_s1 + $0x1200] ss:$52 sps:$4 sm:$0xff]  }
 0x384   :  { %9610 = vmatpush2.bf16.msra.mxu1 %v17250_v22  ;;  %9558 = vmatprep.subr.bf16.mxu0 %v17255_v21  ;;  %v17268_v22 = vld [vmem:[%s24468_s1 + $0x1880] ss:$52 sps:$4 sm:$0xff]   ;;  %v17273_v21 = vld [vmem:[%s24468_s1 + $0x119c] ss:$52 sps:$4 sm:$0xff]  }
 0x385   :  { %9611 = vmatprep.subr.bf16.mxu1 %v17258_v17  ;;  %v17276_v17 = vld [vmem:[%s24468_s1 + $0x181c] ss:$52 sps:$4 sm:$0xff]  }
 0x387   :  { %9559 = vmatpush2.bf16.msra.mxu0 %v17253_v10  ;;  %v21580_v10 = vpop.f32.mrf.mxu1 }
 0x388   :  { %9612 = vmatpush2.bf16.msra.mxu1 %v17256_v20  ;;  %9560 = vmatprep.subr.bf16.mxu0 %v17261_v57  ;;  %24553 = vst [vmem:[#allocation50_spill] sm:$0xff] %v21580_v10  ;;  %v17271_v20 = vld [vmem:[%s24468_s1 + $0x1198] ss:$52 sps:$4 sm:$0xff]   ;;  %v21644_v10 = vpop.f32.mrf.mxu0 }
 0x389   :  { %9613 = vmatprep.subr.bf16.mxu1 %v17264_v24  ;;  %v17274_v57 = vld [vmem:[%s24468_s1 + $0x1818] ss:$52 sps:$4 sm:$0xff]   ;;  %v17279_v24 = vld [vmem:[%s24468_s1 + $0x1134] ss:$52 sps:$4 sm:$0xff]   ;;  %24555 = vst [vmem:[#allocation52_spill] sm:$0xff] %v21644_v10 }
 0x38b   :  { %9561 = vmatpush2.bf16.msra.mxu0 %v17259_v9  ;;  %v17282_v9 = vld [vmem:[%s24468_s1 + $0x17b4] ss:$52 sps:$4 sm:$0xff]  }
 0x38c   :  { %9614 = vmatpush2.bf16.msra.mxu1 %v17262_v30  ;;  %9562 = vmatprep.subr.bf16.mxu0 %v17267_v23 }
 0x38d   :  { %9615 = vmatprep.subr.bf16.mxu1 %v17270_v34  ;;  %v17277_v34 = vld [vmem:[%s24468_s1 + $0x1130] ss:$52 sps:$4 sm:$0xff]  }
 0x38f   :  { %9563 = vmatpush2.bf16.msra.mxu0 %v17265_v50  ;;  %v17280_v50 = vld [vmem:[%s24468_s1 + $0x17b0] ss:$52 sps:$4 sm:$0xff]  }
 0x390   :  { %9616 = vmatpush2.bf16.msra.mxu1 %v17268_v22  ;;  %9564 = vmatprep.subr.bf16.mxu0 %v17273_v21  ;;  %v17285_v21 = vld [vmem:[%s24468_s1 + $0x10cc] ss:$52 sps:$4 sm:$0xff]  }
 0x391   :  { %9617 = vmatprep.subr.bf16.mxu1 %v17276_v17 }
 0x393   :  { %v9203_v30 = vpop.f32.mrf.mxu1  ;;  %9565 = vmatpush2.bf16.msra.mxu0 %v17271_v20 }
 0x394   :  { %v9204_v23 = vadd.f32 %v9203_v30, %v21427_v35  ;;  %9618 = vmatpush2.bf16.msra.mxu1 %v17274_v57  ;;  %9566 = vmatprep.subr.bf16.mxu0 %v17279_v24  ;;  %v17288_v35 = vld [vmem:[%s24468_s1 + $0x174c] ss:$52 sps:$4 sm:$0xff]   ;;  %v17283_v24 = vld [vmem:[%s24468_s1 + $0x10c8] ss:$52 sps:$4 sm:$0xff]  }
 0x395   :  { %v9205_v22 = vpop.f32.mrf.mxu1  ;;  %9619 = vmatprep.subr.bf16.mxu1 %v17282_v9  ;;  %v17286_v9 = vld [vmem:[%s24468_s1 + $0x1748] ss:$52 sps:$4 sm:$0xff]  }
 0x396   :  { %v9206_v17 = vadd.f32 %v9205_v22, %v21441_v59  ;;  %v17291_v59 = vld [vmem:[%s24468_s1 + $0x1064] ss:$52 sps:$4 sm:$0xff]   ;;  %v17289_v22 = vld [vmem:[%s24468_s1 + $0x1060] ss:$52 sps:$4 sm:$0xff]  }
 0x397   :  { %v9207_v20 = vpop.f32.mrf.mxu1  ;;  %9567 = vmatpush2.bf16.msra.mxu0 %v17277_v34 }
 0x398   :  { %v9208_v57 = vadd.f32 %v9207_v20, %v21445_v55  ;;  %9620 = vmatpush2.bf16.msra.mxu1 %v17280_v50  ;;  %9568 = vmatprep.subr.bf16.mxu0 %v17285_v21  ;;  %v17294_v55 = vld [vmem:[%s24468_s1 + $0x16e4] ss:$52 sps:$4 sm:$0xff]   ;;  %v17292_v21 = vld [vmem:[%s24468_s1 + $0x16e0] ss:$52 sps:$4 sm:$0xff]   ;;  %v17297_v20 = vld [vmem:[%s24468_s1 + $0x1cfc] ss:$52 sps:$4 sm:$0xff]  }
 0x399   :  { %v21615_v30 = vpop.f32.mrf.mxu1  ;;  %9621 = vmatprep.subr.bf16.mxu1 %v17288_v35 }
 0x39a   :  { %24554 = vst [vmem:[#allocation51_spill] sm:$0xff] %v21615_v30 }
 0x39b   :  { %v9213_v34 = vpop.f32.mrf.mxu1  ;;  %9569 = vmatpush2.bf16.msra.mxu0 %v17283_v24 }
 0x39c   :  { %v9214_v50 = vadd.f32 %v9213_v34, %v21470_v31  ;;  %9622 = vmatpush2.bf16.msra.mxu1 %v17286_v9  ;;  %9570 = vmatprep.subr.bf16.mxu0 %v17291_v59  ;;  %v17300_v31 = vld [vmem:[%s24468_s1 + $0x237c] ss:$52 sps:$4 sm:$0xff]   ;;  %v17295_v59 = vld [vmem:[%s24468_s1 + $0x1cf8] ss:$52 sps:$4 sm:$0xff]  }
 0x39d   :  { %v9215_v35 = vpop.f32.mrf.mxu1  ;;  %9623 = vmatprep.subr.bf16.mxu1 %v17294_v55  ;;  %v17298_v55 = vld [vmem:[%s24468_s1 + $0x2378] ss:$52 sps:$4 sm:$0xff]  }
 0x39e   :  { %v9216_v24 = vadd.f32 %v9215_v35, %v21478_v8  ;;  %v17303_v8 = vld [vmem:[%s24468_s1 + $0x1c94] ss:$52 sps:$4 sm:$0xff]   ;;  %v17301_v35 = vld [vmem:[%s24468_s1 + $0x1c90] ss:$52 sps:$4 sm:$0xff]  }
 0x39f   :  { %v9217_v9 = vpop.f32.mrf.mxu1  ;;  %9571 = vmatpush2.bf16.msra.mxu0 %v17289_v22 }
 0x3a0   :  { %v9218_v34 = vadd.f32 %v9217_v9, %v21488_v6  ;;  %9624 = vmatpush2.bf16.msra.mxu1 %v17292_v21  ;;  %9646 = vmatprep.subr.bf16.mxu0 %v17297_v20  ;;  %v17306_v6 = vld [vmem:[%s24468_s1 + $0x2314] ss:$52 sps:$4 sm:$0xff]   ;;  %v17304_v20 = vld [vmem:[%s24468_s1 + $0x2310] ss:$52 sps:$4 sm:$0xff]   ;;  %v17309_v9 = vld [vmem:[%s24468_s1 + $0x1c2c] ss:$52 sps:$4 sm:$0xff]  }
 0x3a1   :  { %9699 = vmatprep.subr.bf16.mxu1 %v17300_v31 }
 0x3a2   :  { %v9256_v22 = vpop.f32.mrf.mxu0  ;;  %9573 = vmatmul.mubr.bf16.vlgmr.msra.gmra.mxu0 %v18789_v47 }
 0x3a3   :  { %9626 = vmatmul.mubr.bf16.vlgmr.msra.gmra.mxu1 %v18791_v48  ;;  %v21654_v21 = vadd.f32 %v9256_v22, %v9204_v23  ;;  %9647 = vmatpush1.bf16.msra.mxu0 %v17295_v59  ;;  %v17312_v23 = vld [vmem:[%s24468_s1 + $0x22ac] ss:$52 sps:$4 sm:$0xff]  }
 0x3a4   :  { %9700 = vmatpush1.bf16.msra.mxu1 %v17298_v55  ;;  %v9258_v31 = vpop.f32.mrf.mxu0  ;;  %9648 = vmatprep.subr.bf16.mxu0 %v17303_v8  ;;  %v17307_v8 = vld [vmem:[%s24468_s1 + $0x1c28] ss:$52 sps:$4 sm:$0xff]  }
 0x3a5   :  { %9701 = vmatprep.subr.bf16.mxu1 %v17306_v6  ;;  %v21668_v59 = vadd.f32 %v9258_v31, %v9206_v17  ;;  %9582 = vmatprep.mubr.bf16.mxu0 %v18811_v58  ;;  %v17310_v6 = vld [vmem:[%s24468_s1 + $0x22a8] ss:$52 sps:$4 sm:$0xff]   ;;  %v17315_v17 = vld [vmem:[%s24468_s1 + $0x1bc4] ss:$52 sps:$4 sm:$0xff]   ;;  %v17313_v31 = vld [vmem:[%s24468_s1 + $0x1bc0] ss:$52 sps:$4 sm:$0xff]  }
 0x3a6   :  { %9635 = vmatprep.mubr.bf16.mxu1 %v18819_v61  ;;  %v9260_v55 = vpop.f32.mrf.mxu0 }
 0x3a7   :  { %v21672_v22 = vadd.f32 %v9260_v55, %v9208_v57  ;;  %9649 = vmatpush1.bf16.msra.mxu0 %v17301_v35  ;;  %v17318_v57 = vld [vmem:[%s24468_s1 + $0x2244] ss:$52 sps:$4 sm:$0xff]   ;;  %v17321_v55 = vld [vmem:[%s24468_s1 + $0x1b5c] ss:$52 sps:$4 sm:$0xff]  }
 0x3a8   :  { %9702 = vmatpush1.bf16.msra.mxu1 %v17304_v20  ;;  %v21680_v10 = vpop.f32.mrf.mxu0  ;;  %9650 = vmatprep.subr.bf16.mxu0 %v17309_v9  ;;  %v17316_v9 = vld [vmem:[%s24468_s1 + $0x2240] ss:$52 sps:$4 sm:$0xff]  }
 0x3a9   :  { %24556 = vst [vmem:[#allocation53_spill] sm:$0xff] %v21680_v10  ;;  %9703 = vmatprep.subr.bf16.mxu1 %v17312_v23 }
 0x3aa   :  { %v9266_v35 = vpop.f32.mrf.mxu0  ;;  %9583 = vmatmul.mubr.bf16.gmra.mxu0 %v18837_v4 }
 0x3ab   :  { %9636 = vmatmul.mubr.bf16.gmra.mxu1 %v18845_v7  ;;  %v21690_v20 = vadd.f32 %v9266_v35, %v9214_v50  ;;  %9651 = vmatpush1.bf16.msra.mxu0 %v17307_v8  ;;  %v17324_v50 = vld [vmem:[%s24468_s1 + $0x21dc] ss:$52 sps:$4 sm:$0xff]  }
 0x3ac   :  { %9704 = vmatpush1.bf16.msra.mxu1 %v17310_v6  ;;  %v9268_v23 = vpop.f32.mrf.mxu0  ;;  %9652 = vmatprep.subr.bf16.mxu0 %v17315_v17  ;;  %v17319_v17 = vld [vmem:[%s24468_s1 + $0x1b58] ss:$52 sps:$4 sm:$0xff]  }
 0x3ad   :  { %9705 = vmatprep.subr.bf16.mxu1 %v17318_v57  ;;  %v21704_v8 = vadd.f32 %v9268_v23, %v9216_v24  ;;  %9678 = vmatprep.mubr.bf16.mxu0 %v18873_v18  ;;  %v17322_v57 = vld [vmem:[%s24468_s1 + $0x21d8] ss:$52 sps:$4 sm:$0xff]   ;;  %v17327_v24 = vld [vmem:[%s24468_s1 + $0x1af4] ss:$52 sps:$4 sm:$0xff]  }
 0x3ae   :  { %9731 = vmatprep.mubr.bf16.mxu1 %v18875_v19  ;;  %v9270_v6 = vpop.f32.mrf.mxu0  ;;  %v17333_v23 = vld [vmem:[%s24468_s1 + $0x1a8c] ss:$52 sps:$4 sm:$0xff]  }
 0x3af   :  { %v21708_v35 = vadd.f32 %v9270_v6, %v9218_v34  ;;  %9653 = vmatpush1.bf16.msra.mxu0 %v17313_v31  ;;  %v17330_v34 = vld [vmem:[%s24468_s1 + $0x2174] ss:$52 sps:$4 sm:$0xff]   ;;  %v17325_v31 = vld [vmem:[%s24468_s1 + $0x1af0] ss:$52 sps:$4 sm:$0xff]  }
 0x3b0   :  { %9706 = vmatpush1.bf16.msra.mxu1 %v17316_v9  ;;  %9654 = vmatprep.subr.bf16.mxu0 %v17321_v55  ;;  %v17328_v9 = vld [vmem:[%s24468_s1 + $0x2170] ss:$52 sps:$4 sm:$0xff]   ;;  %v17336_v55 = vld [vmem:[%s24468_s1 + $0x210c] ss:$52 sps:$4 sm:$0xff]   ;;  %v17334_v6 = vld [vmem:[%s24468_s1 + $0x2108] ss:$52 sps:$4 sm:$0xff]  }
 0x3b1   :  { %9707 = vmatprep.subr.bf16.mxu1 %v17324_v50  ;;  %v17331_v50 = vld [vmem:[%s24468_s1 + $0x1a88] ss:$52 sps:$4 sm:$0xff]  }
 0x3b3   :  { %9655 = vmatpush1.bf16.msra.mxu0 %v17319_v17  ;;  %v17339_v17 = vld [vmem:[%s24468_s1 + $0x1a24] ss:$52 sps:$4 sm:$0xff]  }
 0x3b4   :  { %9708 = vmatpush1.bf16.msra.mxu1 %v17322_v57  ;;  %9656 = vmatprep.subr.bf16.mxu0 %v17327_v24  ;;  %v17342_v57 = vld [vmem:[%s24468_s1 + $0x20a4] ss:$52 sps:$4 sm:$0xff]   ;;  %v17337_v24 = vld [vmem:[%s24468_s1 + $0x1a20] ss:$52 sps:$4 sm:$0xff]  }
 0x3b5   :  { %9709 = vmatprep.subr.bf16.mxu1 %v17330_v34  ;;  %v17340_v34 = vld [vmem:[%s24468_s1 + $0x20a0] ss:$52 sps:$4 sm:$0xff]  }
 0x3b7   :  { %9657 = vmatpush1.bf16.msra.mxu0 %v17325_v31  ;;  %v17345_v31 = vld [vmem:[%s24468_s1 + $0x203c] ss:$52 sps:$4 sm:$0xff]  }
 0x3b8   :  { %9710 = vmatpush1.bf16.msra.mxu1 %v17328_v9  ;;  %9658 = vmatprep.subr.bf16.mxu0 %v17333_v23  ;;  %v17348_v9 = vld [vmem:[%s24468_s1 + $0x26bc] ss:$52 sps:$4 sm:$0xff]   ;;  %v17343_v23 = vld [vmem:[%s24468_s1 + $0x2038] ss:$52 sps:$4 sm:$0xff]  }
 0x3b9   :  { %9711 = vmatprep.subr.bf16.mxu1 %v17336_v55  ;;  %v17346_v55 = vld [vmem:[%s24468_s1 + $0x26b8] ss:$52 sps:$4 sm:$0xff]  }
 0x3bb   :  { %9659 = vmatpush1.bf16.msra.mxu0 %v17331_v50  ;;  %v17351_v50 = vld [vmem:[%s24468_s1 + $0x1fd4] ss:$52 sps:$4 sm:$0xff]  }
 0x3bc   :  { %9712 = vmatpush1.bf16.msra.mxu1 %v17334_v6  ;;  %9660 = vmatprep.subr.bf16.mxu0 %v17339_v17  ;;  %v17354_v6 = vld [vmem:[%s24468_s1 + $0x2654] ss:$52 sps:$4 sm:$0xff]   ;;  %v17349_v17 = vld [vmem:[%s24468_s1 + $0x1fd0] ss:$52 sps:$4 sm:$0xff]  }
 0x3bd   :  { %9713 = vmatprep.subr.bf16.mxu1 %v17342_v57  ;;  %v17352_v57 = vld [vmem:[%s24468_s1 + $0x2650] ss:$52 sps:$4 sm:$0xff]  }
 0x3bf   :  { %9661 = vmatpush1.bf16.msra.mxu0 %v17337_v24  ;;  %v17357_v24 = vld [vmem:[%s24468_s1 + $0x1f6c] ss:$52 sps:$4 sm:$0xff]  }
 0x3c0   :  { %9714 = vmatpush1.bf16.msra.mxu1 %v17340_v34  ;;  %9662 = vmatprep.subr.bf16.mxu0 %v17345_v31  ;;  %v17360_v34 = vld [vmem:[%s24468_s1 + $0x25ec] ss:$52 sps:$4 sm:$0xff]   ;;  %v17355_v31 = vld [vmem:[%s24468_s1 + $0x1f68] ss:$52 sps:$4 sm:$0xff]  }
 0x3c1   :  { %9715 = vmatprep.subr.bf16.mxu1 %v17348_v9  ;;  %v17358_v9 = vld [vmem:[%s24468_s1 + $0x25e8] ss:$52 sps:$4 sm:$0xff]  }
 0x3c3   :  { %9663 = vmatpush2.bf16.msra.mxu0 %v17343_v23  ;;  %v17363_v23 = vld [vmem:[%s24468_s1 + $0x1f04] ss:$52 sps:$4 sm:$0xff]  }
 0x3c4   :  { %9716 = vmatpush2.bf16.msra.mxu1 %v17346_v55  ;;  %9664 = vmatprep.subr.bf16.mxu0 %v17351_v50  ;;  %v17366_v55 = vld [vmem:[%s24468_s1 + $0x2584] ss:$52 sps:$4 sm:$0xff]   ;;  %v17361_v50 = vld [vmem:[%s24468_s1 + $0x1f00] ss:$52 sps:$4 sm:$0xff]  }
 0x3c5   :  { %9717 = vmatprep.subr.bf16.mxu1 %v17354_v6  ;;  %v17364_v6 = vld [vmem:[%s24468_s1 + $0x2580] ss:$52 sps:$4 sm:$0xff]  }
 0x3c7   :  { %9665 = vmatpush2.bf16.msra.mxu0 %v17349_v17  ;;  %v17369_v17 = vld [vmem:[%s24468_s1 + $0x1e9c] ss:$52 sps:$4 sm:$0xff]  }
 0x3c8   :  { %9718 = vmatpush2.bf16.msra.mxu1 %v17352_v57  ;;  %9666 = vmatprep.subr.bf16.mxu0 %v17357_v24  ;;  %v17372_v57 = vld [vmem:[%s24468_s1 + $0x251c] ss:$52 sps:$4 sm:$0xff]   ;;  %v17367_v24 = vld [vmem:[%s24468_s1 + $0x1e98] ss:$52 sps:$4 sm:$0xff]  }
 0x3c9   :  { %9719 = vmatprep.subr.bf16.mxu1 %v17360_v34  ;;  %v17370_v34 = vld [vmem:[%s24468_s1 + $0x2518] ss:$52 sps:$4 sm:$0xff]  }
 0x3cb   :  { %9667 = vmatpush2.bf16.msra.mxu0 %v17355_v31  ;;  %v21812_v31 = vpop.f32.mrf.mxu1 }
 0x3cc   :  { %9720 = vmatpush2.bf16.msra.mxu1 %v17358_v9  ;;  %9668 = vmatprep.subr.bf16.mxu0 %v17363_v23  ;;  %24557 = vst [vmem:[#allocation54_spill] sm:$0xff] %v21812_v31  ;;  %v17375_v9 = vld [vmem:[%s24468_s1 + $0x1e34] ss:$52 sps:$4 sm:$0xff]   ;;  %v17381_v31 = vld [vmem:[%s24468_s1 + $0x1dcc] ss:$52 sps:$4 sm:$0xff]  }
 0x3cd   :  { %9721 = vmatprep.subr.bf16.mxu1 %v17366_v55  ;;  %v17378_v23 = vld [vmem:[%s24468_s1 + $0x24b4] ss:$52 sps:$4 sm:$0xff]  }
 0x3cf   :  { %9669 = vmatpush2.bf16.msra.mxu0 %v17361_v50 }
 0x3d0   :  { %9722 = vmatpush2.bf16.msra.mxu1 %v17364_v6  ;;  %9670 = vmatprep.subr.bf16.mxu0 %v17369_v17  ;;  %v17373_v6 = vld [vmem:[%s24468_s1 + $0x1e30] ss:$52 sps:$4 sm:$0xff]  }
 0x3d1   :  { %9723 = vmatprep.subr.bf16.mxu1 %v17372_v57  ;;  %v17376_v17 = vld [vmem:[%s24468_s1 + $0x24b0] ss:$52 sps:$4 sm:$0xff]  }
 0x3d3   :  { %v9309_v55 = vpop.f32.mrf.mxu1  ;;  %9671 = vmatpush2.bf16.msra.mxu0 %v17367_v24 }
 0x3d4   :  { %v9310_v50 = vadd.f32 %v9309_v55, %v21654_v21  ;;  %9724 = vmatpush2.bf16.msra.mxu1 %v17370_v34  ;;  %9672 = vmatprep.subr.bf16.mxu0 %v17375_v9  ;;  %v17384_v21 = vld [vmem:[%s24468_s1 + $0x244c] ss:$52 sps:$4 sm:$0xff]   ;;  %v17379_v9 = vld [vmem:[%s24468_s1 + $0x1dc8] ss:$52 sps:$4 sm:$0xff]  }
 0x3d5   :  { %v9311_v57 = vpop.f32.mrf.mxu1  ;;  %9725 = vmatprep.subr.bf16.mxu1 %v17378_v23  ;;  %v1459_v34 = vld [vmem:[%s24468_s1 + $0x2720] sm:$0x33]  ;;  %v17382_v23 = vld [vmem:[%s24468_s1 + $0x2448] ss:$52 sps:$4 sm:$0xff]  }
 0x3d6   :  { %v21834_v24 = vadd.f32 %v9311_v57, %v21668_v59  ;;  %v17387_v59 = vld [vmem:[%s24468_s1 + $0x1d64] ss:$52 sps:$4 sm:$0xff]  }
 0x3d7   :  { %v9313_v55 = vpop.f32.mrf.mxu1  ;;  %9673 = vmatpush2.bf16.msra.mxu0 %v17373_v6  ;;  %v15114_v6 = vcombine.high %v1459_v34, %v1459_v34 }
 0x3d8   :  { %24558 = vst [vmem:[#allocation55_spill] sm:$0xff] %v21834_v24  ;;  %v9314_v10 = vadd.f32 %v9313_v55, %v21672_v22  ;;  %9726 = vmatpush2.bf16.msra.mxu1 %v17376_v17  ;;  %9674 = vmatprep.subr.bf16.mxu0 %v17381_v31  ;;  %v17390_v22 = vld [vmem:[%s24468_s1 + $0x23e4] ss:$52 sps:$4 sm:$0xff]   ;;  %v17385_v55 = vld [vmem:[%s24468_s1 + $0x1d60] ss:$52 sps:$4 sm:$0xff]  }
 0x3d9   :  { %v21846_v30 = vpop.f32.mrf.mxu1  ;;  %9727 = vmatprep.subr.bf16.mxu1 %v17384_v21  ;;  %v17388_v31 = vld [vmem:[%s24468_s1 + $0x23e0] ss:$52 sps:$4 sm:$0xff]   ;;  %v15113_v21 = vcombine.low %v1459_v34, %v1459_v34 }
 0x3da   :  { %24559 = vst [vmem:[#allocation56_spill] sm:$0xff] %v21846_v30  ;;  %v7939_v30 = vand.u32 %v15114_v6, %v19033_v28  ;;  %v17393_v34 = vld [vmem:[%s24468_s1 + $0x300] ss:$52 sps:$4 sm:$0xff]  }
 0x3db   :  { %v9319_v17 = vpop.f32.mrf.mxu1  ;;  %9675 = vmatpush2.bf16.msra.mxu0 %v17379_v9 }
 0x3dc   :  { %v9320_v57 = vadd.f32 %v9319_v17, %v21690_v20  ;;  %9728 = vmatpush2.bf16.msra.mxu1 %v17382_v23  ;;  %9676 = vmatprep.subr.bf16.mxu0 %v17387_v59  ;;  %v17395_v20 = vld [vmem:[%s24468_s1 + $0x304] ss:$52 sps:$4 sm:$0xff]   ;;  %v7936_v59 = vand.u32 %v15113_v21, %v19033_v28 }
 0x3dd   :  { %v9321_v24 = vpop.f32.mrf.mxu1  ;;  %9729 = vmatprep.subr.bf16.mxu1 %v17390_v22  ;;  %v21871_v22 = vpop.f32.mrf.mxu0 }
 0x3de   :  { %v9322_v9 = vadd.f32 %v9321_v24, %v21704_v8  ;;  %24560 = vst [vmem:[#allocation57_spill] sm:$0xff] %v21871_v22  ;;  %v17398_v8 = vld [vmem:[%s24468_s1 + $0x29c] ss:$52 sps:$4 sm:$0xff]  }
 0x3df   :  { %v9323_v23 = vpop.f32.mrf.mxu1  ;;  %9677 = vmatpush2.bf16.msra.mxu0 %v17385_v55 }
 0x3e0   :  { %v9324_v17 = vadd.f32 %v9323_v23, %v21708_v35  ;;  %9730 = vmatpush2.bf16.msra.mxu1 %v17388_v31  ;;  %9766 = vmatprep.subr.bf16.mxu0 %v7939_v30  ;;  %v17407_v35 = vld [vmem:[%s24468_s1 + $0x984] ss:$52 sps:$4 sm:$0xff]   ;;  %v17401_v23 = vld [vmem:[%s24468_s1 + $0x234] ss:$52 sps:$4 sm:$0xff]  }
 0x3e1   :  { %v21873_v6 = vpop.f32.mrf.mxu1  ;;  %9805 = vmatprep.subr.bf16.mxu1 %v17395_v20  ;;  %v17396_v30 = vld [vmem:[%s24468_s1 + $0x298] ss:$52 sps:$4 sm:$0xff]  }
 0x3e2   :  { %24561 = vst [vmem:[#allocation58_spill] sm:$0xff] %v21873_v6  ;;  %v9362_v24 = vpop.f32.mrf.mxu0  ;;  %9679 = vmatmul.mubr.bf16.vlgmr.msra.gmra.mxu0 %v19054_v38 }
 0x3e3   :  { %9732 = vmatmul.mubr.bf16.vlgmr.msra.gmra.mxu1 %v19056_v39  ;;  %v9415_v55 = vpop.f32.mrf.mxu1  ;;  %v9363_v31 = vadd.f32 %v9362_v24, %v9310_v50  ;;  %9767 = vmatpush1.bf16.msra.mxu0 %v7936_v59  ;;  %v17399_v24 = vld [vmem:[%s24468_s1 + $0x230] ss:$52 sps:$4 sm:$0xff]  }
 0x3e4   :  { %9806 = vmatpush1.bf16.msra.mxu1 %v17393_v34  ;;  %v21886_v21 = vpop.f32.mrf.mxu0  ;;  %9688 = vmatprep.mubr.bf16.mxu0 %v19068_v46 }
 0x3e5   :  { %24562 = vst [vmem:[#allocation59_spill] sm:$0xff] %v21886_v21  ;;  %v21888_v20 = vpop.f32.mrf.mxu1  ;;  %9807 = vmatprep.subr.bf16.mxu1 %v17398_v8  ;;  %v9416_v6 = vadd.f32 %v9415_v55, %v9363_v31  ;;  %9741 = vmatprep.mubr.bf16.mxu1 %v19076_v52  ;;  %v17404_v55 = vld [vmem:[%s24468_s1 + $0x1cc] ss:$52 sps:$4 sm:$0xff]  }
 0x3e6   :  { %24563 = vst [vmem:[#allocation60_spill] sm:$0xff] %v21888_v20  ;;  %9858 = vmatprep.subr.bf16.mxu0 %v17407_v35  ;;  %v9366_v50 = vpop.f32.mrf.mxu0 }
 0x3e7   :  { %v9419_v34 = vpop.f32.mrf.mxu1  ;;  %v9367_v59 = vadd.f32 %v9366_v50, %v9314_v10  ;;  %v10525_v10 = vmax.f32 %v9416_v6, 0.0 }
 0x3e8   :  { %9808 = vmatpush1.bf16.msra.mxu1 %v17396_v30  ;;  %v21898_v22 = vpop.f32.mrf.mxu0 }
 0x3e9   :  { %24564 = vst [vmem:[#allocation61_spill] sm:$0xff] %v21898_v22  ;;  %v21900_v8 = vpop.f32.mrf.mxu1  ;;  %9809 = vmatprep.subr.bf16.mxu1 %v17401_v23  ;;  %v9420_v31 = vadd.f32 %v9419_v34, %v9367_v59  ;;  %v17410_v34 = vld [vmem:[%s24468_s1 + $0x164] ss:$52 sps:$4 sm:$0xff]  }
 0x3ea   :  { %24565 = vst [vmem:[#allocation62_spill] sm:$0xff] %v21900_v8  ;;  %v9372_v20 = vpop.f32.mrf.mxu0  ;;  %9689 = vmatmul.mubr.bf16.gmra.mxu0 %v19097_v62  ;;  %v17402_v8 = vld [vmem:[%s24468_s1 + $0x1c8] ss:$52 sps:$4 sm:$0xff]  }
 0x3eb   :  { %v9425_v35 = vpop.f32.mrf.mxu1  ;;  %9742 = vmatmul.mubr.bf16.gmra.mxu1 %v19099_v1  ;;  %v10538_v30 = vmax.f32 %v9420_v31, 0.0  ;;  %v9373_v50 = vadd.f32 %v9372_v20, %v9320_v57  ;;  %9784 = vmatprep.mubr.bf16.mxu0 %v24527_v60 }
 0x3ec   :  { %9810 = vmatpush1.bf16.msra.mxu1 %v17399_v24  ;;  %v9374_v23 = vpop.f32.mrf.mxu0  ;;  %9837 = vmatprep.mubr.bf16.mxu1 %v18444_v53 }
 0x3ed   :  { %v9427_v21 = vpop.f32.mrf.mxu1  ;;  %9811 = vmatprep.subr.bf16.mxu1 %v17404_v55  ;;  %v21915_v59 = vpack.c.bf16 %v10538_v30, %v10525_v10  ;;  %v9375_v6 = vadd.f32 %v9374_v23, %v9322_v9  ;;  %v9426_v57 = vadd.f32 %v9425_v35, %v9373_v50  ;;  %v17405_v55 = vld [vmem:[%s24468_s1 + $0x980] ss:$52 sps:$4 sm:$0xff]   ;;  %v17413_v9 = vld [vmem:[%s24468_s1 + $0x91c] ss:$52 sps:$4 sm:$0xff]   ;;  %v17411_v10 = vld [vmem:[%s24468_s1 + $0x918] ss:$52 sps:$4 sm:$0xff]  }
 0x3ee   :  { %v9376_v20 = vpop.f32.mrf.mxu0  ;;  %v17414_v30 = vld [vmem:[%s24468_s1 + $0xf8] ss:$52 sps:$4 sm:$0xff]   ;;  %v17419_v50 = vld [vmem:[%s24468_s1 + $0x8b4] ss:$52 sps:$4 sm:$0xff]  }
 0x3ef   :  { %24566 = vst [vmem:[#allocation63_spill] sm:$0xff] %v21915_v59  ;;  %v9429_v24 = vpop.f32.mrf.mxu1  ;;  %v9377_v31 = vadd.f32 %v9376_v20, %v9324_v17  ;;  %v21917_v22 = vadd.f32 %v9427_v21, %v9375_v6  ;;  %v17416_v17 = vld [vmem:[%s24468_s1 + $0xfc] ss:$52 sps:$4 sm:$0xff]   ;;  %v17422_v23 = vld [vmem:[%s24468_s1 + $0x94] ss:$52 sps:$4 sm:$0xff]  }
 0x3f0   :  { %9812 = vmatpush1.bf16.msra.mxu1 %v17402_v8  ;;  %v10551_v8 = vmax.f32 %v9426_v57, 0.0  ;;  %v17420_v6 = vld [vmem:[%s24468_s1 + $0x90] ss:$52 sps:$4 sm:$0xff]   ;;  %v17425_v57 = vld [vmem:[%s24468_s1 + $0x84c] ss:$52 sps:$4 sm:$0xff]  }
 0x3f1   :  { %24567 = vst [vmem:[#allocation64_spill] sm:$0xff] %v21917_v22  ;;  %9813 = vmatprep.subr.bf16.mxu1 %v17410_v34  ;;  %v9430_v21 = vadd.f32 %v9429_v24, %v9377_v31  ;;  %v17428_v20 = vld [vmem:[%s24468_s1 + $0x2c] ss:$52 sps:$4 sm:$0xff]   ;;  %v17423_v24 = vld [vmem:[%s24468_s1 + $0x848] ss:$52 sps:$4 sm:$0xff]  }
 0x3f2   :  { %15126 = vmatmul.mubr.msk.bf16.vlgmr.msra.gmra.mxu0 %vm7900_vm2, %v19123_v11  ;;  %v17426_v31 = vld [vmem:[%s24468_s1 + $0x28] ss:$52 sps:$4 sm:$0xff]  }
 0x3f3   :  { %v10564_v35 = vmax.f32 %v9430_v21, 0.0  ;;  %9859 = vmatpush1.bf16.msra.mxu0 %v17405_v55  ;;  %9794 = vmatprep.mubr.bf16.mxu0 %v24527_v60  ;;  %v17431_v55 = vld [vmem:[%s24468_s1 + $0x7e4] ss:$52 sps:$4 sm:$0xff]   ;;  %v17432_v21 = vld [vmem:[%s24468_s1 + $0x640] ss:$52 sps:$4 sm:$0xff]  }
 0x3f4   :  { %9814 = vmatpush1.bf16.msra.mxu1 %v17408_v16  ;;  %9860 = vmatprep.subr.bf16.mxu0 %v17413_v9  ;;  %v17417_v16 = vld [vmem:[%s24468_s1 + $0x8b0] ss:$52 sps:$4 sm:$0xff]  }
 0x3f5   :  { %9815 = vmatprep.subr.bf16.mxu1 %v17416_v17  ;;  %v21945_v34 = vpack.c.bf16 %v10564_v35, %v10551_v8  ;;  %v17434_v9 = vld [vmem:[%s24468_s1 + $0x644] ss:$52 sps:$4 sm:$0xff]   ;;  %v17429_v17 = vld [vmem:[%s24468_s1 + $0x7e0] ss:$52 sps:$4 sm:$0xff]   ;;  %v17437_v8 = vld [vmem:[%s24468_s1 + $0x77c] ss:$52 sps:$4 sm:$0xff]  }
 0x3f6   :  { %v17440_v35 = vld [vmem:[%s24468_s1 + $0x5dc] ss:$52 sps:$4 sm:$0xff]  }
 0x3f7   :  { %24568 = vst [vmem:[#allocation65_spill] sm:$0xff] %v21945_v34  ;;  %9861 = vmatpush1.bf16.msra.mxu0 %v17411_v10  ;;  %v17435_v10 = vld [vmem:[%s24468_s1 + $0x778] ss:$52 sps:$4 sm:$0xff]  }
 0x3f8   :  { %9816 = vmatpush1.bf16.msra.mxu1 %v17414_v30  ;;  %9862 = vmatprep.subr.bf16.mxu0 %v17419_v50  ;;  %v17438_v30 = vld [vmem:[%s24468_s1 + $0x5d8] ss:$52 sps:$4 sm:$0xff]   ;;  %v17443_v50 = vld [vmem:[%s24468_s1 + $0x714] ss:$52 sps:$4 sm:$0xff]  }
 0x3f9   :  { %9817 = vmatprep.subr.bf16.mxu1 %v17422_v23  ;;  %v17446_v23 = vld [vmem:[%s24468_s1 + $0x574] ss:$52 sps:$4 sm:$0xff]  }
 0x3fa   :  { %15127 = vmatmul.mubr.msk.bf16.gmra.mxu0 %vm7900_vm2, %v19158_v26 }
 0x3fb   :  { %9863 = vmatpush1.bf16.msra.mxu0 %v17417_v16  ;;  %9890 = vmatprep.mubr.bf16.mxu0 %v18446_v54  ;;  %v17441_v16 = vld [vmem:[%s24468_s1 + $0x710] ss:$52 sps:$4 sm:$0xff]  }
 0x3fc   :  { %9818 = vmatpush1.bf16.msra.mxu1 %v17420_v6  ;;  %9864 = vmatprep.subr.bf16.mxu0 %v17425_v57  ;;  %v17444_v6 = vld [vmem:[%s24468_s1 + $0x570] ss:$52 sps:$4 sm:$0xff]   ;;  %v17449_v57 = vld [vmem:[%s24468_s1 + $0x6ac] ss:$52 sps:$4 sm:$0xff]  }
 0x3fd   :  { %9819 = vmatprep.subr.bf16.mxu1 %v17428_v20  ;;  %v17452_v20 = vld [vmem:[%s24468_s1 + $0x50c] ss:$52 sps:$4 sm:$0xff]  }
 0x3ff   :  { %9865 = vmatpush1.bf16.msra.mxu0 %v17423_v24  ;;  %v17447_v24 = vld [vmem:[%s24468_s1 + $0x6a8] ss:$52 sps:$4 sm:$0xff]  }
 0x400   :  { %9820 = vmatpush1.bf16.msra.mxu1 %v17426_v31  ;;  %9866 = vmatprep.subr.bf16.mxu0 %v17431_v55  ;;  %v17450_v31 = vld [vmem:[%s24468_s1 + $0x508] ss:$52 sps:$4 sm:$0xff]   ;;  %v17455_v55 = vld [vmem:[%s24468_s1 + $0xcc4] ss:$52 sps:$4 sm:$0xff]  }
 0x401   :  { %9821 = vmatprep.subr.bf16.mxu1 %v17434_v9  ;;  %v17458_v9 = vld [vmem:[%s24468_s1 + $0x4a4] ss:$52 sps:$4 sm:$0xff]  }
 0x403   :  { %9867 = vmatpush1.bf16.msra.mxu0 %v17429_v17  ;;  %v17453_v17 = vld [vmem:[%s24468_s1 + $0xcc0] ss:$52 sps:$4 sm:$0xff]  }
 0x404   :  { %9822 = vmatpush2.bf16.msra.mxu1 %v17432_v21  ;;  %9868 = vmatprep.subr.bf16.mxu0 %v17437_v8  ;;  %v17456_v21 = vld [vmem:[%s24468_s1 + $0x4a0] ss:$52 sps:$4 sm:$0xff]   ;;  %v17461_v8 = vld [vmem:[%s24468_s1 + $0xc5c] ss:$52 sps:$4 sm:$0xff]  }
 0x405   :  { %9823 = vmatprep.subr.bf16.mxu1 %v17440_v35  ;;  %v17464_v35 = vld [vmem:[%s24468_s1 + $0x43c] ss:$52 sps:$4 sm:$0xff]  }
 0x407   :  { %9869 = vmatpush1.bf16.msra.mxu0 %v17435_v10  ;;  %v17459_v10 = vld [vmem:[%s24468_s1 + $0xc58] ss:$52 sps:$4 sm:$0xff]  }
 0x408   :  { %9824 = vmatpush2.bf16.msra.mxu1 %v17438_v30  ;;  %9870 = vmatprep.subr.bf16.mxu0 %v17443_v50  ;;  %v17462_v30 = vld [vmem:[%s24468_s1 + $0x438] ss:$52 sps:$4 sm:$0xff]   ;;  %v17467_v50 = vld [vmem:[%s24468_s1 + $0xbf4] ss:$52 sps:$4 sm:$0xff]  }
 0x409   :  { %9825 = vmatprep.subr.bf16.mxu1 %v17446_v23  ;;  %v17470_v23 = vld [vmem:[%s24468_s1 + $0x3d4] ss:$52 sps:$4 sm:$0xff]  }
 0x40b   :  { %9871 = vmatpush1.bf16.msra.mxu0 %v17441_v16  ;;  %v17465_v16 = vld [vmem:[%s24468_s1 + $0xbf0] ss:$52 sps:$4 sm:$0xff]  }
 0x40c   :  { %9826 = vmatpush2.bf16.msra.mxu1 %v17444_v6  ;;  %9872 = vmatprep.subr.bf16.mxu0 %v17449_v57  ;;  %v17468_v6 = vld [vmem:[%s24468_s1 + $0x3d0] ss:$52 sps:$4 sm:$0xff]   ;;  %v17473_v57 = vld [vmem:[%s24468_s1 + $0xb8c] ss:$52 sps:$4 sm:$0xff]  }
 0x40d   :  { %9827 = vmatprep.subr.bf16.mxu1 %v17452_v20  ;;  %v17476_v20 = vld [vmem:[%s24468_s1 + $0x36c] ss:$52 sps:$4 sm:$0xff]  }
 0x40f   :  { %9873 = vmatpush1.bf16.msra.mxu0 %v17447_v24  ;;  %v17471_v24 = vld [vmem:[%s24468_s1 + $0xb88] ss:$52 sps:$4 sm:$0xff]  }
 0x410   :  { %9828 = vmatpush2.bf16.msra.mxu1 %v17450_v31  ;;  %9874 = vmatprep.subr.bf16.mxu0 %v17455_v55  ;;  %v17474_v31 = vld [vmem:[%s24468_s1 + $0x368] ss:$52 sps:$4 sm:$0xff]   ;;  %v17479_v55 = vld [vmem:[%s24468_s1 + $0xb24] ss:$52 sps:$4 sm:$0xff]  }
 0x411   :  { %9829 = vmatprep.subr.bf16.mxu1 %v17458_v9  ;;  %v1463_v9 = vld [vmem:[%s24470_s2 + $0x8] sm:$0x1f] }
 0x413   :  { %9875 = vmatpush2.bf16.msra.mxu0 %v17453_v17  ;;  %v17482_v17 = vld [vmem:[%s24468_s1 + $0x1004] ss:$52 sps:$4 sm:$0xff]  }
 0x414   :  { %9830 = vmatpush2.bf16.msra.mxu1 %v17456_v21  ;;  %9876 = vmatprep.subr.bf16.mxu0 %v17461_v8  ;;  %v17477_v21 = vld [vmem:[%s24468_s1 + $0xb20] ss:$52 sps:$4 sm:$0xff]   ;;  %v22078_v8 = vrot.slane %v1463_v9, %v19283_v33 }
 0x415   :  { %9831 = vmatprep.subr.bf16.mxu1 %v17464_v35  ;;  %v17480_v35 = vld [vmem:[%s24468_s1 + $0x1000] ss:$52 sps:$4 sm:$0xff]  }
 0x417   :  { %9877 = vmatpush2.bf16.msra.mxu0 %v17459_v10  ;;  %v22083_v10 = vpop.f32.mrf.mxu0 }
 0x418   :  { %9832 = vmatpush2.bf16.msra.mxu1 %v17462_v30  ;;  %9878 = vmatprep.subr.bf16.mxu0 %v17467_v50  ;;  %24569 = vst [vmem:[#allocation66_spill] sm:$0xff] %v22083_v10  ;;  %v22085_v30 = vpop.f32.mrf.mxu1  ;;  %v17485_v50 = vld [vmem:[%s24468_s1 + $0xabc] ss:$52 sps:$4 sm:$0xff]  }
 0x419   :  { %9833 = vmatprep.subr.bf16.mxu1 %v17470_v23  ;;  %24570 = vst [vmem:[#allocation67_spill] sm:$0xff] %v22085_v30  ;;  %v17488_v23 = vld [vmem:[%s24468_s1 + $0xf9c] ss:$52 sps:$4 sm:$0xff]  }
 0x41b   :  { %9879 = vmatpush2.bf16.msra.mxu0 %v17465_v16  ;;  %v22094_v16 = vrot.slane %v1463_v9, %v19292_v36  ;;  %v17491_v9 = vld [vmem:[%s24468_s1 + $0xa54] ss:$52 sps:$4 sm:$0xff]  }
 0x41c   :  { %9834 = vmatpush2.bf16.msra.mxu1 %v17468_v6  ;;  %9880 = vmatprep.subr.bf16.mxu0 %v17473_v57 }
 0x41d   :  { %9835 = vmatprep.subr.bf16.mxu1 %v17476_v20 }
 0x41f   :  { %9881 = vmatpush2.bf16.msra.mxu0 %v17471_v24  ;;  %v17483_v24 = vld [vmem:[%s24468_s1 + $0xab8] ss:$52 sps:$4 sm:$0xff]  }
 0x420   :  { %9836 = vmatpush2.bf16.msra.mxu1 %v17474_v31  ;;  %9882 = vmatprep.subr.bf16.mxu0 %v17479_v55  ;;  %v17486_v31 = vld [vmem:[%s24468_s1 + $0xf98] ss:$52 sps:$4 sm:$0xff]  }
 0x421   :  { %9911 = vmatprep.subr.bf16.mxu1 %v17482_v17 }
 0x422   :  { %v9468_v6 = vpop.f32.mrf.mxu0 }
 0x423   :  { %v9521_v57 = vpop.f32.mrf.mxu1  ;;  %9838 = vmatmul.mubr.bf16.vlgmr.msra.gmra.mxu1 %v18513_v12  ;;  %v9469_v20 = vadd.f32 %v9468_v6, %v22078_v8  ;;  %9883 = vmatpush2.bf16.msra.mxu0 %v17477_v21  ;;  %v17494_v21 = vld [vmem:[%s24468_s1 + $0xf34] ss:$52 sps:$4 sm:$0xff]  }
 0x424   :  { %9912 = vmatpush1.bf16.msra.mxu1 %v17480_v35  ;;  %v9470_v55 = vpop.f32.mrf.mxu0  ;;  %9884 = vmatprep.subr.bf16.mxu0 %v17485_v50 }
 0x425   :  { %v9523_v17 = vpop.f32.mrf.mxu1  ;;  %9913 = vmatprep.subr.bf16.mxu1 %v17488_v23  ;;  %v22110_v35 = vadd.f32 %v9521_v57, %v9469_v20  ;;  %v9471_v6 = vadd.f32 %v9470_v55, %v22094_v16  ;;  %9847 = vmatprep.mubr.bf16.mxu1 %v18588_v37  ;;  %v17489_v23 = vld [vmem:[%s24468_s1 + $0xa50] ss:$52 sps:$4 sm:$0xff]  }
 0x426   :  { %v9472_v33 = vpop.f32.mrf.mxu0  ;;  %v17492_v57 = vld [vmem:[%s24468_s1 + $0xf30] ss:$52 sps:$4 sm:$0xff]  }
 0x427   :  { %v9525_v36 = vpop.f32.mrf.mxu1  ;;  %v22114_v34 = vadd.f32 %v9523_v17, %v9471_v6  ;;  %v9473_v50 = vadd.f32 %v9472_v33, %v22078_v8  ;;  %9885 = vmatpush2.bf16.msra.mxu0 %v17483_v24  ;;  %v17497_v33 = vld [vmem:[%s24468_s1 + $0x9ec] ss:$52 sps:$4 sm:$0xff]  }
 0x428   :  { %9914 = vmatpush1.bf16.msra.mxu1 %v17486_v31  ;;  %v22123_v20 = vpop.f32.mrf.mxu0  ;;  %9886 = vmatprep.subr.bf16.mxu0 %v17491_v9  ;;  %v17500_v24 = vld [vmem:[%s24468_s1 + $0xecc] ss:$52 sps:$4 sm:$0xff]   ;;  %v17495_v9 = vld [vmem:[%s24468_s1 + $0x9e8] ss:$52 sps:$4 sm:$0xff]  }
 0x429   :  { %24571 = vst [vmem:[#allocation68_spill] sm:$0xff] %v22114_v34  ;;  %24572 = vst [vmem:[#allocation69_spill] sm:$0xff] %v22123_v20  ;;  %v22125_v55 = vpop.f32.mrf.mxu1  ;;  %9915 = vmatprep.subr.bf16.mxu1 %v17494_v21  ;;  %v22133_v31 = vadd.f32 %v9525_v36, %v9473_v50  ;;  %v17498_v21 = vld [vmem:[%s24468_s1 + $0xec8] ss:$52 sps:$4 sm:$0xff]   ;;  %v17503_v36 = vld [vmem:[%s24468_s1 + $0x1684] ss:$52 sps:$4 sm:$0xff]  }
 0x42a   :  { %24573 = vst [vmem:[#allocation70_spill] sm:$0xff] %v22125_v55  ;;  %v9478_v17 = vpop.f32.mrf.mxu0  ;;  %v17506_v50 = vld [vmem:[%s24468_s1 + $0xe64] ss:$52 sps:$4 sm:$0xff]  }
 0x42b   :  { %v9531_v6 = vpop.f32.mrf.mxu1  ;;  %9848 = vmatmul.mubr.bf16.gmra.mxu1 %v18602_v42  ;;  %9887 = vmatpush2.bf16.msra.mxu0 %v17489_v23  ;;  %v9479_v59 = vadd.f32 %v9478_v17, %v22078_v8 }
 0x42c   :  { %9916 = vmatpush1.bf16.msra.mxu1 %v17492_v57  ;;  %9888 = vmatprep.subr.bf16.mxu0 %v17497_v33  ;;  %v9480_v23 = vpop.f32.mrf.mxu0  ;;  %v17501_v33 = vld [vmem:[%s24468_s1 + $0x1680] ss:$52 sps:$4 sm:$0xff]  }
 0x42d   :  { %9917 = vmatprep.subr.bf16.mxu1 %v17500_v24  ;;  %v9533_v57 = vpop.f32.mrf.mxu1  ;;  %v9481_v22 = vadd.f32 %v9480_v23, %v22094_v16  ;;  %v22150_v30 = vadd.f32 %v9531_v6, %v9479_v59  ;;  %9943 = vmatprep.mubr.bf16.mxu1 %v18660_v63  ;;  %v17504_v24 = vld [vmem:[%s24468_s1 + $0xe60] ss:$52 sps:$4 sm:$0xff]   ;;  %v17509_v59 = vld [vmem:[%s24468_s1 + $0x161c] ss:$52 sps:$4 sm:$0xff]  }
 0x42e   :  { %v9482_v10 = vpop.f32.mrf.mxu0  ;;  %v17512_v6 = vld [vmem:[%s24468_s1 + $0xdfc] ss:$52 sps:$4 sm:$0xff]  }
 0x42f   :  { %9889 = vmatpush2.bf16.msra.mxu0 %v17495_v9  ;;  %v9483_v17 = vadd.f32 %v9482_v10, %v22078_v8  ;;  %v22160_v34 = vadd.f32 %v9533_v57, %v9481_v22  ;;  %v9535_v9 = vpop.f32.mrf.mxu1  ;;  %v17507_v22 = vld [vmem:[%s24468_s1 + $0x1618] ss:$52 sps:$4 sm:$0xff]   ;;  %v17515_v10 = vld [vmem:[%s24468_s1 + $0x15b4] ss:$52 sps:$4 sm:$0xff]   ;;  %v17516_v23 = vld [vmem:[%s24468_s1 + $0xd90] ss:$52 sps:$4 sm:$0xff]  }
 0x430   :  { %9918 = vmatpush1.bf16.msra.mxu1 %v17498_v21  ;;  %9964 = vmatprep.subr.bf16.mxu0 %v17503_v36  ;;  %v17510_v8 = vld [vmem:[%s24468_s1 + $0xdf8] ss:$52 sps:$4 sm:$0xff]   ;;  %v17518_v36 = vld [vmem:[%s24468_s1 + $0xd94] ss:$52 sps:$4 sm:$0xff]  }
 0x431   :  { %9919 = vmatprep.subr.bf16.mxu1 %v17506_v50  ;;  %v22168_v21 = vadd.f32 %v9535_v9, %v9483_v17  ;;  %v17513_v50 = vld [vmem:[%s24468_s1 + $0x15b0] ss:$52 sps:$4 sm:$0xff]   ;;  %v17521_v57 = vld [vmem:[%s24468_s1 + $0x154c] ss:$52 sps:$4 sm:$0xff]   ;;  %v17522_v17 = vld [vmem:[%s24468_s1 + $0xd28] ss:$52 sps:$4 sm:$0xff]  }
 0x432   :  { %9891 = vmatmul.mubr.bf16.vlgmr.msra.gmra.mxu0 %v18515_v13  ;;  %v17525_v9 = vld [vmem:[%s24468_s1 + $0x14e0] ss:$52 sps:$4 sm:$0xff]  }
 0x433   :  { %9965 = vmatpush1.bf16.msra.mxu0 %v17501_v33  ;;  %9900 = vmatprep.mubr.bf16.mxu0 %v18604_v43  ;;  %v17524_v33 = vld [vmem:[%s24468_s1 + $0xd2c] ss:$52 sps:$4 sm:$0xff]  }
 0x434   :  { %9920 = vmatpush1.bf16.msra.mxu1 %v17504_v24  ;;  %9966 = vmatprep.subr.bf16.mxu0 %v17509_v59  ;;  %v17519_v24 = vld [vmem:[%s24468_s1 + $0x1548] ss:$52 sps:$4 sm:$0xff]   ;;  %v17527_v59 = vld [vmem:[%s24468_s1 + $0x14e4] ss:$52 sps:$4 sm:$0xff]  }
 0x435   :  { %9921 = vmatprep.subr.bf16.mxu1 %v17512_v6  ;;  %v17530_v6 = vld [vmem:[%s24468_s1 + $0x1344] ss:$52 sps:$4 sm:$0xff]  }
 0x437   :  { %9967 = vmatpush1.bf16.msra.mxu0 %v17507_v22  ;;  %v17528_v22 = vld [vmem:[%s24468_s1 + $0x1340] ss:$52 sps:$4 sm:$0xff]  }
 0x438   :  { %9922 = vmatpush1.bf16.msra.mxu1 %v17510_v8  ;;  %9968 = vmatprep.subr.bf16.mxu0 %v17515_v10  ;;  %v17533_v8 = vld [vmem:[%s24468_s1 + $0x147c] ss:$52 sps:$4 sm:$0xff]  }
 0x439   :  { %9923 = vmatprep.subr.bf16.mxu1 %v17518_v36  ;;  %v17536_v10 = vld [vmem:[%s24468_s1 + $0x12dc] ss:$52 sps:$4 sm:$0xff]   ;;  %v17531_v36 = vld [vmem:[%s24468_s1 + $0x1478] ss:$52 sps:$4 sm:$0xff]  }
 0x43a   :  { %9901 = vmatmul.mubr.bf16.gmra.mxu0 %v18624_v49 }
 0x43b   :  { %9969 = vmatpush1.bf16.msra.mxu0 %v17513_v50  ;;  %9996 = vmatprep.mubr.bf16.mxu0 %v18662_v0  ;;  %v17534_v50 = vld [vmem:[%s24468_s1 + $0x12d8] ss:$52 sps:$4 sm:$0xff]  }
 0x43c   :  { %9924 = vmatpush1.bf16.msra.mxu1 %v17516_v23  ;;  %9970 = vmatprep.subr.bf16.mxu0 %v17521_v57  ;;  %v17539_v23 = vld [vmem:[%s24468_s1 + $0x1414] ss:$52 sps:$4 sm:$0xff]  }
 0x43d   :  { %9925 = vmatprep.subr.bf16.mxu1 %v17524_v33  ;;  %v17542_v57 = vld [vmem:[%s24468_s1 + $0x1274] ss:$52 sps:$4 sm:$0xff]   ;;  %v17537_v33 = vld [vmem:[%s24468_s1 + $0x1410] ss:$52 sps:$4 sm:$0xff]  }
 0x43f   :  { %9971 = vmatpush1.bf16.msra.mxu0 %v17519_v24  ;;  %v17540_v24 = vld [vmem:[%s24468_s1 + $0x1270] ss:$52 sps:$4 sm:$0xff]  }
 0x440   :  { %9926 = vmatpush1.bf16.msra.mxu1 %v17522_v17  ;;  %9972 = vmatprep.subr.bf16.mxu0 %v17527_v59  ;;  %v17545_v17 = vld [vmem:[%s24468_s1 + $0x13ac] ss:$52 sps:$4 sm:$0xff]  }
 0x441   :  { %9927 = vmatprep.subr.bf16.mxu1 %v17530_v6  ;;  %v17548_v59 = vld [vmem:[%s24468_s1 + $0x120c] ss:$52 sps:$4 sm:$0xff]   ;;  %v17543_v6 = vld [vmem:[%s24468_s1 + $0x13a8] ss:$52 sps:$4 sm:$0xff]  }
 0x443   :  { %9973 = vmatpush1.bf16.msra.mxu0 %v17525_v9  ;;  %v17546_v9 = vld [vmem:[%s24468_s1 + $0x1208] ss:$52 sps:$4 sm:$0xff]  }
 0x444   :  { %9928 = vmatpush2.bf16.msra.mxu1 %v17528_v22  ;;  %9974 = vmatprep.subr.bf16.mxu0 %v17533_v8  ;;  %v17551_v22 = vld [vmem:[%s24468_s1 + $0x19c4] ss:$52 sps:$4 sm:$0xff]  }
 0x445   :  { %9929 = vmatprep.subr.bf16.mxu1 %v17536_v10  ;;  %v17554_v8 = vld [vmem:[%s24468_s1 + $0x11a4] ss:$52 sps:$4 sm:$0xff]   ;;  %v17549_v10 = vld [vmem:[%s24468_s1 + $0x19c0] ss:$52 sps:$4 sm:$0xff]  }
 0x447   :  { %9975 = vmatpush1.bf16.msra.mxu0 %v17531_v36  ;;  %v17552_v36 = vld [vmem:[%s24468_s1 + $0x11a0] ss:$52 sps:$4 sm:$0xff]  }
 0x448   :  { %9930 = vmatpush2.bf16.msra.mxu1 %v17534_v50  ;;  %9976 = vmatprep.subr.bf16.mxu0 %v17539_v23  ;;  %v17557_v50 = vld [vmem:[%s24468_s1 + $0x195c] ss:$52 sps:$4 sm:$0xff]  }
 0x449   :  { %9931 = vmatprep.subr.bf16.mxu1 %v17542_v57  ;;  %v17560_v23 = vld [vmem:[%s24468_s1 + $0x113c] ss:$52 sps:$4 sm:$0xff]   ;;  %v17555_v57 = vld [vmem:[%s24468_s1 + $0x1958] ss:$52 sps:$4 sm:$0xff]  }
 0x44b   :  { %9977 = vmatpush1.bf16.msra.mxu0 %v17537_v33  ;;  %v17558_v33 = vld [vmem:[%s24468_s1 + $0x1138] ss:$52 sps:$4 sm:$0xff]  }
 0x44c   :  { %9932 = vmatpush2.bf16.msra.mxu1 %v17540_v24  ;;  %9978 = vmatprep.subr.bf16.mxu0 %v17545_v17  ;;  %v17563_v24 = vld [vmem:[%s24468_s1 + $0x18f4] ss:$52 sps:$4 sm:$0xff]  }
 0x44d   :  { %9933 = vmatprep.subr.bf16.mxu1 %v17548_v59  ;;  %v17566_v17 = vld [vmem:[%s24468_s1 + $0x10d4] ss:$52 sps:$4 sm:$0xff]   ;;  %v17561_v59 = vld [vmem:[%s24468_s1 + $0x18f0] ss:$52 sps:$4 sm:$0xff]  }
 0x44f   :  { %9979 = vmatpush1.bf16.msra.mxu0 %v17543_v6  ;;  %v17564_v6 = vld [vmem:[%s24468_s1 + $0x10d0] ss:$52 sps:$4 sm:$0xff]  }
 0x450   :  { %9934 = vmatpush2.bf16.msra.mxu1 %v17546_v9  ;;  %9980 = vmatprep.subr.bf16.mxu0 %v17551_v22  ;;  %v17569_v9 = vld [vmem:[%s24468_s1 + $0x188c] ss:$52 sps:$4 sm:$0xff]  }
 0x451   :  { %9935 = vmatprep.subr.bf16.mxu1 %v17554_v8  ;;  %v17572_v22 = vld [vmem:[%s24468_s1 + $0x106c] ss:$52 sps:$4 sm:$0xff]   ;;  %v17567_v8 = vld [vmem:[%s24468_s1 + $0x1888] ss:$52 sps:$4 sm:$0xff]  }
 0x453   :  { %9981 = vmatpush2.bf16.msra.mxu0 %v17549_v10  ;;  %v17570_v10 = vld [vmem:[%s24468_s1 + $0x1068] ss:$52 sps:$4 sm:$0xff]  }
 0x454   :  { %9936 = vmatpush2.bf16.msra.mxu1 %v17552_v36  ;;  %9982 = vmatprep.subr.bf16.mxu0 %v17557_v50  ;;  %v17575_v36 = vld [vmem:[%s24468_s1 + $0x1824] ss:$52 sps:$4 sm:$0xff]  }
 0x455   :  { %9937 = vmatprep.subr.bf16.mxu1 %v17560_v23  ;;  %v17578_v50 = vld [vmem:[%s24468_s1 + $0x1d04] ss:$52 sps:$4 sm:$0xff]   ;;  %v17573_v23 = vld [vmem:[%s24468_s1 + $0x1820] ss:$52 sps:$4 sm:$0xff]  }
 0x457   :  { %9983 = vmatpush2.bf16.msra.mxu0 %v17555_v57  ;;  %v17576_v57 = vld [vmem:[%s24468_s1 + $0x1d00] ss:$52 sps:$4 sm:$0xff]  }
 0x458   :  { %9938 = vmatpush2.bf16.msra.mxu1 %v17558_v33  ;;  %9984 = vmatprep.subr.bf16.mxu0 %v17563_v24  ;;  %v22312_v33 = vpop.f32.mrf.mxu0  ;;  %v22314_v24 = vpop.f32.mrf.mxu1 }
 0x459   :  { %9939 = vmatprep.subr.bf16.mxu1 %v17566_v17  ;;  %v17581_v17 = vld [vmem:[%s24468_s1 + $0x17bc] ss:$52 sps:$4 sm:$0xff]  }
 0x45b   :  { %9985 = vmatpush2.bf16.msra.mxu0 %v17561_v59  ;;  %v17584_v59 = vld [vmem:[%s24468_s1 + $0x1c9c] ss:$52 sps:$4 sm:$0xff]  }
 0x45c   :  { %9940 = vmatpush2.bf16.msra.mxu1 %v17564_v6  ;;  %9986 = vmatprep.subr.bf16.mxu0 %v17569_v9 }
 0x45d   :  { %9941 = vmatprep.subr.bf16.mxu1 %v17572_v22 }
 0x45f   :  { %9987 = vmatpush2.bf16.msra.mxu0 %v17567_v8  ;;  %v17579_v8 = vld [vmem:[%s24468_s1 + $0x17b8] ss:$52 sps:$4 sm:$0xff]  }
 0x460   :  { %9942 = vmatpush2.bf16.msra.mxu1 %v17570_v10  ;;  %9988 = vmatprep.subr.bf16.mxu0 %v17575_v36  ;;  %v17582_v10 = vld [vmem:[%s24468_s1 + $0x1c98] ss:$52 sps:$4 sm:$0xff]  }
 0x461   :  { %10017 = vmatprep.subr.bf16.mxu1 %v17578_v50 }
 0x462   :  { %v9574_v6 = vpop.f32.mrf.mxu0 }
 0x463   :  { %v9627_v9 = vpop.f32.mrf.mxu1  ;;  %9944 = vmatmul.mubr.bf16.vlgmr.msra.gmra.mxu1 %v18789_v47  ;;  %v9575_v22 = vadd.f32 %v9574_v6, %v22110_v35  ;;  %9989 = vmatpush2.bf16.msra.mxu0 %v17573_v23  ;;  %v17587_v35 = vld [vmem:[%s24468_s1 + $0x1754] ss:$52 sps:$4 sm:$0xff]  }
 0x464   :  { %10018 = vmatpush1.bf16.msra.mxu1 %v17576_v57  ;;  %v22330_v36 = vpop.f32.mrf.mxu0  ;;  %9990 = vmatprep.subr.bf16.mxu0 %v17581_v17  ;;  %v17590_v23 = vld [vmem:[%s24468_s1 + $0x1c34] ss:$52 sps:$4 sm:$0xff]   ;;  %v17585_v17 = vld [vmem:[%s24468_s1 + $0x1750] ss:$52 sps:$4 sm:$0xff]  }
 0x465   :  { %24574 = vst [vmem:[#allocation71_spill] sm:$0xff] %v22330_v36  ;;  %v22332_v50 = vpop.f32.mrf.mxu1  ;;  %10019 = vmatprep.subr.bf16.mxu1 %v17584_v59  ;;  %v22340_v57 = vadd.f32 %v9627_v9, %v9575_v22  ;;  %9953 = vmatprep.mubr.bf16.mxu1 %v18811_v58  ;;  %v17588_v59 = vld [vmem:[%s24468_s1 + $0x1c30] ss:$52 sps:$4 sm:$0xff]   ;;  %v17596_v22 = vld [vmem:[%s24468_s1 + $0x1bcc] ss:$52 sps:$4 sm:$0xff]  }
 0x466   :  { %24575 = vst [vmem:[#allocation72_spill] sm:$0xff] %v22332_v50  ;;  %v9578_v6 = vpop.f32.mrf.mxu0 }
 0x467   :  { %v9631_v55 = vpop.f32.mrf.mxu1  ;;  %v9579_v36 = vadd.f32 %v9578_v6, %v22133_v31  ;;  %9991 = vmatpush2.bf16.msra.mxu0 %v17579_v8  ;;  %v17593_v31 = vld [vmem:[%s24468_s1 + $0x16ec] ss:$52 sps:$4 sm:$0xff]  }
 0x468   :  { %10020 = vmatpush1.bf16.msra.mxu1 %v17582_v10  ;;  %v22350_v50 = vpop.f32.mrf.mxu0  ;;  %9992 = vmatprep.subr.bf16.mxu0 %v17587_v35  ;;  %v17591_v35 = vld [vmem:[%s24468_s1 + $0x16e8] ss:$52 sps:$4 sm:$0xff]  }
 0x469   :  { %24576 = vst [vmem:[#allocation73_spill] sm:$0xff] %v22350_v50  ;;  %v22352_v9 = vpop.f32.mrf.mxu1  ;;  %10021 = vmatprep.subr.bf16.mxu1 %v17590_v23  ;;  %v22360_v8 = vadd.f32 %v9631_v55, %v9579_v36  ;;  %v17594_v23 = vld [vmem:[%s24468_s1 + $0x1bc8] ss:$52 sps:$4 sm:$0xff]   ;;  %v17599_v36 = vld [vmem:[%s24468_s1 + $0x2384] ss:$52 sps:$4 sm:$0xff]  }
 0x46a   :  { %24577 = vst [vmem:[#allocation74_spill] sm:$0xff] %v22352_v9  ;;  %v9584_v10 = vpop.f32.mrf.mxu0 }
 0x46b   :  { %9954 = vmatmul.mubr.bf16.gmra.mxu1 %v18837_v4  ;;  %v9637_v6 = vpop.f32.mrf.mxu1  ;;  %v9585_v50 = vadd.f32 %v9584_v10, %v22150_v30  ;;  %9993 = vmatpush2.bf16.msra.mxu0 %v17585_v17  ;;  %v17602_v30 = vld [vmem:[%s24468_s1 + $0x1b64] ss:$52 sps:$4 sm:$0xff]  }
 0x46c   :  { %10022 = vmatpush1.bf16.msra.mxu1 %v17588_v59  ;;  %v9586_v9 = vpop.f32.mrf.mxu0  ;;  %9994 = vmatprep.subr.bf16.mxu0 %v17593_v31 }
 0x46d   :  { %v9639_v55 = vpop.f32.mrf.mxu1  ;;  %10023 = vmatprep.subr.bf16.mxu1 %v17596_v22  ;;  %v9587_v17 = vadd.f32 %v9586_v9, %v22160_v34  ;;  %v22377_v59 = vadd.f32 %v9637_v6, %v9585_v50  ;;  %10049 = vmatprep.mubr.bf16.mxu1 %v18873_v18  ;;  %v17597_v22 = vld [vmem:[%s24468_s1 + $0x2380] ss:$52 sps:$4 sm:$0xff]   ;;  %v17605_v50 = vld [vmem:[%s24468_s1 + $0x231c] ss:$52 sps:$4 sm:$0xff]   ;;  %v17603_v6 = vld [vmem:[%s24468_s1 + $0x2318] ss:$52 sps:$4 sm:$0xff]  }
 0x46e   :  { %v9588_v10 = vpop.f32.mrf.mxu0  ;;  %v17600_v34 = vld [vmem:[%s24468_s1 + $0x1b60] ss:$52 sps:$4 sm:$0xff]  }
 0x46f   :  { %v9641_v20 = vpop.f32.mrf.mxu1  ;;  %v9589_v31 = vadd.f32 %v9588_v10, %v22168_v21  ;;  %v22381_v5 = vadd.f32 %v9639_v55, %v9587_v17  ;;  %9995 = vmatpush2.bf16.msra.mxu0 %v17591_v35  ;;  %v17608_v21 = vld [vmem:[%s24468_s1 + $0x1afc] ss:$52 sps:$4 sm:$0xff]   ;;  %v17606_v35 = vld [vmem:[%s24468_s1 + $0x1af8] ss:$52 sps:$4 sm:$0xff]  }
 0x470   :  { %10024 = vmatpush1.bf16.msra.mxu1 %v17594_v23  ;;  %10070 = vmatprep.subr.bf16.mxu0 %v17599_v36  ;;  %v17611_v23 = vld [vmem:[%s24468_s1 + $0x22b4] ss:$52 sps:$4 sm:$0xff]   ;;  %v17609_v55 = vld [vmem:[%s24468_s1 + $0x22b0] ss:$52 sps:$4 sm:$0xff]   ;;  %v17620_v17 = vld [vmem:[%s24468_s1 + $0x1a2c] ss:$52 sps:$4 sm:$0xff]  }
 0x471   :  { %10025 = vmatprep.subr.bf16.mxu1 %v17602_v30  ;;  %v22395_v9 = vadd.f32 %v9641_v20, %v9589_v31  ;;  %v17614_v20 = vld [vmem:[%s24468_s1 + $0x1a94] ss:$52 sps:$4 sm:$0xff]   ;;  %v17612_v36 = vld [vmem:[%s24468_s1 + $0x1a90] ss:$52 sps:$4 sm:$0xff]   ;;  %v17617_v30 = vld [vmem:[%s24468_s1 + $0x224c] ss:$52 sps:$4 sm:$0xff]  }
 0x472   :  { %9997 = vmatmul.mubr.bf16.vlgmr.msra.gmra.mxu0 %v18791_v48  ;;  %v17615_v10 = vld [vmem:[%s24468_s1 + $0x2248] ss:$52 sps:$4 sm:$0xff]  }
 0x473   :  { %10071 = vmatpush1.bf16.msra.mxu0 %v17597_v22  ;;  %10006 = vmatprep.mubr.bf16.mxu0 %v18819_v61  ;;  %v17618_v31 = vld [vmem:[%s24468_s1 + $0x1a28] ss:$52 sps:$4 sm:$0xff]   ;;  %v17623_v22 = vld [vmem:[%s24468_s1 + $0x21e4] ss:$52 sps:$4 sm:$0xff]  }
 0x474   :  { %10026 = vmatpush1.bf16.msra.mxu1 %v17600_v34  ;;  %10072 = vmatprep.subr.bf16.mxu0 %v17605_v50  ;;  %v17626_v34 = vld [vmem:[%s24468_s1 + $0x2044] ss:$52 sps:$4 sm:$0xff]   ;;  %v17621_v50 = vld [vmem:[%s24468_s1 + $0x21e0] ss:$52 sps:$4 sm:$0xff]  }
 0x475   :  { %10027 = vmatprep.subr.bf16.mxu1 %v17608_v21  ;;  %v17624_v21 = vld [vmem:[%s24468_s1 + $0x2040] ss:$52 sps:$4 sm:$0xff]  }
 0x477   :  { %10073 = vmatpush1.bf16.msra.mxu0 %v17603_v6  ;;  %v17629_v6 = vld [vmem:[%s24468_s1 + $0x217c] ss:$52 sps:$4 sm:$0xff]  }
 0x478   :  { %10028 = vmatpush1.bf16.msra.mxu1 %v17606_v35  ;;  %10074 = vmatprep.subr.bf16.mxu0 %v17611_v23  ;;  %v17632_v35 = vld [vmem:[%s24468_s1 + $0x1fdc] ss:$52 sps:$4 sm:$0xff]   ;;  %v17627_v23 = vld [vmem:[%s24468_s1 + $0x2178] ss:$52 sps:$4 sm:$0xff]  }
 0x479   :  { %10029 = vmatprep.subr.bf16.mxu1 %v17614_v20  ;;  %v17630_v20 = vld [vmem:[%s24468_s1 + $0x1fd8] ss:$52 sps:$4 sm:$0xff]  }
 0x47a   :  { %10007 = vmatmul.mubr.bf16.gmra.mxu0 %v18845_v7 }
 0x47b   :  { %10075 = vmatpush1.bf16.msra.mxu0 %v17609_v55  ;;  %10102 = vmatprep.mubr.bf16.mxu0 %v18875_v19  ;;  %v17635_v55 = vld [vmem:[%s24468_s1 + $0x2114] ss:$52 sps:$4 sm:$0xff]  }
 0x47c   :  { %10030 = vmatpush1.bf16.msra.mxu1 %v17612_v36  ;;  %10076 = vmatprep.subr.bf16.mxu0 %v17617_v30  ;;  %v17638_v36 = vld [vmem:[%s24468_s1 + $0x1f74] ss:$52 sps:$4 sm:$0xff]   ;;  %v17633_v30 = vld [vmem:[%s24468_s1 + $0x2110] ss:$52 sps:$4 sm:$0xff]  }
 0x47d   :  { %10031 = vmatprep.subr.bf16.mxu1 %v17620_v17  ;;  %v17636_v17 = vld [vmem:[%s24468_s1 + $0x1f70] ss:$52 sps:$4 sm:$0xff]  }
 0x47f   :  { %10077 = vmatpush1.bf16.msra.mxu0 %v17615_v10  ;;  %v17641_v10 = vld [vmem:[%s24468_s1 + $0x20ac] ss:$52 sps:$4 sm:$0xff]  }
 0x480   :  { %10032 = vmatpush1.bf16.msra.mxu1 %v17618_v31  ;;  %10078 = vmatprep.subr.bf16.mxu0 %v17623_v22  ;;  %v17644_v31 = vld [vmem:[%s24468_s1 + $0x1f0c] ss:$52 sps:$4 sm:$0xff]   ;;  %v17639_v22 = vld [vmem:[%s24468_s1 + $0x20a8] ss:$52 sps:$4 sm:$0xff]  }
 0x481   :  { %10033 = vmatprep.subr.bf16.mxu1 %v17626_v34  ;;  %v17642_v34 = vld [vmem:[%s24468_s1 + $0x1f08] ss:$52 sps:$4 sm:$0xff]  }
 0x483   :  { %10079 = vmatpush1.bf16.msra.mxu0 %v17621_v50  ;;  %v17647_v50 = vld [vmem:[%s24468_s1 + $0x26c4] ss:$52 sps:$4 sm:$0xff]  }
 0x484   :  { %10034 = vmatpush2.bf16.msra.mxu1 %v17624_v21  ;;  %10080 = vmatprep.subr.bf16.mxu0 %v17629_v6  ;;  %v17650_v21 = vld [vmem:[%s24468_s1 + $0x1ea4] ss:$52 sps:$4 sm:$0xff]   ;;  %v17645_v6 = vld [vmem:[%s24468_s1 + $0x26c0] ss:$52 sps:$4 sm:$0xff]  }
 0x485   :  { %10035 = vmatprep.subr.bf16.mxu1 %v17632_v35  ;;  %v17648_v35 = vld [vmem:[%s24468_s1 + $0x1ea0] ss:$52 sps:$4 sm:$0xff]  }
 0x487   :  { %10081 = vmatpush1.bf16.msra.mxu0 %v17627_v23  ;;  %v17653_v23 = vld [vmem:[%s24468_s1 + $0x265c] ss:$52 sps:$4 sm:$0xff]  }
 0x488   :  { %10036 = vmatpush2.bf16.msra.mxu1 %v17630_v20  ;;  %10082 = vmatprep.subr.bf16.mxu0 %v17635_v55  ;;  %v17656_v20 = vld [vmem:[%s24468_s1 + $0x1e3c] ss:$52 sps:$4 sm:$0xff]   ;;  %v17651_v55 = vld [vmem:[%s24468_s1 + $0x2658] ss:$52 sps:$4 sm:$0xff]  }
 0x489   :  { %10037 = vmatprep.subr.bf16.mxu1 %v17638_v36  ;;  %v17654_v36 = vld [vmem:[%s24468_s1 + $0x1e38] ss:$52 sps:$4 sm:$0xff]  }
 0x48b   :  { %10083 = vmatpush1.bf16.msra.mxu0 %v17633_v30  ;;  %v17659_v30 = vld [vmem:[%s24468_s1 + $0x25f4] ss:$52 sps:$4 sm:$0xff]  }
 0x48c   :  { %10038 = vmatpush2.bf16.msra.mxu1 %v17636_v17  ;;  %10084 = vmatprep.subr.bf16.mxu0 %v17641_v10  ;;  %v17662_v17 = vld [vmem:[%s24468_s1 + $0x1dd4] ss:$52 sps:$4 sm:$0xff]  }
 0x48d   :  { %10039 = vmatprep.subr.bf16.mxu1 %v17644_v31  ;;  %v1460_v10 = vld [vmem:[%s24468_s1 + $0x2728] sm:$0x33]  ;;  %v17657_v31 = vld [vmem:[%s24468_s1 + $0x25f0] ss:$52 sps:$4 sm:$0xff]  }
 0x48f   :  { %10085 = vmatpush1.bf16.msra.mxu0 %v17639_v22  ;;  %v17660_v22 = vld [vmem:[%s24468_s1 + $0x1dd0] ss:$52 sps:$4 sm:$0xff]  }
 0x490   :  { %10040 = vmatpush2.bf16.msra.mxu1 %v17642_v34  ;;  %10086 = vmatprep.subr.bf16.mxu0 %v17647_v50  ;;  %v17665_v34 = vld [vmem:[%s24468_s1 + $0x258c] ss:$52 sps:$4 sm:$0xff]  }
 0x491   :  { %10041 = vmatprep.subr.bf16.mxu1 %v17650_v21  ;;  %v17668_v50 = vld [vmem:[%s24468_s1 + $0x1d6c] ss:$52 sps:$4 sm:$0xff]   ;;  %v15116_v21 = vcombine.high %v1460_v10, %v1460_v10 }
 0x493   :  { %10087 = vmatpush2.bf16.msra.mxu0 %v17645_v6  ;;  %v17663_v6 = vld [vmem:[%s24468_s1 + $0x2588] ss:$52 sps:$4 sm:$0xff]  }
 0x494   :  { %10042 = vmatpush2.bf16.msra.mxu1 %v17648_v35  ;;  %10088 = vmatprep.subr.bf16.mxu0 %v17653_v23  ;;  %v17666_v35 = vld [vmem:[%s24468_s1 + $0x1d68] ss:$52 sps:$4 sm:$0xff]   ;;  %v17671_v23 = vld [vmem:[%s24468_s1 + $0x2524] ss:$52 sps:$4 sm:$0xff]  }
 0x495   :  { %10043 = vmatprep.subr.bf16.mxu1 %v17656_v20  ;;  %v15115_v20 = vcombine.low %v1460_v10, %v1460_v10  ;;  %v17674_v10 = vld [vmem:[%s24468_s1 + $0x24bc] ss:$52 sps:$4 sm:$0xff]  }
 0x497   :  { %10089 = vmatpush2.bf16.msra.mxu0 %v17651_v55  ;;  %v7945_v55 = vand.u32 %v15116_v21, %v19033_v28 }
 0x498   :  { %10044 = vmatpush2.bf16.msra.mxu1 %v17654_v36  ;;  %10090 = vmatprep.subr.bf16.mxu0 %v17659_v30  ;;  %v17669_v36 = vld [vmem:[%s24468_s1 + $0x2520] ss:$52 sps:$4 sm:$0xff]   ;;  %v7942_v30 = vand.u32 %v15115_v20, %v19033_v28 }
 0x499   :  { %10045 = vmatprep.subr.bf16.mxu1 %v17662_v17  ;;  %v22538_v17 = vpop.f32.mrf.mxu0  ;;  %v17679_v20 = vld [vmem:[%s24468_s1 + $0x2454] ss:$52 sps:$4 sm:$0xff]  }
 0x49b   :  { %10091 = vmatpush2.bf16.msra.mxu0 %v17657_v31  ;;  %v22540_v31 = vpop.f32.mrf.mxu1 }
 0x49c   :  { %10046 = vmatpush2.bf16.msra.mxu1 %v17660_v22  ;;  %10092 = vmatprep.subr.bf16.mxu0 %v17665_v34  ;;  %v17672_v22 = vld [vmem:[%s24468_s1 + $0x24b8] ss:$52 sps:$4 sm:$0xff]   ;;  %v17684_v34 = vld [vmem:[%s24468_s1 + $0xcc8] ss:$52 sps:$4 sm:$0xff]  }
 0x49d   :  { %10047 = vmatprep.subr.bf16.mxu1 %v17668_v50 }
 0x49f   :  { %10093 = vmatpush2.bf16.msra.mxu0 %v17663_v6 }
 0x4a0   :  { %10048 = vmatpush2.bf16.msra.mxu1 %v17666_v35  ;;  %10094 = vmatprep.subr.bf16.mxu0 %v17671_v23 }
 0x4a1   :  { %10137 = vmatprep.subr.bf16.mxu1 %v7945_v55 }
 0x4a2   :  { %v9680_v50 = vpop.f32.mrf.mxu0 }
 0x4a3   :  { %v9733_v21 = vpop.f32.mrf.mxu1  ;;  %10050 = vmatmul.mubr.bf16.vlgmr.msra.gmra.mxu1 %v19054_v38  ;;  %v9681_v6 = vadd.f32 %v9680_v50, %v22340_v57  ;;  %10095 = vmatpush2.bf16.msra.mxu0 %v17669_v36 }
 0x4a4   :  { %10138 = vmatpush1.bf16.msra.mxu1 %v7942_v30  ;;  %v22553_v35 = vpop.f32.mrf.mxu0  ;;  %10096 = vmatprep.subr.bf16.mxu0 %v17674_v10 }
 0x4a5   :  { %24578 = vst [vmem:[#allocation75_spill] sm:$0xff] %v22553_v35  ;;  %v22555_v23 = vpop.f32.mrf.mxu1  ;;  %10059 = vmatprep.mubr.bf16.mxu1 %v19068_v46  ;;  %v9734_v55 = vadd.f32 %v9733_v21, %v9681_v6  ;;  %15506 = vmatprep.subr.bf16.mxu1 %v17684_v34  ;;  %v17680_v6 = vld [vmem:[%s24468_s1 + $0x23e8] ss:$52 sps:$4 sm:$0xff]  }
 0x4a6   :  { %24579 = vst [vmem:[#allocation76_spill] sm:$0xff] %v22555_v23  ;;  %v9684_v57 = vpop.f32.mrf.mxu0  ;;  %v17682_v23 = vld [vmem:[%s24468_s1 + $0x23ec] ss:$52 sps:$4 sm:$0xff]  }
 0x4a7   :  { %v9737_v36 = vpop.f32.mrf.mxu1  ;;  %v9685_v30 = vadd.f32 %v9684_v57, %v22360_v8  ;;  %10097 = vmatpush2.bf16.msra.mxu0 %v17672_v22  ;;  %v17683_v57 = vld [vmem:[%s24468_s1 + $0x648] ss:$52 sps:$4 sm:$0xff]  }
 0x4a8   :  { %v22565_v50 = vpop.f32.mrf.mxu0  ;;  %10098 = vmatprep.subr.bf16.mxu0 %v17679_v20 }
 0x4a9   :  { %24580 = vst [vmem:[#allocation77_spill] sm:$0xff] %v22565_v50  ;;  %v22567_v10 = vpop.f32.mrf.mxu1  ;;  %v9738_v21 = vadd.f32 %v9737_v36, %v9685_v30  ;;  %v9485_v50 = vadd.f32 %v22312_v33, %v22094_v16 }
 0x4aa   :  { %24581 = vst [vmem:[#allocation78_spill] sm:$0xff] %v22567_v10  ;;  %v9690_v34 = vpop.f32.mrf.mxu0  ;;  %v17685_v10 = vld [vmem:[%s24468_s1 + $0x308] ss:$52 sps:$4 sm:$0xff]  }
 0x4ab   :  { %10060 = vmatmul.mubr.bf16.gmra.mxu1 %v19097_v62  ;;  %v9743_v35 = vpop.f32.mrf.mxu1  ;;  %v9691_v8 = vadd.f32 %v9690_v34, %v22377_v59  ;;  %10099 = vmatpush2.bf16.msra.mxu0 %v17677_v27  ;;  %v17686_v27 = vld [vmem:[%s24468_s1 + $0x988] ss:$52 sps:$4 sm:$0xff]  }
 0x4ac   :  { %10155 = vmatprep.mubr.bf16.mxu1 %v24527_v60  ;;  %v9692_v22 = vpop.f32.mrf.mxu0  ;;  %10100 = vmatprep.subr.bf16.mxu0 %v17682_v23  ;;  %v17687_v23 = vld [vmem:[%s24468_s1 + $0x5e0] ss:$52 sps:$4 sm:$0xff]  }
 0x4ad   :  { %v9745_v20 = vpop.f32.mrf.mxu1  ;;  %v9693_v36 = vadd.f32 %v9692_v22, %v22381_v5  ;;  %v9744_v30 = vadd.f32 %v9743_v35, %v9691_v8  ;;  %v17688_v22 = vld [vmem:[%s24468_s1 + $0xc60] ss:$52 sps:$4 sm:$0xff]  }
 0x4ae   :  { %v9694_v59 = vpop.f32.mrf.mxu0 }
 0x4af   :  { %v9747_v34 = vpop.f32.mrf.mxu1  ;;  %v9695_v5 = vadd.f32 %v9694_v59, %v22395_v9  ;;  %v9746_v35 = vadd.f32 %v9745_v20, %v9693_v36  ;;  %10101 = vmatpush2.bf16.msra.mxu0 %v17680_v6  ;;  %v17691_v9 = vld [vmem:[%s24468_s1 + $0x578] ss:$52 sps:$4 sm:$0xff]   ;;  %v9538_v6 = vadd.f32 %v22314_v24, %v9485_v50 }
 0x4b0   :  { %v9696_v8 = vpop.f32.mrf.mxu0  ;;  %15478 = vmatprep.subr.bf16.mxu0 %v17683_v57  ;;  %v17692_v36 = vld [vmem:[%s24468_s1 + $0xbf8] ss:$52 sps:$4 sm:$0xff]  }
 0x4b1   :  { %v9748_v41 = vadd.f32 %v9747_v34, %v9695_v5  ;;  %v9591_v59 = vadd.f32 %v22538_v17, %v9538_v6  ;;  %v17693_v24 = vld [vmem:[%s24468_s1 + $0x238] ss:$52 sps:$4 sm:$0xff]   ;;  %v17696_v34 = vld [vmem:[%s24468_s1 + $0xb90] ss:$52 sps:$4 sm:$0xff]  }
 0x4b2   :  { %10103 = vmatmul.mubr.bf16.vlgmr.msra.gmra.mxu0 %v19056_v39  ;;  %v9786_v33 = vpop.f32.mrf.mxu0 }
 0x4b3   :  { %15128 = vmatmul.mubr.msk.bf16.vlgmr.msra.gmra.mxu1 %vm7900_vm2, %v19123_v11  ;;  %v9787_v20 = vadd.f32 %v9786_v33, %v9734_v55  ;;  %15479 = vmatpush3.bf16.msra.mxu0 %v17685_v10  ;;  %v17694_v55 = vld [vmem:[%s24468_s1 + $0x8b8] ss:$52 sps:$4 sm:$0xff]   ;;  %v17695_v10 = vld [vmem:[%s24468_s1 + $0x510] ss:$52 sps:$4 sm:$0xff]  }
 0x4b4   :  { %15507 = vmatpush3.bf16.msra.mxu1 %v17686_v27  ;;  %v22610_v57 = vpop.f32.mrf.mxu0  ;;  %15480 = vmatprep.subr.bf16.mxu0 %v17687_v23  ;;  %v9644_v23 = vadd.f32 %v22540_v31, %v9591_v59  ;;  %v17697_v33 = vld [vmem:[%s24468_s1 + $0x1d0] ss:$52 sps:$4 sm:$0xff]   ;;  %v17699_v31 = vld [vmem:[%s24468_s1 + $0x4a8] ss:$52 sps:$4 sm:$0xff]  }
 0x4b5   :  { %15508 = vmatprep.subr.bf16.mxu1 %v17688_v22  ;;  %10112 = vmatprep.mubr.bf16.mxu0 %v19076_v52  ;;  %v10527_v5 = vmax.f32 %v9787_v20, 0.0  ;;  %v9749_v20 = vpop.f32.mrf.mxu1  ;;  %v17700_v59 = vld [vmem:[%s24468_s1 + $0xb28] ss:$52 sps:$4 sm:$0xff]  }
 0x4b6   :  { %10165 = vmatprep.mubr.bf16.mxu1 %v24527_v60  ;;  %v9790_v50 = vpop.f32.mrf.mxu0 }
 0x4b7   :  { %v9791_v27 = vadd.f32 %v9790_v50, %v9738_v21  ;;  %15481 = vmatpush3.bf16.msra.mxu0 %v17689_v29  ;;  %v9697_v21 = vadd.f32 %v9696_v8, %v9644_v23  ;;  %v17702_v8 = vld [vmem:[%s24468_s1 + $0x7e8] ss:$52 sps:$4 sm:$0xff]  }
 0x4b8   :  { %15509 = vmatpush3.bf16.msra.mxu1 %v17690_v2  ;;  %v22627_v17 = vpop.f32.mrf.mxu0  ;;  %15482 = vmatprep.subr.bf16.mxu0 %v17691_v9  ;;  %v17698_v2 = vld [vmem:[%s24468_s1 + $0x850] ss:$52 sps:$4 sm:$0xff]  }
 0x4b9   :  { %15510 = vmatprep.subr.bf16.mxu1 %v17692_v36  ;;  %v10540_v22 = vmax.f32 %v9791_v27, 0.0  ;;  %v17701_v27 = vld [vmem:[%s24468_s1 + $0x168] ss:$52 sps:$4 sm:$0xff]  }
 0x4ba   :  { %10113 = vmatmul.mubr.bf16.gmra.mxu0 %v19099_v1  ;;  %v9796_v29 = vpop.f32.mrf.mxu0 }
 0x4bb   :  { %15129 = vmatmul.mubr.msk.bf16.gmra.mxu1 %vm7900_vm2, %v19158_v26  ;;  %v22645_v9 = vpack.c.bf16 %v10540_v22, %v10527_v5  ;;  %v9797_v6 = vadd.f32 %v9796_v29, %v9744_v30  ;;  %15483 = vmatpush3.bf16.msra.mxu0 %v17693_v24  ;;  %v17703_v24 = vld [vmem:[%s24468_s1 + $0x440] ss:$52 sps:$4 sm:$0xff]  }
 0x4bc   :  { %15511 = vmatpush3.bf16.msra.mxu1 %v17694_v55  ;;  %v9798_v36 = vpop.f32.mrf.mxu0  ;;  %15484 = vmatprep.subr.bf16.mxu0 %v17695_v10  ;;  %v9750_v55 = vadd.f32 %v9749_v20, %v9697_v21  ;;  %v17710_v20 = vld [vmem:[%s24468_s1 + $0x718] ss:$52 sps:$4 sm:$0xff]  }
 0x4bd   :  { %24582 = vst [vmem:[#allocation79_spill] sm:$0xff] %v22645_v9  ;;  %15512 = vmatprep.subr.bf16.mxu1 %v17696_v34  ;;  %v9799_v50 = vadd.f32 %v9798_v36, %v9746_v35  ;;  %10208 = vmatprep.mubr.bf16.mxu0 %v18444_v53  ;;  %v17704_v34 = vld [vmem:[%s24468_s1 + $0xac0] ss:$52 sps:$4 sm:$0xff]   ;;  %v10553_v23 = vmax.f32 %v9797_v6, 0.0  ;;  %v17709_v6 = vld [vmem:[%s24468_s1 + $0x98] ss:$52 sps:$4 sm:$0xff]  }
 0x4be   :  { %10257 = vmatprep.mubr.bf16.mxu1 %v18446_v54  ;;  %v9800_v30 = vpop.f32.mrf.mxu0  ;;  %v17705_v54 = vld [vmem:[%s24468_s1 + $0x100] ss:$52 sps:$4 sm:$0xff]   ;;  %v17711_v36 = vld [vmem:[%s24468_s1 + $0x370] ss:$52 sps:$4 sm:$0xff]  }
 0x4bf   :  { %v9801_v10 = vadd.f32 %v9800_v30, %v9748_v41  ;;  %15485 = vmatpush3.bf16.msra.mxu0 %v17697_v33  ;;  %v10554_v22 = vmax.f32 %v9799_v50, 0.0  ;;  %v17706_v33 = vld [vmem:[%s24468_s1 + $0x780] ss:$52 sps:$4 sm:$0xff]   ;;  %v17713_v50 = vld [vmem:[%s24468_s1 + $0x30] ss:$52 sps:$4 sm:$0xff]  }
 0x4c0   :  { %15513 = vmatpush3.bf16.msra.mxu1 %v17698_v2  ;;  %v9802_v35 = vpop.f32.mrf.mxu0  ;;  %15486 = vmatprep.subr.bf16.mxu0 %v17699_v31  ;;  %v17707_v2 = vld [vmem:[%s24468_s1 + $0x3d8] ss:$52 sps:$4 sm:$0xff]   ;;  %v17716_v30 = vld [vmem:[%s24468_s1 + $0x19c8] ss:$52 sps:$4 sm:$0xff]  }
 0x4c1   :  { %15514 = vmatprep.subr.bf16.mxu1 %v17700_v59  ;;  %v10566_v53 = vmax.f32 %v9801_v10, 0.0  ;;  %v9803_v5 = vadd.f32 %v9802_v35, %v9750_v55  ;;  %v17708_v31 = vld [vmem:[%s24468_s1 + $0xa58] ss:$52 sps:$4 sm:$0xff]   ;;  %v17712_v59 = vld [vmem:[%s24468_s1 + $0x9f0] ss:$52 sps:$4 sm:$0xff]  }
 0x4c2   :  { %v17718_v55 = vld [vmem:[%s24468_s1 + $0x1688] ss:$52 sps:$4 sm:$0xff]   ;;  %v17719_v10 = vld [vmem:[%s24468_s1 + $0x12e0] ss:$52 sps:$4 sm:$0xff]  }
 0x4c3   :  { %v22667_v29 = vpack.c.bf16 %v10566_v53, %v10553_v23  ;;  %v10567_v41 = vmax.f32 %v9803_v5, 0.0  ;;  %15487 = vmatpush3.bf16.msra.mxu0 %v17701_v27  ;;  %v17714_v27 = vld [vmem:[%s24468_s1 + $0x6b0] ss:$52 sps:$4 sm:$0xff]   ;;  %v17720_v35 = vld [vmem:[%s24468_s1 + $0x1960] ss:$52 sps:$4 sm:$0xff]  }
 0x4c4   :  { %15515 = vmatpush3.bf16.msra.mxu1 %v17702_v8  ;;  %15488 = vmatprep.subr.bf16.mxu0 %v17703_v24  ;;  %v17715_v8 = vld [vmem:[%s24468_s1 + $0x1348] ss:$52 sps:$4 sm:$0xff]   ;;  %v17722_v23 = vld [vmem:[%s24468_s1 + $0x1620] ss:$52 sps:$4 sm:$0xff]   ;;  %v17723_v53 = vld [vmem:[%s24468_s1 + $0x1278] ss:$52 sps:$4 sm:$0xff]  }
 0x4c5   :  { %15516 = vmatprep.subr.bf16.mxu1 %v17704_v34  ;;  %v22678_v21 = vpack.c.bf16 %v10567_v41, %v10554_v22  ;;  %v17717_v24 = vld [vmem:[%s24468_s1 + $0x1008] ss:$52 sps:$4 sm:$0xff]   ;;  %v17721_v34 = vld [vmem:[%s24468_s1 + $0xfa0] ss:$52 sps:$4 sm:$0xff]   ;;  %v17724_v5 = vld [vmem:[%s24468_s1 + $0x18f8] ss:$52 sps:$4 sm:$0xff]  }
 0x4c6   :  { %v17728_v22 = vld [vmem:[%s24468_s1 + $0x1890] ss:$52 sps:$4 sm:$0xff]   ;;  %v17731_v41 = vld [vmem:[%s24468_s1 + $0x11a8] ss:$52 sps:$4 sm:$0xff]  }
 0x4c7   :  { %24583 = vst [vmem:[#allocation80_spill] sm:$0xff] %v22678_v21  ;;  %15489 = vmatpush3.bf16.msra.mxu0 %v17705_v54  ;;  %v17727_v54 = vld [vmem:[%s24468_s1 + $0x1210] ss:$52 sps:$4 sm:$0xff]  }
 0x4c8   :  { %15517 = vmatpush3.bf16.msra.mxu1 %v17706_v33  ;;  %15490 = vmatprep.subr.bf16.mxu0 %v17707_v2  ;;  %v17732_v33 = vld [vmem:[%s24468_s1 + $0x1828] ss:$52 sps:$4 sm:$0xff]  }
 0x4c9   :  { %15518 = vmatprep.subr.bf16.mxu1 %v17708_v31  ;;  %v17733_v2 = vld [vmem:[%s24468_s1 + $0xe68] ss:$52 sps:$4 sm:$0xff]   ;;  %v17736_v31 = vld [vmem:[%s24468_s1 + $0x17c0] ss:$52 sps:$4 sm:$0xff]  }
 0x4cb   :  { %15491 = vmatpush3.bf16.msra.mxu0 %v17709_v6  ;;  %v17737_v6 = vld [vmem:[%s24468_s1 + $0xe00] ss:$52 sps:$4 sm:$0xff]  }
 0x4cc   :  { %15519 = vmatpush3.bf16.msra.mxu1 %v17710_v20  ;;  %15492 = vmatprep.subr.bf16.mxu0 %v17711_v36  ;;  %v17740_v36 = vld [vmem:[%s24468_s1 + $0x1758] ss:$52 sps:$4 sm:$0xff]  }
 0x4cd   :  { %15520 = vmatprep.subr.bf16.mxu1 %v17712_v59  ;;  %v17741_v59 = vld [vmem:[%s24468_s1 + $0xd98] ss:$52 sps:$4 sm:$0xff]  }
 0x4cf   :  { %15493 = vmatpush3.bf16.msra.mxu0 %v17713_v50  ;;  %v17742_v50 = vld [vmem:[%s24468_s1 + $0x1418] ss:$52 sps:$4 sm:$0xff]  }
 0x4d0   :  { %15521 = vmatpush3.bf16.msra.mxu1 %v17714_v27  ;;  %15534 = vmatprep.subr.bf16.mxu0 %v17715_v8  ;;  %v17743_v27 = vld [vmem:[%s24468_s1 + $0x1070] ss:$52 sps:$4 sm:$0xff]  }
 0x4d1   :  { %15562 = vmatprep.subr.bf16.mxu1 %v17716_v30  ;;  %v17744_v30 = vld [vmem:[%s24468_s1 + $0x16f0] ss:$52 sps:$4 sm:$0xff]  }
 0x4d2   :  { %10209 = vmatmul.mubr.bf16.vlgmr.msra.gmra.mxu0 %v18513_v12  ;;  %v17725_v12 = vld [vmem:[%s24468_s1 + $0xf38] ss:$52 sps:$4 sm:$0xff]  }
 0x4d3   :  { %10258 = vmatmul.mubr.bf16.vlgmr.msra.gmra.mxu1 %v18515_v13  ;;  %15535 = vmatpush3.bf16.msra.mxu0 %v17717_v24  ;;  %v17726_v13 = vld [vmem:[%s24468_s1 + $0x15b8] ss:$52 sps:$4 sm:$0xff]   ;;  %v17745_v24 = vld [vmem:[%s24468_s1 + $0xd30] ss:$52 sps:$4 sm:$0xff]  }
 0x4d4   :  { %15563 = vmatpush3.bf16.msra.mxu1 %v17718_v55  ;;  %15536 = vmatprep.subr.bf16.mxu0 %v17719_v10  ;;  %v17746_v55 = vld [vmem:[%s24468_s1 + $0x13b0] ss:$52 sps:$4 sm:$0xff]   ;;  %v17747_v10 = vld [vmem:[%s24468_s1 + $0x2048] ss:$52 sps:$4 sm:$0xff]  }
 0x4d5   :  { %15564 = vmatprep.subr.bf16.mxu1 %v17720_v35  ;;  %10216 = vmatprep.mubr.bf16.mxu0 %v18588_v37  ;;  %v17729_v37 = vld [vmem:[%s24468_s1 + $0xed0] ss:$52 sps:$4 sm:$0xff]  }
 0x4d6   :  { %10265 = vmatprep.mubr.bf16.mxu1 %v18604_v43  ;;  %v17730_v43 = vld [vmem:[%s24468_s1 + $0x1550] ss:$52 sps:$4 sm:$0xff]  }
 0x4d7   :  { %15537 = vmatpush3.bf16.msra.mxu0 %v17721_v34  ;;  %v17748_v34 = vld [vmem:[%s24468_s1 + $0x26c8] ss:$52 sps:$4 sm:$0xff]  }
 0x4d8   :  { %15565 = vmatpush3.bf16.msra.mxu1 %v17722_v23  ;;  %15538 = vmatprep.subr.bf16.mxu0 %v17723_v53  ;;  %v18231_v23 = vld [vmem:[%s24470_s2 + $0x8] sm:$0x1f] }
 0x4d9   :  { %15566 = vmatprep.subr.bf16.mxu1 %v17724_v5  ;;  %v1509_v53 = vrot.slane %v18231_v23, %v20003_v40  ;;  %v17749_v5 = vld [vmem:[%s24468_s1 + $0x1d08] ss:$52 sps:$4 sm:$0xff]  }
 0x4da   :  { %10217 = vmatmul.mubr.bf16.gmra.mxu0 %v18602_v42  ;;  %v17734_v42 = vld [vmem:[%s24468_s1 + $0x14e8] ss:$52 sps:$4 sm:$0xff]  }
 0x4db   :  { %10266 = vmatmul.mubr.bf16.gmra.mxu1 %v18624_v49  ;;  %15539 = vmatpush3.bf16.msra.mxu0 %v17725_v12  ;;  %v17735_v49 = vld [vmem:[%s24468_s1 + $0x1140] ss:$52 sps:$4 sm:$0xff]   ;;  %v17750_v12 = vld [vmem:[%s24468_s1 + $0x2388] ss:$52 sps:$4 sm:$0xff]  }
 0x4dc   :  { %15567 = vmatpush3.bf16.msra.mxu1 %v17726_v13  ;;  %15540 = vmatprep.subr.bf16.mxu0 %v17727_v54  ;;  %v17751_v13 = vld [vmem:[%s24468_s1 + $0x1fe0] ss:$52 sps:$4 sm:$0xff]  }
 0x4dd   :  { %15568 = vmatprep.subr.bf16.mxu1 %v17728_v22  ;;  %10306 = vmatprep.mubr.bf16.mxu0 %v18660_v63  ;;  %v17738_v63 = vld [vmem:[%s24468_s1 + $0x1480] ss:$52 sps:$4 sm:$0xff]  }
 0x4de   :  { %10355 = vmatprep.mubr.bf16.mxu1 %v18662_v0  ;;  %v17739_v0 = vld [vmem:[%s24468_s1 + $0x10d8] ss:$52 sps:$4 sm:$0xff]   ;;  %v17752_v22 = vld [vmem:[%s24468_s1 + $0x2660] ss:$52 sps:$4 sm:$0xff]  }
 0x4df   :  { %15541 = vmatpush3.bf16.msra.mxu0 %v17729_v37  ;;  %v18056_v40 = vld [vmem:[%s24471_s3 + $0x888] ss:$12 sps:$4 sm:$0xff]  }
 0x4e0   :  { %15569 = vmatpush3.bf16.msra.mxu1 %v17730_v43  ;;  %15542 = vmatprep.subr.bf16.mxu0 %v17731_v41  ;;  %v17753_v43 = vld [vmem:[%s24468_s1 + $0x1ca0] ss:$52 sps:$4 sm:$0xff]  }
 0x4e1   :  { %15570 = vmatprep.subr.bf16.mxu1 %v17732_v33  ;;  %v17754_v41 = vld [vmem:[%s24468_s1 + $0x2320] ss:$52 sps:$4 sm:$0xff]  }
 0x4e3   :  { %15543 = vmatpush3.bf16.msra.mxu0 %v17733_v2  ;;  %v9839_v20 = vpop.f32.mrf.mxu1  ;;  %v17755_v2 = vld [vmem:[%s24468_s1 + $0x1f78] ss:$52 sps:$4 sm:$0xff]  }
 0x4e4   :  { %15571 = vmatpush3.bf16.msra.mxu1 %v17734_v42  ;;  %15544 = vmatprep.subr.bf16.mxu0 %v17735_v49  ;;  %v9840_v37 = vadd.f32 %v9839_v20, %v1509_v53  ;;  %v17759_v20 = vld [vmem:[%s24468_s1 + $0x1f10] ss:$52 sps:$4 sm:$0xff]  }
 0x4e5   :  { %15572 = vmatprep.subr.bf16.mxu1 %v17736_v31  ;;  %v22793_v8 = vpop.f32.mrf.mxu1 }
 0x4e7   :  { %15545 = vmatpush3.bf16.msra.mxu0 %v17737_v6  ;;  %v9843_v35 = vpop.f32.mrf.mxu1  ;;  %v17756_v6 = vld [vmem:[%s24468_s1 + $0x25f8] ss:$52 sps:$4 sm:$0xff]  }
 0x4e8   :  { %15573 = vmatpush3.bf16.msra.mxu1 %v17738_v63  ;;  %15546 = vmatprep.subr.bf16.mxu0 %v17739_v0  ;;  %v17758_v63 = vld [vmem:[%s24468_s1 + $0x22b8] ss:$52 sps:$4 sm:$0xff]  }
 0x4e9   :  { %15574 = vmatprep.subr.bf16.mxu1 %v17740_v36  ;;  %v22823_v54 = vpop.f32.mrf.mxu1 }
 0x4eb   :  { %15547 = vmatpush3.bf16.msra.mxu0 %v17741_v59  ;;  %v9849_v42 = vpop.f32.mrf.mxu1  ;;  %v24584_v59 = vsub.s32 3, %v19265_v25 }
 0x4ec   :  { %15575 = vmatpush3.bf16.msra.mxu1 %v17742_v50  ;;  %15548 = vmatprep.subr.bf16.mxu0 %v17743_v27 }
 0x4ed   :  { %15576 = vmatprep.subr.bf16.mxu1 %v17744_v30  ;;  %v9851_v36 = vpop.f32.mrf.mxu1  ;;  %v22859_v50 = vrot.slane %v18231_v23, %v24584_v59  ;;  %v17760_v30 = vld [vmem:[%s24468_s1 + $0x2590] ss:$52 sps:$4 sm:$0xff]  }
 0x4ee   :  { %v17778_v59 = vld [vmem:[%s24468_s1 + $0x20b0] ss:$52 sps:$4 sm:$0xff]  }
 0x4ef   :  { %15549 = vmatpush3.bf16.msra.mxu0 %v17745_v24  ;;  %v17761_v24 = vld [vmem:[%s24468_s1 + $0x1bd0] ss:$52 sps:$4 sm:$0xff]   ;;  %v9853_v23 = vpop.f32.mrf.mxu1 }
 0x4f0   :  { %15577 = vmatpush3.bf16.msra.mxu1 %v17746_v55  ;;  %15590 = vmatprep.subr.bf16.mxu0 %v17747_v10  ;;  %v17762_v55 = vld [vmem:[%s24468_s1 + $0x2250] ss:$52 sps:$4 sm:$0xff]   ;;  %v9852_v10 = vadd.f32 %v9851_v36, %v22859_v50 }
 0x4f1   :  { %15618 = vmatprep.subr.bf16.mxu1 %v17748_v34  ;;  %v17777_v36 = vld [vmem:[%s24468_s1 + $0x1a30] ss:$52 sps:$4 sm:$0xff]  }
 0x4f2   :  { %v9892_v33 = vpop.f32.mrf.mxu0  ;;  %10307 = vmatmul.mubr.bf16.vlgmr.msra.gmra.mxu0 %v18789_v47  ;;  %v9844_v47 = vadd.f32 %v9843_v35, %v1509_v53  ;;  %v17763_v35 = vld [vmem:[%s24468_s1 + $0x1ea8] ss:$52 sps:$4 sm:$0xff]  }
 0x4f3   :  { %10356 = vmatmul.mubr.bf16.vlgmr.msra.gmra.mxu1 %v18791_v48  ;;  %v22839_v49 = vadd.f32 %v9892_v33, %v9840_v37  ;;  %15591 = vmatpush3.bf16.msra.mxu0 %v17749_v5  ;;  %v17757_v48 = vld [vmem:[%s24468_s1 + $0x1c38] ss:$52 sps:$4 sm:$0xff]   ;;  %v17767_v37 = vld [vmem:[%s24468_s1 + $0x1e40] ss:$52 sps:$4 sm:$0xff]  }
 0x4f4   :  { %15619 = vmatpush3.bf16.msra.mxu1 %v17750_v12  ;;  %v22841_v31 = vpop.f32.mrf.mxu0  ;;  %15592 = vmatprep.subr.bf16.mxu0 %v17751_v13  ;;  %v9854_v12 = vadd.f32 %v9853_v23, %v1509_v53  ;;  %v17764_v13 = vld [vmem:[%s24468_s1 + $0x2528] ss:$52 sps:$4 sm:$0xff]  }
 0x4f5   :  { %15620 = vmatprep.subr.bf16.mxu1 %v17752_v22  ;;  %10314 = vmatprep.mubr.bf16.mxu0 %v18811_v58  ;;  %v17766_v22 = vld [vmem:[%s24468_s1 + $0x21e8] ss:$52 sps:$4 sm:$0xff]  }
 0x4f6   :  { %10363 = vmatprep.mubr.bf16.mxu1 %v18819_v61  ;;  %v9896_v0 = vpop.f32.mrf.mxu0  ;;  %v9850_v61 = vadd.f32 %v9849_v42, %v1509_v53  ;;  %v17780_v23 = vld [vmem:[%s24471_s3 + $0xa8] ss:$12 sps:$4 sm:$0xff]  }
 0x4f7   :  { %v22861_v58 = vadd.f32 %v9896_v0, %v9844_v47  ;;  %15593 = vmatpush3.bf16.msra.mxu0 %v17753_v43  ;;  %v17779_v0 = vld [vmem:[%s24468_s1 + $0x2730] ss:$0 sps:$4 sm:$0x33]  }
 0x4f8   :  { %15621 = vmatpush3.bf16.msra.mxu1 %v17754_v41  ;;  %v22863_v27 = vpop.f32.mrf.mxu0  ;;  %15594 = vmatprep.subr.bf16.mxu0 %v17755_v2  ;;  %v7991_v41 = vadd.f32 %v19377_v45, %v19310_v51  ;;  %v17770_v2 = vld [vmem:[%s24468_s1 + $0x2180] ss:$52 sps:$4 sm:$0xff]   ;;  %v17771_v45 = vld [vmem:[%s24468_s1 + $0x1dd8] ss:$52 sps:$4 sm:$0xff]  }
 0x4f9   :  { %15622 = vmatprep.subr.bf16.mxu1 %v17756_v6  ;;  %v17772_v6 = vld [vmem:[%s24468_s1 + $0x2458] ss:$52 sps:$4 sm:$0xff]  }
 0x4fa   :  { %10315 = vmatmul.mubr.bf16.gmra.mxu0 %v18837_v4  ;;  %v9902_v34 = vpop.f32.mrf.mxu0  ;;  %v8044_v42 = vadd.f32 %v19396_v3, %v7991_v41  ;;  %v17775_v3 = vld [vmem:[%s24468_s1 + $0x1d70] ss:$52 sps:$4 sm:$0xff]   ;;  %v17794_v41 = vld [vmem:[%s24471_s3 + $0x22c] ss:$12 sps:$4 sm:$0xff]  }
 0x4fb   :  { %10364 = vmatmul.mubr.bf16.gmra.mxu1 %v18845_v7  ;;  %15595 = vmatpush3.bf16.msra.mxu0 %v17757_v48  ;;  %v22880_v5 = vadd.f32 %v9902_v34, %v9850_v61  ;;  %v17765_v7 = vld [vmem:[%s24468_s1 + $0x1b68] ss:$52 sps:$4 sm:$0xff]   ;;  %v17773_v48 = vld [vmem:[%s24468_s1 + $0x1a98] ss:$52 sps:$4 sm:$0xff]   ;;  %v24585_v61 = vld [vmem:[#allocation8_spill] sm:$0xff] }
 0x4fc   :  { %15623 = vmatpush3.bf16.msra.mxu1 %v17758_v63  ;;  %15596 = vmatprep.subr.bf16.mxu0 %v17759_v20  ;;  %v9904_v4 = vpop.f32.mrf.mxu0  ;;  %v8097_v47 = vadd.f32 %v19565_v56, %v8044_v42  ;;  %v17774_v63 = vld [vmem:[%s24468_s1 + $0x2118] ss:$52 sps:$4 sm:$0xff]   ;;  %v17776_v56 = vld [vmem:[%s24468_s1 + $0x23f0] ss:$52 sps:$4 sm:$0xff]  }
 0x4fd   :  { %15624 = vmatprep.subr.bf16.mxu1 %v17760_v30  ;;  %10404 = vmatprep.mubr.bf16.mxu0 %v18873_v18  ;;  %v22893_v53 = vadd.f32 %v9904_v4, %v9852_v10  ;;  %v17768_v18 = vld [vmem:[%s24468_s1 + $0x24c0] ss:$52 sps:$4 sm:$0xff]   ;;  %v7948_v10 = vand.u32 %v17779_v0, %v19033_v28  ;;  %v24589_v4 = vld [vmem:[#allocation21_spill] sm:$0xff]  ;;  %v24593_v42 = vld [vmem:[#allocation11_spill] sm:$0xff] }
 0x4fe   :  { %10453 = vmatprep.mubr.bf16.mxu1 %v18875_v19  ;;  %v9906_v43 = vpop.f32.mrf.mxu0  ;;  %v17769_v19 = vld [vmem:[%s24468_s1 + $0x1b00] ss:$52 sps:$4 sm:$0xff]   ;;  %v8150_v20 = vadd.f32 %v19567_v15, %v8097_v47  ;;  %v17782_v15 = vld [vmem:[%s24471_s3 + $0xac] ss:$12 sps:$4 sm:$0xff]  }
 0x4ff   :  { %15597 = vmatpush3.bf16.msra.mxu0 %v17761_v24  ;;  %v22900_v33 = vadd.f32 %v9906_v43, %v9854_v12  ;;  %v24586_v24 = vld [vmem:[#allocation17_spill] sm:$0xff]  ;;  %v17785_v28 = vld [vmem:[%s24471_s3 + $0x94] ss:$12 sps:$4 sm:$0xff]  }
 0x500   :  { %15625 = vmatpush3.bf16.msra.mxu1 %v17762_v55  ;;  %15598 = vmatprep.subr.bf16.mxu0 %v17763_v35  ;;  %v8203_v30 = vadd.f32 %v24585_v61, %v8150_v20  ;;  %v8362_v55 = vadd.f32 %v24586_v24, %v20016_v32  ;;  %v24587_v35 = vld [vmem:[#allocation20_spill] sm:$0xff]  ;;  %v24588_v12 = vld [vmem:[#allocation9_spill] sm:$0xff] }
 0x501   :  { %15626 = vmatprep.subr.bf16.mxu1 %v17764_v13  ;;  %v17786_v47 = vld [vmem:[%s24471_s3 + $0x78] ss:$12 sps:$4 sm:$0xff]   ;;  %v17795_v0 = vld [vmem:[%s24471_s3 + $0x48] ss:$12 sps:$4 sm:$0xff]   ;;  %v17798_v20 = vld [vmem:[%s24471_s3 + $0x210] ss:$12 sps:$4 sm:$0xff]  }
 0x502   :  { %v8415_v34 = vadd.f32 %v24587_v35, %v8362_v55  ;;  %v8256_v13 = vadd.f32 %v24588_v12, %v8203_v30  ;;  %v17801_v30 = vld [vmem:[%s24471_s3 + $0x30] ss:$12 sps:$4 sm:$0xff]  }
 0x503   :  { %15599 = vmatpush3.bf16.msra.mxu0 %v17765_v7  ;;  %v24590_v7 = vld [vmem:[#allocation12_spill] sm:$0xff] }
 0x504   :  { %15627 = vmatpush3.bf16.msra.mxu1 %v17766_v22  ;;  %15600 = vmatprep.subr.bf16.mxu0 %v17767_v37  ;;  %v8468_v32 = vadd.f32 %v24589_v4, %v8415_v34  ;;  %v8309_v22 = vadd.f32 %v24590_v7, %v8256_v13  ;;  %v24591_v37 = vld [vmem:[#allocation22_spill] sm:$0xff] }
 0x505   :  { %15628 = vmatprep.subr.bf16.mxu1 %v17768_v18  ;;  %v17783_v18 = vld [vmem:[%s24471_s3 + $0x90] ss:$12 sps:$4 sm:$0xff]   ;;  %v17810_v4 = vld [vmem:[%s24471_s3 + $0x1e0] ss:$12 sps:$4 sm:$0xff]  }
 0x506   :  { %v8521_v43 = vadd.f32 %v24591_v37, %v8468_v32  ;;  %v17812_v34 = vld [vmem:[%s24471_s3 + $0x1e4] ss:$12 sps:$4 sm:$0xff]  }
 0x507   :  { %15601 = vmatpush3.bf16.msra.mxu0 %v17769_v19  ;;  %v24592_v19 = vld [vmem:[#allocation23_spill] sm:$0xff]  ;;  %v17815_v13 = vld [vmem:[%s24471_s3 + $0x4] ss:$12 sps:$4 sm:$0xff]  }
 0x508   :  { %15629 = vmatpush3.bf16.msra.mxu1 %v17770_v2  ;;  %15602 = vmatprep.subr.bf16.mxu0 %v17771_v45  ;;  %v8574_v2 = vadd.f32 %v24592_v19, %v8521_v43  ;;  %v17788_v45 = vld [vmem:[%s24471_s3 + $0x7c] ss:$12 sps:$4 sm:$0xff]   ;;  %v17818_v43 = vld [vmem:[%s24471_s3 + $0x1cc] ss:$12 sps:$4 sm:$0xff]  }
 0x509   :  { %15630 = vmatprep.subr.bf16.mxu1 %v17772_v6  ;;  %v10520_v6 = vmax.f32 %v24593_v42, 0.0  ;;  %v17816_v19 = vld [vmem:[%s24471_s3 + $0x1c8] ss:$12 sps:$4 sm:$0xff]  }
 0x50b   :  { %15603 = vmatpush3.bf16.msra.mxu0 %v17773_v48 }
 0x50c   :  { %15631 = vmatpush3.bf16.msra.mxu1 %v17774_v63  ;;  %15604 = vmatprep.subr.bf16.mxu0 %v17775_v3 }
 0x50d   :  { %15632 = vmatprep.subr.bf16.mxu1 %v17776_v56  ;;  %v9855_v56 = vpop.f32.mrf.mxu1 }
 0x50f   :  { %15605 = vmatpush3.bf16.msra.mxu0 %v17777_v36  ;;  %v17803_v36 = vld [vmem:[%s24471_s3 + $0x34] ss:$12 sps:$4 sm:$0xff]  }
 0x510   :  { %15633 = vmatpush3.bf16.msra.mxu1 %v17778_v59  ;;  %15875 = vmatprep.subr.bf16.mxu0 %v7948_v10 }
 0x511   :  { %12694 = vmatprep.subr.bf16.mxu1 %v17782_v15  ;;  %v17804_v15 = vld [vmem:[%s24471_s3 + $0x1f8] ss:$12 sps:$4 sm:$0xff]  }
 0x512   :  { %10405 = vmatmul.mubr.bf16.vlgmr.msra.gmra.mxu0 %v19054_v38  ;;  %v10533_v38 = vmax.f32 %v8309_v22, 0.0  ;;  %v9908_v22 = vpop.f32.mrf.mxu0 }
 0x513   :  { %10454 = vmatmul.mubr.bf16.vlgmr.msra.gmra.mxu1 %v19056_v39  ;;  %15876 = vmatpush3.bf16.msra.mxu0 %v7948_v10  ;;  %v8627_v39 = vadd.f32 %v20509_v44, %v8574_v2  ;;  %v24594_v44 = vld [vmem:[#allocation24_spill] sm:$0xff]  ;;  %v17809_v10 = vld [vmem:[%s24471_s3 + $0x1c] ss:$12 sps:$4 sm:$0xff]  }
 0x514   :  { %12695 = vmatpush1.bf16.msra.mxu1 %v17780_v23  ;;  %10412 = vmatprep.mubr.bf16.mxu0 %v19068_v46  ;;  %v17791_v46 = vld [vmem:[%s24471_s3 + $0x64] ss:$12 sps:$4 sm:$0xff]   ;;  %v22982_v63 = vpack.c.bf16 %v10533_v38, %v10520_v6  ;;  %v10522_v3 = vmax.f32 %v24594_v44, 0.0  ;;  %v17827_v38 = vld [vmem:[%s24471_s3 + $0x154] ss:$12 sps:$4 sm:$0xff]  }
 0x515   :  { %12696 = vmatprep.subr.bf16.mxu1 %v17785_v28  ;;  %10461 = vmatprep.mubr.bf16.mxu1 %v19076_v52  ;;  %v8680_v48 = vadd.f32 %v20511_v14, %v8627_v39  ;;  %v17789_v52 = vld [vmem:[%s24471_s3 + $0x60] ss:$12 sps:$4 sm:$0xff]  }
 0x516   :  { %12747 = vmatprep.subr.bf16.mxu0 %v17794_v41  ;;  %v17797_v14 = vld [vmem:[%s24471_s3 + $0x4c] ss:$12 sps:$4 sm:$0xff]  }
 0x517   :  { %v17813_v28 = vld [vmem:[%s24471_s3] ss:$12 sps:$4 sm:$0xff]  }
 0x518   :  { %12697 = vmatpush1.bf16.msra.mxu1 %v17783_v18  ;;  %v17821_v41 = vld [vmem:[%s24471_s3 + $0x16c] ss:$12 sps:$4 sm:$0xff]  }
 0x519   :  { %12698 = vmatprep.subr.bf16.mxu1 %v17788_v45 }
 0x51a   :  { %10413 = vmatmul.mubr.bf16.gmra.mxu0 %v19097_v62  ;;  %v10535_v62 = vmax.f32 %v8680_v48, 0.0 }
 0x51b   :  { %10462 = vmatmul.mubr.bf16.gmra.mxu1 %v19099_v1  ;;  %15877 = vmatprep.mubr.msk.bf16.mxu0 %vm7900_vm2, %v19123_v11  ;;  %v17792_v1 = vld [vmem:[%s24471_s3 + $0x228] ss:$12 sps:$4 sm:$0xff]  }
 0x51c   :  { %12699 = vmatpush1.bf16.msra.mxu1 %v17786_v47  ;;  %12726 = vmatprep.mubr.bf16.mxu1 %v22982_v63  ;;  %v17800_v11 = vld [vmem:[%s24471_s3 + $0x214] ss:$12 sps:$4 sm:$0xff]   ;;  %v23013_v61 = vpack.c.bf16 %v10535_v62, %v10522_v3  ;;  %v17822_v47 = vld [vmem:[%s24471_s3 + $0x1b0] ss:$12 sps:$4 sm:$0xff]  }
 0x51d   :  { %12700 = vmatprep.subr.bf16.mxu1 %v17791_v46  ;;  %v24595_v46 = vld [vmem:[#allocation4_spill] sm:$0xff]  ;;  %v17833_v62 = vld [vmem:[%s24471_s3 + $0x13c] ss:$12 sps:$4 sm:$0xff]  }
 0x51e   :  { %v8001_v48 = vadd.f32 %v24595_v46, %v19310_v51  ;;  %v17828_v51 = vld [vmem:[%s24471_s3 + $0x198] ss:$12 sps:$4 sm:$0xff]   ;;  %v17851_v46 = vld [vmem:[%s24471_s3 + $0xf4] ss:$12 sps:$4 sm:$0xff]  }
 0x520   :  { %12701 = vmatpush1.bf16.msra.mxu1 %v17789_v52 }
 0x521   :  { %12702 = vmatprep.subr.bf16.mxu1 %v17797_v14  ;;  %v17830_v14 = vld [vmem:[%s24471_s3 + $0x19c] ss:$12 sps:$4 sm:$0xff]  }
 0x522   :  { %15878 = vmatmul.mubr.msk.bf16.vlgmr.msra.gmra.mxu0 %vm7900_vm2, %v19158_v26  ;;  %v17806_v26 = vld [vmem:[%s24471_s3 + $0x1fc] ss:$12 sps:$4 sm:$0xff]  }
 0x523   :  { %v9945_v59 = vpop.f32.mrf.mxu1  ;;  %12748 = vmatpush1.bf16.msra.mxu0 %v17792_v1  ;;  %12779 = vmatprep.mubr.bf16.mxu0 %v23013_v61  ;;  %v17831_v1 = vld [vmem:[%s24471_s3 + $0x138] ss:$12 sps:$4 sm:$0xff]  }
 0x524   :  { %v9946_v24 = vadd.f32 %v9945_v59, %v22839_v49  ;;  %12703 = vmatpush1.bf16.msra.mxu1 %v17795_v0  ;;  %12749 = vmatprep.subr.bf16.mxu0 %v17800_v11  ;;  %v17807_v49 = vld [vmem:[%s24471_s3 + $0x18] ss:$12 sps:$4 sm:$0xff]   ;;  %v24597_v11 = vld [vmem:[#allocation28_spill] sm:$0xff] }
 0x525   :  { %v23020_v55 = vpop.f32.mrf.mxu1  ;;  %12704 = vmatprep.subr.bf16.mxu1 %v17803_v36 }
 0x527   :  { %v9949_v35 = vpop.f32.mrf.mxu1  ;;  %12750 = vmatpush1.bf16.msra.mxu0 %v17798_v20  ;;  %v24598_v20 = vld [vmem:[#allocation29_spill] sm:$0xff] }
 0x528   :  { %v9950_v23 = vadd.f32 %v9949_v35, %v22861_v58  ;;  %12705 = vmatpush1.bf16.msra.mxu1 %v17801_v30  ;;  %12751 = vmatprep.subr.bf16.mxu0 %v17806_v26  ;;  %v9856_v58 = vadd.f32 %v9855_v56, %v22859_v50  ;;  %v24596_v56 = vld [vmem:[#allocation5_spill] sm:$0xff]  ;;  %v8733_v36 = vadd.f32 %v24598_v20, %v24597_v11  ;;  %v17836_v30 = vld [vmem:[%s24471_s3 + $0x184] ss:$12 sps:$4 sm:$0xff]   ;;  %v17834_v35 = vld [vmem:[%s24471_s3 + $0x180] ss:$12 sps:$4 sm:$0xff]  }
 0x529   :  { %v23038_v12 = vpop.f32.mrf.mxu1  ;;  %12706 = vmatprep.subr.bf16.mxu1 %v17809_v10  ;;  %v8054_v0 = vadd.f32 %v24596_v56, %v8001_v48  ;;  %v24599_v26 = vld [vmem:[#allocation6_spill] sm:$0xff]  ;;  %v17846_v48 = vld [vmem:[%s24471_s3 + $0x2d0] ss:$12 sps:$4 sm:$0xff]   ;;  %v24607_v56 = vld [vmem:[#allocation19_spill] sm:$0xff] }
 0x52a   :  { %v9909_v45 = vadd.f32 %v9908_v22, %v9856_v58  ;;  %v24601_v58 = vld [vmem:[#allocation7_spill] sm:$0xff] }
 0x52b   :  { %v9955_v32 = vpop.f32.mrf.mxu1  ;;  %12752 = vmatpush1.bf16.msra.mxu0 %v17804_v15  ;;  %v8107_v10 = vadd.f32 %v24599_v26, %v8054_v0  ;;  %v17857_v20 = vld [vmem:[%s24471_s3 + $0xdc] ss:$12 sps:$4 sm:$0xff]  }
 0x52c   :  { %v9956_v7 = vadd.f32 %v9955_v32, %v22880_v5  ;;  %12707 = vmatpush1.bf16.msra.mxu1 %v17807_v49  ;;  %12753 = vmatprep.subr.bf16.mxu0 %v17812_v34  ;;  %v17819_v5 = vld [vmem:[%s24471_s3 + $0x168] ss:$12 sps:$4 sm:$0xff]   ;;  %v17839_v49 = vld [vmem:[%s24471_s3 + $0x124] ss:$12 sps:$4 sm:$0xff]   ;;  %v17837_v34 = vld [vmem:[%s24471_s3 + $0x120] ss:$12 sps:$4 sm:$0xff]  }
 0x52d   :  { %v9957_v37 = vpop.f32.mrf.mxu1  ;;  %12708 = vmatprep.subr.bf16.mxu1 %v17815_v13  ;;  %v17842_v32 = vld [vmem:[%s24471_s3 + $0x2ec] ss:$12 sps:$4 sm:$0xff]   ;;  %v8160_v22 = vadd.f32 %v24601_v58, %v8107_v10  ;;  %v24609_v10 = vld [vmem:[#allocation14_spill] sm:$0xff] }
 0x52e   :  { %v9958_v18 = vadd.f32 %v9957_v37, %v22893_v53  ;;  %v17824_v53 = vld [vmem:[%s24471_s3 + $0x1b4] ss:$12 sps:$4 sm:$0xff]   ;;  %v24602_v37 = vld [vmem:[#allocation33_spill] sm:$0xff] }
 0x52f   :  { %v9959_v2 = vpop.f32.mrf.mxu1  ;;  %12754 = vmatpush1.bf16.msra.mxu0 %v17810_v4  ;;  %v17861_v58 = vld [vmem:[%s24471_s3 + $0xc0] ss:$12 sps:$4 sm:$0xff]  }
 0x530   :  { %v9960_v42 = vadd.f32 %v9959_v2, %v22900_v33  ;;  %12709 = vmatpush1.bf16.msra.mxu1 %v17813_v28  ;;  %12755 = vmatprep.subr.bf16.mxu0 %v17818_v43  ;;  %v17825_v33 = vld [vmem:[%s24471_s3 + $0x150] ss:$12 sps:$4 sm:$0xff]   ;;  %v17843_v2 = vld [vmem:[%s24471_s3 + $0x108] ss:$12 sps:$4 sm:$0xff]  }
 0x531   :  { %v9961_v6 = vpop.f32.mrf.mxu1  ;;  %12710 = vmatprep.subr.bf16.mxu1 %v17821_v41 }
 0x532   :  { %v23071_v39 = vadd.f32 %v9961_v6, %v9909_v45  ;;  %v9998_v52 = vpop.f32.mrf.mxu0  ;;  %v24603_v45 = vld [vmem:[#allocation10_spill] sm:$0xff] }
 0x533   :  { %v23084_v44 = vadd.f32 %v9998_v52, %v9946_v24  ;;  %12756 = vmatpush1.bf16.msra.mxu0 %v17816_v19  ;;  %v17845_v19 = vld [vmem:[%s24471_s3 + $0x10c] ss:$12 sps:$4 sm:$0xff]   ;;  %v8213_v6 = vadd.f32 %v24603_v45, %v8160_v22  ;;  %v17849_v52 = vld [vmem:[%s24471_s3 + $0xf0] ss:$12 sps:$4 sm:$0xff]   ;;  %v17872_v45 = vld [vmem:[%s24471_s3 + $0x274] ss:$12 sps:$4 sm:$0xff]  }
 0x534   :  { %12711 = vmatpush2.bf16.msra.mxu1 %v17819_v5  ;;  %v23086_v3 = vpop.f32.mrf.mxu0  ;;  %12757 = vmatprep.subr.bf16.mxu0 %v17824_v53  ;;  %v24611_v22 = vld [vmem:[#allocation40_spill] sm:$0xff] }
 0x535   :  { %12712 = vmatprep.subr.bf16.mxu1 %v17827_v38  ;;  %v17848_v38 = vld [vmem:[%s24471_s3 + $0x2d4] ss:$12 sps:$4 sm:$0xff]  }
 0x536   :  { %v10002_v59 = vpop.f32.mrf.mxu0 }
 0x537   :  { %v23103_v24 = vadd.f32 %v10002_v59, %v9950_v23  ;;  %12758 = vmatpush1.bf16.msra.mxu0 %v17822_v47  ;;  %v24600_v23 = vld [vmem:[#allocation30_spill] sm:$0xff] }
 0x538   :  { %12713 = vmatpush2.bf16.msra.mxu1 %v17825_v33  ;;  %v23106_v15 = vpop.f32.mrf.mxu0  ;;  %12759 = vmatprep.subr.bf16.mxu0 %v17830_v14  ;;  %v8786_v13 = vadd.f32 %v24600_v23, %v8733_v36  ;;  %v17852_v36 = vld [vmem:[%s24471_s3 + $0x2b8] ss:$12 sps:$4 sm:$0xff]  }
 0x539   :  { %12714 = vmatprep.subr.bf16.mxu1 %v17833_v62  ;;  %v24606_v62 = vld [vmem:[#allocation37_spill] sm:$0xff] }
 0x53a   :  { %v10008_v4 = vpop.f32.mrf.mxu0  ;;  %v8839_v43 = vadd.f32 %v24602_v37, %v8786_v13  ;;  %v17855_v59 = vld [vmem:[%s24471_s3 + $0xd8] ss:$12 sps:$4 sm:$0xff]   ;;  %v10524_v37 = vmax.f32 %v24611_v22, 0.0 }
 0x53b   :  { %v23121_v28 = vadd.f32 %v10008_v4, %v9956_v7  ;;  %12760 = vmatpush1.bf16.msra.mxu0 %v17828_v51  ;;  %v17840_v7 = vld [vmem:[%s24471_s3 + $0x2e8] ss:$12 sps:$4 sm:$0xff]   ;;  %v17860_v13 = vld [vmem:[%s24471_s3 + $0x2a4] ss:$12 sps:$4 sm:$0xff]   ;;  %v17893_v22 = vld [vmem:[%s24471_s3 + $0x34c] ss:$12 sps:$4 sm:$0xff]  }
 0x53c   :  { %12715 = vmatpush2.bf16.msra.mxu1 %v17831_v1  ;;  %v10010_v41 = vpop.f32.mrf.mxu0  ;;  %12761 = vmatprep.subr.bf16.mxu0 %v17836_v30  ;;  %v17854_v1 = vld [vmem:[%s24471_s3 + $0x2bc] ss:$12 sps:$4 sm:$0xff]   ;;  %v24608_v30 = vld [vmem:[#allocation38_spill] sm:$0xff] }
 0x53d   :  { %12716 = vmatprep.subr.bf16.mxu1 %v17839_v49  ;;  %v23128_v5 = vadd.f32 %v10010_v41, %v9958_v18  ;;  %v24604_v18 = vld [vmem:[#allocation34_spill] sm:$0xff]  ;;  %v10546_v49 = vmax.f32 %v24609_v10, 0.0  ;;  %v17866_v41 = vld [vmem:[%s24471_s3 + $0x28c] ss:$12 sps:$4 sm:$0xff]  }
 0x53e   :  { %v10012_v53 = vpop.f32.mrf.mxu0  ;;  %v8892_v33 = vadd.f32 %v24604_v18, %v8839_v43  ;;  %v17863_v4 = vld [vmem:[%s24471_s3 + $0xc4] ss:$12 sps:$4 sm:$0xff]   ;;  %v24612_v18 = vld [vmem:[#allocation13_spill] sm:$0xff] }
 0x53f   :  { %v23140_v47 = vadd.f32 %v10012_v53, %v9960_v42  ;;  %12762 = vmatpush1.bf16.msra.mxu0 %v17834_v35  ;;  %v24605_v42 = vld [vmem:[#allocation16_spill] sm:$0xff] }
 0x540   :  { %12717 = vmatpush2.bf16.msra.mxu1 %v17837_v34  ;;  %12763 = vmatprep.subr.bf16.mxu0 %v17842_v32  ;;  %v8266_v14 = vadd.f32 %v24605_v42, %v8213_v6  ;;  %v8945_v51 = vadd.f32 %v24606_v62, %v8892_v33  ;;  %v24610_v34 = vld [vmem:[#allocation41_spill] sm:$0xff]  ;;  %v17858_v32 = vld [vmem:[%s24471_s3 + $0x2a0] ss:$12 sps:$4 sm:$0xff]   ;;  %v17887_v10 = vld [vmem:[%s24471_s3 + $0x364] ss:$12 sps:$4 sm:$0xff]  }
 0x541   :  { %12718 = vmatprep.subr.bf16.mxu1 %v17845_v19  ;;  %v17869_v19 = vld [vmem:[%s24471_s3 + $0x3ac] ss:$12 sps:$4 sm:$0xff]   ;;  %v17870_v53 = vld [vmem:[%s24471_s3 + $0x270] ss:$12 sps:$4 sm:$0xff]  }
 0x542   :  { %v8319_v0 = vadd.f32 %v24607_v56, %v8266_v14  ;;  %v8998_v26 = vadd.f32 %v24608_v30, %v8945_v51  ;;  %v17873_v33 = vld [vmem:[%s24471_s3 + $0x390] ss:$12 sps:$4 sm:$0xff]   ;;  %v17876_v51 = vld [vmem:[%s24471_s3 + $0x258] ss:$12 sps:$4 sm:$0xff]  }
 0x543   :  { %12764 = vmatpush2.bf16.msra.mxu0 %v17840_v7  ;;  %v17864_v7 = vld [vmem:[%s24471_s3 + $0x288] ss:$12 sps:$4 sm:$0xff]   ;;  %v24615_v14 = vld [vmem:[#allocation49_spill] sm:$0xff] }
 0x544   :  { %12719 = vmatpush2.bf16.msra.mxu1 %v17843_v2  ;;  %12765 = vmatprep.subr.bf16.mxu0 %v17848_v38  ;;  %v10559_v35 = vmax.f32 %v8319_v0, 0.0  ;;  %v9051_v23 = vadd.f32 %v24610_v34, %v8998_v26  ;;  %v17867_v2 = vld [vmem:[%s24471_s3 + $0x3a8] ss:$12 sps:$4 sm:$0xff]   ;;  %v17879_v56 = vld [vmem:[%s24471_s3 + $0x378] ss:$12 sps:$4 sm:$0xff]  }
 0x545   :  { %12720 = vmatprep.subr.bf16.mxu1 %v17851_v46  ;;  %v17875_v38 = vld [vmem:[%s24471_s3 + $0x394] ss:$12 sps:$4 sm:$0xff]   ;;  %v17878_v42 = vld [vmem:[%s24471_s3 + $0x25c] ss:$12 sps:$4 sm:$0xff]  }
 0x546   :  { %v10537_v43 = vmax.f32 %v9051_v23, 0.0  ;;  %v23198_v6 = vpack.c.bf16 %v10559_v35, %v10546_v49  ;;  %v24613_v46 = vld [vmem:[#allocation46_spill] sm:$0xff]  ;;  %v24616_v0 = vld [vmem:[#allocation51_spill] sm:$0xff]  ;;  %v24619_v34 = vld [vmem:[#allocation56_spill] sm:$0xff] }
 0x547   :  { %12766 = vmatpush2.bf16.msra.mxu0 %v17846_v48  ;;  %v24614_v48 = vld [vmem:[#allocation48_spill] sm:$0xff]  ;;  %v24618_v49 = vld [vmem:[#allocation15_spill] sm:$0xff] }
 0x548   :  { %12721 = vmatpush2.bf16.msra.mxu1 %v17849_v52  ;;  %12767 = vmatprep.subr.bf16.mxu0 %v17854_v1  ;;  %v9104_v52 = vadd.f32 %v24614_v48, %v24613_v46  ;;  %v17881_v1 = vld [vmem:[%s24471_s3 + $0x37c] ss:$12 sps:$4 sm:$0xff]   ;;  %v23231_v26 = vpack.c.bf16 %v10537_v43, %v10524_v37  ;;  %v17882_v35 = vld [vmem:[%s24471_s3 + $0x240] ss:$12 sps:$4 sm:$0xff]  }
 0x549   :  { %12722 = vmatprep.subr.bf16.mxu1 %v17857_v20  ;;  %v24621_v37 = vld [vmem:[#allocation55_spill] sm:$0xff] }
 0x54a   :  { %v9157_v62 = vadd.f32 %v24615_v14, %v9104_v52  ;;  %v24622_v43 = vld [vmem:[#allocation59_spill] sm:$0xff]  ;;  %v24625_v52 = vld [vmem:[#allocation60_spill] sm:$0xff] }
 0x54b   :  { %12768 = vmatpush2.bf16.msra.mxu0 %v17852_v36  ;;  %v17884_v36 = vld [vmem:[%s24471_s3 + $0x244] ss:$12 sps:$4 sm:$0xff]   ;;  %v24626_v14 = vld [vmem:[#allocation27_spill] sm:$0xff] }
 0x54c   :  { %12723 = vmatpush2.bf16.msra.mxu1 %v17855_v59  ;;  %12769 = vmatprep.subr.bf16.mxu0 %v17860_v13  ;;  %v9210_v20 = vadd.f32 %v24616_v0, %v9157_v62  ;;  %v24617_v59 = vld [vmem:[#allocation53_spill] sm:$0xff]  ;;  %v17885_v13 = vld [vmem:[%s24471_s3 + $0x360] ss:$12 sps:$4 sm:$0xff]  }
 0x54d   :  { %12724 = vmatprep.subr.bf16.mxu1 %v17863_v4  ;;  %v17890_v4 = vld [vmem:[%s24471_s3 + $0x52c] ss:$12 sps:$4 sm:$0xff]   ;;  %v17902_v0 = vld [vmem:[%s24471_s3 + $0x4fc] ss:$12 sps:$4 sm:$0xff]  }
 0x54e   :  { %v9263_v30 = vadd.f32 %v24617_v59, %v9210_v20 }
 0x54f   :  { %12770 = vmatpush2.bf16.msra.mxu0 %v17858_v32  ;;  %v24620_v32 = vld [vmem:[#allocation61_spill] sm:$0xff] }
 0x550   :  { %12725 = vmatpush2.bf16.msra.mxu1 %v17861_v58  ;;  %12771 = vmatprep.subr.bf16.mxu0 %v17866_v41  ;;  %v9316_v23 = vadd.f32 %v24619_v34, %v9263_v30  ;;  %v9365_v41 = vadd.f32 %v24622_v43, %v24621_v37  ;;  %v17903_v34 = vld [vmem:[%s24471_s3 + $0x318] ss:$12 sps:$4 sm:$0xff]   ;;  %v17909_v43 = vld [vmem:[%s24471_s3 + $0x300] ss:$12 sps:$4 sm:$0xff]  }
 0x551   :  { %12800 = vmatprep.subr.bf16.mxu1 %v17869_v19  ;;  %v17888_v19 = vld [vmem:[%s24471_s3 + $0x528] ss:$12 sps:$4 sm:$0xff]  }
 0x552   :  { %v9369_v58 = vadd.f32 %v24620_v32, %v9316_v23  ;;  %v17908_v23 = vld [vmem:[%s24471_s3 + $0x4e4] ss:$12 sps:$4 sm:$0xff]  }
 0x553   :  { %12727 = vmatmul.mubr.bf16.vlgmr.msra.gmra.mxu1 %v24612_v18  ;;  %12772 = vmatpush2.bf16.msra.mxu0 %v17864_v7  ;;  %v17891_v7 = vld [vmem:[%s24471_s3 + $0x348] ss:$12 sps:$4 sm:$0xff]  }
 0x554   :  { %12736 = vmatprep.mubr.bf16.mxu1 %v23198_v6  ;;  %12801 = vmatpush1.bf16.msra.mxu1 %v17867_v2  ;;  %v17896_v2 = vld [vmem:[%s24471_s3 + $0x514] ss:$12 sps:$4 sm:$0xff]  }
 0x555   :  { %12773 = vmatprep.subr.bf16.mxu0 %v17872_v45  ;;  %12802 = vmatprep.subr.bf16.mxu1 %v17875_v38  ;;  %v24623_v45 = vld [vmem:[#allocation62_spill] sm:$0xff] }
 0x556   :  { %v17899_v38 = vld [vmem:[%s24471_s3 + $0x334] ss:$12 sps:$4 sm:$0xff]  }
 0x557   :  { %12774 = vmatpush2.bf16.msra.mxu0 %v17870_v53  ;;  %v9422_v53 = vadd.f32 %v24623_v45, %v9369_v58  ;;  %v17912_v45 = vld [vmem:[%s24471_s3 + $0x4c8] ss:$12 sps:$4 sm:$0xff]  }
 0x558   :  { %12803 = vmatpush1.bf16.msra.mxu1 %v17873_v33  ;;  %12775 = vmatprep.subr.bf16.mxu0 %v17878_v42  ;;  %v24624_v33 = vld [vmem:[#allocation25_spill] sm:$0xff]  ;;  %v9418_v42 = vadd.f32 %v24625_v52, %v9365_v41 }
 0x559   :  { %12804 = vmatprep.subr.bf16.mxu1 %v17881_v1  ;;  %v10539_v20 = vmax.f32 %v9422_v53, 0.0  ;;  %v17914_v41 = vld [vmem:[%s24471_s3 + $0x4cc] ss:$12 sps:$4 sm:$0xff]   ;;  %v10014_v53 = vpop.f32.mrf.mxu0 }
 0x55a   :  { %v10526_v59 = vmax.f32 %v9418_v42, 0.0 }
 0x55b   :  { %12737 = vmatmul.mubr.bf16.gmra.mxu1 %v24618_v49  ;;  %12776 = vmatpush2.bf16.msra.mxu0 %v17876_v51  ;;  %v17894_v51 = vld [vmem:[%s24471_s3 + $0x510] ss:$12 sps:$4 sm:$0xff]  }
 0x55c   :  { %12832 = vmatprep.mubr.bf16.mxu1 %v23231_v26  ;;  %12805 = vmatpush1.bf16.msra.mxu1 %v17879_v56  ;;  %v17897_v56 = vld [vmem:[%s24471_s3 + $0x330] ss:$12 sps:$4 sm:$0xff]  }
 0x55d   :  { %12777 = vmatprep.subr.bf16.mxu0 %v17884_v36  ;;  %12806 = vmatprep.subr.bf16.mxu1 %v17887_v10  ;;  %v17900_v10 = vld [vmem:[%s24471_s3 + $0x4f8] ss:$12 sps:$4 sm:$0xff]  }
 0x55f   :  { %12778 = vmatpush2.bf16.msra.mxu0 %v17882_v35 }
 0x560   :  { %12807 = vmatpush1.bf16.msra.mxu1 %v17885_v13  ;;  %12853 = vmatprep.subr.bf16.mxu0 %v17890_v4  ;;  %v23297_v13 = vpack.c.bf16 %v10539_v20, %v10526_v59  ;;  %v24627_v4 = vld [vmem:[#allocation26_spill] sm:$0xff] }
 0x561   :  { %12808 = vmatprep.subr.bf16.mxu1 %v17893_v22  ;;  %v17906_v22 = vld [vmem:[%s24471_s3 + $0x4e0] ss:$12 sps:$4 sm:$0xff]  }
 0x562   :  { %12780 = vmatmul.mubr.bf16.vlgmr.msra.gmra.mxu0 %v24624_v33 }
 0x563   :  { %v10051_v48 = vpop.f32.mrf.mxu1  ;;  %12789 = vmatprep.mubr.bf16.mxu0 %v24626_v14  ;;  %12854 = vmatpush1.bf16.msra.mxu0 %v17888_v19 }
 0x564   :  { %v10052_v62 = vadd.f32 %v10051_v48, %v23084_v44  ;;  %12809 = vmatpush1.bf16.msra.mxu1 %v17891_v7  ;;  %12855 = vmatprep.subr.bf16.mxu0 %v17896_v2  ;;  %v17905_v44 = vld [vmem:[%s24471_s3 + $0x31c] ss:$12 sps:$4 sm:$0xff]   ;;  %v17920_v48 = vld [vmem:[%s24471_s3 + $0x4b4] ss:$12 sps:$4 sm:$0xff]  }
 0x565   :  { %v23274_v1 = vpop.f32.mrf.mxu1  ;;  %12810 = vmatprep.subr.bf16.mxu1 %v17899_v38 }
 0x567   :  { %v10055_v36 = vpop.f32.mrf.mxu1  ;;  %12856 = vmatpush1.bf16.msra.mxu0 %v17894_v51 }
 0x568   :  { %v10056_v30 = vadd.f32 %v10055_v36, %v23103_v24  ;;  %12811 = vmatpush1.bf16.msra.mxu1 %v17897_v56  ;;  %12857 = vmatprep.subr.bf16.mxu0 %v17902_v0  ;;  %v17911_v24 = vld [vmem:[%s24471_s3 + $0x304] ss:$12 sps:$4 sm:$0xff]   ;;  %v17926_v36 = vld [vmem:[%s24471_s3 + $0x49c] ss:$12 sps:$4 sm:$0xff]  }
 0x569   :  { %v23289_v35 = vpop.f32.mrf.mxu1  ;;  %12812 = vmatprep.subr.bf16.mxu1 %v17905_v44  ;;  %v17918_v56 = vld [vmem:[%s24471_s3 + $0x4b0] ss:$12 sps:$4 sm:$0xff]  }
 0x56a   :  { %12790 = vmatmul.mubr.bf16.gmra.mxu0 %v24627_v4  ;;  %v17921_v44 = vld [vmem:[%s24471_s3 + $0x450] ss:$12 sps:$4 sm:$0xff]  }
 0x56b   :  { %v10061_v32 = vpop.f32.mrf.mxu1  ;;  %12858 = vmatpush1.bf16.msra.mxu0 %v17900_v10  ;;  %12885 = vmatprep.mubr.bf16.mxu0 %v23297_v13 }
 0x56c   :  { %v10062_v58 = vadd.f32 %v10061_v32, %v23121_v28  ;;  %12813 = vmatpush1.bf16.msra.mxu1 %v17903_v34  ;;  %12859 = vmatprep.subr.bf16.mxu0 %v17908_v23  ;;  %v17917_v28 = vld [vmem:[%s24471_s3 + $0x46c] ss:$12 sps:$4 sm:$0xff]  }
 0x56d   :  { %v10063_v37 = vpop.f32.mrf.mxu1  ;;  %12814 = vmatprep.subr.bf16.mxu1 %v17911_v24  ;;  %v17924_v24 = vld [vmem:[%s24471_s3 + $0x498] ss:$12 sps:$4 sm:$0xff]   ;;  %v24628_v32 = vld [vmem:[#allocation31_spill] sm:$0xff] }
 0x56e   :  { %v10064_v19 = vadd.f32 %v10063_v37, %v23128_v5  ;;  %v17915_v5 = vld [vmem:[%s24471_s3 + $0x468] ss:$12 sps:$4 sm:$0xff]  }
 0x56f   :  { %v10065_v7 = vpop.f32.mrf.mxu1  ;;  %12860 = vmatpush1.bf16.msra.mxu0 %v17906_v22  ;;  %v8743_v22 = vadd.f32 %v24628_v32, %v24597_v11  ;;  %v17935_v11 = vld [vmem:[%s24471_s3 + $0x424] ss:$12 sps:$4 sm:$0xff]  }
 0x570   :  { %v23319_v2 = vadd.f32 %v10065_v7, %v23140_v47  ;;  %12815 = vmatpush1.bf16.msra.mxu1 %v17909_v43  ;;  %12861 = vmatprep.subr.bf16.mxu0 %v17914_v41  ;;  %v17923_v47 = vld [vmem:[%s24471_s3 + $0x454] ss:$12 sps:$4 sm:$0xff]   ;;  %v17927_v41 = vld [vmem:[%s24471_s3 + $0x438] ss:$12 sps:$4 sm:$0xff]  }
 0x571   :  { %v10067_v38 = vpop.f32.mrf.mxu1  ;;  %12816 = vmatprep.subr.bf16.mxu1 %v17917_v28 }
 0x572   :  { %v10104_v52 = vpop.f32.mrf.mxu0 }
 0x573   :  { %v10157_v42 = vpop.f32.mrf.mxu1  ;;  %v10105_v51 = vadd.f32 %v10104_v52, %v10052_v62  ;;  %12862 = vmatpush1.bf16.msra.mxu0 %v17912_v45  ;;  %v17929_v62 = vld [vmem:[%s24471_s3 + $0x43c] ss:$12 sps:$4 sm:$0xff]   ;;  %v17930_v52 = vld [vmem:[%s24471_s3 + $0x480] ss:$12 sps:$4 sm:$0xff]  }
 0x574   :  { %12817 = vmatpush2.bf16.msra.mxu1 %v17915_v5  ;;  %v23336_v0 = vpop.f32.mrf.mxu0  ;;  %12863 = vmatprep.subr.bf16.mxu0 %v17920_v48 }
 0x575   :  { %v23338_v20 = vpop.f32.mrf.mxu1  ;;  %12818 = vmatprep.subr.bf16.mxu1 %v17923_v47  ;;  %v10158_v34 = vadd.f32 %v10157_v42, %v10105_v51  ;;  %v24629_v42 = vld [vmem:[#allocation32_spill] sm:$0xff] }
 0x576   :  { %v10108_v59 = vpop.f32.mrf.mxu0  ;;  %v8796_v51 = vadd.f32 %v24629_v42, %v8743_v22 }
 0x577   :  { %v10161_v10 = vpop.f32.mrf.mxu1  ;;  %v10109_v23 = vadd.f32 %v10108_v59, %v10056_v30  ;;  %12864 = vmatpush1.bf16.msra.mxu0 %v17918_v56  ;;  %v17932_v30 = vld [vmem:[%s24471_s3 + $0x484] ss:$12 sps:$4 sm:$0xff]   ;;  %v10529_v5 = vmax.f32 %v10158_v34, 0.0  ;;  %v17941_v34 = vld [vmem:[%s24471_s3 + $0x40c] ss:$12 sps:$4 sm:$0xff]  }
 0x578   :  { %12819 = vmatpush2.bf16.msra.mxu1 %v17921_v44  ;;  %v23354_v37 = vpop.f32.mrf.mxu0  ;;  %12865 = vmatprep.subr.bf16.mxu0 %v17926_v36  ;;  %v17933_v36 = vld [vmem:[%s24471_s3 + $0x420] ss:$12 sps:$4 sm:$0xff]  }
 0x579   :  { %v23356_v43 = vpop.f32.mrf.mxu1  ;;  %v10162_v28 = vadd.f32 %v10161_v10, %v10109_v23  ;;  %12820 = vmatprep.subr.bf16.mxu1 %v17929_v62  ;;  %v17938_v62 = vld [vmem:[%s24471_s3 + $0x5ec] ss:$12 sps:$4 sm:$0xff]  }
 0x57a   :  { %v10114_v7 = vpop.f32.mrf.mxu0  ;;  %v24630_v23 = vld [vmem:[#allocation35_spill] sm:$0xff] }
 0x57b   :  { %v10167_v45 = vpop.f32.mrf.mxu1  ;;  %v10542_v48 = vmax.f32 %v10162_v28, 0.0  ;;  %v10115_v47 = vadd.f32 %v10114_v7, %v10062_v58  ;;  %12866 = vmatpush1.bf16.msra.mxu0 %v17924_v24  ;;  %v10015_v58 = vadd.f32 %v10014_v53, %v23071_v39  ;;  %v8849_v24 = vadd.f32 %v24630_v23, %v8796_v51  ;;  %v17936_v39 = vld [vmem:[%s24471_s3 + $0x5e8] ss:$12 sps:$4 sm:$0xff]  }
 0x57c   :  { %12821 = vmatpush2.bf16.msra.mxu1 %v17927_v41  ;;  %v10116_v56 = vpop.f32.mrf.mxu0  ;;  %12867 = vmatprep.subr.bf16.mxu0 %v17932_v30  ;;  %v17950_v23 = vld [vmem:[%s24471_s3 + $0x5bc] ss:$12 sps:$4 sm:$0xff]  }
 0x57d   :  { %v10169_v44 = vpop.f32.mrf.mxu1  ;;  %v23378_v59 = vpack.c.bf16 %v10542_v48, %v10529_v5  ;;  %v10117_v10 = vadd.f32 %v10116_v56, %v10064_v19  ;;  %12822 = vmatprep.subr.bf16.mxu1 %v17935_v11  ;;  %v10068_v41 = vadd.f32 %v10067_v38, %v10015_v58  ;;  %v10168_v30 = vadd.f32 %v10167_v45, %v10115_v47  ;;  %v24631_v19 = vld [vmem:[#allocation69_spill] sm:$0xff]  ;;  %v17939_v5 = vld [vmem:[%s24471_s3 + $0x408] ss:$12 sps:$4 sm:$0xff]  }
 0x57e   :  { %v10118_v32 = vpop.f32.mrf.mxu0  ;;  %v9475_v53 = vadd.f32 %v24631_v19, %v22094_v16  ;;  %v17947_v16 = vld [vmem:[%s24471_s3 + $0x3f4] ss:$12 sps:$4 sm:$0xff]   ;;  %v17948_v19 = vld [vmem:[%s24471_s3 + $0x5b8] ss:$12 sps:$4 sm:$0xff]  }
 0x57f   :  { %v10171_v22 = vpop.f32.mrf.mxu1  ;;  %v10119_v28 = vadd.f32 %v10118_v32, %v23319_v2  ;;  %12868 = vmatpush1.bf16.msra.mxu0 %v17930_v52  ;;  %v17944_v2 = vld [vmem:[%s24471_s3 + $0x5d4] ss:$12 sps:$4 sm:$0xff]   ;;  %v10170_v38 = vadd.f32 %v10169_v44, %v10117_v10  ;;  %v10555_v42 = vmax.f32 %v10168_v30, 0.0  ;;  %v24635_v30 = vld [vmem:[#allocation73_spill] sm:$0xff] }
 0x580   :  { %12823 = vmatpush2.bf16.msra.mxu1 %v17933_v36  ;;  %v10120_v11 = vpop.f32.mrf.mxu0  ;;  %12869 = vmatprep.subr.bf16.mxu0 %v17938_v62  ;;  %v24632_v47 = vld [vmem:[#allocation36_spill] sm:$0xff]  ;;  %v24633_v62 = vld [vmem:[#allocation39_spill] sm:$0xff]  ;;  %v24634_v44 = vld [vmem:[#allocation70_spill] sm:$0xff] }
 0x581   :  { %v10173_v7 = vpop.f32.mrf.mxu1  ;;  %v10121_v45 = vadd.f32 %v10120_v11, %v10068_v41  ;;  %v10172_v48 = vadd.f32 %v10171_v22, %v10119_v28  ;;  %12824 = vmatprep.subr.bf16.mxu1 %v17941_v34  ;;  %v8902_v52 = vadd.f32 %v24632_v47, %v8849_v24  ;;  %v17942_v36 = vld [vmem:[%s24471_s3 + $0x5d0] ss:$12 sps:$4 sm:$0xff]   ;;  %v9528_v10 = vadd.f32 %v24634_v44, %v9475_v53 }
 0x582   :  { %v17945_v34 = vld [vmem:[%s24471_s3 + $0x3f0] ss:$12 sps:$4 sm:$0xff]   ;;  %v10556_v24 = vmax.f32 %v10170_v38, 0.0  ;;  %v17951_v38 = vld [vmem:[%s24471_s3 + $0x3d8] ss:$12 sps:$4 sm:$0xff]  }
 0x583   :  { %v10568_v51 = vmax.f32 %v10172_v48, 0.0  ;;  %v10174_v56 = vadd.f32 %v10173_v7, %v10121_v45  ;;  %12870 = vmatpush2.bf16.msra.mxu0 %v17936_v39  ;;  %v8955_v58 = vadd.f32 %v24633_v62, %v8902_v52  ;;  %v17953_v41 = vld [vmem:[%s24471_s3 + $0x3dc] ss:$12 sps:$4 sm:$0xff]   ;;  %v9581_v28 = vadd.f32 %v24635_v30, %v9528_v10  ;;  %v24637_v7 = vld [vmem:[#allocation68_spill] sm:$0xff]  ;;  %v24639_v48 = vld [vmem:[#allocation50_spill] sm:$0xff] }
 0x584   :  { %12825 = vmatpush2.bf16.msra.mxu1 %v17939_v5  ;;  %12871 = vmatprep.subr.bf16.mxu0 %v17944_v2  ;;  %v24636_v53 = vld [vmem:[#allocation45_spill] sm:$0xff]  ;;  %v24638_v5 = vld [vmem:[#allocation71_spill] sm:$0xff]  ;;  %v17956_v45 = vld [vmem:[%s24471_s3 + $0x5a4] ss:$12 sps:$4 sm:$0xff]  }
 0x585   :  { %v23411_v32 = vpack.c.bf16 %v10568_v51, %v10555_v42  ;;  %v10569_v22 = vmax.f32 %v10174_v56, 0.0  ;;  %12826 = vmatprep.subr.bf16.mxu1 %v17947_v16  ;;  %v9008_v11 = vadd.f32 %v24636_v53, %v8955_v58  ;;  %v9577_v2 = vadd.f32 %v24638_v5, %v24637_v7  ;;  %v17959_v47 = vld [vmem:[%s24471_s3 + $0x3c4] ss:$12 sps:$4 sm:$0xff]   ;;  %v24640_v52 = vld [vmem:[#allocation47_spill] sm:$0xff]  ;;  %v24643_v44 = vld [vmem:[#allocation77_spill] sm:$0xff] }
 0x586   :  { %v9114_v16 = vadd.f32 %v24639_v48, %v24613_v46  ;;  %v24641_v51 = vld [vmem:[#allocation74_spill] sm:$0xff]  ;;  %v24642_v62 = vld [vmem:[#allocation72_spill] sm:$0xff]  ;;  %v24645_v30 = vld [vmem:[#allocation75_spill] sm:$0xff] }
 0x587   :  { %v23417_v39 = vpack.c.bf16 %v10569_v22, %v10556_v24  ;;  %12872 = vmatpush2.bf16.msra.mxu0 %v17942_v36  ;;  %v9061_v42 = vadd.f32 %v24640_v52, %v9008_v11  ;;  %v9634_v56 = vadd.f32 %v24641_v51, %v9581_v28  ;;  %v17954_v36 = vld [vmem:[%s24471_s3 + $0x5a0] ss:$12 sps:$4 sm:$0xff]   ;;  %v9630_v58 = vadd.f32 %v24642_v62, %v9577_v2  ;;  %v17960_v11 = vld [vmem:[%s24471_s3 + $0x588] ss:$12 sps:$4 sm:$0xff]   ;;  %v24649_v48 = vld [vmem:[#allocation57_spill] sm:$0xff] }
 0x588   :  { %12827 = vmatpush2.bf16.msra.mxu1 %v17945_v34  ;;  %12873 = vmatprep.subr.bf16.mxu0 %v17950_v23  ;;  %v17957_v46 = vld [vmem:[%s24471_s3 + $0x3c0] ss:$12 sps:$4 sm:$0xff]   ;;  %v24644_v23 = vld [vmem:[#allocation52_spill] sm:$0xff] }
 0x589   :  { %12828 = vmatprep.subr.bf16.mxu1 %v17953_v41  ;;  %v9687_v10 = vadd.f32 %v24643_v44, %v9634_v56  ;;  %v17962_v34 = vld [vmem:[%s24471_s3 + $0x58c] ss:$12 sps:$4 sm:$0xff]   ;;  %v9167_v24 = vadd.f32 %v24644_v23, %v9114_v16  ;;  %v10563_v41 = vmax.f32 %v9061_v42, 0.0  ;;  %v9683_v28 = vadd.f32 %v24645_v30, %v9630_v58  ;;  %v24648_v2 = vld [vmem:[#allocation78_spill] sm:$0xff]  ;;  %v24650_v42 = vld [vmem:[#allocation76_spill] sm:$0xff] }
 0x58a   :  { %v17965_v22 = vld [vmem:[%s24471_s3 + $0x6ac] ss:$12 sps:$4 sm:$0xff]   ;;  %v17971_v52 = vld [vmem:[%s24471_s3 + $0x694] ss:$12 sps:$4 sm:$0xff]   ;;  %v9846_v44 = vadd.f32 %v22823_v54, %v22859_v50  ;;  %v17974_v54 = vld [vmem:[%s24471_s3 + $0x55c] ss:$12 sps:$4 sm:$0xff]  }
 0x58b   :  { %12874 = vmatpush2.bf16.msra.mxu0 %v17948_v19  ;;  %v24646_v19 = vld [vmem:[#allocation54_spill] sm:$0xff]  ;;  %v24647_v7 = vld [vmem:[#allocation43_spill] sm:$0xff]  ;;  %v9736_v51 = vadd.f32 %v24650_v42, %v9683_v28 }
 0x58c   :  { %12829 = vmatpush2.bf16.msra.mxu1 %v17951_v38  ;;  %12875 = vmatprep.subr.bf16.mxu0 %v17956_v45  ;;  %v9220_v53 = vadd.f32 %v24646_v19, %v9167_v24  ;;  %v10550_v5 = vmax.f32 %v24647_v7, 0.0  ;;  %v9740_v38 = vadd.f32 %v24648_v2, %v9687_v10  ;;  %v17963_v45 = vld [vmem:[%s24471_s3 + $0x6a8] ss:$12 sps:$4 sm:$0xff]   ;;  %v24652_v62 = vld [vmem:[#allocation58_spill] sm:$0xff] }
 0x58d   :  { %12830 = vmatprep.subr.bf16.mxu1 %v17959_v47  ;;  %v17968_v47 = vld [vmem:[%s24471_s3 + $0x574] ss:$12 sps:$4 sm:$0xff]   ;;  %v17983_v2 = vld [vmem:[%s24471_s3 + $0x664] ss:$12 sps:$4 sm:$0xff]  }
 0x58e   :  { %v9273_v16 = vadd.f32 %v24649_v48, %v9220_v53  ;;  %v9793_v56 = vadd.f32 %v22627_v17, %v9740_v38  ;;  %v24653_v10 = vld [vmem:[#allocation42_spill] sm:$0xff]  ;;  %v17969_v17 = vld [vmem:[%s24471_s3 + $0x690] ss:$12 sps:$4 sm:$0xff]  }
 0x58f   :  { %12876 = vmatpush2.bf16.msra.mxu0 %v17954_v36  ;;  %v23472_v36 = vpack.c.bf16 %v10563_v41, %v10550_v5  ;;  %v24654_v23 = vld [vmem:[#allocation66_spill] sm:$0xff]  ;;  %v9899_v41 = vadd.f32 %v22863_v27, %v9846_v44  ;;  %v24655_v27 = vld [vmem:[#allocation67_spill] sm:$0xff] }
 0x590   :  { %12831 = vmatpush2.bf16.msra.mxu1 %v17957_v46  ;;  %12877 = vmatprep.subr.bf16.mxu0 %v17962_v34  ;;  %v9326_v58 = vadd.f32 %v24652_v62, %v9273_v16  ;;  %v17966_v46 = vld [vmem:[%s24471_s3 + $0x570] ss:$12 sps:$4 sm:$0xff]   ;;  %v9789_v34 = vadd.f32 %v22610_v57, %v9736_v51  ;;  %v10541_v30 = vmax.f32 %v9793_v56, 0.0  ;;  %v17972_v53 = vld [vmem:[%s24471_s3 + $0x558] ss:$12 sps:$4 sm:$0xff]  }
 0x591   :  { %12906 = vmatprep.subr.bf16.mxu1 %v17965_v22  ;;  %24651 = vst [vmem:[#allocation8_spill] sm:$0xff] %v23472_v36  ;;  %v9842_v22 = vadd.f32 %v22793_v8, %v22859_v50  ;;  %v17977_v57 = vld [vmem:[%s24471_s3 + $0x67c] ss:$12 sps:$4 sm:$0xff]   ;;  %v9952_v19 = vadd.f32 %v23038_v12, %v9899_v41  ;;  %v17975_v50 = vld [vmem:[%s24471_s3 + $0x678] ss:$12 sps:$4 sm:$0xff]  }
 0x592   :  { %v9379_v24 = vadd.f32 %v24654_v23, %v9326_v58  ;;  %v23501_v8 = vpop.f32.mrf.mxu0  ;;  %v17980_v5 = vld [vmem:[%s24471_s3 + $0x544] ss:$12 sps:$4 sm:$0xff]   ;;  %v17989_v56 = vld [vmem:[%s24471_s3 + $0x64c] ss:$12 sps:$4 sm:$0xff]   ;;  %v17995_v23 = vld [vmem:[%s24471_s3 + $0x634] ss:$12 sps:$4 sm:$0xff]  }
 0x593   :  { %12833 = vmatmul.mubr.bf16.vlgmr.msra.gmra.mxu1 %v24653_v10  ;;  %12878 = vmatpush2.bf16.msra.mxu0 %v17960_v11  ;;  %v9895_v28 = vadd.f32 %v22841_v31, %v9842_v22  ;;  %v10528_v11 = vmax.f32 %v9789_v34, 0.0  ;;  %v10005_v12 = vadd.f32 %v23106_v15, %v9952_v19  ;;  %v23515_v38 = vpop.f32.mrf.mxu1  ;;  %v17978_v15 = vld [vmem:[%s24471_s3 + $0x540] ss:$12 sps:$4 sm:$0xff]   ;;  %v24658_v58 = vld [vmem:[#allocation64_spill] sm:$0xff]  ;;  %v18001_v19 = vld [vmem:[%s24471_s3 + $0x61c] ss:$12 sps:$4 sm:$0xff]  }
 0x594   :  { %12842 = vmatprep.mubr.bf16.mxu1 %v23472_v36  ;;  %12907 = vmatpush1.bf16.msra.mxu1 %v17963_v45  ;;  %v9432_v7 = vadd.f32 %v24655_v27, %v9379_v24  ;;  %v10552_v44 = vmax.f32 %v24658_v58, 0.0  ;;  %v17984_v34 = vld [vmem:[%s24471_s3 + $0x828] ss:$12 sps:$4 sm:$0xff]   ;;  %v17996_v27 = vld [vmem:[%s24471_s3 + $0x7f8] ss:$12 sps:$4 sm:$0xff]  }
 0x595   :  { %12879 = vmatprep.subr.bf16.mxu0 %v17968_v47  ;;  %12908 = vmatprep.subr.bf16.mxu1 %v17971_v52  ;;  %v9948_v31 = vadd.f32 %v23020_v55, %v9895_v28  ;;  %v23517_v45 = vpack.c.bf16 %v10541_v30, %v10528_v11  ;;  %v10058_v16 = vadd.f32 %v23289_v35, %v10005_v12  ;;  %v24657_v55 = vld [vmem:[#allocation44_spill] sm:$0xff]  ;;  %v23525_v47 = vpop.f32.mrf.mxu0  ;;  %v17981_v52 = vld [vmem:[%s24471_s3 + $0x660] ss:$12 sps:$4 sm:$0xff]   ;;  %v23539_v62 = vpop.f32.mrf.mxu1  ;;  %v17998_v28 = vld [vmem:[%s24471_s3 + $0x7fc] ss:$12 sps:$4 sm:$0xff]  }
 0x596   :  { %v10565_v35 = vmax.f32 %v9432_v7, 0.0  ;;  %v24660_v22 = vld [vmem:[#allocation63_spill] sm:$0xff]  ;;  %v17993_v30 = vld [vmem:[%s24471_s3 + $0x630] ss:$12 sps:$4 sm:$0xff]   ;;  %v18071_v36 = vld [vmem:[%s24471_s3 + $0x978] ss:$12 sps:$4 sm:$0xff]  }
 0x597   :  { %12880 = vmatpush2.bf16.msra.mxu0 %v17966_v46  ;;  %24656 = vst [vmem:[#allocation17_spill] sm:$0xff] %v23517_v45  ;;  %v10001_v48 = vadd.f32 %v23086_v3, %v9948_v31  ;;  %v17986_v3 = vld [vmem:[%s24471_s3 + $0x82c] ss:$12 sps:$4 sm:$0xff]   ;;  %v10111_v51 = vadd.f32 %v23354_v37, %v10058_v16  ;;  %v17987_v37 = vld [vmem:[%s24471_s3 + $0x648] ss:$12 sps:$4 sm:$0xff]   ;;  %v23560_v24 = vpop.f32.mrf.mxu1 }
 0x598   :  { %12909 = vmatpush1.bf16.msra.mxu1 %v17969_v17  ;;  %12881 = vmatprep.subr.bf16.mxu0 %v17974_v54  ;;  %v17992_v17 = vld [vmem:[%s24471_s3 + $0x814] ss:$12 sps:$4 sm:$0xff]   ;;  %v17999_v31 = vld [vmem:[%s24471_s3 + $0x618] ss:$12 sps:$4 sm:$0xff]  }
 0x599   :  { %12910 = vmatprep.subr.bf16.mxu1 %v17977_v57  ;;  %v10054_v42 = vadd.f32 %v23274_v1, %v10001_v48  ;;  %v23546_v1 = vpop.f32.mrf.mxu0  ;;  %v10164_v54 = vadd.f32 %v23356_v43, %v10111_v51  ;;  %v17990_v43 = vld [vmem:[%s24471_s3 + $0x810] ss:$12 sps:$4 sm:$0xff]  }
 0x59a   :  { %v18004_v12 = vld [vmem:[%s24471_s3 + $0x7e4] ss:$12 sps:$4 sm:$0xff]   ;;  %v24662_v16 = vld [vmem:[#allocation65_spill] sm:$0xff] }
 0x59b   :  { %12843 = vmatmul.mubr.bf16.gmra.mxu1 %v24657_v55  ;;  %12882 = vmatpush2.bf16.msra.mxu0 %v17972_v53  ;;  %v10107_v46 = vadd.f32 %v23336_v0, %v10054_v42  ;;  %v23555_v0 = vpack.c.bf16 %v10565_v35, %v10552_v44  ;;  %v23568_v57 = vpop.f32.mrf.mxu0  ;;  %v23579_v53 = vpop.f32.mrf.mxu1  ;;  %v18010_v35 = vld [vmem:[%s24471_s3 + $0x7cc] ss:$12 sps:$4 sm:$0xff]   ;;  %v18011_v44 = vld [vmem:[%s24471_s3 + $0x768] ss:$12 sps:$4 sm:$0xff]   ;;  %v15496_v55 = vadd.f32 %v23525_v47, %v23501_v8 }
 0x59c   :  { %12911 = vmatpush1.bf16.msra.mxu1 %v17975_v50  ;;  %12938 = vmatprep.mubr.bf16.mxu1 %v23517_v45  ;;  %v18013_v42 = vld [vmem:[%s24471_s3 + $0x76c] ss:$12 sps:$4 sm:$0xff]  }
 0x59d   :  { %12883 = vmatprep.subr.bf16.mxu0 %v17980_v5  ;;  %12912 = vmatprep.subr.bf16.mxu1 %v17983_v2  ;;  %24659 = vst [vmem:[#allocation20_spill] sm:$0xff] %v23555_v0  ;;  %v10160_v41 = vadd.f32 %v23338_v20, %v10107_v46  ;;  %v10543_v20 = vmax.f32 %v10164_v54, 0.0  ;;  %v23581_v11 = vpop.f32.mrf.mxu0  ;;  %v23586_v7 = vpop.f32.mrf.mxu1  ;;  %v18007_v2 = vld [vmem:[%s24471_s3 + $0x604] ss:$12 sps:$4 sm:$0xff]   ;;  %v18016_v46 = vld [vmem:[%s24471_s3 + $0x7b4] ss:$12 sps:$4 sm:$0xff]  }
 0x59f   :  { %12884 = vmatpush2.bf16.msra.mxu0 %v17978_v15  ;;  %v10530_v50 = vmax.f32 %v10160_v41, 0.0  ;;  %v23599_v48 = vpop.f32.mrf.mxu0  ;;  %v18002_v15 = vld [vmem:[%s24471_s3 + $0x7e0] ss:$12 sps:$4 sm:$0xff]   ;;  %v18017_v41 = vld [vmem:[%s24471_s3 + $0x750] ss:$12 sps:$4 sm:$0xff]  }
 0x5a0   :  { %12913 = vmatpush1.bf16.msra.mxu1 %v17981_v52  ;;  %12959 = vmatprep.subr.bf16.mxu0 %v17986_v3  ;;  %v23606_v52 = vpop.f32.mrf.mxu1  ;;  %v18005_v3 = vld [vmem:[%s24471_s3 + $0x600] ss:$12 sps:$4 sm:$0xff]  }
 0x5a1   :  { %12914 = vmatprep.subr.bf16.mxu1 %v17989_v56  ;;  %v23594_v5 = vpack.c.bf16 %v10543_v20, %v10530_v50  ;;  %v23617_v51 = vpop.f32.mrf.mxu0  ;;  %v18008_v56 = vld [vmem:[%s24471_s3 + $0x7c8] ss:$12 sps:$4 sm:$0xff]   ;;  %v18020_v20 = vld [vmem:[%s24471_s3 + $0x798] ss:$12 sps:$4 sm:$0xff]  }
 0x5a2   :  { %12886 = vmatmul.mubr.bf16.vlgmr.msra.gmra.mxu0 %v24660_v22  ;;  %v23622_v58 = vpop.f32.mrf.mxu1  ;;  %v18023_v50 = vld [vmem:[%s24471_s3 + $0x738] ss:$12 sps:$4 sm:$0xff]   ;;  %v24663_v22 = vsub.s32 4, %v19265_v25  ;;  %v18073_v25 = vld [vmem:[%s24471_s3 + $0x97c] ss:$12 sps:$4 sm:$0xff]  }
 0x5a3   :  { %12895 = vmatprep.mubr.bf16.mxu0 %v23555_v0  ;;  %12960 = vmatpush1.bf16.msra.mxu0 %v17984_v34  ;;  %24661 = vst [vmem:[#allocation9_spill] sm:$0xff] %v23594_v5  ;;  %v18019_v34 = vld [vmem:[%s24471_s3 + $0x754] ss:$12 sps:$4 sm:$0xff]  }
 0x5a4   :  { %12915 = vmatpush1.bf16.msra.mxu1 %v17987_v37  ;;  %12961 = vmatprep.subr.bf16.mxu0 %v17992_v17  ;;  %v23633_v37 = vpop.f32.mrf.mxu0  ;;  %v18014_v17 = vld [vmem:[%s24471_s3 + $0x7b0] ss:$12 sps:$4 sm:$0xff]   ;;  %v23638_v54 = vpop.f32.mrf.mxu1 }
 0x5a5   :  { %12916 = vmatprep.subr.bf16.mxu1 %v17995_v23 }
 0x5a7   :  { %12962 = vmatpush1.bf16.msra.mxu0 %v17990_v43  ;;  %v18022_v43 = vld [vmem:[%s24471_s3 + $0x79c] ss:$12 sps:$4 sm:$0xff]  }
 0x5a8   :  { %12917 = vmatpush1.bf16.msra.mxu1 %v17993_v30  ;;  %12963 = vmatprep.subr.bf16.mxu0 %v17998_v28  ;;  %v18025_v30 = vld [vmem:[%s24471_s3 + $0x73c] ss:$12 sps:$4 sm:$0xff]  }
 0x5a9   :  { %12918 = vmatprep.subr.bf16.mxu1 %v18001_v19 }
 0x5aa   :  { %12896 = vmatmul.mubr.bf16.gmra.mxu0 %v24662_v16 }
 0x5ab   :  { %12964 = vmatpush1.bf16.msra.mxu0 %v17996_v27  ;;  %12991 = vmatprep.mubr.bf16.mxu0 %v23594_v5  ;;  %v18028_v27 = vld [vmem:[%s24471_s3 + $0x784] ss:$12 sps:$4 sm:$0xff]   ;;  %v18059_v5 = vld [vmem:[%s24471_s3 + $0x9a8] ss:$12 sps:$4 sm:$0xff]  }
 0x5ac   :  { %12919 = vmatpush1.bf16.msra.mxu1 %v17999_v31  ;;  %12965 = vmatprep.subr.bf16.mxu0 %v18004_v12  ;;  %v18031_v31 = vld [vmem:[%s24471_s3 + $0x724] ss:$12 sps:$4 sm:$0xff]  }
 0x5ad   :  { %12920 = vmatprep.subr.bf16.mxu1 %v18007_v2  ;;  %v18026_v2 = vld [vmem:[%s24471_s3 + $0x780] ss:$12 sps:$4 sm:$0xff]  }
 0x5af   :  { %12966 = vmatpush1.bf16.msra.mxu0 %v18002_v15 }
 0x5b0   :  { %12921 = vmatpush1.bf16.msra.mxu1 %v18005_v3  ;;  %12967 = vmatprep.subr.bf16.mxu0 %v18010_v35  ;;  %v18029_v3 = vld [vmem:[%s24471_s3 + $0x720] ss:$12 sps:$4 sm:$0xff]  }
 0x5b1   :  { %12922 = vmatprep.subr.bf16.mxu1 %v18013_v42  ;;  %v18034_v35 = vld [vmem:[%s24471_s3 + $0x8ec] ss:$12 sps:$4 sm:$0xff]  }
 0x5b2   :  { %v23640_v23 = vpop.f32.mrf.mxu0  ;;  %v18037_v42 = vld [vmem:[%s24471_s3 + $0x70c] ss:$12 sps:$4 sm:$0xff]  }
 0x5b3   :  { %12968 = vmatpush1.bf16.msra.mxu0 %v18008_v56  ;;  %v23651_v28 = vpop.f32.mrf.mxu1 }
 0x5b4   :  { %12923 = vmatpush2.bf16.msra.mxu1 %v18011_v44  ;;  %12969 = vmatprep.subr.bf16.mxu0 %v18016_v46  ;;  %v23656_v19 = vpop.f32.mrf.mxu0  ;;  %v18032_v44 = vld [vmem:[%s24471_s3 + $0x8e8] ss:$12 sps:$4 sm:$0xff]  }
 0x5b5   :  { %12924 = vmatprep.subr.bf16.mxu1 %v18019_v34  ;;  %v23667_v12 = vpop.f32.mrf.mxu1  ;;  %v18035_v34 = vld [vmem:[%s24471_s3 + $0x708] ss:$12 sps:$4 sm:$0xff]  }
 0x5b6   :  { %v23672_v15 = vpop.f32.mrf.mxu0 }
 0x5b7   :  { %12970 = vmatpush1.bf16.msra.mxu0 %v18014_v17  ;;  %v23683_v56 = vpop.f32.mrf.mxu1  ;;  %v18040_v17 = vld [vmem:[%s24471_s3 + $0x8d4] ss:$12 sps:$4 sm:$0xff]  }
 0x5b8   :  { %12925 = vmatpush2.bf16.msra.mxu1 %v18017_v41  ;;  %12971 = vmatprep.subr.bf16.mxu0 %v18022_v43  ;;  %v23688_v46 = vpop.f32.mrf.mxu0  ;;  %v18043_v41 = vld [vmem:[%s24471_s3 + $0x6f4] ss:$12 sps:$4 sm:$0xff]  }
 0x5b9   :  { %12926 = vmatprep.subr.bf16.mxu1 %v18025_v30  ;;  %v23699_v43 = vpop.f32.mrf.mxu1  ;;  %v18038_v30 = vld [vmem:[%s24471_s3 + $0x8d0] ss:$12 sps:$4 sm:$0xff]  }
 0x5bb   :  { %12972 = vmatpush1.bf16.msra.mxu0 %v18020_v20  ;;  %v23704_v20 = vpop.f32.mrf.mxu0 }
 0x5bc   :  { %12927 = vmatpush2.bf16.msra.mxu1 %v18023_v50  ;;  %12973 = vmatprep.subr.bf16.mxu0 %v18028_v27  ;;  %v23706_v50 = vpop.f32.mrf.mxu1  ;;  %v18041_v27 = vld [vmem:[%s24471_s3 + $0x6f0] ss:$12 sps:$4 sm:$0xff]  }
 0x5bd   :  { %12928 = vmatprep.subr.bf16.mxu1 %v18031_v31  ;;  %v18046_v31 = vld [vmem:[%s24471_s3 + $0x8bc] ss:$12 sps:$4 sm:$0xff]  }
 0x5bf   :  { %12974 = vmatpush1.bf16.msra.mxu0 %v18026_v2  ;;  %v18049_v2 = vld [vmem:[%s24471_s3 + $0x6dc] ss:$12 sps:$4 sm:$0xff]  }
 0x5c0   :  { %12929 = vmatpush2.bf16.msra.mxu1 %v18029_v3  ;;  %12975 = vmatprep.subr.bf16.mxu0 %v18034_v35  ;;  %v18044_v3 = vld [vmem:[%s24471_s3 + $0x8b8] ss:$12 sps:$4 sm:$0xff]   ;;  %v23720_v35 = vpop.f32.mrf.mxu0 }
 0x5c1   :  { %12930 = vmatprep.subr.bf16.mxu1 %v18037_v42  ;;  %v23722_v42 = vpop.f32.mrf.mxu1 }
 0x5c3   :  { %12976 = vmatpush2.bf16.msra.mxu0 %v18032_v44  ;;  %v18047_v44 = vld [vmem:[%s24471_s3 + $0x6d8] ss:$12 sps:$4 sm:$0xff]  }
 0x5c4   :  { %12931 = vmatpush2.bf16.msra.mxu1 %v18035_v34  ;;  %12977 = vmatprep.subr.bf16.mxu0 %v18040_v17  ;;  %v18052_v34 = vld [vmem:[%s24471_s3 + $0x8a4] ss:$12 sps:$4 sm:$0xff]  }
 0x5c5   :  { %12932 = vmatprep.subr.bf16.mxu1 %v18043_v41  ;;  %v18055_v17 = vld [vmem:[%s24471_s3 + $0x6c4] ss:$12 sps:$4 sm:$0xff]   ;;  %v18050_v41 = vld [vmem:[%s24471_s3 + $0x8a0] ss:$12 sps:$4 sm:$0xff]  }
 0x5c7   :  { %12978 = vmatpush2.bf16.msra.mxu0 %v18038_v30  ;;  %v23736_v30 = vpop.f32.mrf.mxu0 }
 0x5c8   :  { %12933 = vmatpush2.bf16.msra.mxu1 %v18041_v27  ;;  %12979 = vmatprep.subr.bf16.mxu0 %v18046_v31  ;;  %v23738_v27 = vpop.f32.mrf.mxu1  ;;  %v18053_v31 = vld [vmem:[%s24471_s3 + $0x6c0] ss:$12 sps:$4 sm:$0xff]  }
 0x5c9   :  { %12934 = vmatprep.subr.bf16.mxu1 %v18049_v2  ;;  %v18058_v2 = vld [vmem:[%s24471_s3 + $0x88c] ss:$12 sps:$4 sm:$0xff]  }
 0x5cb   :  { %12980 = vmatpush2.bf16.msra.mxu0 %v18044_v3  ;;  %v18061_v3 = vld [vmem:[%s24471_s3 + $0x9ac] ss:$12 sps:$4 sm:$0xff]  }
 0x5cc   :  { %12935 = vmatpush2.bf16.msra.mxu1 %v18047_v44  ;;  %12981 = vmatprep.subr.bf16.mxu0 %v18052_v34  ;;  %v23752_v44 = vpop.f32.mrf.mxu0  ;;  %v23754_v34 = vpop.f32.mrf.mxu1 }
 0x5cd   :  { %12936 = vmatprep.subr.bf16.mxu1 %v18055_v17  ;;  %v18064_v17 = vld [vmem:[%s24471_s3 + $0x874] ss:$12 sps:$4 sm:$0xff]  }
 0x5cf   :  { %12982 = vmatpush2.bf16.msra.mxu0 %v18050_v41  ;;  %v18067_v41 = vld [vmem:[%s24471_s3 + $0x994] ss:$12 sps:$4 sm:$0xff]  }
 0x5d0   :  { %12937 = vmatpush2.bf16.msra.mxu1 %v18053_v31  ;;  %12983 = vmatprep.subr.bf16.mxu0 %v18058_v2  ;;  %v15499_v31 = vadd.f32 %v23568_v57, %v23546_v1  ;;  %v18062_v2 = vld [vmem:[%s24471_s3 + $0x870] ss:$12 sps:$4 sm:$0xff]  }
 0x5d1   :  { %13012 = vmatprep.subr.bf16.mxu1 %v18061_v3  ;;  %v18232_v3 = vld [vmem:[%s24470_s2 + $0x8] sm:$0x1f]  ;;  %v18065_v57 = vld [vmem:[%s24471_s3 + $0x990] ss:$12 sps:$4 sm:$0xff]  }
 0x5d2   :  { %v23765_v16 = vpop.f32.mrf.mxu0  ;;  %v1517_v45 = vrot.slane %v18232_v3, %v24663_v22 }
 0x5d3   :  { %v23767_v0 = vpop.f32.mrf.mxu1  ;;  %12939 = vmatmul.mubr.bf16.vlgmr.msra.gmra.mxu1 %v22645_v9  ;;  %12984 = vmatpush2.bf16.msra.mxu0 %v18056_v40  ;;  %v18070_v9 = vld [vmem:[%s24471_s3 + $0x85c] ss:$12 sps:$4 sm:$0xff]  }
 0x5d4   :  { %12948 = vmatprep.mubr.bf16.mxu1 %v22678_v21  ;;  %13013 = vmatpush1.bf16.msra.mxu1 %v18059_v5  ;;  %v23783_v1 = vpop.f32.mrf.mxu0  ;;  %v10214_v22 = vadd.f32 %v15499_v31, %v1517_v45  ;;  %v18068_v5 = vld [vmem:[%s24471_s3 + $0x858] ss:$12 sps:$4 sm:$0xff]   ;;  %v10211_v3 = vadd.f32 %v15496_v55, %v1517_v45  ;;  %v15524_v21 = vadd.f32 %v23539_v62, %v23515_v38 }
 0x5d5   :  { %v23785_v40 = vpop.f32.mrf.mxu1  ;;  %12985 = vmatprep.subr.bf16.mxu0 %v18064_v17  ;;  %13014 = vmatprep.subr.bf16.mxu1 %v18067_v41  ;;  %v18076_v31 = vld [vmem:[%s24471_s3 + $0x844] ss:$12 sps:$4 sm:$0xff]   ;;  %v15505_v55 = vadd.f32 %v23633_v37, %v23617_v51  ;;  %v15555_v38 = vadd.f32 %v23688_v46, %v23672_v15  ;;  %v15502_v62 = vadd.f32 %v23599_v48, %v23581_v11  ;;  %v18074_v51 = vld [vmem:[%s24471_s3 + $0x840] ss:$12 sps:$4 sm:$0xff]  }
 0x5d6   :  { %v15609_v8 = vpop.f32.mrf.mxu0  ;;  %v10260_v37 = vadd.f32 %v15524_v21, %v10211_v3  ;;  %v18077_v11 = vld [vmem:[%s24471_s3 + $0x960] ss:$12 sps:$4 sm:$0xff]   ;;  %v18080_v48 = vld [vmem:[%s24471_s3 + $0x170] ss:$12 sps:$4 sm:$0xff]  }
 0x5d7   :  { %v23796_v47 = vpop.f32.mrf.mxu1  ;;  %12986 = vmatpush2.bf16.msra.mxu0 %v18062_v2  ;;  %v15527_v2 = vadd.f32 %v23579_v53, %v23560_v24  ;;  %v18083_v21 = vld [vmem:[%s24471_s3 + $0x94c] ss:$12 sps:$4 sm:$0xff]  }
 0x5d8   :  { %13015 = vmatpush1.bf16.msra.mxu1 %v18065_v57  ;;  %v15610_v17 = vpop.f32.mrf.mxu0  ;;  %12987 = vmatprep.subr.bf16.mxu0 %v18070_v9  ;;  %v18079_v9 = vld [vmem:[%s24471_s3 + $0x964] ss:$12 sps:$4 sm:$0xff]   ;;  %v15552_v57 = vadd.f32 %v23656_v19, %v23640_v23  ;;  %v10222_v23 = vadd.f32 %v15505_v55, %v1517_v45  ;;  %v15533_v19 = vadd.f32 %v23638_v54, %v23622_v58 }
 0x5d9   :  { %v23803_v41 = vpop.f32.mrf.mxu1  ;;  %13016 = vmatprep.subr.bf16.mxu1 %v18073_v25  ;;  %v10263_v53 = vadd.f32 %v15527_v2, %v10214_v22  ;;  %v15530_v25 = vadd.f32 %v23606_v52, %v23586_v7  ;;  %v15583_v58 = vadd.f32 %v23699_v43, %v23683_v56  ;;  %v15561_v54 = vadd.f32 %v23752_v44, %v23736_v30 }
 0x5da   :  { %v23824_v10 = vpop.f32.mrf.mxu0  ;;  %v10309_v22 = vadd.f32 %v15552_v57, %v10260_v37  ;;  %v15611_v2 = vadd.f32 %v15610_v17, %v15609_v8  ;;  %v15558_v7 = vadd.f32 %v23720_v35, %v23704_v20  ;;  %v10271_v56 = vadd.f32 %v15533_v19, %v10222_v23  ;;  %v18088_v20 = vld [vmem:[%s24471_s3 + $0x934] ss:$12 sps:$4 sm:$0xff]  }
 0x5db   :  { %v23826_v24 = vpop.f32.mrf.mxu1  ;;  %12949 = vmatmul.mubr.bf16.gmra.mxu1 %v22667_v29  ;;  %12988 = vmatpush2.bf16.msra.mxu0 %v18068_v5  ;;  %v10312_v46 = vadd.f32 %v15555_v38, %v10263_v53  ;;  %v15580_v5 = vadd.f32 %v23667_v12, %v23651_v28  ;;  %v18081_v28 = vld [vmem:[%s24471_s3 + $0x948] ss:$12 sps:$4 sm:$0xff]   ;;  %v18085_v12 = vld [vmem:[%s24471_s3 + $0x158] ss:$12 sps:$4 sm:$0xff]   ;;  %v15608_v30 = vadd.f32 %v23783_v1, %v23765_v16  ;;  %v18086_v53 = vld [vmem:[%s24471_s3 + $0x930] ss:$12 sps:$4 sm:$0xff]  }
 0x5dc   :  { %13017 = vmatpush1.bf16.msra.mxu1 %v18071_v36  ;;  %v15613_v15 = vpop.f32.mrf.mxu0  ;;  %12989 = vmatprep.subr.bf16.mxu0 %v18076_v31  ;;  %v10219_v36 = vadd.f32 %v15502_v62, %v1517_v45  ;;  %v18084_v45 = vld [vmem:[%s24471_s3 + $0xb0] ss:$12 sps:$4 sm:$0xff]   ;;  %v10320_v55 = vadd.f32 %v15561_v54, %v10271_v56  ;;  %v15589_v38 = vadd.f32 %v23754_v34, %v23738_v27  ;;  %v18089_v16 = vld [vmem:[%s24471_s3 + $0x98] ss:$12 sps:$4 sm:$0xff]   ;;  %v18090_v27 = vld [vmem:[%s24471_s3 + $0x140] ss:$12 sps:$4 sm:$0xff]  }
 0x5dd   :  { %13018 = vmatprep.subr.bf16.mxu1 %v18079_v9  ;;  %13044 = vmatprep.mubr.bf16.mxu1 %v24527_v60  ;;  %v15641_v31 = vpop.f32.mrf.mxu1  ;;  %v10361_v43 = vadd.f32 %v15583_v58, %v10312_v46  ;;  %v10358_v44 = vadd.f32 %v15580_v5, %v10309_v22  ;;  %v15586_v62 = vadd.f32 %v23722_v42, %v23706_v50  ;;  %v18093_v50 = vld [vmem:[%s24471_s3 + $0x91c] ss:$12 sps:$4 sm:$0xff]   ;;  %v18098_v22 = vld [vmem:[%s24471_s3 + $0x904] ss:$12 sps:$4 sm:$0xff]  }
 0x5de   :  { %v15615_v3 = vpop.f32.mrf.mxu0  ;;  %v10268_v35 = vadd.f32 %v15530_v25, %v10219_v36  ;;  %v15639_v37 = vadd.f32 %v23803_v41, %v23796_v47  ;;  %v10369_v23 = vadd.f32 %v15589_v38, %v10320_v55  ;;  %v15614_v19 = vadd.f32 %v15613_v15, %v23824_v10  ;;  %v18091_v41 = vld [vmem:[%s24471_s3 + $0x918] ss:$12 sps:$4 sm:$0xff]   ;;  %v18099_v54 = vld [vmem:[%s24471_s3 + $0x68] ss:$12 sps:$4 sm:$0xff]   ;;  %v18108_v55 = vld [vmem:[%s24471_s3 + $0xe0] ss:$12 sps:$4 sm:$0xff]  }
 0x5df   :  { %12990 = vmatpush2.bf16.msra.mxu0 %v18074_v51  ;;  %v15643_v8 = vpop.f32.mrf.mxu1  ;;  %v10410_v9 = vadd.f32 %v15611_v2, %v10361_v43  ;;  %v10407_v34 = vadd.f32 %v15608_v30, %v10358_v44  ;;  %v15636_v51 = vadd.f32 %v23785_v40, %v23767_v0  ;;  %v18094_v0 = vld [vmem:[%s24471_s3 + $0x80] ss:$12 sps:$4 sm:$0xff]   ;;  %v18104_v56 = vld [vmem:[%s24471_s3 + $0xf8] ss:$12 sps:$4 sm:$0xff]  }
 0x5e0   :  { %13019 = vmatpush1.bf16.msra.mxu1 %v18077_v11  ;;  %v15616_v52 = vpop.f32.mrf.mxu0  ;;  %15649 = vmatprep.subr.bf16.mxu0 %v18080_v48  ;;  %v10317_v1 = vadd.f32 %v15558_v7, %v10268_v35  ;;  %v18096_v2 = vld [vmem:[%s24471_s3 + $0x900] ss:$12 sps:$4 sm:$0xff]   ;;  %v18105_v44 = vld [vmem:[%s24471_s3 + $0x38] ss:$12 sps:$4 sm:$0xff]  }
 0x5e1   :  { %13020 = vmatprep.subr.bf16.mxu1 %v18083_v21  ;;  %v15617_v11 = vadd.f32 %v15616_v52, %v15615_v3  ;;  %v15644_v42 = vpop.f32.mrf.mxu1  ;;  %v10459_v46 = vadd.f32 %v15639_v37, %v10410_v9  ;;  %v18095_v21 = vld [vmem:[%s24471_s3 + $0x128] ss:$12 sps:$4 sm:$0xff]   ;;  %v10456_v15 = vadd.f32 %v15636_v51, %v10407_v34  ;;  %v15642_v3 = vadd.f32 %v15641_v31, %v23826_v24  ;;  %v18116_v34 = vld [vmem:[%s24471_s3 + $0x470] ss:$12 sps:$4 sm:$0xff]  }
 0x5e2   :  { %12992 = vmatmul.mubr.bf16.vlgmr.msra.gmra.mxu0 %v23378_v59  ;;  %v23869_v17 = vpop.f32.mrf.mxu0  ;;  %v10366_v40 = vadd.f32 %v15586_v62, %v10317_v1  ;;  %v15645_v10 = vadd.f32 %v15644_v42, %v15643_v8  ;;  %v18107_v8 = vld [vmem:[%s24471_s3 + $0x218] ss:$12 sps:$4 sm:$0xff]   ;;  %v18111_v1 = vld [vmem:[%s24471_s3 + $0x200] ss:$12 sps:$4 sm:$0xff]   ;;  %v18117_v51 = vld [vmem:[%s24471_s3 + $0x290] ss:$12 sps:$4 sm:$0xff]  }
 0x5e3   :  { %13001 = vmatprep.mubr.bf16.mxu0 %v23417_v39  ;;  %15650 = vmatpush3.bf16.msra.mxu0 %v18084_v45  ;;  %v10418_v36 = vadd.f32 %v15617_v11, %v10369_v23  ;;  %v18100_v45 = vld [vmem:[%s24471_s3 + $0x110] ss:$12 sps:$4 sm:$0xff]   ;;  %v18120_v11 = vld [vmem:[%s24471_s3 + $0x458] ss:$12 sps:$4 sm:$0xff]   ;;  %v18124_v23 = vld [vmem:[%s24471_s3 + $0x440] ss:$12 sps:$4 sm:$0xff]  }
 0x5e4   :  { %13021 = vmatpush1.bf16.msra.mxu1 %v18081_v28  ;;  %v10504_v57 = vpop.f32.mrf.mxu0  ;;  %15651 = vmatprep.subr.bf16.mxu0 %v18085_v12  ;;  %v10415_v5 = vadd.f32 %v15614_v19, %v10366_v40  ;;  %v18101_v28 = vld [vmem:[%s24471_s3 + $0x50] ss:$12 sps:$4 sm:$0xff]   ;;  %v18122_v42 = vld [vmem:[%s24471_s3 + $0x398] ss:$12 sps:$4 sm:$0xff]   ;;  %v18127_v19 = vld [vmem:[%s24471_s3 + $0x1a0] ss:$12 sps:$4 sm:$0xff]  }
 0x5e5   :  { %13022 = vmatprep.subr.bf16.mxu1 %v18088_v20  ;;  %v10505_v58 = vadd.f32 %v10504_v57, %v10456_v15  ;;  %v10467_v7 = vadd.f32 %v15645_v10, %v10418_v36  ;;  %v18103_v12 = vld [vmem:[%s24471_s3 + $0x230] ss:$12 sps:$4 sm:$0xff]   ;;  %v18106_v20 = vld [vmem:[%s24471_s3 + $0x2d8] ss:$12 sps:$4 sm:$0xff]   ;;  %v18114_v57 = vld [vmem:[%s24471_s3 + $0x2a8] ss:$12 sps:$4 sm:$0xff]  }
 0x5e6   :  { %v15880_v48 = vpop.f32.mrf.mxu0  ;;  %v10464_v31 = vadd.f32 %v15642_v3, %v10415_v5  ;;  %v18118_v37 = vld [vmem:[%s24471_s3 + $0x3b0] ss:$12 sps:$4 sm:$0xff]   ;;  %v18130_v40 = vld [vmem:[%s24471_s3 + $0x368] ss:$12 sps:$4 sm:$0xff]   ;;  %v18136_v36 = vld [vmem:[%s24471_s3 + $0x3f8] ss:$12 sps:$4 sm:$0xff]  }
 0x5e7   :  { %15652 = vmatpush3.bf16.msra.mxu0 %v18089_v16  ;;  %v10531_v52 = vmax.f32 %v10505_v58, 0.0  ;;  %v10516_v43 = vadd.f32 %v15880_v48, %v10467_v7  ;;  %v18109_v16 = vld [vmem:[%s24471_s3 + $0x20] ss:$12 sps:$4 sm:$0xff]   ;;  %v18123_v48 = vld [vmem:[%s24471_s3 + $0x1b8] ss:$12 sps:$4 sm:$0xff]  }
 0x5e8   :  { %13023 = vmatpush1.bf16.msra.mxu1 %v18086_v53  ;;  %v10507_v47 = vpop.f32.mrf.mxu0  ;;  %15653 = vmatprep.subr.bf16.mxu0 %v18090_v27  ;;  %v10513_v35 = vadd.f32 %v23869_v17, %v10464_v31  ;;  %v18110_v17 = vld [vmem:[%s24471_s3 + $0x2c0] ss:$12 sps:$4 sm:$0xff]   ;;  %v18113_v53 = vld [vmem:[%s24471_s3 + $0x8] ss:$12 sps:$4 sm:$0xff]   ;;  %v18138_v10 = vld [vmem:[%s24471_s3 + $0x5d8] ss:$12 sps:$4 sm:$0xff]  }
 0x5e9   :  { %v10508_v25 = vadd.f32 %v10507_v47, %v10459_v46  ;;  %13024 = vmatprep.subr.bf16.mxu1 %v18093_v50  ;;  %v10570_v38 = vmax.f32 %v10516_v43, 0.0  ;;  %v18115_v27 = vld [vmem:[%s24471_s3 + $0x1e8] ss:$12 sps:$4 sm:$0xff]   ;;  %v18121_v50 = vld [vmem:[%s24471_s3 + $0x278] ss:$12 sps:$4 sm:$0xff]  }
 0x5ea   :  { %13002 = vmatmul.mubr.bf16.gmra.mxu0 %v23411_v32  ;;  %v10557_v9 = vmax.f32 %v10513_v35, 0.0  ;;  %v18128_v46 = vld [vmem:[%s24471_s3 + $0x428] ss:$12 sps:$4 sm:$0xff]   ;;  %v18137_v15 = vld [vmem:[%s24471_s3 + $0x338] ss:$12 sps:$4 sm:$0xff]  }
 0x5eb   :  { %15654 = vmatpush3.bf16.msra.mxu0 %v18094_v0  ;;  %13097 = vmatprep.mubr.bf16.mxu0 %v22982_v63  ;;  %v10544_v24 = vmax.f32 %v10508_v25, 0.0  ;;  %v18102_v63 = vld [vmem:[%s24471_s3 + $0x2f0] ss:$12 sps:$4 sm:$0xff]   ;;  %v18129_v0 = vld [vmem:[%s24471_s3 + $0x248] ss:$12 sps:$4 sm:$0xff]  }
 0x5ec   :  { %13025 = vmatpush1.bf16.msra.mxu1 %v18091_v41  ;;  %15655 = vmatprep.subr.bf16.mxu0 %v18095_v21  ;;  %v23955_v62 = vpack.c.bf16 %v10570_v38, %v10557_v9  ;;  %v18131_v47 = vld [vmem:[%s24471_s3 + $0x188] ss:$12 sps:$4 sm:$0xff]   ;;  %v18132_v41 = vld [vmem:[%s24471_s3 + $0x410] ss:$12 sps:$4 sm:$0xff]   ;;  %v18139_v25 = vld [vmem:[%s24471_s3 + $0x518] ss:$12 sps:$4 sm:$0xff]  }
 0x5ed   :  { %13026 = vmatprep.subr.bf16.mxu1 %v18098_v22  ;;  %v23929_v30 = vpack.c.bf16 %v10544_v24, %v10531_v52  ;;  %v18135_v21 = vld [vmem:[%s24471_s3 + $0x530] ss:$12 sps:$4 sm:$0xff]   ;;  %v18140_v22 = vld [vmem:[%s24471_s3 + $0x3e0] ss:$12 sps:$4 sm:$0xff]   ;;  %v18144_v3 = vld [vmem:[%s24471_s3 + $0x3c8] ss:$12 sps:$4 sm:$0xff]  }
 0x5ee   :  { %v18143_v5 = vld [vmem:[%s24471_s3 + $0x500] ss:$12 sps:$4 sm:$0xff]   ;;  %v18146_v58 = vld [vmem:[%s24471_s3 + $0x5a8] ss:$12 sps:$4 sm:$0xff]   ;;  %v18150_v7 = vld [vmem:[%s24471_s3 + $0x6b0] ss:$12 sps:$4 sm:$0xff]  }
 0x5ef   :  { %15656 = vmatpush3.bf16.msra.mxu0 %v18099_v54  ;;  %v18145_v54 = vld [vmem:[%s24471_s3 + $0x308] ss:$12 sps:$4 sm:$0xff]   ;;  %v18152_v24 = vld [vmem:[%s24471_s3 + $0x758] ss:$12 sps:$4 sm:$0xff]   ;;  %v18157_v43 = vld [vmem:[%s24471_s3 + $0x560] ss:$12 sps:$4 sm:$0xff]  }
 0x5f0   :  { %13027 = vmatpush1.bf16.msra.mxu1 %v18096_v2  ;;  %15657 = vmatprep.subr.bf16.mxu0 %v18100_v45  ;;  %v18147_v2 = vld [vmem:[%s24471_s3 + $0x4e8] ss:$12 sps:$4 sm:$0xff]   ;;  %v18148_v45 = vld [vmem:[%s24471_s3 + $0x770] ss:$12 sps:$4 sm:$0xff]   ;;  %v18154_v31 = vld [vmem:[%s24471_s3 + $0x698] ss:$12 sps:$4 sm:$0xff]  }
 0x5f1   :  { %15677 = vmatprep.subr.bf16.mxu1 %v18102_v63  ;;  %v18153_v63 = vld [vmem:[%s24471_s3 + $0x578] ss:$12 sps:$4 sm:$0xff]   ;;  %v18159_v35 = vld [vmem:[%s24471_s3 + $0x4a0] ss:$12 sps:$4 sm:$0xff]   ;;  %v24666_v38 = vld [vmem:[#allocation44_spill] sm:$0xff] }
 0x5f2   :  { %v24664_v52 = vld [vmem:[#allocation42_spill] sm:$0xff]  ;;  %v24667_v9 = vld [vmem:[#allocation17_spill] sm:$0xff] }
 0x5f3   :  { %13045 = vmatmul.mubr.bf16.vlgmr.msra.gmra.mxu1 %v23929_v30  ;;  %15658 = vmatpush3.bf16.msra.mxu0 %v18101_v28  ;;  %v18155_v28 = vld [vmem:[%s24471_s3 + $0x4b8] ss:$12 sps:$4 sm:$0xff]  }
 0x5f4   :  { %15678 = vmatpush3.bf16.msra.mxu1 %v18103_v12  ;;  %15659 = vmatprep.subr.bf16.mxu0 %v18104_v56  ;;  %v24665_v12 = vld [vmem:[#allocation8_spill] sm:$0xff]  ;;  %v18156_v56 = vld [vmem:[%s24471_s3 + $0x740] ss:$12 sps:$4 sm:$0xff]  }
 0x5f5   :  { %15679 = vmatprep.subr.bf16.mxu1 %v18106_v20  ;;  %13054 = vmatprep.mubr.bf16.mxu1 %v24527_v60  ;;  %v18112_v60 = vld [vmem:[%s24471_s3 + $0xc8] ss:$12 sps:$4 sm:$0xff]   ;;  %v18158_v20 = vld [vmem:[%s24471_s3 + $0x680] ss:$12 sps:$4 sm:$0xff]  }
 0x5f7   :  { %15660 = vmatpush3.bf16.msra.mxu0 %v18105_v44  ;;  %v18160_v44 = vld [vmem:[%s24471_s3 + $0x728] ss:$12 sps:$4 sm:$0xff]  }
 0x5f8   :  { %15680 = vmatpush3.bf16.msra.mxu1 %v18107_v8  ;;  %15661 = vmatprep.subr.bf16.mxu0 %v18108_v55  ;;  %v18161_v8 = vld [vmem:[%s24471_s3 + $0x548] ss:$12 sps:$4 sm:$0xff]  }
 0x5f9   :  { %15681 = vmatprep.subr.bf16.mxu1 %v18110_v17  ;;  %v18162_v55 = vld [vmem:[%s24471_s3 + $0x668] ss:$12 sps:$4 sm:$0xff]  }
 0x5fa   :  { %v18163_v17 = vld [vmem:[%s24471_s3 + $0x488] ss:$12 sps:$4 sm:$0xff]  }
 0x5fb   :  { %13055 = vmatmul.mubr.bf16.gmra.mxu1 %v23955_v62  ;;  %15662 = vmatpush3.bf16.msra.mxu0 %v18109_v16  ;;  %v18164_v16 = vld [vmem:[%s24471_s3 + $0x710] ss:$12 sps:$4 sm:$0xff]  }
 0x5fc   :  { %15682 = vmatpush3.bf16.msra.mxu1 %v18111_v1  ;;  %13146 = vmatprep.mubr.bf16.mxu1 %v23013_v61  ;;  %v18119_v61 = vld [vmem:[%s24471_s3 + $0x1d0] ss:$12 sps:$4 sm:$0xff]  }
 0x5fd   :  { %15663 = vmatprep.subr.bf16.mxu0 %v18112_v60  ;;  %15683 = vmatprep.subr.bf16.mxu1 %v18114_v57  ;;  %v18166_v1 = vld [vmem:[%s24471_s3 + $0x8f0] ss:$12 sps:$4 sm:$0xff]  }
 0x5fe   :  { %v18165_v60 = vld [vmem:[%s24471_s3 + $0x650] ss:$12 sps:$4 sm:$0xff]  }
 0x5ff   :  { %15664 = vmatpush3.bf16.msra.mxu0 %v18113_v53  ;;  %v18167_v57 = vld [vmem:[%s24471_s3 + $0x830] ss:$12 sps:$4 sm:$0xff]   ;;  %v18168_v53 = vld [vmem:[%s24471_s3 + $0x6f8] ss:$12 sps:$4 sm:$0xff]  }
 0x600   :  { %15684 = vmatpush3.bf16.msra.mxu1 %v18115_v27  ;;  %15705 = vmatprep.subr.bf16.mxu0 %v18116_v34  ;;  %v18170_v27 = vld [vmem:[%s24471_s3 + $0x8d8] ss:$12 sps:$4 sm:$0xff]   ;;  %v24668_v34 = vld [vmem:[#allocation63_spill] sm:$0xff] }
 0x601   :  { %15685 = vmatprep.subr.bf16.mxu1 %v18117_v51  ;;  %v18169_v51 = vld [vmem:[%s24471_s3 + $0x638] ss:$12 sps:$4 sm:$0xff]  }
 0x602   :  { %13098 = vmatmul.mubr.bf16.vlgmr.msra.gmra.mxu0 %v24612_v18  ;;  %v18126_v18 = vld [vmem:[%s24471_s3 + $0x380] ss:$12 sps:$4 sm:$0xff]  }
 0x603   :  { %13105 = vmatprep.mubr.bf16.mxu0 %v23198_v6  ;;  %15706 = vmatpush3.bf16.msra.mxu0 %v18118_v37  ;;  %v18125_v6 = vld [vmem:[%s24471_s3 + $0x260] ss:$12 sps:$4 sm:$0xff]   ;;  %v24669_v37 = vld [vmem:[#allocation20_spill] sm:$0xff] }
 0x604   :  { %15686 = vmatpush3.bf16.msra.mxu1 %v18119_v61  ;;  %15707 = vmatprep.subr.bf16.mxu0 %v18120_v11  ;;  %v18171_v61 = vld [vmem:[%s24471_s3 + $0x818] ss:$12 sps:$4 sm:$0xff]   ;;  %v18172_v11 = vld [vmem:[%s24471_s3 + $0x6e0] ss:$12 sps:$4 sm:$0xff]  }
 0x605   :  { %15687 = vmatprep.subr.bf16.mxu1 %v18121_v50  ;;  %v18174_v50 = vld [vmem:[%s24471_s3 + $0x8c0] ss:$12 sps:$4 sm:$0xff]  }
 0x607   :  { %15708 = vmatpush3.bf16.msra.mxu0 %v18122_v42  ;;  %v18173_v42 = vld [vmem:[%s24471_s3 + $0x620] ss:$12 sps:$4 sm:$0xff]  }
 0x608   :  { %15688 = vmatpush3.bf16.msra.mxu1 %v18123_v48  ;;  %15709 = vmatprep.subr.bf16.mxu0 %v18124_v23  ;;  %v18175_v48 = vld [vmem:[%s24471_s3 + $0x800] ss:$12 sps:$4 sm:$0xff]   ;;  %v18176_v23 = vld [vmem:[%s24471_s3 + $0x6c8] ss:$12 sps:$4 sm:$0xff]  }
 0x609   :  { %15689 = vmatprep.subr.bf16.mxu1 %v18125_v6  ;;  %v18178_v6 = vld [vmem:[%s24471_s3 + $0x8a8] ss:$12 sps:$4 sm:$0xff]  }
 0x60a   :  { %13106 = vmatmul.mubr.bf16.gmra.mxu0 %v24618_v49  ;;  %v18134_v49 = vld [vmem:[%s24471_s3 + $0x5f0] ss:$12 sps:$4 sm:$0xff]  }
 0x60b   :  { %15710 = vmatpush3.bf16.msra.mxu0 %v18126_v18  ;;  %13195 = vmatprep.mubr.bf16.mxu0 %v23231_v26  ;;  %v18133_v26 = vld [vmem:[%s24471_s3 + $0x350] ss:$12 sps:$4 sm:$0xff]  }
 0x60c   :  { %15690 = vmatpush3.bf16.msra.mxu1 %v18127_v19  ;;  %15711 = vmatprep.subr.bf16.mxu0 %v18128_v46  ;;  %v24670_v18 = vld [vmem:[#allocation65_spill] sm:$0xff]  ;;  %v18177_v19 = vld [vmem:[%s24471_s3 + $0x608] ss:$12 sps:$4 sm:$0xff]  }
 0x60d   :  { %15691 = vmatprep.subr.bf16.mxu1 %v18129_v0  ;;  %v24671_v46 = vld [vmem:[#allocation9_spill] sm:$0xff]  ;;  %v18179_v0 = vld [vmem:[%s24471_s3 + $0x7e8] ss:$12 sps:$4 sm:$0xff]  }
 0x60f   :  { %15712 = vmatpush3.bf16.msra.mxu0 %v18130_v40  ;;  %v18180_v40 = vld [vmem:[%s24471_s3 + $0x9b0] ss:$12 sps:$4 sm:$0xff]  }
 0x610   :  { %15692 = vmatpush3.bf16.msra.mxu1 %v18131_v47  ;;  %15713 = vmatprep.subr.bf16.mxu0 %v18132_v41  ;;  %v18181_v47 = vld [vmem:[%s24471_s3 + $0x890] ss:$12 sps:$4 sm:$0xff]  }
 0x611   :  { %15733 = vmatprep.subr.bf16.mxu1 %v18134_v49  ;;  %v18182_v41 = vld [vmem:[%s24471_s3 + $0x7d0] ss:$12 sps:$4 sm:$0xff]   ;;  %v18183_v49 = vld [vmem:[%s24471_s3 + $0x998] ss:$12 sps:$4 sm:$0xff]  }
 0x613   :  { %13147 = vmatmul.mubr.bf16.vlgmr.msra.gmra.mxu1 %v24624_v33  ;;  %15714 = vmatpush3.bf16.msra.mxu0 %v18133_v26  ;;  %v18142_v33 = vld [vmem:[%s24471_s3 + $0x5c0] ss:$12 sps:$4 sm:$0xff]   ;;  %v18184_v26 = vld [vmem:[%s24471_s3 + $0x878] ss:$12 sps:$4 sm:$0xff]  }
 0x614   :  { %13154 = vmatprep.mubr.bf16.mxu1 %v24626_v14  ;;  %15734 = vmatpush3.bf16.msra.mxu1 %v18135_v21  ;;  %v18141_v14 = vld [vmem:[%s24471_s3 + $0x320] ss:$12 sps:$4 sm:$0xff]  }
 0x615   :  { %15715 = vmatprep.subr.bf16.mxu0 %v18136_v36  ;;  %15735 = vmatprep.subr.bf16.mxu1 %v18138_v10  ;;  %v24672_v21 = vld [vmem:[#allocation79_spill] sm:$0xff]  ;;  %v24673_v36 = vld [vmem:[#allocation80_spill] sm:$0xff]  ;;  %v18185_v10 = vld [vmem:[%s24471_s3 + $0x7b8] ss:$12 sps:$4 sm:$0xff]  }
 0x617   :  { %15716 = vmatpush3.bf16.msra.mxu0 %v18137_v15  ;;  %v18186_v15 = vld [vmem:[%s24471_s3 + $0x980] ss:$12 sps:$4 sm:$0xff]  }
 0x618   :  { %15736 = vmatpush3.bf16.msra.mxu1 %v18139_v25  ;;  %15717 = vmatprep.subr.bf16.mxu0 %v18140_v22  ;;  %v18187_v25 = vld [vmem:[%s24471_s3 + $0x860] ss:$12 sps:$4 sm:$0xff]  }
 0x619   :  { %15737 = vmatprep.subr.bf16.mxu1 %v18142_v33  ;;  %v18188_v22 = vld [vmem:[%s24471_s3 + $0x7a0] ss:$12 sps:$4 sm:$0xff]   ;;  %v18189_v33 = vld [vmem:[%s24471_s3 + $0x968] ss:$12 sps:$4 sm:$0xff]  }
 0x61b   :  { %13155 = vmatmul.mubr.bf16.gmra.mxu1 %v24627_v4  ;;  %15718 = vmatpush3.bf16.msra.mxu0 %v18141_v14  ;;  %v18149_v4 = vld [vmem:[%s24471_s3 + $0x590] ss:$12 sps:$4 sm:$0xff]   ;;  %v18190_v14 = vld [vmem:[%s24471_s3 + $0x848] ss:$12 sps:$4 sm:$0xff]  }
 0x61c   :  { %15738 = vmatpush3.bf16.msra.mxu1 %v18143_v5  ;;  %13244 = vmatprep.mubr.bf16.mxu1 %v23297_v13  ;;  %v18151_v13 = vld [vmem:[%s24471_s3 + $0x4d0] ss:$12 sps:$4 sm:$0xff]   ;;  %v18191_v5 = vld [vmem:[%s24471_s3 + $0x788] ss:$12 sps:$4 sm:$0xff]  }
 0x61d   :  { %15719 = vmatprep.subr.bf16.mxu0 %v18144_v3  ;;  %15739 = vmatprep.subr.bf16.mxu1 %v18146_v58  ;;  %v18192_v3 = vld [vmem:[%s24471_s3 + $0x950] ss:$12 sps:$4 sm:$0xff]  }
 0x61e   :  { %v18196_v58 = vld [vmem:[%s24472_s5 + $0x78] sm:$0xff]  }
 0x61f   :  { %15720 = vmatpush3.bf16.msra.mxu0 %v18145_v54  ;;  %v18198_v54 = vld [vmem:[%s24472_s5 + $0x70] sm:$0xff]  }
 0x620   :  { %15740 = vmatpush3.bf16.msra.mxu1 %v18147_v2  ;;  %15761 = vmatprep.subr.bf16.mxu0 %v18148_v45  ;;  %v18194_v2 = vld [vmem:[%s24471_s3 + $0x920] ss:$12 sps:$4 sm:$0xff]   ;;  %v18199_v45 = vld [vmem:[%s24472_s5 + $0x30] sm:$0xff]  }
 0x621   :  { %15741 = vmatprep.subr.bf16.mxu1 %v18149_v4  ;;  %v18200_v4 = vld [vmem:[%s24472_s5 + $0x68] sm:$0xff]  }
 0x622   :  { %13196 = vmatmul.mubr.bf16.vlgmr.msra.gmra.mxu0 %v24664_v52 }
 0x623   :  { %13203 = vmatprep.mubr.bf16.mxu0 %v24665_v12  ;;  %15762 = vmatpush3.bf16.msra.mxu0 %v18150_v7  ;;  %v18201_v7 = vld [vmem:[%s24472_s5 + $0x28] sm:$0xff]  }
 0x624   :  { %15742 = vmatpush3.bf16.msra.mxu1 %v18151_v13  ;;  %15763 = vmatprep.subr.bf16.mxu0 %v18152_v24  ;;  %v18202_v13 = vld [vmem:[%s24472_s5 + $0x60] sm:$0xff]  }
 0x625   :  { %15743 = vmatprep.subr.bf16.mxu1 %v18153_v63  ;;  %v18203_v63 = vld [vmem:[%s24472_s5 + $0x20] sm:$0xff]  }
 0x627   :  { %15764 = vmatpush3.bf16.msra.mxu0 %v18154_v31  ;;  %v18204_v31 = vld [vmem:[%s24472_s5 + $0x58] sm:$0xff]  }
 0x628   :  { %15744 = vmatpush3.bf16.msra.mxu1 %v18155_v28  ;;  %15765 = vmatprep.subr.bf16.mxu0 %v18156_v56  ;;  %v18206_v28 = vld [vmem:[%s24472_s5 + $0x50] sm:$0xff]  }
 0x629   :  { %15745 = vmatprep.subr.bf16.mxu1 %v18157_v43  ;;  %v18207_v56 = vld [vmem:[%s24472_s5 + $0x10] sm:$0xff]   ;;  %v24279_v43 = vpop.f32.mrf.mxu0 }
 0x62a   :  { %13204 = vmatmul.mubr.bf16.gmra.mxu0 %v24666_v38  ;;  %v18211_v38 = vld [vmem:[%s24472_s5] sm:$0xff]  }
 0x62b   :  { %15766 = vmatpush3.bf16.msra.mxu0 %v18158_v20  ;;  %13293 = vmatprep.mubr.bf16.mxu0 %v24667_v9  ;;  %v18208_v20 = vld [vmem:[%s24472_s5 + $0x48] sm:$0xff]  }
 0x62c   :  { %15746 = vmatpush3.bf16.msra.mxu1 %v18159_v35  ;;  %15767 = vmatprep.subr.bf16.mxu0 %v18160_v44  ;;  %v18209_v35 = vld [vmem:[%s24472_s5 + $0x8] sm:$0xff]   ;;  %v24289_v44 = vpop.f32.mrf.mxu0 }
 0x62d   :  { %15747 = vmatprep.subr.bf16.mxu1 %v18161_v8  ;;  %v18210_v8 = vld [vmem:[%s24472_s5 + $0x40] sm:$0xff]  }
 0x62f   :  { %15768 = vmatpush3.bf16.msra.mxu0 %v18162_v55 }
 0x630   :  { %15748 = vmatpush3.bf16.msra.mxu1 %v18163_v17  ;;  %15769 = vmatprep.subr.bf16.mxu0 %v18164_v16  ;;  %v24299_v17 = vpop.f32.mrf.mxu0 }
 0x631   :  { %15789 = vmatprep.subr.bf16.mxu1 %v18166_v1 }
 0x632   :  { %v24303_v16 = vpop.f32.mrf.mxu0 }
 0x633   :  { %13245 = vmatmul.mubr.bf16.vlgmr.msra.gmra.mxu1 %v24668_v34  ;;  %15770 = vmatpush3.bf16.msra.mxu0 %v18165_v60 }
 0x634   :  { %13252 = vmatprep.mubr.bf16.mxu1 %v24669_v37  ;;  %15790 = vmatpush3.bf16.msra.mxu1 %v18167_v57  ;;  %v24307_v60 = vpop.f32.mrf.mxu0 }
 0x635   :  { %15771 = vmatprep.subr.bf16.mxu0 %v18168_v53  ;;  %15791 = vmatprep.subr.bf16.mxu1 %v18170_v27 }
 0x636   :  { %v24311_v53 = vpop.f32.mrf.mxu0 }
 0x637   :  { %15772 = vmatpush3.bf16.msra.mxu0 %v18169_v51 }
 0x638   :  { %15792 = vmatpush3.bf16.msra.mxu1 %v18171_v61  ;;  %15773 = vmatprep.subr.bf16.mxu0 %v18172_v11  ;;  %v24315_v34 = vpop.f32.mrf.mxu0 }
 0x639   :  { %15793 = vmatprep.subr.bf16.mxu1 %v18174_v50 }
 0x63a   :  { %v24319_v37 = vpop.f32.mrf.mxu0 }
 0x63b   :  { %13253 = vmatmul.mubr.bf16.gmra.mxu1 %v24670_v18  ;;  %15774 = vmatpush3.bf16.msra.mxu0 %v18173_v42 }
 0x63c   :  { %15794 = vmatpush3.bf16.msra.mxu1 %v18175_v48  ;;  %13342 = vmatprep.mubr.bf16.mxu1 %v24671_v46  ;;  %v18213_v46 = vld [vmem:[%s24472_s5 + $0xb0] sm:$0xff]  }
 0x63d   :  { %15775 = vmatprep.subr.bf16.mxu0 %v18176_v23  ;;  %15795 = vmatprep.subr.bf16.mxu1 %v18178_v6  ;;  %v18212_v6 = vld [vmem:[%s24472_s5 + $0xb8] sm:$0xff]  }
 0x63f   :  { %15776 = vmatpush3.bf16.msra.mxu0 %v18177_v19 }
 0x640   :  { %15796 = vmatpush3.bf16.msra.mxu1 %v18179_v0  ;;  %15881 = vmatprep.subr.bf16.mxu0 %v18180_v40 }
 0x641   :  { %15797 = vmatprep.subr.bf16.mxu1 %v18181_v47 }
 0x642   :  { %13294 = vmatmul.mubr.bf16.vlgmr.msra.gmra.mxu0 %v24672_v21  ;;  %v18215_v21 = vld [vmem:[%s24472_s5 + $0xa0] sm:$0xff]  }
 0x643   :  { %13301 = vmatprep.mubr.bf16.mxu0 %v24673_v36  ;;  %15882 = vmatpush3.bf16.msra.mxu0 %v18180_v40 }
 0x644   :  { %15798 = vmatpush3.bf16.msra.mxu1 %v18182_v41  ;;  %15883 = vmatprep.subr.bf16.mxu0 %v18183_v49  ;;  %v18214_v41 = vld [vmem:[%s24472_s5 + $0xa8] sm:$0xff]  }
 0x645   :  { %15799 = vmatprep.subr.bf16.mxu1 %v18184_v26 }
 0x647   :  { %15884 = vmatpush3.bf16.msra.mxu0 %v18183_v49 }
 0x648   :  { %15800 = vmatpush3.bf16.msra.mxu1 %v18185_v10  ;;  %15885 = vmatprep.subr.bf16.mxu0 %v18186_v15 }
 0x649   :  { %15801 = vmatprep.subr.bf16.mxu1 %v18187_v25 }
 0x64a   :  { %13302 = vmatmul.mubr.bf16.gmra.mxu0 %v22667_v29  ;;  %v18193_v29 = vld [vmem:[%s24471_s3 + $0x938] ss:$12 sps:$4 sm:$0xff]  }
 0x64b   :  { %15886 = vmatpush3.bf16.msra.mxu0 %v18186_v15  ;;  %15897 = vmatprep.mubr.bf16.mxu0 %v23929_v30  ;;  %v18197_v30 = vld [vmem:[%s24472_s5 + $0x38] sm:$0xff]  }
 0x64c   :  { %15802 = vmatpush3.bf16.msra.mxu1 %v18188_v22  ;;  %15887 = vmatprep.subr.bf16.mxu0 %v18189_v33  ;;  %v18216_v15 = vld [vmem:[%s24472_s5 + $0x98] sm:$0xff]  }
 0x64d   :  { %15803 = vmatprep.subr.bf16.mxu1 %v18190_v14  ;;  %v18217_v14 = vld [vmem:[%s24472_s5 + $0x90] sm:$0xff]  }
 0x64f   :  { %15888 = vmatpush3.bf16.msra.mxu0 %v18189_v33 }
 0x650   :  { %15804 = vmatpush3.bf16.msra.mxu1 %v18191_v5  ;;  %15889 = vmatprep.subr.bf16.mxu0 %v18192_v3 }
 0x651   :  { %15827 = vmatprep.subr.bf16.mxu1 %v18196_v58  ;;  %v24370_v58 = vld [vmem:[%s24473_s4] sm:$0x7] }
 0x653   :  { %13343 = vmatmul.mubr.bf16.vlgmr.msra.gmra.mxu1 %v23378_v59  ;;  %15890 = vmatpush3.bf16.msra.mxu0 %v18192_v3  ;;  %v18195_v59 = vld [vmem:[%s24471_s3 + $0x908] ss:$12 sps:$4 sm:$0xff]  }
 0x654   :  { %13350 = vmatprep.mubr.bf16.mxu1 %v23417_v39  ;;  %15891 = vmatprep.subr.bf16.mxu0 %v18193_v29  ;;  %v24248_v39 = vpop.f32.mrf.mxu1 }
 0x655   :  { %15828 = vmatpush3.bf16.msra.mxu1 %v18197_v30  ;;  %v24674_v30 = vld [vmem:[#allocation3_spill] sm:$0xff] }
 0x656   :  { %15829 = vmatprep.subr.bf16.mxu1 %v18198_v54  ;;  %v24257_v24 = vpop.f32.mrf.mxu1  ;;  %v11022_v54 = vrot.slane %v24370_v58, %v24674_v30 }
 0x657   :  { %15892 = vmatpush3.bf16.msra.mxu0 %v18193_v29  ;;  %v18218_v29 = vld [vmem:[%s24472_s5 + $0x88] sm:$0xff]  }
 0x658   :  { %15893 = vmatprep.subr.bf16.mxu0 %v18194_v2  ;;  %v24265_v52 = vpop.f32.mrf.mxu1 }
 0x659   :  { %15830 = vmatpush3.bf16.msra.mxu1 %v18199_v45 }
 0x65a   :  { %15831 = vmatprep.subr.bf16.mxu1 %v18200_v4  ;;  %v24274_v12 = vpop.f32.mrf.mxu1 }
 0x65b   :  { %13351 = vmatmul.mubr.bf16.gmra.mxu1 %v23411_v32  ;;  %15894 = vmatpush3.bf16.msra.mxu0 %v18194_v2  ;;  %v18205_v32 = vld [vmem:[%s24472_s5 + $0x18] sm:$0xff]   ;;  %v24675_v2 = vld [vmem:[#allocation2_spill] sm:$0xff] }
 0x65c   :  { %15895 = vmatprep.subr.bf16.mxu0 %v18195_v59  ;;  %v11018_v45 = vrot.slane %v24370_v58, %v24675_v2 }
 0x65d   :  { %15832 = vmatpush3.bf16.msra.mxu1 %v18201_v7  ;;  %v18219_v7 = vld [vmem:[%s24472_s5 + $0x80] sm:$0xff]  }
 0x65e   :  { %15833 = vmatprep.subr.bf16.mxu1 %v18202_v13  ;;  %v12731_v13 = vadd.f32 %v24257_v24, %v11022_v54 }
 0x65f   :  { %15896 = vmatpush3.bf16.msra.mxu0 %v18195_v59 }
 0x660   :  { %15901 = vmatprep.subr.bf16.mxu0 %v18212_v6 }
 0x661   :  { %15834 = vmatpush3.bf16.msra.mxu1 %v18203_v63  ;;  %v12733_v63 = vadd.f32 %v24265_v52, %v11018_v45 }
 0x662   :  { %15898 = vmatmul.mubr.bf16.vlgmr.msra.gmra.mxu0 %v23955_v62  ;;  %15835 = vmatprep.subr.bf16.mxu1 %v18204_v31  ;;  %v24284_v62 = vpop.f32.mrf.mxu1  ;;  %v24323_v11 = vpop.f32.mrf.mxu0  ;;  %v12729_v31 = vadd.f32 %v24248_v39, %v11018_v45 }
 0x663   :  { %15902 = vmatpush3.bf16.msra.mxu0 %v18212_v6 }
 0x664   :  { %v24294_v55 = vpop.f32.mrf.mxu1  ;;  %v24327_v42 = vpop.f32.mrf.mxu0  ;;  %15903 = vmatprep.subr.bf16.mxu0 %v18213_v46 }
 0x665   :  { %15836 = vmatpush3.bf16.msra.mxu1 %v18205_v32 }
 0x666   :  { %15837 = vmatprep.subr.bf16.mxu1 %v18206_v28  ;;  %v24301_v9 = vpop.f32.mrf.mxu1  ;;  %v12891_v23 = vpop.f32.mrf.mxu0 }
 0x667   :  { %15904 = vmatpush3.bf16.msra.mxu0 %v18213_v46 }
 0x668   :  { %v24305_v1 = vpop.f32.mrf.mxu1  ;;  %v24336_v19 = vpop.f32.mrf.mxu0  ;;  %15905 = vmatprep.subr.bf16.mxu0 %v18214_v41 }
 0x669   :  { %15838 = vmatpush3.bf16.msra.mxu1 %v18207_v56  ;;  %v12735_v56 = vadd.f32 %v24274_v12, %v11022_v54 }
 0x66a   :  { %15839 = vmatprep.subr.bf16.mxu1 %v18208_v20  ;;  %v24309_v57 = vpop.f32.mrf.mxu1  ;;  %v24343_v40 = vpop.f32.mrf.mxu0  ;;  %v12784_v20 = vadd.f32 %v24289_v44, %v12731_v13  ;;  %v12741_v44 = vadd.f32 %v24294_v55, %v11022_v54 }
 0x66b   :  { %15906 = vmatpush3.bf16.msra.mxu0 %v18214_v41 }
 0x66c   :  { %v24313_v27 = vpop.f32.mrf.mxu1  ;;  %v24350_v49 = vpop.f32.mrf.mxu0  ;;  %15907 = vmatprep.subr.bf16.mxu0 %v18215_v21 }
 0x66d   :  { %15840 = vmatpush3.bf16.msra.mxu1 %v18209_v35  ;;  %v12786_v35 = vadd.f32 %v24299_v17, %v12733_v63  ;;  %v12837_v24 = vadd.f32 %v24313_v27, %v12784_v20 }
 0x66e   :  { %15841 = vmatprep.subr.bf16.mxu1 %v18210_v8  ;;  %v24317_v51 = vpop.f32.mrf.mxu1  ;;  %v24355_v36 = vpop.f32.mrf.mxu0  ;;  %v12782_v8 = vadd.f32 %v24279_v43, %v12729_v31 }
 0x66f   :  { %15908 = vmatpush3.bf16.msra.mxu0 %v18215_v21  ;;  %v12839_v52 = vadd.f32 %v24317_v51, %v12786_v35  ;;  %v12890_v12 = vadd.f32 %v24327_v42, %v12837_v24 }
 0x670   :  { %v24321_v61 = vpop.f32.mrf.mxu1  ;;  %v24360_v25 = vpop.f32.mrf.mxu0  ;;  %15909 = vmatprep.subr.bf16.mxu0 %v18216_v15  ;;  %v12835_v6 = vadd.f32 %v24309_v57, %v12782_v8  ;;  %v12739_v57 = vadd.f32 %v24284_v62, %v11018_v45 }
 0x671   :  { %15842 = vmatpush3.bf16.msra.mxu1 %v18211_v38  ;;  %v12788_v38 = vadd.f32 %v24303_v16, %v12735_v56  ;;  %v12892_v21 = vadd.f32 %v12891_v23, %v12839_v52  ;;  %v12743_v16 = vadd.f32 %v24301_v9, %v11018_v45 }
 0x672   :  { %v24325_v50 = vpop.f32.mrf.mxu1  ;;  %v12888_v17 = vadd.f32 %v24323_v11, %v12835_v6  ;;  %v12792_v9 = vadd.f32 %v24307_v60, %v12739_v57 }
 0x673   :  { %15910 = vmatpush3.bf16.msra.mxu0 %v18216_v15  ;;  %v12841_v41 = vadd.f32 %v24321_v61, %v12788_v38  ;;  %v12794_v61 = vadd.f32 %v24311_v53, %v12741_v44  ;;  %v12796_v55 = vadd.f32 %v24315_v34, %v12743_v16 }
 0x674   :  { %v24329_v48 = vpop.f32.mrf.mxu1  ;;  %15911 = vmatprep.subr.bf16.mxu0 %v18217_v14  ;;  %v12845_v45 = vadd.f32 %v24325_v50, %v12792_v9 }
 0x675   :  { %v12894_v27 = vadd.f32 %v24336_v19, %v12841_v41 }
 0x676   :  { %v24334_v18 = vpop.f32.mrf.mxu1 }
 0x677   :  { %15912 = vmatpush3.bf16.msra.mxu0 %v18217_v14  ;;  %v12745_v14 = vadd.f32 %v24305_v1, %v11022_v54  ;;  %v12849_v1 = vadd.f32 %v24334_v18, %v12796_v55 }
 0x678   :  { %v24341_v0 = vpop.f32.mrf.mxu1  ;;  %15913 = vmatprep.subr.bf16.mxu0 %v18218_v29 }
 0x679   :  { %v12798_v19 = vadd.f32 %v24319_v37, %v12745_v14  ;;  %v12902_v37 = vadd.f32 %v24355_v36, %v12849_v1 }
 0x67b   :  { %15914 = vmatpush3.bf16.msra.mxu0 %v18218_v29  ;;  %v12851_v34 = vadd.f32 %v24341_v0, %v12798_v19 }
 0x67c   :  { %15915 = vmatprep.subr.bf16.mxu0 %v18219_v7 }
 0x67f   :  { %15916 = vmatpush3.bf16.msra.mxu0 %v18219_v7 }
 0x693   :  { %v24345_v47 = vpop.f32.mrf.mxu1 }
 0x694   :  { %v12941_v42 = vadd.f32 %v24345_v47, %v12888_v17 }
 0x695   :  { %v12942_v26 = vpop.f32.mrf.mxu1 }
 0x696   :  { %v12943_v15 = vadd.f32 %v12942_v26, %v12890_v12  ;;  %v12847_v26 = vadd.f32 %v24329_v48, %v12794_v61  ;;  %v12898_v48 = vadd.f32 %v24343_v40, %v12845_v45 }
 0x697   :  { %v12944_v10 = vpop.f32.mrf.mxu1 }
 0x698   :  { %v12945_v51 = vadd.f32 %v12944_v10, %v12892_v21  ;;  %v12900_v60 = vadd.f32 %v24350_v49, %v12847_v26 }
 0x699   :  { %v12946_v22 = vpop.f32.mrf.mxu1 }
 0x69a   :  { %v12947_v11 = vadd.f32 %v12946_v22, %v12894_v27 }
 0x69b   :  { %v24365_v5 = vpop.f32.mrf.mxu1 }
 0x69c   :  { %v12951_v0 = vadd.f32 %v24365_v5, %v12898_v48 }
 0x69d   :  { %v12952_v4 = vpop.f32.mrf.mxu1 }
 0x69e   :  { %v12953_v63 = vadd.f32 %v12952_v4, %v12900_v60 }
 0x69f   :  { %v12954_v32 = vpop.f32.mrf.mxu1 }
 0x6a0   :  { %v12955_v31 = vadd.f32 %v12954_v32, %v12902_v37 }
 0x6a1   :  { %v12956_v39 = vpop.f32.mrf.mxu1 }
 0x6a2   :  { %v12993_v33 = vpop.f32.mrf.mxu0 }
 0x6a3   :  { %v12994_v62 = vadd.f32 %v12993_v33, %v12941_v42  ;;  %v12904_v33 = vadd.f32 %v24360_v25, %v12851_v34 }
 0x6a4   :  { %v12995_v3 = vpop.f32.mrf.mxu0 }
 0x6a5   :  { %v12996_v30 = vadd.f32 %v12995_v3, %v12943_v15  ;;  %v12957_v8 = vadd.f32 %v12956_v39, %v12904_v33 }
 0x6a6   :  { %v12997_v59 = vpop.f32.mrf.mxu0 }
 0x6a7   :  { %v12998_v2 = vadd.f32 %v12997_v59, %v12945_v51 }
 0x6a8   :  { %v12999_v28 = vpop.f32.mrf.mxu0 }
 0x6a9   :  { %v13000_v53 = vadd.f32 %v12999_v28, %v12947_v11 }
 0x6aa   :  { %v13003_v46 = vpop.f32.mrf.mxu0 }
 0x6ab   :  { %v13004_v24 = vadd.f32 %v13003_v46, %v12951_v0 }
 0x6ac   :  { %v13005_v23 = vpop.f32.mrf.mxu0 }
 0x6ad   :  { %v13006_v49 = vadd.f32 %v13005_v23, %v12953_v63 }
 0x6ae   :  { %v13007_v22 = vpop.f32.mrf.mxu0 }
 0x6af   :  { %v13008_v38 = vadd.f32 %v13007_v22, %v12955_v31  ;;  %v18220_v31 = vld [vmem:[%s24474_s7 + $0x38] sm:$0xff]  }
 0x6b0   :  { %v13009_v56 = vpop.f32.mrf.mxu0  ;;  %15921 = vmatprep.subr.bf16.mxu1 %v18220_v31 }
 0x6b1   :  { %v13010_v6 = vadd.f32 %v13009_v56, %v12957_v8 }
 0x6b3   :  { %v13046_v43 = vpop.f32.mrf.mxu1 }
 0x6b4   :  { %v13047_v3 = vadd.f32 %v13046_v43, %v12994_v62 }
 0x6b5   :  { %v13048_v29 = vpop.f32.mrf.mxu1 }
 0x6b6   :  { %v13049_v54 = vadd.f32 %v13048_v29, %v12996_v30  ;;  %v13408_v20 = vmax.f32 %v13047_v3, 0.0 }
 0x6b7   :  { %v13050_v10 = vpop.f32.mrf.mxu1 }
 0x6b8   :  { %v13051_v47 = vadd.f32 %v13050_v10, %v12998_v2  ;;  %v13409_v28 = vmax.f32 %v13049_v54, 0.0 }
 0x6b9   :  { %v13052_v59 = vpop.f32.mrf.mxu1 }
 0x6ba   :  { %v13053_v7 = vadd.f32 %v13052_v59, %v13000_v53  ;;  %v13411_v18 = vmax.f32 %v13051_v47, 0.0 }
 0x6bb   :  { %v13056_v13 = vpop.f32.mrf.mxu1 }
 0x6bc   :  { %v13412_v50 = vmax.f32 %v13053_v7, 0.0  ;;  %v13420_v52 = vpack.c.bf16 %v13411_v18, %v13408_v20  ;;  %v13057_v4 = vadd.f32 %v13056_v13, %v13004_v24  ;;  %v18222_v20 = vld [vmem:[%s24474_s7 + $0x28] sm:$0xff]  }
 0x6bd   :  { %v13058_v35 = vpop.f32.mrf.mxu1 }
 0x6be   :  { %v13421_v36 = vpack.c.bf16 %v13412_v50, %v13409_v28  ;;  %v13059_v25 = vadd.f32 %v13058_v35, %v13006_v49  ;;  %v13414_v17 = vmax.f32 %v13057_v4, 0.0  ;;  %v18221_v28 = vld [vmem:[%s24474_s7 + $0x30] sm:$0xff]   ;;  %v24676_v49 = vld [vmem:[#allocation18_spill] sm:$0xff] }
 0x6bf   :  { %v13060_v40 = vpop.f32.mrf.mxu1 }
 0x6c0   :  { %v13061_v41 = vadd.f32 %v13060_v40, %v13008_v38  ;;  %13657 = vmatprep.mubr.bf16.mxu1 %v13421_v36  ;;  %v13415_v5 = vmax.f32 %v13059_v25, 0.0  ;;  %v11026_v38 = vrot.slane %v24370_v58, %v24676_v49 }
 0x6c1   :  { %v13062_v32 = vpop.f32.mrf.mxu1  ;;  %13658 = vmatmul.mubr.bf16.vlgmr.msra.gmra.mxu1 %v13420_v52 }
 0x6c2   :  { %v13063_v12 = vadd.f32 %v13062_v32, %v13010_v6  ;;  %v13417_v21 = vmax.f32 %v13061_v41, 0.0  ;;  %v15665_v39 = vpop.f32.mrf.mxu0  ;;  %15922 = vmatpush3.bf16.msra.mxu1 %v18220_v31  ;;  %v18223_v32 = vld [vmem:[%s24474_s7 + $0x20] sm:$0xff]  }
 0x6c3   :  { %15923 = vmatprep.subr.bf16.mxu1 %v18221_v28 }
 0x6c4   :  { %v13418_v44 = vmax.f32 %v13063_v12, 0.0  ;;  %v13423_v16 = vpack.c.bf16 %v13417_v21, %v13414_v17  ;;  %v15666_v46 = vpop.f32.mrf.mxu0 }
 0x6c5   :  { %v15667_v36 = vadd.f32 %v15666_v46, %v15665_v39 }
 0x6c6   :  { %v13424_v43 = vpack.c.bf16 %v13418_v44, %v13415_v5  ;;  %v15668_v27 = vpop.f32.mrf.mxu0  ;;  %15924 = vmatpush3.bf16.msra.mxu1 %v18221_v28 }
 0x6c7   :  { %15925 = vmatprep.subr.bf16.mxu1 %v18222_v20  ;;  %v13100_v17 = vadd.f32 %v15667_v36, %v11026_v38 }
 0x6c8   :  { %13665 = vmatprep.mubr.bf16.mxu1 %v13424_v43  ;;  %v15669_v15 = vpop.f32.mrf.mxu0 }
 0x6c9   :  { %13666 = vmatmul.mubr.bf16.gmra.mxu1 %v13423_v16  ;;  %v15670_v25 = vadd.f32 %v15669_v15, %v15668_v27 }
 0x6ca   :  { %v15671_v51 = vpop.f32.mrf.mxu0  ;;  %15926 = vmatpush3.bf16.msra.mxu1 %v18222_v20 }
 0x6cb   :  { %v13103_v15 = vadd.f32 %v15670_v25, %v11026_v38  ;;  %15927 = vmatprep.subr.bf16.mxu1 %v18223_v32 }
 0x6cc   :  { %v15672_v14 = vpop.f32.mrf.mxu0 }
 0x6cd   :  { %v15673_v35 = vadd.f32 %v15672_v14, %v15671_v51 }
 0x6ce   :  { %v15674_v42 = vpop.f32.mrf.mxu0  ;;  %15928 = vmatpush3.bf16.msra.mxu1 %v18223_v32  ;;  %v18227_v32 = vld [vmem:[%s24474_s7] sm:$0xff]  }
 0x6cf   :  { %v13108_v12 = vadd.f32 %v15673_v35, %v11026_v38 }
 0x6d0   :  { %v15675_v29 = vpop.f32.mrf.mxu0 }
 0x6d1   :  { %v15676_v8 = vadd.f32 %v15675_v29, %v15674_v42 }
 0x6d3   :  { %v15693_v57 = vpop.f32.mrf.mxu1  ;;  %v13111_v21 = vadd.f32 %v15676_v8, %v11026_v38 }
 0x6d5   :  { %v15694_v61 = vpop.f32.mrf.mxu1 }
 0x6d6   :  { %v15695_v41 = vadd.f32 %v15694_v61, %v15693_v57 }
 0x6d7   :  { %v15696_v23 = vpop.f32.mrf.mxu1 }
 0x6d8   :  { %v13149_v57 = vadd.f32 %v15695_v41, %v13100_v17 }
 0x6d9   :  { %v15697_v55 = vpop.f32.mrf.mxu1 }
 0x6da   :  { %v15698_v58 = vadd.f32 %v15697_v55, %v15696_v23 }
 0x6db   :  { %v15699_v30 = vpop.f32.mrf.mxu1 }
 0x6dd   :  { %v15700_v9 = vpop.f32.mrf.mxu1 }
 0x6de   :  { %v15701_v40 = vadd.f32 %v15700_v9, %v15699_v30  ;;  %v18224_v30 = vld [vmem:[%s24474_s7 + $0x18] sm:$0xff]  }
 0x6df   :  { %v15702_v26 = vpop.f32.mrf.mxu1  ;;  %15929 = vmatprep.subr.bf16.mxu1 %v18224_v30 }
 0x6e0   :  { %v13157_v46 = vadd.f32 %v15701_v40, %v13108_v12  ;;  %15930 = vmatpush3.bf16.msra.mxu1 %v18224_v30 }
 0x6e1   :  { %v15703_v10 = vpop.f32.mrf.mxu1 }
 0x6e2   :  { %v15721_v11 = vpop.f32.mrf.mxu0  ;;  %v15704_v6 = vadd.f32 %v15703_v10, %v15702_v26 }
 0x6e4   :  { %v15722_v2 = vpop.f32.mrf.mxu0  ;;  %v13160_v51 = vadd.f32 %v15704_v6, %v13111_v21 }
 0x6e5   :  { %v15723_v43 = vadd.f32 %v15722_v2, %v15721_v11  ;;  %v13152_v2 = vadd.f32 %v15698_v58, %v13103_v15 }
 0x6e6   :  { %v15724_v19 = vpop.f32.mrf.mxu0 }
 0x6e7   :  { %v13198_v26 = vadd.f32 %v15723_v43, %v13149_v57 }
 0x6e8   :  { %v15725_v62 = vpop.f32.mrf.mxu0 }
 0x6e9   :  { %v15726_v61 = vadd.f32 %v15725_v62, %v15724_v19 }
 0x6ea   :  { %v15727_v1 = vpop.f32.mrf.mxu0 }
 0x6eb   :  { %v13201_v62 = vadd.f32 %v15726_v61, %v13152_v2 }
 0x6ec   :  { %v15728_v54 = vpop.f32.mrf.mxu0 }
 0x6ed   :  { %v15729_v5 = vadd.f32 %v15728_v54, %v15727_v1 }
 0x6ee   :  { %v15730_v45 = vpop.f32.mrf.mxu0 }
 0x6ef   :  { %v13206_v9 = vadd.f32 %v15729_v5, %v13157_v46 }
 0x6f0   :  { %v15731_v22 = vpop.f32.mrf.mxu0 }
 0x6f1   :  { %v15732_v44 = vadd.f32 %v15731_v22, %v15730_v45 }
 0x6f3   :  { %v15749_v53 = vpop.f32.mrf.mxu1  ;;  %v13209_v23 = vadd.f32 %v15732_v44, %v13160_v51 }
 0x6f5   :  { %v15750_v47 = vpop.f32.mrf.mxu1 }
 0x6f6   :  { %v15751_v42 = vadd.f32 %v15750_v47, %v15749_v53 }
 0x6f7   :  { %v24415_v34 = vpop.f32.mrf.mxu1 }
 0x6f8   :  { %v13247_v53 = vadd.f32 %v15751_v42, %v13198_v26 }
 0x6f9   :  { %v15753_v3 = vpop.f32.mrf.mxu1 }
 0x6fa   :  { %v15754_v10 = vadd.f32 %v15753_v3, %v24415_v34 }
 0x6fb   :  { %v15755_v37 = vpop.f32.mrf.mxu1 }
 0x6fc   :  { %v13250_v28 = vadd.f32 %v15754_v10, %v13201_v62  ;;  %v15469_v62 = vld [vmem:[%s24476_s8] ss:$0 sm:$0xff] }
 0x6fd   :  { %v15756_v48 = vpop.f32.mrf.mxu1 }
 0x6fe   :  { %v15757_v14 = vadd.f32 %v15756_v48, %v15755_v37 }
 0x6ff   :  { %v15758_v18 = vpop.f32.mrf.mxu1 }
 0x700   :  { %v13255_v45 = vadd.f32 %v15757_v14, %v13206_v9  ;;  %v15444_v14 = vld [vmem:[%s24475_s6] ss:$0 sm:$0xff] }
 0x701   :  { %v15759_v63 = vpop.f32.mrf.mxu1 }
 0x702   :  { %v15777_v59 = vpop.f32.mrf.mxu0  ;;  %v15760_v27 = vadd.f32 %v15759_v63, %v15758_v18 }
 0x704   :  { %v15778_v60 = vpop.f32.mrf.mxu0  ;;  %v13258_v22 = vadd.f32 %v15760_v27, %v13209_v23 }
 0x705   :  { %v15779_v1 = vadd.f32 %v15778_v60, %v15777_v59 }
 0x706   :  { %v24417_v7 = vpop.f32.mrf.mxu0 }
 0x707   :  { %v13296_v34 = vadd.f32 %v15779_v1, %v13247_v53 }
 0x708   :  { %v24419_v33 = vpop.f32.mrf.mxu0 }
 0x709   :  { %v15782_v47 = vadd.f32 %v24419_v33, %v24417_v7 }
 0x70a   :  { %v15783_v13 = vpop.f32.mrf.mxu0 }
 0x70b   :  { %v13299_v20 = vadd.f32 %v15782_v47, %v13250_v28 }
 0x70c   :  { %v15784_v50 = vpop.f32.mrf.mxu0 }
 0x70d   :  { %v15785_v55 = vadd.f32 %v15784_v50, %v15783_v13 }
 0x70e   :  { %v15786_v24 = vpop.f32.mrf.mxu0 }
 0x70f   :  { %v13304_v18 = vadd.f32 %v15785_v55, %v13255_v45 }
 0x710   :  { %v15787_v39 = vpop.f32.mrf.mxu0 }
 0x711   :  { %v15788_v11 = vadd.f32 %v15787_v39, %v15786_v24 }
 0x713   :  { %v15805_v0 = vpop.f32.mrf.mxu1  ;;  %v13307_v13 = vadd.f32 %v15788_v11, %v13258_v22 }
 0x715   :  { %v15806_v56 = vpop.f32.mrf.mxu1 }
 0x716   :  { %v15807_v37 = vadd.f32 %v15806_v56, %v15805_v0 }
 0x717   :  { %v15808_v52 = vpop.f32.mrf.mxu1 }
 0x718   :  { %v13345_v35 = vadd.f32 %v15807_v37, %v13296_v34 }
 0x719   :  { %v15809_v4 = vpop.f32.mrf.mxu1 }
 0x71a   :  { %v15810_v3 = vadd.f32 %v15809_v4, %v15808_v52  ;;  %v18225_v52 = vld [vmem:[%s24474_s7 + $0x10] sm:$0xff]   ;;  %v18226_v4 = vld [vmem:[%s24474_s7 + $0x8] sm:$0xff]  }
 0x71b   :  { %v15811_v16 = vpop.f32.mrf.mxu1  ;;  %15931 = vmatprep.subr.bf16.mxu1 %v18225_v52 }
 0x71c   :  { %v13348_v7 = vadd.f32 %v15810_v3, %v13299_v20  ;;  %15932 = vmatpush3.bf16.msra.mxu1 %v18225_v52 }
 0x71d   :  { %v15812_v29 = vpop.f32.mrf.mxu1  ;;  %15933 = vmatprep.subr.bf16.mxu1 %v18226_v4 }
 0x71e   :  { %v15813_v19 = vadd.f32 %v15812_v29, %v15811_v16 }
 0x71f   :  { %v15814_v54 = vpop.f32.mrf.mxu1 }
 0x720   :  { %v13353_v59 = vadd.f32 %v15813_v19, %v13304_v18  ;;  %15934 = vmatpush3.bf16.msra.mxu1 %v18226_v4 }
 0x721   :  { %v15815_v48 = vpop.f32.mrf.mxu1  ;;  %15935 = vmatprep.subr.bf16.mxu1 %v18227_v32 }
 0x722   :  { %v15816_v63 = vadd.f32 %v15815_v48, %v15814_v54  ;;  %v15899_v31 = vpop.f32.mrf.mxu0 }
 0x723   :  { %v13402_v33 = vadd.f32 %v15899_v31, %v13353_v59 }
 0x724   :  { %v13393_v60 = vpop.f32.mrf.mxu0  ;;  %v13356_v50 = vadd.f32 %v15816_v63, %v13307_v13  ;;  %15936 = vmatpush3.bf16.msra.mxu1 %v18227_v32 }
 0x725   :  { %v13394_v49 = vadd.f32 %v13393_v60, %v13345_v35  ;;  %v13416_v6 = vmax.f32 %v13402_v33, 0.0 }
 0x726   :  { %v15900_v8 = vpop.f32.mrf.mxu0 }
 0x727   :  { %v13405_v38 = vadd.f32 %v15900_v8, %v13356_v50  ;;  %v13410_v24 = vmax.f32 %v13394_v49, 0.0 }
 0x728   :  { %v13396_v0 = vpop.f32.mrf.mxu0 }
 0x729   :  { %v13397_v56 = vadd.f32 %v13396_v0, %v13348_v7  ;;  %v13419_v36 = vmax.f32 %v13405_v38, 0.0 }
 0x72b   :  { %v13413_v40 = vmax.f32 %v13397_v56, 0.0  ;;  %v13425_v41 = vpack.c.bf16 %v13419_v36, %v13416_v6 }
 0x72d   :  { %v13422_v25 = vpack.c.bf16 %v13413_v40, %v13410_v24 }
 0x72f   :  { %15917 = vmatprep.mubr.bf16.mxu0 %v13422_v25 }
 0x730   :  { %15918 = vmatmul.mubr.bf16.vlgmr.msra.gmra.mxu0 %v13425_v41 }
 0x781   :  { %v15843_v12 = vpop.f32.mrf.mxu1 }
 0x783   :  { %v15844_v21 = vpop.f32.mrf.mxu1 }
 0x784   :  { %v15845_v16 = vadd.f32 %v15844_v21, %v15843_v12 }
 0x785   :  { %v15846_v5 = vpop.f32.mrf.mxu1 }
 0x786   :  { %v13660_v61 = vadd.f32 %v15845_v16, %v15444_v14 }
 0x787   :  { %v15847_v44 = vpop.f32.mrf.mxu1 }
 0x788   :  { %v15848_v15 = vadd.f32 %v15847_v44, %v15846_v5 }
 0x789   :  { %v15849_v17 = vpop.f32.mrf.mxu1 }
 0x78a   :  { %v13663_v55 = vadd.f32 %v15848_v15, %v15444_v14 }
 0x78b   :  { %v15850_v58 = vpop.f32.mrf.mxu1 }
 0x78c   :  { %v15851_v51 = vadd.f32 %v15850_v58, %v15849_v17 }
 0x78d   :  { %v15852_v43 = vpop.f32.mrf.mxu1 }
 0x78e   :  { %v13668_v29 = vadd.f32 %v15851_v51, %v15444_v14 }
 0x78f   :  { %v15853_v39 = vpop.f32.mrf.mxu1 }
 0x790   :  { %v15854_v46 = vadd.f32 %v15853_v39, %v15852_v43 }
 0x792   :  { %v13671_v42 = vadd.f32 %v15854_v46, %v15444_v14 }
 0x7f0   :  { %v15919_v27 = vpop.f32.mrf.mxu0 }
 0x7f1   :  { %v13717_v11 = vadd.f32 %v15919_v27, %v13668_v29 }
 0x7f2   :  { %v13708_v57 = vpop.f32.mrf.mxu0 }
 0x7f3   :  { %v13709_v9 = vadd.f32 %v13708_v57, %v13660_v61  ;;  %v13725_v45 = vmax.f32 %v13717_v11, 0.0 }
 0x7f4   :  { %v15920_v30 = vpop.f32.mrf.mxu0 }
 0x7f5   :  { %v13720_v23 = vadd.f32 %v15920_v30, %v13671_v42  ;;  %v13723_v1 = vmax.f32 %v13709_v9, 0.0 }
 0x7f6   :  { %v13711_v2 = vpop.f32.mrf.mxu0 }
 0x7f7   :  { %v13712_v26 = vadd.f32 %v13711_v2, %v13663_v55  ;;  %v13726_v10 = vmax.f32 %v13720_v23, 0.0 }
 0x7f9   :  { %v13724_v54 = vmax.f32 %v13712_v26, 0.0  ;;  %v13728_v19 = vpack.c.bf16 %v13726_v10, %v13725_v45 }
 0x7fb   :  { %v13727_v22 = vpack.c.bf16 %v13724_v54, %v13723_v1 }
 0x7fd   :  { %15937 = vmatprep.mubr.bf16.mxu1 %v13727_v22 }
 0x7fe   :  { %15938 = vmatmul.mubr.bf16.vlgmr.msra.gmra.mxu1 %v13728_v19 }
 0x8be   :  { %v15939_v53 = vpop.f32.mrf.mxu1 }
 0x8bf   :  { %v13843_v47 = vadd.f32 %v15939_v53, %v15469_v62 }
 0x8c0   :  { %v13834_v37 = vpop.f32.mrf.mxu1 }
 0x8c1   :  { %13851 = vst [vmem:[%s24477_s9 + $0x10] sm:$0xff] %v13843_v47  ;;  %v13835_v48 = vadd.f32 %v15469_v62, %v13834_v37 }
 0x8c2   :  { %v15940_v18 = vpop.f32.mrf.mxu1 }
 0x8c3   :  { %13849 = vst [vmem:[%s24477_s9] sm:$0xff] %v13835_v48  ;;  %v13846_v13 = vadd.f32 %v15940_v18, %v15469_v62 }
 0x8c4   :  { %v13837_v63 = vpop.f32.mrf.mxu1 }
 0x8c5   :  { %13852 = vst [vmem:[%s24477_s9 + $0x18] sm:$0xff] %v13846_v13  ;;  %v13838_v31 = vadd.f32 %v15469_v62, %v13837_v63 }
 0x8c7   :  { %13850 = vst [vmem:[%s24477_s9 + $0x8] sm:$0xff] %v13838_v31 }

</bundles_post_ra>
